<compile_context>
chip_gen: v7x
topology: tpu7x:2x2x1
jax: 0.10.0
libtpu: 0.0.40
codegen_flags: <defaults>
</compile_context>

<pallas_src>
import numpy as np
import jax
import jax.numpy as jnp
from jax import lax
from jax.experimental import pallas as pl
from jax.experimental.pallas import tpu as pltpu

KS = 3
PAD = 1
N_PTS = KS * KS


# ----------------------------- Pallas kernel ------------------------------ #
def _deform_conv_kernel(wx_ref, idx_ref, g_ref, exp_ref, grp_ref, o_ref):
    # wx_ref : (N, Hp*OUTCp, Wp) f32  weight-folded padded image,
    #          wx[n, r*OUTCp + o, w] = sum_c W[o,c,n] * x_pad[c, r, w]
    # idx_ref: (N*4, HWt) int32      rows per point: [row_lo, row_hi, col_lo, col_hi]
    # g_ref  : (N*4, HWt) f32        rows per point: [gx_lo, gx_hi, gy_lo, gy_hi]
    # exp_ref: (Hp*OUTCp, Hp) f32    constant: exp[j, r] = (j // OUTCp == r)
    # grp_ref: (OUTCp, Hp*OUTCp) f32 constant: grp[o, j] = (j %  OUTCp == o)
    # o_ref  : (OUTCp, HWt) f32      lane-dense output tile
    n_pts = wx_ref.shape[0]
    ro, wp = wx_ref.shape[1], wx_ref.shape[2]
    outc_p, hw_t = o_ref.shape
    hp = ro // outc_p

    # hoisted once per grid step (tiny)
    h_iota = lax.broadcasted_iota(jnp.int32, (hp, hw_t), 0)
    w_iota = lax.broadcasted_iota(jnp.int32, (wp, hw_t), 0)
    expand = exp_ref[...]          # (ro, hp)
    group_sum = grp_ref[...]       # (outc_p, ro)

    # Per-point temporaries are only ~(ro, HWt); a static Python loop keeps all
    # slices static and lets the scheduler overlap the independent point work.
    acc = jnp.zeros((outc_p, hw_t), jnp.float32)
    for n in range(n_pts):
        idx4 = idx_ref[4 * n:4 * n + 4, :]       # (4, HWt) int32
        g4 = g_ref[4 * n:4 * n + 4, :]           # (4, HWt) f32

        # separable weighted one-hots: R_n (Hp, HWt), C_n (Wp, HWt)
        r_mat = (jnp.where(idx4[0:1, :] == h_iota, g4[0:1, :], 0.0)
                 + jnp.where(idx4[1:2, :] == h_iota, g4[1:2, :], 0.0))
        c_mat = (jnp.where(idx4[2:3, :] == w_iota, g4[2:3, :], 0.0)
                 + jnp.where(idx4[3:4, :] == w_iota, g4[3:4, :], 0.0))

        # column gather on the MXU: (ro, Wp) @ (Wp, HWt)
        y = jnp.dot(wx_ref[n], c_mat, preferred_element_type=jnp.float32)
        # broadcast R over the OUTCp sub-rows via a constant matmul (MXU, not VPU)
        r_big = jnp.dot(expand, r_mat, preferred_element_type=jnp.float32)
        # row combine + per-output-channel group sum via a constant matmul
        acc = acc + jnp.dot(group_sum, y * r_big,
                            preferred_element_type=jnp.float32)

    o_ref[...] = acc


# ----------------------------- glue (plain JAX) ---------------------------- #
def _precompute(x, offset, weight, ks=KS, pad=PAD):
    """Replicates the PyTorch index / bilinear-weight math and packs kernel inputs."""
    B, C, H, W = x.shape
    N = ks * ks
    OUTC = weight.shape[0]
    Hp, Wp = H + 2 * pad, W + 2 * pad
    HW = H * W

    # even offset channels -> row offsets, odd -> col offsets (torch gather)
    off_x = offset[:, 0::2].astype(jnp.float32)      # (B, N, H, W)
    off_y = offset[:, 1::2].astype(jnp.float32)

    kern = np.arange(-(ks - 1) // 2, (ks - 1) // 2 + 1)
    kxg, kyg = np.meshgrid(kern, kern, indexing="ij")
    kern_x = jnp.asarray(kxg.flatten(), jnp.float32)[None, :, None, None]
    kern_y = jnp.asarray(kyg.flatten(), jnp.float32)[None, :, None, None]
    base_x = jnp.arange(1, H + 1, dtype=jnp.float32)[None, None, :, None]
    base_y = jnp.arange(1, W + 1, dtype=jnp.float32)[None, None, None, :]

    p_x = base_x + kern_x + off_x                    # (B, N, H, W)
    p_y = base_y + kern_y + off_y

    q_lt_x = jnp.clip(jnp.floor(p_x), 0, Hp - 1)
    q_lt_y = jnp.clip(jnp.floor(p_y), 0, Wp - 1)
    q_rb_x = jnp.clip(jnp.floor(p_x) + 1, 0, Hp - 1)
    q_rb_y = jnp.clip(jnp.floor(p_y) + 1, 0, Wp - 1)

    mask_x = ((p_x < pad) | (p_x > Hp - 1 - pad)).astype(jnp.float32)
    mask_y = ((p_y < pad) | (p_y > Wp - 1 - pad)).astype(jnp.float32)
    p_x = p_x * (1 - mask_x) + jnp.floor(p_x) * mask_x
    p_y = p_y * (1 - mask_y) + jnp.floor(p_y) * mask_y
    p_x = jnp.clip(p_x, 0, Hp - 1)
    p_y = jnp.clip(p_y, 0, Wp - 1)

    # separable bilinear weights:  g_lt = gx_l*gy_l, g_rb = gx_h*gy_h, ...
    gx_l = 1 + (q_lt_x - p_x)
    gx_h = 1 - (q_rb_x - p_x)
    gy_l = 1 + (q_lt_y - p_y)
    gy_h = 1 - (q_rb_y - p_y)

    # pack row/col indices + weights lane-dense: (B, N*4, HW)
    idx = jnp.stack([q_lt_x, q_rb_x, q_lt_y, q_rb_y], axis=2).astype(jnp.int32)
    idx = idx.reshape(B, N * 4, HW)
    gws = jnp.stack([gx_l, gx_h, gy_l, gy_h], axis=2).astype(jnp.float32)
    gws = gws.reshape(B, N * 4, HW)

    # fold the conv weight into the padded image once per (b, n)
    x_pad = jnp.pad(x.astype(jnp.float32),
                    ((0, 0), (0, 0), (pad, pad), (pad, pad)))     # (B, C, Hp, Wp)
    w_k = jnp.transpose(weight.astype(jnp.float32).reshape(OUTC, C, N),
                        (2, 0, 1))                                # (N, OUTC, C)
    outc_p = ((OUTC + 7) // 8) * 8
    wx = jnp.einsum("noc,bchw->bnhow", w_k, x_pad)                # (B,N,Hp,OUTC,Wp)
    if outc_p != OUTC:
        wx = jnp.pad(wx, ((0, 0), (0, 0), (0, 0), (0, outc_p - OUTC), (0, 0)))
    wx = wx.reshape(B, N, Hp * outc_p, Wp)                        # rows = r*OUTCp + o

    dims = dict(B=B, C=C, H=H, W=W, N=N, OUTC=OUTC, OUTCP=outc_p,
                HP=Hp, WP=Wp, HW=HW)
    return wx, idx, gws, dims


def _pick_hw_tile(HW, B):
    """HW tile: multiple of 128, VMEM-aware cap, >=2 grid steps when B == 1."""
    lane = 128
    hw_pad = ((HW + lane - 1) // lane) * lane
    try:
        info = pltpu.get_tpu_info()
        vmem = getattr(info, "vmem_capacity_bytes", 128 * 1024 * 1024)
    except Exception:
        vmem = 128 * 1024 * 1024
    cap = 1024 if vmem >= 100 * 1024 * 1024 else 512   # smaller tiles on 64 MiB (v7x)
    thw = min(hw_pad, cap)
    if B == 1 and hw_pad <= thw and hw_pad >= 2 * lane:
        # guarantee >=2 parallel grid steps so both v7x TensorCores get work
        thw = ((hw_pad // 2 + lane - 1) // lane) * lane
    hw_pad = ((HW + thw - 1) // thw) * thw
    return thw, hw_pad


@jax.jit
def deform_conv2d(x, offset, weight):
    wx, idx, gws, d = _precompute(x, offset, weight)
    B, HW, N = d["B"], d["HW"], d["N"]
    OUTC, OUTCP = d["OUTC"], d["OUTCP"]
    Hp, Wp, H, W = d["HP"], d["WP"], d["H"], d["W"]
    RO = Hp * OUTCP

    thw, hw_pad = _pick_hw_tile(HW, B)
    if hw_pad != HW:
        pad_n = hw_pad - HW
        # zero weights => zero contribution; padded output columns are sliced off
        idx = jnp.pad(idx, ((0, 0), (0, 0), (0, pad_n)))
        gws = jnp.pad(gws, ((0, 0), (0, 0), (0, pad_n)))
    n_hw = hw_pad // thw

    # constant expand / group-sum matrices (consumed by the MXU in the kernel)
    j = np.arange(RO)
    exp_c = jnp.asarray((j[:, None] // OUTCP
                         == np.arange(Hp)[None, :]).astype(np.float32))   # (RO, Hp)
    grp_c = jnp.asarray((j[None, :] % OUTCP
                         == np.arange(OUTCP)[:, None]).astype(np.float32))  # (OUTCP, RO)

    flops = 2 * B * N * hw_pad * (RO * Wp + RO * Hp + OUTCP * RO)
    bytes_acc = 4 * (int(wx.size) + 2 * int(idx.size)
                     + int(exp_c.size) + int(grp_c.size) + B * OUTCP * hw_pad)

    out = pl.pallas_call(
        _deform_conv_kernel,
        out_shape=jax.ShapeDtypeStruct((B, OUTCP, hw_pad), jnp.float32),
        grid_spec=pltpu.PrefetchScalarGridSpec(
            num_scalar_prefetch=0,
            grid=(B, n_hw),
            in_specs=[
                pl.BlockSpec((None, N, RO, Wp), lambda b, t: (b, 0, 0, 0)),
                pl.BlockSpec((None, N * 4, thw), lambda b, t: (b, 0, t)),
                pl.BlockSpec((None, N * 4, thw), lambda b, t: (b, 0, t)),
                pl.BlockSpec((RO, Hp), lambda b, t: (0, 0)),
                pl.BlockSpec((OUTCP, RO), lambda b, t: (0, 0)),
            ],
            out_specs=pl.BlockSpec((None, OUTCP, thw), lambda b, t: (b, 0, t)),
        ),
        compiler_params=pltpu.CompilerParams(
            dimension_semantics=("parallel", "parallel")),
        cost_estimate=pl.CostEstimate(flops=flops, transcendentals=0,
                                      bytes_accessed=bytes_acc),
    )(wx, idx, gws, exp_c, grp_c)

    # (B, OUTCP, HW) is NCHW-ordered: slice padding off and reshape, no transpose.
    return out[:, :OUTC, :HW].reshape(B, OUTC, H, W)


# ------------------------- independent reference --------------------------- #
def deform_conv2d_ref(x, offset, weight, ks=KS, pad=PAD):
    """Pure-JAX gather-based reference mirroring the PyTorch forward."""
    B, C, H, W = x.shape
    N = ks * ks
    OUTC = weight.shape[0]
    Hp, Wp = H + 2 * pad, W + 2 * pad

    off_x = offset[:, 0::2].astype(jnp.float32)
    off_y = offset[:, 1::2].astype(jnp.float32)

    kern = np.arange(-(ks - 1) // 2, (ks - 1) // 2 + 1)
    kxg, kyg = np.meshgrid(kern, kern, indexing="ij")
    kern_x = jnp.asarray(kxg.flatten(), jnp.float32)[None, :, None, None]
    kern_y = jnp.asarray(kyg.flatten(), jnp.float32)[None, :, None, None]
    base_x = jnp.arange(1, H + 1, dtype=jnp.float32)[None, None, :, None]
    base_y = jnp.arange(1, W + 1, dtype=jnp.float32)[None, None, None, :]
    p_x = base_x + kern_x + off_x
    p_y = base_y + kern_y + off_y

    q_lt_x = jnp.clip(jnp.floor(p_x), 0, Hp - 1)
    q_lt_y = jnp.clip(jnp.floor(p_y), 0, Wp - 1)
    q_rb_x = jnp.clip(jnp.floor(p_x) + 1, 0, Hp - 1)
    q_rb_y = jnp.clip(jnp.floor(p_y) + 1, 0, Wp - 1)

    mask_x = ((p_x < pad) | (p_x > Hp - 1 - pad)).astype(jnp.float32)
    mask_y = ((p_y < pad) | (p_y > Wp - 1 - pad)).astype(jnp.float32)
    p_x = p_x * (1 - mask_x) + jnp.floor(p_x) * mask_x
    p_y = p_y * (1 - mask_y) + jnp.floor(p_y) * mask_y
    p_x = jnp.clip(p_x, 0, Hp - 1)
    p_y = jnp.clip(p_y, 0, Wp - 1)

    g_lt = (1 + (q_lt_x - p_x)) * (1 + (q_lt_y - p_y))
    g_rb = (1 - (q_rb_x - p_x)) * (1 - (q_rb_y - p_y))
    g_lb = (1 + (q_lt_x - p_x)) * (1 - (q_rb_y - p_y))
    g_rt = (1 - (q_rb_x - p_x)) * (1 + (q_lt_y - p_y))

    x_pad = jnp.pad(x.astype(jnp.float32),
                    ((0, 0), (0, 0), (pad, pad), (pad, pad))).reshape(B, C, Hp * Wp)

    def gather(i_x, i_y):
        flat = (i_x * Wp + i_y).astype(jnp.int32).reshape(B, 1, N * H * W)
        flat = jnp.broadcast_to(flat, (B, C, N * H * W))
        return jnp.take_along_axis(x_pad, flat, axis=2).reshape(B, C, N, H, W)

    xo = (g_lt[:, None] * gather(q_lt_x, q_lt_y)
          + g_rb[:, None] * gather(q_rb_x, q_rb_y)
          + g_lb[:, None] * gather(q_lt_x, q_rb_y)
          + g_rt[:, None] * gather(q_rb_x, q_lt_y))        # (B, C, N, H, W)

    w_k = weight.astype(jnp.float32).reshape(OUTC, C, N)   # n = kx*ks + ky
    return jnp.einsum("ocn,bcnhw->bohw", w_k, xo)


if __name__ == "__main__":
    B, C, H, W = 2, 4, 16, 16
    OUTC = 8
    key = jax.random.PRNGKey(0)
    kx, ko, kw = jax.random.split(key, 3)

    x = jax.random.normal(kx, (B, C, H, W), jnp.float32)
    # offsets come from an upstream conv in the original model; synthesize here
    offset = 2.0 * jax.random.normal(ko, (B, 2 * N_PTS, H, W), jnp.float32)
    weight = 0.1 * jax.random.normal(kw, (OUTC, C, KS, KS), jnp.float32)

    out = jax.block_until_ready(deform_conv2d(x, offset, weight))
    ref = jax.block_until_ready(deform_conv2d_ref(x, offset, weight))

    assert out.shape == (B, OUTC, H, W), out.shape
    max_err = float(np.max(np.abs(np.asarray(out) - np.asarray(ref))))
    assert np.allclose(np.asarray(out), np.asarray(ref),
                       rtol=2e-3, atol=2e-3), max_err
    print("KERNEL_OK")
</pallas_src>

<mosaic_0001>
module attributes {stable_mosaic.version = 11 : i64} {
  func.func @_deform_conv_kernel(%arg0: i32, %arg1: i32, %arg2: memref<1x9x144x18xf32, #tpu.memory_space<vmem>>, %arg3: memref<1x36x256xi32, #tpu.memory_space<vmem>>, %arg4: memref<1x36x256xf32, #tpu.memory_space<vmem>>, %arg5: memref<144x18xf32, #tpu.memory_space<vmem>>, %arg6: memref<8x144xf32, #tpu.memory_space<vmem>>, %arg7: memref<1x8x256xf32, #tpu.memory_space<vmem>>) attributes {dimension_semantics = [#tpu.dimension_semantics<parallel>, #tpu.dimension_semantics<parallel>], iteration_bounds = array<i64: 2, 1>, scalar_prefetch = 0 : i64, scratch_operands = 0 : i64, tpu.core_type = #tpu.core_type<tc>, window_params = [{transform_indices = @transform_0, window_bounds = array<i64: 1, 9, 144, 18>}, {transform_indices = @transform_1, window_bounds = array<i64: 1, 36, 256>}, {transform_indices = @transform_2, window_bounds = array<i64: 1, 36, 256>}, {pipeline_mode = #tpu.pipeline_mode<synchronous>, transform_indices = @transform_3, window_bounds = array<i64: 144, 18>}, {pipeline_mode = #tpu.pipeline_mode<synchronous>, transform_indices = @transform_4, window_bounds = array<i64: 8, 144>}, {transform_indices = @transform_5, window_bounds = array<i64: 1, 8, 256>}]} {
    %0 = tpu.iota {dimensions = array<i32: 0>} : vector<18x256xi32>
    %1 = tpu.iota {dimensions = array<i32: 0>} : vector<18x256xi32>
    %c0 = arith.constant 0 : index
    %c0_0 = arith.constant 0 : index
    %2 = vector.load %arg5[%c0, %c0_0] : memref<144x18xf32, #tpu.memory_space<vmem>>, vector<144x18xf32>
    %c0_1 = arith.constant 0 : index
    %c0_2 = arith.constant 0 : index
    %3 = vector.load %arg6[%c0_1, %c0_2] : memref<8x144xf32, #tpu.memory_space<vmem>>, vector<8x144xf32>
    %cst = arith.constant 0.000000e+00 : f32
    %4 = vector.broadcast %cst : f32 to vector<8x256xf32>
    %c0_3 = arith.constant 0 : index
    %c0_4 = arith.constant 0 : index
    %c0_5 = arith.constant 0 : index
    %5 = vector.load %arg3[%c0_3, %c0_4, %c0_5] : memref<1x36x256xi32, #tpu.memory_space<vmem>>, vector<1x4x256xi32>
    %6 = vector.shape_cast %5 : vector<1x4x256xi32> to vector<4x256xi32>
    %c0_6 = arith.constant 0 : index
    %c0_7 = arith.constant 0 : index
    %c0_8 = arith.constant 0 : index
    %7 = vector.load %arg4[%c0_6, %c0_7, %c0_8] : memref<1x36x256xf32, #tpu.memory_space<vmem>>, vector<1x4x256xf32>
    %8 = vector.shape_cast %7 : vector<1x4x256xf32> to vector<4x256xf32>
    %9 = vector.extract_strided_slice %6 {offsets = [0, 0], sizes = [1, 256], strides = [1, 1]} : vector<4x256xi32> to vector<1x256xi32>
    %10 = vector.broadcast %9 : vector<1x256xi32> to vector<18x256xi32>
    %11 = arith.cmpi eq, %10, %0 : vector<18x256xi32>
    %12 = vector.extract_strided_slice %8 {offsets = [0, 0], sizes = [1, 256], strides = [1, 1]} : vector<4x256xf32> to vector<1x256xf32>
    %cst_9 = arith.constant 0.000000e+00 : f32
    %13 = vector.shape_cast %12 : vector<1x256xf32> to vector<1x256xf32>
    %14 = vector.broadcast %13 : vector<1x256xf32> to vector<18x256xf32>
    %15 = vector.broadcast %cst_9 : f32 to vector<18x256xf32>
    %16 = arith.select %11, %14, %15 : vector<18x256xi1>, vector<18x256xf32>
    %17 = vector.extract_strided_slice %6 {offsets = [1, 0], sizes = [1, 256], strides = [1, 1]} : vector<4x256xi32> to vector<1x256xi32>
    %18 = vector.broadcast %17 : vector<1x256xi32> to vector<18x256xi32>
    %19 = arith.cmpi eq, %18, %0 : vector<18x256xi32>
    %20 = vector.extract_strided_slice %8 {offsets = [1, 0], sizes = [1, 256], strides = [1, 1]} : vector<4x256xf32> to vector<1x256xf32>
    %cst_10 = arith.constant 0.000000e+00 : f32
    %21 = vector.shape_cast %20 : vector<1x256xf32> to vector<1x256xf32>
    %22 = vector.broadcast %21 : vector<1x256xf32> to vector<18x256xf32>
    %23 = vector.broadcast %cst_10 : f32 to vector<18x256xf32>
    %24 = arith.select %19, %22, %23 : vector<18x256xi1>, vector<18x256xf32>
    %25 = arith.addf %16, %24 : vector<18x256xf32>
    %26 = vector.extract_strided_slice %6 {offsets = [2, 0], sizes = [1, 256], strides = [1, 1]} : vector<4x256xi32> to vector<1x256xi32>
    %27 = vector.broadcast %26 : vector<1x256xi32> to vector<18x256xi32>
    %28 = arith.cmpi eq, %27, %1 : vector<18x256xi32>
    %29 = vector.extract_strided_slice %8 {offsets = [2, 0], sizes = [1, 256], strides = [1, 1]} : vector<4x256xf32> to vector<1x256xf32>
    %cst_11 = arith.constant 0.000000e+00 : f32
    %30 = vector.shape_cast %29 : vector<1x256xf32> to vector<1x256xf32>
    %31 = vector.broadcast %30 : vector<1x256xf32> to vector<18x256xf32>
    %32 = vector.broadcast %cst_11 : f32 to vector<18x256xf32>
    %33 = arith.select %28, %31, %32 : vector<18x256xi1>, vector<18x256xf32>
    %34 = vector.extract_strided_slice %6 {offsets = [3, 0], sizes = [1, 256], strides = [1, 1]} : vector<4x256xi32> to vector<1x256xi32>
    %35 = vector.broadcast %34 : vector<1x256xi32> to vector<18x256xi32>
    %36 = arith.cmpi eq, %35, %1 : vector<18x256xi32>
    %37 = vector.extract_strided_slice %8 {offsets = [3, 0], sizes = [1, 256], strides = [1, 1]} : vector<4x256xf32> to vector<1x256xf32>
    %cst_12 = arith.constant 0.000000e+00 : f32
    %38 = vector.shape_cast %37 : vector<1x256xf32> to vector<1x256xf32>
    %39 = vector.broadcast %38 : vector<1x256xf32> to vector<18x256xf32>
    %40 = vector.broadcast %cst_12 : f32 to vector<18x256xf32>
    %41 = arith.select %36, %39, %40 : vector<18x256xi1>, vector<18x256xf32>
    %42 = arith.addf %33, %41 : vector<18x256xf32>
    %c0_13 = arith.constant 0 : index
    %c0_14 = arith.constant 0 : index
    %c0_15 = arith.constant 0 : index
    %c0_16 = arith.constant 0 : index
    %43 = vector.load %arg2[%c0_13, %c0_14, %c0_15, %c0_16] : memref<1x9x144x18xf32, #tpu.memory_space<vmem>>, vector<1x1x144x18xf32>
    %44 = vector.shape_cast %43 : vector<1x1x144x18xf32> to vector<144x18xf32>
    %cst_17 = arith.constant dense<0.000000e+00> : vector<144x256xf32>
    %45 = tpu.matmul %44, %42, %cst_17 {dimension_numbers = #tpu.dot_dimension_numbers<[1], [0], [0], [1], [0, 0, 1, 1], [], []>} : vector<144x18xf32>, vector<18x256xf32>, vector<144x256xf32> -> vector<144x256xf32>
    %cst_18 = arith.constant dense<0.000000e+00> : vector<144x256xf32>
    %46 = tpu.matmul %2, %25, %cst_18 {dimension_numbers = #tpu.dot_dimension_numbers<[1], [0], [0], [1], [0, 0, 1, 1], [], []>} : vector<144x18xf32>, vector<18x256xf32>, vector<144x256xf32> -> vector<144x256xf32>
    %47 = arith.mulf %45, %46 : vector<144x256xf32>
    %cst_19 = arith.constant dense<0.000000e+00> : vector<8x256xf32>
    %48 = tpu.matmul %3, %47, %cst_19 {dimension_numbers = #tpu.dot_dimension_numbers<[1], [0], [0], [1], [0, 0, 1, 1], [], []>} : vector<8x144xf32>, vector<144x256xf32>, vector<8x256xf32> -> vector<8x256xf32>
    %49 = arith.addf %4, %48 : vector<8x256xf32>
    %c0_20 = arith.constant 0 : index
    %c4 = arith.constant 4 : index
    %c0_21 = arith.constant 0 : index
    %50 = vector.load %arg3[%c0_20, %c4, %c0_21] : memref<1x36x256xi32, #tpu.memory_space<vmem>>, vector<1x4x256xi32>
    %51 = vector.shape_cast %50 : vector<1x4x256xi32> to vector<4x256xi32>
    %c0_22 = arith.constant 0 : index
    %c4_23 = arith.constant 4 : index
    %c0_24 = arith.constant 0 : index
    %52 = vector.load %arg4[%c0_22, %c4_23, %c0_24] : memref<1x36x256xf32, #tpu.memory_space<vmem>>, vector<1x4x256xf32>
    %53 = vector.shape_cast %52 : vector<1x4x256xf32> to vector<4x256xf32>
    %54 = vector.extract_strided_slice %51 {offsets = [0, 0], sizes = [1, 256], strides = [1, 1]} : vector<4x256xi32> to vector<1x256xi32>
    %55 = vector.broadcast %54 : vector<1x256xi32> to vector<18x256xi32>
    %56 = arith.cmpi eq, %55, %0 : vector<18x256xi32>
    %57 = vector.extract_strided_slice %53 {offsets = [0, 0], sizes = [1, 256], strides = [1, 1]} : vector<4x256xf32> to vector<1x256xf32>
    %cst_25 = arith.constant 0.000000e+00 : f32
    %58 = vector.shape_cast %57 : vector<1x256xf32> to vector<1x256xf32>
    %59 = vector.broadcast %58 : vector<1x256xf32> to vector<18x256xf32>
    %60 = vector.broadcast %cst_25 : f32 to vector<18x256xf32>
    %61 = arith.select %56, %59, %60 : vector<18x256xi1>, vector<18x256xf32>
    %62 = vector.extract_strided_slice %51 {offsets = [1, 0], sizes = [1, 256], strides = [1, 1]} : vector<4x256xi32> to vector<1x256xi32>
    %63 = vector.broadcast %62 : vector<1x256xi32> to vector<18x256xi32>
    %64 = arith.cmpi eq, %63, %0 : vector<18x256xi32>
    %65 = vector.extract_strided_slice %53 {offsets = [1, 0], sizes = [1, 256], strides = [1, 1]} : vector<4x256xf32> to vector<1x256xf32>
    %cst_26 = arith.constant 0.000000e+00 : f32
    %66 = vector.shape_cast %65 : vector<1x256xf32> to vector<1x256xf32>
    %67 = vector.broadcast %66 : vector<1x256xf32> to vector<18x256xf32>
    %68 = vector.broadcast %cst_26 : f32 to vector<18x256xf32>
    %69 = arith.select %64, %67, %68 : vector<18x256xi1>, vector<18x256xf32>
    %70 = arith.addf %61, %69 : vector<18x256xf32>
    %71 = vector.extract_strided_slice %51 {offsets = [2, 0], sizes = [1, 256], strides = [1, 1]} : vector<4x256xi32> to vector<1x256xi32>
    %72 = vector.broadcast %71 : vector<1x256xi32> to vector<18x256xi32>
    %73 = arith.cmpi eq, %72, %1 : vector<18x256xi32>
    %74 = vector.extract_strided_slice %53 {offsets = [2, 0], sizes = [1, 256], strides = [1, 1]} : vector<4x256xf32> to vector<1x256xf32>
    %cst_27 = arith.constant 0.000000e+00 : f32
    %75 = vector.shape_cast %74 : vector<1x256xf32> to vector<1x256xf32>
    %76 = vector.broadcast %75 : vector<1x256xf32> to vector<18x256xf32>
    %77 = vector.broadcast %cst_27 : f32 to vector<18x256xf32>
    %78 = arith.select %73, %76, %77 : vector<18x256xi1>, vector<18x256xf32>
    %79 = vector.extract_strided_slice %51 {offsets = [3, 0], sizes = [1, 256], strides = [1, 1]} : vector<4x256xi32> to vector<1x256xi32>
    %80 = vector.broadcast %79 : vector<1x256xi32> to vector<18x256xi32>
    %81 = arith.cmpi eq, %80, %1 : vector<18x256xi32>
    %82 = vector.extract_strided_slice %53 {offsets = [3, 0], sizes = [1, 256], strides = [1, 1]} : vector<4x256xf32> to vector<1x256xf32>
    %cst_28 = arith.constant 0.000000e+00 : f32
    %83 = vector.shape_cast %82 : vector<1x256xf32> to vector<1x256xf32>
    %84 = vector.broadcast %83 : vector<1x256xf32> to vector<18x256xf32>
    %85 = vector.broadcast %cst_28 : f32 to vector<18x256xf32>
    %86 = arith.select %81, %84, %85 : vector<18x256xi1>, vector<18x256xf32>
    %87 = arith.addf %78, %86 : vector<18x256xf32>
    %c0_29 = arith.constant 0 : index
    %c1 = arith.constant 1 : index
    %c0_30 = arith.constant 0 : index
    %c0_31 = arith.constant 0 : index
    %88 = vector.load %arg2[%c0_29, %c1, %c0_30, %c0_31] : memref<1x9x144x18xf32, #tpu.memory_space<vmem>>, vector<1x1x144x18xf32>
    %89 = vector.shape_cast %88 : vector<1x1x144x18xf32> to vector<144x18xf32>
    %cst_32 = arith.constant dense<0.000000e+00> : vector<144x256xf32>
    %90 = tpu.matmul %89, %87, %cst_32 {dimension_numbers = #tpu.dot_dimension_numbers<[1], [0], [0], [1], [0, 0, 1, 1], [], []>} : vector<144x18xf32>, vector<18x256xf32>, vector<144x256xf32> -> vector<144x256xf32>
    %cst_33 = arith.constant dense<0.000000e+00> : vector<144x256xf32>
    %91 = tpu.matmul %2, %70, %cst_33 {dimension_numbers = #tpu.dot_dimension_numbers<[1], [0], [0], [1], [0, 0, 1, 1], [], []>} : vector<144x18xf32>, vector<18x256xf32>, vector<144x256xf32> -> vector<144x256xf32>
    %92 = arith.mulf %90, %91 : vector<144x256xf32>
    %cst_34 = arith.constant dense<0.000000e+00> : vector<8x256xf32>
    %93 = tpu.matmul %3, %92, %cst_34 {dimension_numbers = #tpu.dot_dimension_numbers<[1], [0], [0], [1], [0, 0, 1, 1], [], []>} : vector<8x144xf32>, vector<144x256xf32>, vector<8x256xf32> -> vector<8x256xf32>
    %94 = arith.addf %49, %93 : vector<8x256xf32>
    %c0_35 = arith.constant 0 : index
    %c8 = arith.constant 8 : index
    %c0_36 = arith.constant 0 : index
    %95 = vector.load %arg3[%c0_35, %c8, %c0_36] : memref<1x36x256xi32, #tpu.memory_space<vmem>>, vector<1x4x256xi32>
    %96 = vector.shape_cast %95 : vector<1x4x256xi32> to vector<4x256xi32>
    %c0_37 = arith.constant 0 : index
    %c8_38 = arith.constant 8 : index
    %c0_39 = arith.constant 0 : index
    %97 = vector.load %arg4[%c0_37, %c8_38, %c0_39] : memref<1x36x256xf32, #tpu.memory_space<vmem>>, vector<1x4x256xf32>
    %98 = vector.shape_cast %97 : vector<1x4x256xf32> to vector<4x256xf32>
    %99 = vector.extract_strided_slice %96 {offsets = [0, 0], sizes = [1, 256], strides = [1, 1]} : vector<4x256xi32> to vector<1x256xi32>
    %100 = vector.broadcast %99 : vector<1x256xi32> to vector<18x256xi32>
    %101 = arith.cmpi eq, %100, %0 : vector<18x256xi32>
    %102 = vector.extract_strided_slice %98 {offsets = [0, 0], sizes = [1, 256], strides = [1, 1]} : vector<4x256xf32> to vector<1x256xf32>
    %cst_40 = arith.constant 0.000000e+00 : f32
    %103 = vector.shape_cast %102 : vector<1x256xf32> to vector<1x256xf32>
    %104 = vector.broadcast %103 : vector<1x256xf32> to vector<18x256xf32>
    %105 = vector.broadcast %cst_40 : f32 to vector<18x256xf32>
    %106 = arith.select %101, %104, %105 : vector<18x256xi1>, vector<18x256xf32>
    %107 = vector.extract_strided_slice %96 {offsets = [1, 0], sizes = [1, 256], strides = [1, 1]} : vector<4x256xi32> to vector<1x256xi32>
    %108 = vector.broadcast %107 : vector<1x256xi32> to vector<18x256xi32>
    %109 = arith.cmpi eq, %108, %0 : vector<18x256xi32>
    %110 = vector.extract_strided_slice %98 {offsets = [1, 0], sizes = [1, 256], strides = [1, 1]} : vector<4x256xf32> to vector<1x256xf32>
    %cst_41 = arith.constant 0.000000e+00 : f32
    %111 = vector.shape_cast %110 : vector<1x256xf32> to vector<1x256xf32>
    %112 = vector.broadcast %111 : vector<1x256xf32> to vector<18x256xf32>
    %113 = vector.broadcast %cst_41 : f32 to vector<18x256xf32>
    %114 = arith.select %109, %112, %113 : vector<18x256xi1>, vector<18x256xf32>
    %115 = arith.addf %106, %114 : vector<18x256xf32>
    %116 = vector.extract_strided_slice %96 {offsets = [2, 0], sizes = [1, 256], strides = [1, 1]} : vector<4x256xi32> to vector<1x256xi32>
    %117 = vector.broadcast %116 : vector<1x256xi32> to vector<18x256xi32>
    %118 = arith.cmpi eq, %117, %1 : vector<18x256xi32>
    %119 = vector.extract_strided_slice %98 {offsets = [2, 0], sizes = [1, 256], strides = [1, 1]} : vector<4x256xf32> to vector<1x256xf32>
    %cst_42 = arith.constant 0.000000e+00 : f32
    %120 = vector.shape_cast %119 : vector<1x256xf32> to vector<1x256xf32>
    %121 = vector.broadcast %120 : vector<1x256xf32> to vector<18x256xf32>
    %122 = vector.broadcast %cst_42 : f32 to vector<18x256xf32>
    %123 = arith.select %118, %121, %122 : vector<18x256xi1>, vector<18x256xf32>
    %124 = vector.extract_strided_slice %96 {offsets = [3, 0], sizes = [1, 256], strides = [1, 1]} : vector<4x256xi32> to vector<1x256xi32>
    %125 = vector.broadcast %124 : vector<1x256xi32> to vector<18x256xi32>
    %126 = arith.cmpi eq, %125, %1 : vector<18x256xi32>
    %127 = vector.extract_strided_slice %98 {offsets = [3, 0], sizes = [1, 256], strides = [1, 1]} : vector<4x256xf32> to vector<1x256xf32>
    %cst_43 = arith.constant 0.000000e+00 : f32
    %128 = vector.shape_cast %127 : vector<1x256xf32> to vector<1x256xf32>
    %129 = vector.broadcast %128 : vector<1x256xf32> to vector<18x256xf32>
    %130 = vector.broadcast %cst_43 : f32 to vector<18x256xf32>
    %131 = arith.select %126, %129, %130 : vector<18x256xi1>, vector<18x256xf32>
    %132 = arith.addf %123, %131 : vector<18x256xf32>
    %c0_44 = arith.constant 0 : index
    %c2 = arith.constant 2 : index
    %c0_45 = arith.constant 0 : index
    %c0_46 = arith.constant 0 : index
    %133 = vector.load %arg2[%c0_44, %c2, %c0_45, %c0_46] : memref<1x9x144x18xf32, #tpu.memory_space<vmem>>, vector<1x1x144x18xf32>
    %134 = vector.shape_cast %133 : vector<1x1x144x18xf32> to vector<144x18xf32>
    %cst_47 = arith.constant dense<0.000000e+00> : vector<144x256xf32>
    %135 = tpu.matmul %134, %132, %cst_47 {dimension_numbers = #tpu.dot_dimension_numbers<[1], [0], [0], [1], [0, 0, 1, 1], [], []>} : vector<144x18xf32>, vector<18x256xf32>, vector<144x256xf32> -> vector<144x256xf32>
    %cst_48 = arith.constant dense<0.000000e+00> : vector<144x256xf32>
    %136 = tpu.matmul %2, %115, %cst_48 {dimension_numbers = #tpu.dot_dimension_numbers<[1], [0], [0], [1], [0, 0, 1, 1], [], []>} : vector<144x18xf32>, vector<18x256xf32>, vector<144x256xf32> -> vector<144x256xf32>
    %137 = arith.mulf %135, %136 : vector<144x256xf32>
    %cst_49 = arith.constant dense<0.000000e+00> : vector<8x256xf32>
    %138 = tpu.matmul %3, %137, %cst_49 {dimension_numbers = #tpu.dot_dimension_numbers<[1], [0], [0], [1], [0, 0, 1, 1], [], []>} : vector<8x144xf32>, vector<144x256xf32>, vector<8x256xf32> -> vector<8x256xf32>
    %139 = arith.addf %94, %138 : vector<8x256xf32>
    %c0_50 = arith.constant 0 : index
    %c12 = arith.constant 12 : index
    %c0_51 = arith.constant 0 : index
    %140 = vector.load %arg3[%c0_50, %c12, %c0_51] : memref<1x36x256xi32, #tpu.memory_space<vmem>>, vector<1x4x256xi32>
    %141 = vector.shape_cast %140 : vector<1x4x256xi32> to vector<4x256xi32>
    %c0_52 = arith.constant 0 : index
    %c12_53 = arith.constant 12 : index
    %c0_54 = arith.constant 0 : index
    %142 = vector.load %arg4[%c0_52, %c12_53, %c0_54] : memref<1x36x256xf32, #tpu.memory_space<vmem>>, vector<1x4x256xf32>
    %143 = vector.shape_cast %142 : vector<1x4x256xf32> to vector<4x256xf32>
    %144 = vector.extract_strided_slice %141 {offsets = [0, 0], sizes = [1, 256], strides = [1, 1]} : vector<4x256xi32> to vector<1x256xi32>
    %145 = vector.broadcast %144 : vector<1x256xi32> to vector<18x256xi32>
    %146 = arith.cmpi eq, %145, %0 : vector<18x256xi32>
    %147 = vector.extract_strided_slice %143 {offsets = [0, 0], sizes = [1, 256], strides = [1, 1]} : vector<4x256xf32> to vector<1x256xf32>
    %cst_55 = arith.constant 0.000000e+00 : f32
    %148 = vector.shape_cast %147 : vector<1x256xf32> to vector<1x256xf32>
    %149 = vector.broadcast %148 : vector<1x256xf32> to vector<18x256xf32>
    %150 = vector.broadcast %cst_55 : f32 to vector<18x256xf32>
    %151 = arith.select %146, %149, %150 : vector<18x256xi1>, vector<18x256xf32>
    %152 = vector.extract_strided_slice %141 {offsets = [1, 0], sizes = [1, 256], strides = [1, 1]} : vector<4x256xi32> to vector<1x256xi32>
    %153 = vector.broadcast %152 : vector<1x256xi32> to vector<18x256xi32>
    %154 = arith.cmpi eq, %153, %0 : vector<18x256xi32>
    %155 = vector.extract_strided_slice %143 {offsets = [1, 0], sizes = [1, 256], strides = [1, 1]} : vector<4x256xf32> to vector<1x256xf32>
    %cst_56 = arith.constant 0.000000e+00 : f32
    %156 = vector.shape_cast %155 : vector<1x256xf32> to vector<1x256xf32>
    %157 = vector.broadcast %156 : vector<1x256xf32> to vector<18x256xf32>
    %158 = vector.broadcast %cst_56 : f32 to vector<18x256xf32>
    %159 = arith.select %154, %157, %158 : vector<18x256xi1>, vector<18x256xf32>
    %160 = arith.addf %151, %159 : vector<18x256xf32>
    %161 = vector.extract_strided_slice %141 {offsets = [2, 0], sizes = [1, 256], strides = [1, 1]} : vector<4x256xi32> to vector<1x256xi32>
    %162 = vector.broadcast %161 : vector<1x256xi32> to vector<18x256xi32>
    %163 = arith.cmpi eq, %162, %1 : vector<18x256xi32>
    %164 = vector.extract_strided_slice %143 {offsets = [2, 0], sizes = [1, 256], strides = [1, 1]} : vector<4x256xf32> to vector<1x256xf32>
    %cst_57 = arith.constant 0.000000e+00 : f32
    %165 = vector.shape_cast %164 : vector<1x256xf32> to vector<1x256xf32>
    %166 = vector.broadcast %165 : vector<1x256xf32> to vector<18x256xf32>
    %167 = vector.broadcast %cst_57 : f32 to vector<18x256xf32>
    %168 = arith.select %163, %166, %167 : vector<18x256xi1>, vector<18x256xf32>
    %169 = vector.extract_strided_slice %141 {offsets = [3, 0], sizes = [1, 256], strides = [1, 1]} : vector<4x256xi32> to vector<1x256xi32>
    %170 = vector.broadcast %169 : vector<1x256xi32> to vector<18x256xi32>
    %171 = arith.cmpi eq, %170, %1 : vector<18x256xi32>
    %172 = vector.extract_strided_slice %143 {offsets = [3, 0], sizes = [1, 256], strides = [1, 1]} : vector<4x256xf32> to vector<1x256xf32>
    %cst_58 = arith.constant 0.000000e+00 : f32
    %173 = vector.shape_cast %172 : vector<1x256xf32> to vector<1x256xf32>
    %174 = vector.broadcast %173 : vector<1x256xf32> to vector<18x256xf32>
    %175 = vector.broadcast %cst_58 : f32 to vector<18x256xf32>
    %176 = arith.select %171, %174, %175 : vector<18x256xi1>, vector<18x256xf32>
    %177 = arith.addf %168, %176 : vector<18x256xf32>
    %c0_59 = arith.constant 0 : index
    %c3 = arith.constant 3 : index
    %c0_60 = arith.constant 0 : index
    %c0_61 = arith.constant 0 : index
    %178 = vector.load %arg2[%c0_59, %c3, %c0_60, %c0_61] : memref<1x9x144x18xf32, #tpu.memory_space<vmem>>, vector<1x1x144x18xf32>
    %179 = vector.shape_cast %178 : vector<1x1x144x18xf32> to vector<144x18xf32>
    %cst_62 = arith.constant dense<0.000000e+00> : vector<144x256xf32>
    %180 = tpu.matmul %179, %177, %cst_62 {dimension_numbers = #tpu.dot_dimension_numbers<[1], [0], [0], [1], [0, 0, 1, 1], [], []>} : vector<144x18xf32>, vector<18x256xf32>, vector<144x256xf32> -> vector<144x256xf32>
    %cst_63 = arith.constant dense<0.000000e+00> : vector<144x256xf32>
    %181 = tpu.matmul %2, %160, %cst_63 {dimension_numbers = #tpu.dot_dimension_numbers<[1], [0], [0], [1], [0, 0, 1, 1], [], []>} : vector<144x18xf32>, vector<18x256xf32>, vector<144x256xf32> -> vector<144x256xf32>
    %182 = arith.mulf %180, %181 : vector<144x256xf32>
    %cst_64 = arith.constant dense<0.000000e+00> : vector<8x256xf32>
    %183 = tpu.matmul %3, %182, %cst_64 {dimension_numbers = #tpu.dot_dimension_numbers<[1], [0], [0], [1], [0, 0, 1, 1], [], []>} : vector<8x144xf32>, vector<144x256xf32>, vector<8x256xf32> -> vector<8x256xf32>
    %184 = arith.addf %139, %183 : vector<8x256xf32>
    %c0_65 = arith.constant 0 : index
    %c16 = arith.constant 16 : index
    %c0_66 = arith.constant 0 : index
    %185 = vector.load %arg3[%c0_65, %c16, %c0_66] : memref<1x36x256xi32, #tpu.memory_space<vmem>>, vector<1x4x256xi32>
    %186 = vector.shape_cast %185 : vector<1x4x256xi32> to vector<4x256xi32>
    %c0_67 = arith.constant 0 : index
    %c16_68 = arith.constant 16 : index
    %c0_69 = arith.constant 0 : index
    %187 = vector.load %arg4[%c0_67, %c16_68, %c0_69] : memref<1x36x256xf32, #tpu.memory_space<vmem>>, vector<1x4x256xf32>
    %188 = vector.shape_cast %187 : vector<1x4x256xf32> to vector<4x256xf32>
    %189 = vector.extract_strided_slice %186 {offsets = [0, 0], sizes = [1, 256], strides = [1, 1]} : vector<4x256xi32> to vector<1x256xi32>
    %190 = vector.broadcast %189 : vector<1x256xi32> to vector<18x256xi32>
    %191 = arith.cmpi eq, %190, %0 : vector<18x256xi32>
    %192 = vector.extract_strided_slice %188 {offsets = [0, 0], sizes = [1, 256], strides = [1, 1]} : vector<4x256xf32> to vector<1x256xf32>
    %cst_70 = arith.constant 0.000000e+00 : f32
    %193 = vector.shape_cast %192 : vector<1x256xf32> to vector<1x256xf32>
    %194 = vector.broadcast %193 : vector<1x256xf32> to vector<18x256xf32>
    %195 = vector.broadcast %cst_70 : f32 to vector<18x256xf32>
    %196 = arith.select %191, %194, %195 : vector<18x256xi1>, vector<18x256xf32>
    %197 = vector.extract_strided_slice %186 {offsets = [1, 0], sizes = [1, 256], strides = [1, 1]} : vector<4x256xi32> to vector<1x256xi32>
    %198 = vector.broadcast %197 : vector<1x256xi32> to vector<18x256xi32>
    %199 = arith.cmpi eq, %198, %0 : vector<18x256xi32>
    %200 = vector.extract_strided_slice %188 {offsets = [1, 0], sizes = [1, 256], strides = [1, 1]} : vector<4x256xf32> to vector<1x256xf32>
    %cst_71 = arith.constant 0.000000e+00 : f32
    %201 = vector.shape_cast %200 : vector<1x256xf32> to vector<1x256xf32>
    %202 = vector.broadcast %201 : vector<1x256xf32> to vector<18x256xf32>
    %203 = vector.broadcast %cst_71 : f32 to vector<18x256xf32>
    %204 = arith.select %199, %202, %203 : vector<18x256xi1>, vector<18x256xf32>
    %205 = arith.addf %196, %204 : vector<18x256xf32>
    %206 = vector.extract_strided_slice %186 {offsets = [2, 0], sizes = [1, 256], strides = [1, 1]} : vector<4x256xi32> to vector<1x256xi32>
    %207 = vector.broadcast %206 : vector<1x256xi32> to vector<18x256xi32>
    %208 = arith.cmpi eq, %207, %1 : vector<18x256xi32>
    %209 = vector.extract_strided_slice %188 {offsets = [2, 0], sizes = [1, 256], strides = [1, 1]} : vector<4x256xf32> to vector<1x256xf32>
    %cst_72 = arith.constant 0.000000e+00 : f32
    %210 = vector.shape_cast %209 : vector<1x256xf32> to vector<1x256xf32>
    %211 = vector.broadcast %210 : vector<1x256xf32> to vector<18x256xf32>
    %212 = vector.broadcast %cst_72 : f32 to vector<18x256xf32>
    %213 = arith.select %208, %211, %212 : vector<18x256xi1>, vector<18x256xf32>
    %214 = vector.extract_strided_slice %186 {offsets = [3, 0], sizes = [1, 256], strides = [1, 1]} : vector<4x256xi32> to vector<1x256xi32>
    %215 = vector.broadcast %214 : vector<1x256xi32> to vector<18x256xi32>
    %216 = arith.cmpi eq, %215, %1 : vector<18x256xi32>
    %217 = vector.extract_strided_slice %188 {offsets = [3, 0], sizes = [1, 256], strides = [1, 1]} : vector<4x256xf32> to vector<1x256xf32>
    %cst_73 = arith.constant 0.000000e+00 : f32
    %218 = vector.shape_cast %217 : vector<1x256xf32> to vector<1x256xf32>
    %219 = vector.broadcast %218 : vector<1x256xf32> to vector<18x256xf32>
    %220 = vector.broadcast %cst_73 : f32 to vector<18x256xf32>
    %221 = arith.select %216, %219, %220 : vector<18x256xi1>, vector<18x256xf32>
    %222 = arith.addf %213, %221 : vector<18x256xf32>
    %c0_74 = arith.constant 0 : index
    %c4_75 = arith.constant 4 : index
    %c0_76 = arith.constant 0 : index
    %c0_77 = arith.constant 0 : index
    %223 = vector.load %arg2[%c0_74, %c4_75, %c0_76, %c0_77] : memref<1x9x144x18xf32, #tpu.memory_space<vmem>>, vector<1x1x144x18xf32>
    %224 = vector.shape_cast %223 : vector<1x1x144x18xf32> to vector<144x18xf32>
    %cst_78 = arith.constant dense<0.000000e+00> : vector<144x256xf32>
    %225 = tpu.matmul %224, %222, %cst_78 {dimension_numbers = #tpu.dot_dimension_numbers<[1], [0], [0], [1], [0, 0, 1, 1], [], []>} : vector<144x18xf32>, vector<18x256xf32>, vector<144x256xf32> -> vector<144x256xf32>
    %cst_79 = arith.constant dense<0.000000e+00> : vector<144x256xf32>
    %226 = tpu.matmul %2, %205, %cst_79 {dimension_numbers = #tpu.dot_dimension_numbers<[1], [0], [0], [1], [0, 0, 1, 1], [], []>} : vector<144x18xf32>, vector<18x256xf32>, vector<144x256xf32> -> vector<144x256xf32>
    %227 = arith.mulf %225, %226 : vector<144x256xf32>
    %cst_80 = arith.constant dense<0.000000e+00> : vector<8x256xf32>
    %228 = tpu.matmul %3, %227, %cst_80 {dimension_numbers = #tpu.dot_dimension_numbers<[1], [0], [0], [1], [0, 0, 1, 1], [], []>} : vector<8x144xf32>, vector<144x256xf32>, vector<8x256xf32> -> vector<8x256xf32>
    %229 = arith.addf %184, %228 : vector<8x256xf32>
    %c0_81 = arith.constant 0 : index
    %c20 = arith.constant 20 : index
    %c0_82 = arith.constant 0 : index
    %230 = vector.load %arg3[%c0_81, %c20, %c0_82] : memref<1x36x256xi32, #tpu.memory_space<vmem>>, vector<1x4x256xi32>
    %231 = vector.shape_cast %230 : vector<1x4x256xi32> to vector<4x256xi32>
    %c0_83 = arith.constant 0 : index
    %c20_84 = arith.constant 20 : index
    %c0_85 = arith.constant 0 : index
    %232 = vector.load %arg4[%c0_83, %c20_84, %c0_85] : memref<1x36x256xf32, #tpu.memory_space<vmem>>, vector<1x4x256xf32>
    %233 = vector.shape_cast %232 : vector<1x4x256xf32> to vector<4x256xf32>
    %234 = vector.extract_strided_slice %231 {offsets = [0, 0], sizes = [1, 256], strides = [1, 1]} : vector<4x256xi32> to vector<1x256xi32>
    %235 = vector.broadcast %234 : vector<1x256xi32> to vector<18x256xi32>
    %236 = arith.cmpi eq, %235, %0 : vector<18x256xi32>
    %237 = vector.extract_strided_slice %233 {offsets = [0, 0], sizes = [1, 256], strides = [1, 1]} : vector<4x256xf32> to vector<1x256xf32>
    %cst_86 = arith.constant 0.000000e+00 : f32
    %238 = vector.shape_cast %237 : vector<1x256xf32> to vector<1x256xf32>
    %239 = vector.broadcast %238 : vector<1x256xf32> to vector<18x256xf32>
    %240 = vector.broadcast %cst_86 : f32 to vector<18x256xf32>
    %241 = arith.select %236, %239, %240 : vector<18x256xi1>, vector<18x256xf32>
    %242 = vector.extract_strided_slice %231 {offsets = [1, 0], sizes = [1, 256], strides = [1, 1]} : vector<4x256xi32> to vector<1x256xi32>
    %243 = vector.broadcast %242 : vector<1x256xi32> to vector<18x256xi32>
    %244 = arith.cmpi eq, %243, %0 : vector<18x256xi32>
    %245 = vector.extract_strided_slice %233 {offsets = [1, 0], sizes = [1, 256], strides = [1, 1]} : vector<4x256xf32> to vector<1x256xf32>
    %cst_87 = arith.constant 0.000000e+00 : f32
    %246 = vector.shape_cast %245 : vector<1x256xf32> to vector<1x256xf32>
    %247 = vector.broadcast %246 : vector<1x256xf32> to vector<18x256xf32>
    %248 = vector.broadcast %cst_87 : f32 to vector<18x256xf32>
    %249 = arith.select %244, %247, %248 : vector<18x256xi1>, vector<18x256xf32>
    %250 = arith.addf %241, %249 : vector<18x256xf32>
    %251 = vector.extract_strided_slice %231 {offsets = [2, 0], sizes = [1, 256], strides = [1, 1]} : vector<4x256xi32> to vector<1x256xi32>
    %252 = vector.broadcast %251 : vector<1x256xi32> to vector<18x256xi32>
    %253 = arith.cmpi eq, %252, %1 : vector<18x256xi32>
    %254 = vector.extract_strided_slice %233 {offsets = [2, 0], sizes = [1, 256], strides = [1, 1]} : vector<4x256xf32> to vector<1x256xf32>
    %cst_88 = arith.constant 0.000000e+00 : f32
    %255 = vector.shape_cast %254 : vector<1x256xf32> to vector<1x256xf32>
    %256 = vector.broadcast %255 : vector<1x256xf32> to vector<18x256xf32>
    %257 = vector.broadcast %cst_88 : f32 to vector<18x256xf32>
    %258 = arith.select %253, %256, %257 : vector<18x256xi1>, vector<18x256xf32>
    %259 = vector.extract_strided_slice %231 {offsets = [3, 0], sizes = [1, 256], strides = [1, 1]} : vector<4x256xi32> to vector<1x256xi32>
    %260 = vector.broadcast %259 : vector<1x256xi32> to vector<18x256xi32>
    %261 = arith.cmpi eq, %260, %1 : vector<18x256xi32>
    %262 = vector.extract_strided_slice %233 {offsets = [3, 0], sizes = [1, 256], strides = [1, 1]} : vector<4x256xf32> to vector<1x256xf32>
    %cst_89 = arith.constant 0.000000e+00 : f32
    %263 = vector.shape_cast %262 : vector<1x256xf32> to vector<1x256xf32>
    %264 = vector.broadcast %263 : vector<1x256xf32> to vector<18x256xf32>
    %265 = vector.broadcast %cst_89 : f32 to vector<18x256xf32>
    %266 = arith.select %261, %264, %265 : vector<18x256xi1>, vector<18x256xf32>
    %267 = arith.addf %258, %266 : vector<18x256xf32>
    %c0_90 = arith.constant 0 : index
    %c5 = arith.constant 5 : index
    %c0_91 = arith.constant 0 : index
    %c0_92 = arith.constant 0 : index
    %268 = vector.load %arg2[%c0_90, %c5, %c0_91, %c0_92] : memref<1x9x144x18xf32, #tpu.memory_space<vmem>>, vector<1x1x144x18xf32>
    %269 = vector.shape_cast %268 : vector<1x1x144x18xf32> to vector<144x18xf32>
    %cst_93 = arith.constant dense<0.000000e+00> : vector<144x256xf32>
    %270 = tpu.matmul %269, %267, %cst_93 {dimension_numbers = #tpu.dot_dimension_numbers<[1], [0], [0], [1], [0, 0, 1, 1], [], []>} : vector<144x18xf32>, vector<18x256xf32>, vector<144x256xf32> -> vector<144x256xf32>
    %cst_94 = arith.constant dense<0.000000e+00> : vector<144x256xf32>
    %271 = tpu.matmul %2, %250, %cst_94 {dimension_numbers = #tpu.dot_dimension_numbers<[1], [0], [0], [1], [0, 0, 1, 1], [], []>} : vector<144x18xf32>, vector<18x256xf32>, vector<144x256xf32> -> vector<144x256xf32>
    %272 = arith.mulf %270, %271 : vector<144x256xf32>
    %cst_95 = arith.constant dense<0.000000e+00> : vector<8x256xf32>
    %273 = tpu.matmul %3, %272, %cst_95 {dimension_numbers = #tpu.dot_dimension_numbers<[1], [0], [0], [1], [0, 0, 1, 1], [], []>} : vector<8x144xf32>, vector<144x256xf32>, vector<8x256xf32> -> vector<8x256xf32>
    %274 = arith.addf %229, %273 : vector<8x256xf32>
    %c0_96 = arith.constant 0 : index
    %c24 = arith.constant 24 : index
    %c0_97 = arith.constant 0 : index
    %275 = vector.load %arg3[%c0_96, %c24, %c0_97] : memref<1x36x256xi32, #tpu.memory_space<vmem>>, vector<1x4x256xi32>
    %276 = vector.shape_cast %275 : vector<1x4x256xi32> to vector<4x256xi32>
    %c0_98 = arith.constant 0 : index
    %c24_99 = arith.constant 24 : index
    %c0_100 = arith.constant 0 : index
    %277 = vector.load %arg4[%c0_98, %c24_99, %c0_100] : memref<1x36x256xf32, #tpu.memory_space<vmem>>, vector<1x4x256xf32>
    %278 = vector.shape_cast %277 : vector<1x4x256xf32> to vector<4x256xf32>
    %279 = vector.extract_strided_slice %276 {offsets = [0, 0], sizes = [1, 256], strides = [1, 1]} : vector<4x256xi32> to vector<1x256xi32>
    %280 = vector.broadcast %279 : vector<1x256xi32> to vector<18x256xi32>
    %281 = arith.cmpi eq, %280, %0 : vector<18x256xi32>
    %282 = vector.extract_strided_slice %278 {offsets = [0, 0], sizes = [1, 256], strides = [1, 1]} : vector<4x256xf32> to vector<1x256xf32>
    %cst_101 = arith.constant 0.000000e+00 : f32
    %283 = vector.shape_cast %282 : vector<1x256xf32> to vector<1x256xf32>
    %284 = vector.broadcast %283 : vector<1x256xf32> to vector<18x256xf32>
    %285 = vector.broadcast %cst_101 : f32 to vector<18x256xf32>
    %286 = arith.select %281, %284, %285 : vector<18x256xi1>, vector<18x256xf32>
    %287 = vector.extract_strided_slice %276 {offsets = [1, 0], sizes = [1, 256], strides = [1, 1]} : vector<4x256xi32> to vector<1x256xi32>
    %288 = vector.broadcast %287 : vector<1x256xi32> to vector<18x256xi32>
    %289 = arith.cmpi eq, %288, %0 : vector<18x256xi32>
    %290 = vector.extract_strided_slice %278 {offsets = [1, 0], sizes = [1, 256], strides = [1, 1]} : vector<4x256xf32> to vector<1x256xf32>
    %cst_102 = arith.constant 0.000000e+00 : f32
    %291 = vector.shape_cast %290 : vector<1x256xf32> to vector<1x256xf32>
    %292 = vector.broadcast %291 : vector<1x256xf32> to vector<18x256xf32>
    %293 = vector.broadcast %cst_102 : f32 to vector<18x256xf32>
    %294 = arith.select %289, %292, %293 : vector<18x256xi1>, vector<18x256xf32>
    %295 = arith.addf %286, %294 : vector<18x256xf32>
    %296 = vector.extract_strided_slice %276 {offsets = [2, 0], sizes = [1, 256], strides = [1, 1]} : vector<4x256xi32> to vector<1x256xi32>
    %297 = vector.broadcast %296 : vector<1x256xi32> to vector<18x256xi32>
    %298 = arith.cmpi eq, %297, %1 : vector<18x256xi32>
    %299 = vector.extract_strided_slice %278 {offsets = [2, 0], sizes = [1, 256], strides = [1, 1]} : vector<4x256xf32> to vector<1x256xf32>
    %cst_103 = arith.constant 0.000000e+00 : f32
    %300 = vector.shape_cast %299 : vector<1x256xf32> to vector<1x256xf32>
    %301 = vector.broadcast %300 : vector<1x256xf32> to vector<18x256xf32>
    %302 = vector.broadcast %cst_103 : f32 to vector<18x256xf32>
    %303 = arith.select %298, %301, %302 : vector<18x256xi1>, vector<18x256xf32>
    %304 = vector.extract_strided_slice %276 {offsets = [3, 0], sizes = [1, 256], strides = [1, 1]} : vector<4x256xi32> to vector<1x256xi32>
    %305 = vector.broadcast %304 : vector<1x256xi32> to vector<18x256xi32>
    %306 = arith.cmpi eq, %305, %1 : vector<18x256xi32>
    %307 = vector.extract_strided_slice %278 {offsets = [3, 0], sizes = [1, 256], strides = [1, 1]} : vector<4x256xf32> to vector<1x256xf32>
    %cst_104 = arith.constant 0.000000e+00 : f32
    %308 = vector.shape_cast %307 : vector<1x256xf32> to vector<1x256xf32>
    %309 = vector.broadcast %308 : vector<1x256xf32> to vector<18x256xf32>
    %310 = vector.broadcast %cst_104 : f32 to vector<18x256xf32>
    %311 = arith.select %306, %309, %310 : vector<18x256xi1>, vector<18x256xf32>
    %312 = arith.addf %303, %311 : vector<18x256xf32>
    %c0_105 = arith.constant 0 : index
    %c6 = arith.constant 6 : index
    %c0_106 = arith.constant 0 : index
    %c0_107 = arith.constant 0 : index
    %313 = vector.load %arg2[%c0_105, %c6, %c0_106, %c0_107] : memref<1x9x144x18xf32, #tpu.memory_space<vmem>>, vector<1x1x144x18xf32>
    %314 = vector.shape_cast %313 : vector<1x1x144x18xf32> to vector<144x18xf32>
    %cst_108 = arith.constant dense<0.000000e+00> : vector<144x256xf32>
    %315 = tpu.matmul %314, %312, %cst_108 {dimension_numbers = #tpu.dot_dimension_numbers<[1], [0], [0], [1], [0, 0, 1, 1], [], []>} : vector<144x18xf32>, vector<18x256xf32>, vector<144x256xf32> -> vector<144x256xf32>
    %cst_109 = arith.constant dense<0.000000e+00> : vector<144x256xf32>
    %316 = tpu.matmul %2, %295, %cst_109 {dimension_numbers = #tpu.dot_dimension_numbers<[1], [0], [0], [1], [0, 0, 1, 1], [], []>} : vector<144x18xf32>, vector<18x256xf32>, vector<144x256xf32> -> vector<144x256xf32>
    %317 = arith.mulf %315, %316 : vector<144x256xf32>
    %cst_110 = arith.constant dense<0.000000e+00> : vector<8x256xf32>
    %318 = tpu.matmul %3, %317, %cst_110 {dimension_numbers = #tpu.dot_dimension_numbers<[1], [0], [0], [1], [0, 0, 1, 1], [], []>} : vector<8x144xf32>, vector<144x256xf32>, vector<8x256xf32> -> vector<8x256xf32>
    %319 = arith.addf %274, %318 : vector<8x256xf32>
    %c0_111 = arith.constant 0 : index
    %c28 = arith.constant 28 : index
    %c0_112 = arith.constant 0 : index
    %320 = vector.load %arg3[%c0_111, %c28, %c0_112] : memref<1x36x256xi32, #tpu.memory_space<vmem>>, vector<1x4x256xi32>
    %321 = vector.shape_cast %320 : vector<1x4x256xi32> to vector<4x256xi32>
    %c0_113 = arith.constant 0 : index
    %c28_114 = arith.constant 28 : index
    %c0_115 = arith.constant 0 : index
    %322 = vector.load %arg4[%c0_113, %c28_114, %c0_115] : memref<1x36x256xf32, #tpu.memory_space<vmem>>, vector<1x4x256xf32>
    %323 = vector.shape_cast %322 : vector<1x4x256xf32> to vector<4x256xf32>
    %324 = vector.extract_strided_slice %321 {offsets = [0, 0], sizes = [1, 256], strides = [1, 1]} : vector<4x256xi32> to vector<1x256xi32>
    %325 = vector.broadcast %324 : vector<1x256xi32> to vector<18x256xi32>
    %326 = arith.cmpi eq, %325, %0 : vector<18x256xi32>
    %327 = vector.extract_strided_slice %323 {offsets = [0, 0], sizes = [1, 256], strides = [1, 1]} : vector<4x256xf32> to vector<1x256xf32>
    %cst_116 = arith.constant 0.000000e+00 : f32
    %328 = vector.shape_cast %327 : vector<1x256xf32> to vector<1x256xf32>
    %329 = vector.broadcast %328 : vector<1x256xf32> to vector<18x256xf32>
    %330 = vector.broadcast %cst_116 : f32 to vector<18x256xf32>
    %331 = arith.select %326, %329, %330 : vector<18x256xi1>, vector<18x256xf32>
    %332 = vector.extract_strided_slice %321 {offsets = [1, 0], sizes = [1, 256], strides = [1, 1]} : vector<4x256xi32> to vector<1x256xi32>
    %333 = vector.broadcast %332 : vector<1x256xi32> to vector<18x256xi32>
    %334 = arith.cmpi eq, %333, %0 : vector<18x256xi32>
    %335 = vector.extract_strided_slice %323 {offsets = [1, 0], sizes = [1, 256], strides = [1, 1]} : vector<4x256xf32> to vector<1x256xf32>
    %cst_117 = arith.constant 0.000000e+00 : f32
    %336 = vector.shape_cast %335 : vector<1x256xf32> to vector<1x256xf32>
    %337 = vector.broadcast %336 : vector<1x256xf32> to vector<18x256xf32>
    %338 = vector.broadcast %cst_117 : f32 to vector<18x256xf32>
    %339 = arith.select %334, %337, %338 : vector<18x256xi1>, vector<18x256xf32>
    %340 = arith.addf %331, %339 : vector<18x256xf32>
    %341 = vector.extract_strided_slice %321 {offsets = [2, 0], sizes = [1, 256], strides = [1, 1]} : vector<4x256xi32> to vector<1x256xi32>
    %342 = vector.broadcast %341 : vector<1x256xi32> to vector<18x256xi32>
    %343 = arith.cmpi eq, %342, %1 : vector<18x256xi32>
    %344 = vector.extract_strided_slice %323 {offsets = [2, 0], sizes = [1, 256], strides = [1, 1]} : vector<4x256xf32> to vector<1x256xf32>
    %cst_118 = arith.constant 0.000000e+00 : f32
    %345 = vector.shape_cast %344 : vector<1x256xf32> to vector<1x256xf32>
    %346 = vector.broadcast %345 : vector<1x256xf32> to vector<18x256xf32>
    %347 = vector.broadcast %cst_118 : f32 to vector<18x256xf32>
    %348 = arith.select %343, %346, %347 : vector<18x256xi1>, vector<18x256xf32>
    %349 = vector.extract_strided_slice %321 {offsets = [3, 0], sizes = [1, 256], strides = [1, 1]} : vector<4x256xi32> to vector<1x256xi32>
    %350 = vector.broadcast %349 : vector<1x256xi32> to vector<18x256xi32>
    %351 = arith.cmpi eq, %350, %1 : vector<18x256xi32>
    %352 = vector.extract_strided_slice %323 {offsets = [3, 0], sizes = [1, 256], strides = [1, 1]} : vector<4x256xf32> to vector<1x256xf32>
    %cst_119 = arith.constant 0.000000e+00 : f32
    %353 = vector.shape_cast %352 : vector<1x256xf32> to vector<1x256xf32>
    %354 = vector.broadcast %353 : vector<1x256xf32> to vector<18x256xf32>
    %355 = vector.broadcast %cst_119 : f32 to vector<18x256xf32>
    %356 = arith.select %351, %354, %355 : vector<18x256xi1>, vector<18x256xf32>
    %357 = arith.addf %348, %356 : vector<18x256xf32>
    %c0_120 = arith.constant 0 : index
    %c7 = arith.constant 7 : index
    %c0_121 = arith.constant 0 : index
    %c0_122 = arith.constant 0 : index
    %358 = vector.load %arg2[%c0_120, %c7, %c0_121, %c0_122] : memref<1x9x144x18xf32, #tpu.memory_space<vmem>>, vector<1x1x144x18xf32>
    %359 = vector.shape_cast %358 : vector<1x1x144x18xf32> to vector<144x18xf32>
    %cst_123 = arith.constant dense<0.000000e+00> : vector<144x256xf32>
    %360 = tpu.matmul %359, %357, %cst_123 {dimension_numbers = #tpu.dot_dimension_numbers<[1], [0], [0], [1], [0, 0, 1, 1], [], []>} : vector<144x18xf32>, vector<18x256xf32>, vector<144x256xf32> -> vector<144x256xf32>
    %cst_124 = arith.constant dense<0.000000e+00> : vector<144x256xf32>
    %361 = tpu.matmul %2, %340, %cst_124 {dimension_numbers = #tpu.dot_dimension_numbers<[1], [0], [0], [1], [0, 0, 1, 1], [], []>} : vector<144x18xf32>, vector<18x256xf32>, vector<144x256xf32> -> vector<144x256xf32>
    %362 = arith.mulf %360, %361 : vector<144x256xf32>
    %cst_125 = arith.constant dense<0.000000e+00> : vector<8x256xf32>
    %363 = tpu.matmul %3, %362, %cst_125 {dimension_numbers = #tpu.dot_dimension_numbers<[1], [0], [0], [1], [0, 0, 1, 1], [], []>} : vector<8x144xf32>, vector<144x256xf32>, vector<8x256xf32> -> vector<8x256xf32>
    %364 = arith.addf %319, %363 : vector<8x256xf32>
    %c0_126 = arith.constant 0 : index
    %c32 = arith.constant 32 : index
    %c0_127 = arith.constant 0 : index
    %365 = vector.load %arg3[%c0_126, %c32, %c0_127] : memref<1x36x256xi32, #tpu.memory_space<vmem>>, vector<1x4x256xi32>
    %366 = vector.shape_cast %365 : vector<1x4x256xi32> to vector<4x256xi32>
    %c0_128 = arith.constant 0 : index
    %c32_129 = arith.constant 32 : index
    %c0_130 = arith.constant 0 : index
    %367 = vector.load %arg4[%c0_128, %c32_129, %c0_130] : memref<1x36x256xf32, #tpu.memory_space<vmem>>, vector<1x4x256xf32>
    %368 = vector.shape_cast %367 : vector<1x4x256xf32> to vector<4x256xf32>
    %369 = vector.extract_strided_slice %366 {offsets = [0, 0], sizes = [1, 256], strides = [1, 1]} : vector<4x256xi32> to vector<1x256xi32>
    %370 = vector.broadcast %369 : vector<1x256xi32> to vector<18x256xi32>
    %371 = arith.cmpi eq, %370, %0 : vector<18x256xi32>
    %372 = vector.extract_strided_slice %368 {offsets = [0, 0], sizes = [1, 256], strides = [1, 1]} : vector<4x256xf32> to vector<1x256xf32>
    %cst_131 = arith.constant 0.000000e+00 : f32
    %373 = vector.shape_cast %372 : vector<1x256xf32> to vector<1x256xf32>
    %374 = vector.broadcast %373 : vector<1x256xf32> to vector<18x256xf32>
    %375 = vector.broadcast %cst_131 : f32 to vector<18x256xf32>
    %376 = arith.select %371, %374, %375 : vector<18x256xi1>, vector<18x256xf32>
    %377 = vector.extract_strided_slice %366 {offsets = [1, 0], sizes = [1, 256], strides = [1, 1]} : vector<4x256xi32> to vector<1x256xi32>
    %378 = vector.broadcast %377 : vector<1x256xi32> to vector<18x256xi32>
    %379 = arith.cmpi eq, %378, %0 : vector<18x256xi32>
    %380 = vector.extract_strided_slice %368 {offsets = [1, 0], sizes = [1, 256], strides = [1, 1]} : vector<4x256xf32> to vector<1x256xf32>
    %cst_132 = arith.constant 0.000000e+00 : f32
    %381 = vector.shape_cast %380 : vector<1x256xf32> to vector<1x256xf32>
    %382 = vector.broadcast %381 : vector<1x256xf32> to vector<18x256xf32>
    %383 = vector.broadcast %cst_132 : f32 to vector<18x256xf32>
    %384 = arith.select %379, %382, %383 : vector<18x256xi1>, vector<18x256xf32>
    %385 = arith.addf %376, %384 : vector<18x256xf32>
    %386 = vector.extract_strided_slice %366 {offsets = [2, 0], sizes = [1, 256], strides = [1, 1]} : vector<4x256xi32> to vector<1x256xi32>
    %387 = vector.broadcast %386 : vector<1x256xi32> to vector<18x256xi32>
    %388 = arith.cmpi eq, %387, %1 : vector<18x256xi32>
    %389 = vector.extract_strided_slice %368 {offsets = [2, 0], sizes = [1, 256], strides = [1, 1]} : vector<4x256xf32> to vector<1x256xf32>
    %cst_133 = arith.constant 0.000000e+00 : f32
    %390 = vector.shape_cast %389 : vector<1x256xf32> to vector<1x256xf32>
    %391 = vector.broadcast %390 : vector<1x256xf32> to vector<18x256xf32>
    %392 = vector.broadcast %cst_133 : f32 to vector<18x256xf32>
    %393 = arith.select %388, %391, %392 : vector<18x256xi1>, vector<18x256xf32>
    %394 = vector.extract_strided_slice %366 {offsets = [3, 0], sizes = [1, 256], strides = [1, 1]} : vector<4x256xi32> to vector<1x256xi32>
    %395 = vector.broadcast %394 : vector<1x256xi32> to vector<18x256xi32>
    %396 = arith.cmpi eq, %395, %1 : vector<18x256xi32>
    %397 = vector.extract_strided_slice %368 {offsets = [3, 0], sizes = [1, 256], strides = [1, 1]} : vector<4x256xf32> to vector<1x256xf32>
    %cst_134 = arith.constant 0.000000e+00 : f32
    %398 = vector.shape_cast %397 : vector<1x256xf32> to vector<1x256xf32>
    %399 = vector.broadcast %398 : vector<1x256xf32> to vector<18x256xf32>
    %400 = vector.broadcast %cst_134 : f32 to vector<18x256xf32>
    %401 = arith.select %396, %399, %400 : vector<18x256xi1>, vector<18x256xf32>
    %402 = arith.addf %393, %401 : vector<18x256xf32>
    %c0_135 = arith.constant 0 : index
    %c8_136 = arith.constant 8 : index
    %c0_137 = arith.constant 0 : index
    %c0_138 = arith.constant 0 : index
    %403 = vector.load %arg2[%c0_135, %c8_136, %c0_137, %c0_138] : memref<1x9x144x18xf32, #tpu.memory_space<vmem>>, vector<1x1x144x18xf32>
    %404 = vector.shape_cast %403 : vector<1x1x144x18xf32> to vector<144x18xf32>
    %cst_139 = arith.constant dense<0.000000e+00> : vector<144x256xf32>
    %405 = tpu.matmul %404, %402, %cst_139 {dimension_numbers = #tpu.dot_dimension_numbers<[1], [0], [0], [1], [0, 0, 1, 1], [], []>} : vector<144x18xf32>, vector<18x256xf32>, vector<144x256xf32> -> vector<144x256xf32>
    %cst_140 = arith.constant dense<0.000000e+00> : vector<144x256xf32>
    %406 = tpu.matmul %2, %385, %cst_140 {dimension_numbers = #tpu.dot_dimension_numbers<[1], [0], [0], [1], [0, 0, 1, 1], [], []>} : vector<144x18xf32>, vector<18x256xf32>, vector<144x256xf32> -> vector<144x256xf32>
    %407 = arith.mulf %405, %406 : vector<144x256xf32>
    %cst_141 = arith.constant dense<0.000000e+00> : vector<8x256xf32>
    %408 = tpu.matmul %3, %407, %cst_141 {dimension_numbers = #tpu.dot_dimension_numbers<[1], [0], [0], [1], [0, 0, 1, 1], [], []>} : vector<8x144xf32>, vector<144x256xf32>, vector<8x256xf32> -> vector<8x256xf32>
    %409 = arith.addf %364, %408 : vector<8x256xf32>
    %c0_142 = arith.constant 0 : index
    %c0_143 = arith.constant 0 : index
    %c0_144 = arith.constant 0 : index
    %410 = vector.load %arg7[%c0_142, %c0_143, %c0_144] : memref<1x8x256xf32, #tpu.memory_space<vmem>>, vector<1x8x256xf32>
    %411 = vector.shape_cast %410 : vector<1x8x256xf32> to vector<8x256xf32>
    %412 = vector.shape_cast %409 : vector<8x256xf32> to vector<1x8x256xf32>
    tpu.vector_store %arg7[%c0_142, %c0_143, %c0_144], %412 {strides = array<i32>} : memref<1x8x256xf32, #tpu.memory_space<vmem>>, vector<1x8x256xf32>,
    return
  }
  func.func @transform_0(%arg0: i32, %arg1: i32) -> (i32, i32, i32, i32) {
    %c0_i32 = arith.constant 0 : i32
    %c0_i32_0 = arith.constant 0 : i32
    %c0_i32_1 = arith.constant 0 : i32
    %c0_i32_2 = arith.constant 0 : i32
    return %arg0, %c0_i32, %c0_i32_0, %c0_i32_1 : i32, i32, i32, i32
  }
  func.func @transform_1(%arg0: i32, %arg1: i32) -> (i32, i32, i32) {
    %c0_i32 = arith.constant 0 : i32
    %c0_i32_0 = arith.constant 0 : i32
    return %arg0, %c0_i32, %arg1 : i32, i32, i32
  }
  func.func @transform_2(%arg0: i32, %arg1: i32) -> (i32, i32, i32) {
    %c0_i32 = arith.constant 0 : i32
    %c0_i32_0 = arith.constant 0 : i32
    return %arg0, %c0_i32, %arg1 : i32, i32, i32
  }
  func.func @transform_3(%arg0: i32, %arg1: i32) -> (i32, i32) {
    %c0_i32 = arith.constant 0 : i32
    %c0_i32_0 = arith.constant 0 : i32
    %c0_i32_1 = arith.constant 0 : i32
    return %c0_i32, %c0_i32_0 : i32, i32
  }
  func.func @transform_4(%arg0: i32, %arg1: i32) -> (i32, i32) {
    %c0_i32 = arith.constant 0 : i32
    %c0_i32_0 = arith.constant 0 : i32
    %c0_i32_1 = arith.constant 0 : i32
    return %c0_i32, %c0_i32_0 : i32, i32
  }
  func.func @transform_5(%arg0: i32, %arg1: i32) -> (i32, i32, i32) {
    %c0_i32 = arith.constant 0 : i32
    %c0_i32_0 = arith.constant 0 : i32
    return %arg0, %c0_i32, %arg1 : i32, i32, i32
  }
}

</mosaic_0001>

<bundles_post_ra>
// kernel: deform_conv2d.1
= control target key start
LH: loop header
LB: loop body
LE: loop exit
PB: predicated region body
PF: predicated region fallthrough
CT: control target
= control target key end

     0   :  { %s7618_s18 = smov 0   ;;  %s7620_s19 = smov 0   ;;  %s11021_s0 = inlined_call_operand.vmem [shape: f32[2,9,144,18], index: 0, kind: input, shape index: {}]   ;;  %s11022_s1 = inlined_call_operand.vmem [shape: s32[2,36,256], index: 1, kind: input, shape index: {}]   ;;  %s11023_s2 = inlined_call_operand.vmem [shape: f32[2,36,256], index: 2, kind: input, shape index: {}]   ;;  %s11024_s3 = inlined_call_operand.vmem [shape: f32[144,18], index: 3, kind: input, shape index: {}]   ;;  %s11025_s4 = inlined_call_operand.vmem [shape: f32[8,144], index: 4, kind: input, shape index: {}]   ;;  %s11026_s5 = inlined_call_operand.vmem [shape: f32[2,8,256], index: 5, kind: output, shape index: {}]  }
   0x1   :  { %s7622_s20 = smov 0  }
   0x2 LB: > { %s27_s21 = sadd.s32 1, %s7581_s19  ;;  %p6534_p0 = scmp.ge.s32.totalorder %s7585_s20, 1  ;;  %s7585_s20 = sphi %s7622_s20, %s15_s20   ;;  %s7581_s19 = sphi %s7620_s19, %s11335_s19   ;;  %s7577_s18 = sphi %s7618_s18, %s11334_s18  }
   0x3   : > { %p29_p1 = scmp.ge.s32.totalorder %s27_s21, 2  ;;  %p235_p2 = scmp.lt.s32.totalorder %s7585_s20, 3 }
   0x5   : > { %s11337_s21 = smov (%p29_p1, %s27_s21), 0  ;;  %p236_p3 = pnand %p6534_p0, %p235_p2 }
   0x7   : > { %239 = sbr.rel (%p236_p3) target bundleno = 2471 (0x9a7), region = 40 }
   0xe   : > { %p285_p4 = scmp.lt.s32.totalorder %s7577_s18, 1  ;;  %v320_v0 = vlaneseq  ;;  %v11027_v1 = vmov 0.0   ;;  %vm545_vm0 = vcmask 1041408   ;;  %vm490_vm9 = vcmask 146432  }
   0xf   : > { %616 = vmatprep.mubr.f32.mxu0 %v11027_v1  ;;  %873 = vmatprep.mubr.f32.mxu1 %v11027_v1 }
  0x10   : > { %s11339_s18 = smov (!%p285_p4, %s7577_s18), 1  ;;  %v7640_v2 = vshrl.u32 %v320_v0, 7 }
  0x11   : > { %s7473_s22 = smul.u32 80, %s11339_s18  ;;  %s7055_s26 = sshll.u32 %s11339_s18, 4 }
  0x12   : > { %11113 = vst [vmem:[#allocation2_spill] sm:$0xff] %v7640_v2  ;;  %v7644_v3 = vsub.s32 2, %v7640_v2  ;;  %v7647_v4 = vsub.s32 3, %v7640_v2  ;;  %v7650_v5 = vadd.s32 8, %v7640_v2  ;;  %v7653_v6 = vadd.s32 16, %v7640_v2  ;;  %s7472_s29 = smul.u32 1296, %s11339_s18  ;;  %s318_s30 = scalar_lea.vmem %s11026_s5, %s7055_s26 }
  0x13   : > { %s7658_s25 = scalar_lea.vmem %s11022_s1, %s7473_s22  ;;  %s7663_s28 = scalar_lea.vmem %s11023_s2, %s7473_s22  ;;  %v7666_v7 = vsub.s32 0, %v7640_v2  ;;  %v7669_v8 = vsub.s32 1, %v7640_v2  ;;  %v7672_v9 = vsub.s32 4, %v7640_v2  ;;  %v7675_v10 = vsub.s32 5, %v7640_v2 }
  0x14   : > { %11114 = vst [vmem:[#allocation3_spill] sm:$0xff] %v7644_v3  ;;  %11115 = vst [vmem:[#allocation4_spill] sm:$0xff] %v7647_v4  ;;  %v345_v11 = vld [vmem:[%s7658_s25 + $0x8] sm:$0xf]  ;;  %v344_v13 = vld [vmem:[%s7658_s25] sm:$0xf]  ;;  %s7706_s7 = scalar_lea.vmem %s11021_s0, %s7472_s29 }
  0x15   : > { %11116 = vst [vmem:[#allocation5_spill] sm:$0xff] %v7650_v5  ;;  %11117 = vst [vmem:[#allocation6_spill] sm:$0xff] %v7653_v6  ;;  %v347_v12 = vld [vmem:[%s7663_s28 + $0x8] sm:$0xf]  ;;  %v417_v14 = vrot.slane %v345_v11, %v7644_v3  ;;  %v445_v16 = vrot.slane %v345_v11, %v7647_v4  ;;  %v346_v18 = vld [vmem:[%s7663_s28] sm:$0xf]  ;;  %v413_v19 = vrot.slane %v344_v13, %v7644_v3 }
  0x16   : > { %11118 = vst [vmem:[#allocation7_spill] sm:$0xff] %v7666_v7  ;;  %11119 = vst [vmem:[#allocation8_spill] sm:$0xff] %v7669_v8  ;;  %v431_v15 = vrot.slane %v347_v12, %v7644_v3  ;;  %v459_v17 = vrot.slane %v347_v12, %v7647_v4  ;;  %v427_v20 = vrot.slane %v346_v18, %v7644_v3  ;;  %v472_v53 = vld [vmem:[%s7706_s7] sm:$0xff]  ;;  %v7727_v60 = vld [vmem:[%s7658_s25 + $0x8] sm:$0xf0] }
  0x17   : > { %11120 = vst [vmem:[#allocation9_spill] sm:$0xff] %v7672_v9  ;;  %11121 = vst [vmem:[#allocation10_spill] sm:$0xff] %v7675_v10  ;;  %v441_v21 = vrot.slane %v344_v13, %v7647_v4  ;;  %v455_v22 = vrot.slane %v346_v18, %v7647_v4  ;;  %vm419_vm1 = vcmp.eq.s32.totalorder %v417_v14, %v7640_v2  ;;  %v473_v0 = vld [vmem:[%s7706_s7 + $0x8] sm:$0xff] }
  0x18   : > { %vm421_vm2 = vcmp.eq.s32.totalorder %v417_v14, %v7650_v5  ;;  %vm447_vm3 = vcmp.eq.s32.totalorder %v445_v16, %v7640_v2  ;;  %vm449_vm4 = vcmp.eq.s32.totalorder %v445_v16, %v7650_v5  ;;  %v433_v23 = vsel %vm419_vm1, %v431_v15, 0.0 }
  0x19   : > { %v435_v24 = vsel %vm421_vm2, %v431_v15, 0.0  ;;  %v461_v25 = vsel %vm447_vm3, %v459_v17, 0.0  ;;  %v463_v26 = vsel %vm449_vm4, %v459_v17, 0.0  ;;  %vm418_vm5 = vcmp.eq.s32.totalorder %v413_v19, %v7640_v2 }
  0x1a   : > { %v467_v27 = vadd.f32 %v461_v25, %v433_v23  ;;  %v469_v28 = vadd.f32 %v463_v26, %v435_v24  ;;  %vm420_vm6 = vcmp.eq.s32.totalorder %v413_v19, %v7650_v5  ;;  %v432_v29 = vsel %vm418_vm5, %v427_v20, 0.0  ;;  %v474_v25 = vld [vmem:[%s7706_s7 + $0x10] sm:$0xff] }
  0x1b   : > { %v434_v30 = vsel %vm420_vm6, %v427_v20, 0.0  ;;  %vm446_vm7 = vcmp.eq.s32.totalorder %v441_v21, %v7640_v2  ;;  %vm448_vm8 = vcmp.eq.s32.totalorder %v441_v21, %v7650_v5  ;;  %vm423_vm10 = vcmp.eq.s32.totalorder %v417_v14, %v7653_v6  ;;  %v7735_v14 = vld [vmem:[%s7663_s28 + $0x8] sm:$0xf0] }
  0x1c   : > { %v7056_v31 = vpack.c.bf16 %v469_v28, %v467_v27  ;;  %v460_v32 = vsel %vm446_vm7, %v455_v22, 0.0  ;;  %v462_v33 = vsel %vm448_vm8, %v455_v22, 0.0  ;;  %v437_v36 = vsel %vm423_vm10, %v431_v15, 0.0 }
  0x1d   : > { %v466_v34 = vadd.f32 %v460_v32, %v432_v29  ;;  %v468_v35 = vadd.f32 %v462_v33, %v434_v30  ;;  %vm451_vm11 = vcmp.eq.s32.totalorder %v445_v16, %v7653_v6  ;;  %vm422_vm12 = vcmp.eq.s32.totalorder %v413_v19, %v7653_v6 }
  0x1e   : > { %7057 = vmatprep.subr.bf16.mxu0 %v7056_v31  ;;  %v465_v37 = vsel %vm451_vm11, %v459_v17, 0.0  ;;  %vm450_vm13 = vcmp.eq.s32.totalorder %v441_v21, %v7653_v6  ;;  %v355_v38 = vrot.slane %v345_v11, %v7666_v7  ;;  %v436_v41 = vsel %vm422_vm12, %v427_v20, 0.0  ;;  %v7742_v17 = vld [vmem:[%s7658_s25] sm:$0xf0] }
  0x1f   : > { %v7058_v39 = vpack.c.bf16 %v468_v35, %v466_v34  ;;  %v471_v40 = vadd.f32 %v465_v37, %v437_v36  ;;  %v464_v42 = vsel %vm450_vm13, %v455_v22, 0.0  ;;  %v369_v44 = vrot.slane %v347_v12, %v7666_v7  ;;  %v7745_v22 = vld [vmem:[%s7663_s28] sm:$0xf0] }
  0x20   : > { %v470_v43 = vadd.f32 %v464_v42, %v436_v41  ;;  %vm357_vm14 = vcmp.eq.s32.totalorder %v355_v38, %v7640_v2  ;;  %vm359_vm15 = vcmp.eq.s32.totalorder %v355_v38, %v7650_v5  ;;  %v383_v45 = vrot.slane %v345_v11, %v7669_v8  ;;  %v7777_v34 = vld [vmem:[%s11024_s3 + $0x20] sm:$0xff] }
  0x21   : > { %7059 = vmatpush1.bf16.msra.mxu0 %v7058_v39  ;;  %v397_v46 = vrot.slane %v347_v12, %v7669_v8  ;;  %v351_v47 = vrot.slane %v344_v13, %v7666_v7  ;;  %v365_v48 = vrot.slane %v346_v18, %v7666_v7  ;;  %v371_v49 = vsel %vm357_vm14, %v369_v44, 0.0  ;;  %v475_v39 = vld [vmem:[%s7706_s7 + $0x18] sm:$0xff] }
  0x22   : > { %6540 = vmatprep.subr.msk.mxu0 %vm545_vm0, %v471_v40  ;;  %v373_v50 = vsel %vm359_vm15, %v369_v44, 0.0  ;;  %v379_v51 = vrot.slane %v344_v13, %v7669_v8  ;;  %v393_v52 = vrot.slane %v346_v18, %v7669_v8  ;;  %vm385_vm1 = vcmp.eq.s32.totalorder %v383_v45, %v7640_v2 }
  0x23   : > { %vm387_vm2 = vcmp.eq.s32.totalorder %v383_v45, %v7650_v5  ;;  %vm356_vm3 = vcmp.eq.s32.totalorder %v351_v47, %v7640_v2  ;;  %vm358_vm4 = vcmp.eq.s32.totalorder %v351_v47, %v7650_v5  ;;  %v399_v54 = vsel %vm385_vm1, %v397_v46, 0.0 }
  0x24   : > { %v401_v55 = vsel %vm387_vm2, %v397_v46, 0.0  ;;  %v370_v56 = vsel %vm356_vm3, %v365_v48, 0.0  ;;  %v372_v57 = vsel %vm358_vm4, %v365_v48, 0.0  ;;  %v405_v58 = vadd.f32 %v399_v54, %v371_v49 }
  0x25   : > { %6541 = vmatpush1.msk.msra.mxu0 %vm545_vm0, %v470_v43  ;;  %v407_v59 = vadd.f32 %v401_v55, %v373_v50  ;;  %vm384_vm5 = vcmp.eq.s32.totalorder %v379_v51, %v7640_v2  ;;  %vm386_vm6 = vcmp.eq.s32.totalorder %v379_v51, %v7650_v5  ;;  %vm361_vm7 = vcmp.eq.s32.totalorder %v355_v38, %v7653_v6 }
  0x26   : > { %6542 = vmatmul.mubr.msk.f32.vlgmr.msra.gmra.mrb[0].mxu0 %vm490_vm9, %v472_v53  ;;  %v398_v61 = vsel %vm384_vm5, %v393_v52, 0.0  ;;  %v400_v62 = vsel %vm386_vm6, %v393_v52, 0.0  ;;  %vm389_vm8 = vcmp.eq.s32.totalorder %v383_v45, %v7653_v6  ;;  %v375_v13 = vsel %vm361_vm7, %v369_v44, 0.0 }
  0x27   : > { %622 = vmatprep.mubr.f32.mxu0 %v11027_v1  ;;  %v7060_v63 = vpack.c.bf16 %v407_v59, %v405_v58  ;;  %v404_v11 = vadd.f32 %v398_v61, %v370_v56  ;;  %v406_v12 = vadd.f32 %v400_v62, %v372_v57  ;;  %v403_v15 = vsel %vm389_vm8, %v397_v46, 0.0 }
  0x28   : > { %vm360_vm10 = vcmp.eq.s32.totalorder %v351_v47, %v7653_v6  ;;  %vm388_vm11 = vcmp.eq.s32.totalorder %v379_v51, %v7653_v6  ;;  %v1005_v16 = vrot.slane %v7727_v60, %v7672_v9  ;;  %v409_v19 = vadd.f32 %v403_v15, %v375_v13  ;;  %v7800_v47 = vld [vmem:[%s11024_s3 + $0x28] sm:$0xff] }
  0x29   : > { %7061 = vmatprep.subr.bf16.mxu0 %v7060_v63  ;;  %v7062_v18 = vpack.c.bf16 %v406_v12, %v404_v11  ;;  %7452 = vmatprep.subr.bf16.mxu1 %v7060_v63  ;;  %v374_v20 = vsel %vm360_vm10, %v365_v48, 0.0  ;;  %v402_v21 = vsel %vm388_vm11, %v393_v52, 0.0  ;;  %v1019_v24 = vrot.slane %v7735_v14, %v7672_v9  ;;  %v476_v52 = vld [vmem:[%s7706_s7 + $0x20] sm:$0xff]  ;;  %v7832_v63 = vld [vmem:[%s11024_s3 + $0x30] sm:$0xff] }
  0x2a   : > { %6543 = vmatmul.mubr.msk.f32.gmra.mrb[2].mxu0 %vm490_vm9, %v473_v0  ;;  %v408_v23 = vadd.f32 %v402_v21, %v374_v20  ;;  %vm1007_vm12 = vcmp.eq.s32.totalorder %v1005_v16, %v7640_v2  ;;  %vm1009_vm13 = vcmp.eq.s32.totalorder %v1005_v16, %v7650_v5  ;;  %v1033_v26 = vrot.slane %v7727_v60, %v7675_v10  ;;  %v7868_v20 = vld [vmem:[%s11024_s3 + $0x40] sm:$0xff]  ;;  %v479_v21 = vld [vmem:[%s7706_s7 + $0x38] sm:$0xff] }
  0x2b   : > { %7063 = vmatpush1.bf16.msra.mxu0 %v7062_v18  ;;  %628 = vmatprep.mubr.f32.mxu0 %v11027_v1  ;;  %v1047_v27 = vrot.slane %v7735_v14, %v7675_v10  ;;  %v1001_v28 = vrot.slane %v7742_v17, %v7672_v9  ;;  %v7761_v29 = vsub.s32 6, %v7640_v2  ;;  %v1021_v30 = vsel %vm1007_vm12, %v1019_v24, 0.0 }
  0x2c   : > { %7454 = vmatpush1.bf16.msra.mxu1 %v7062_v18  ;;  %v1023_v31 = vsel %vm1009_vm13, %v1019_v24, 0.0  ;;  %v1015_v32 = vrot.slane %v7745_v22, %v7672_v9  ;;  %v1029_v33 = vrot.slane %v7742_v17, %v7675_v10  ;;  %6560 = vmatprep.subr.msk.mxu0 %vm545_vm0, %v409_v19  ;;  %vm1035_vm14 = vcmp.eq.s32.totalorder %v1033_v26, %v7640_v2  ;;  %v478_v18 = vld [vmem:[%s7706_s7 + $0x30] sm:$0xff] }
  0x2d   : > { %11122 = vst [vmem:[#allocation11_spill] sm:$0xff] %v7761_v29  ;;  %7453 = vmatprep.subr.msk.mxu1 %vm545_vm0, %v409_v19  ;;  %vm1037_vm15 = vcmp.eq.s32.totalorder %v1033_v26, %v7650_v5  ;;  %vm1006_vm1 = vcmp.eq.s32.totalorder %v1001_v28, %v7640_v2  ;;  %vm1008_vm2 = vcmp.eq.s32.totalorder %v1001_v28, %v7650_v5  ;;  %v1049_v35 = vsel %vm1035_vm14, %v1047_v27, 0.0 }
  0x2e   : > { %6544 = vmatmul.mubr.msk.f32.gmra.mrb[4].mxu0 %vm490_vm9, %v474_v25  ;;  %v1051_v36 = vsel %vm1037_vm15, %v1047_v27, 0.0  ;;  %v1020_v37 = vsel %vm1006_vm1, %v1015_v32, 0.0  ;;  %v7780_v38 = vsub.s32 7, %v7640_v2  ;;  %v1055_v40 = vadd.f32 %v1049_v35, %v1021_v30  ;;  %v7890_v25 = vld [vmem:[%s11024_s3 + $0x50] sm:$0xff]  ;;  %v7912_v30 = vld [vmem:[%s11024_s3 + $0x60] sm:$0xff] }
  0x2f   : > { %634 = vmatprep.mubr.f32.mxu0 %v11027_v1  ;;  %v1057_v41 = vadd.f32 %v1051_v36, %v1023_v31  ;;  %vm1034_vm3 = vcmp.eq.s32.totalorder %v1029_v33, %v7640_v2  ;;  %vm1036_vm4 = vcmp.eq.s32.totalorder %v1029_v33, %v7650_v5  ;;  %v1022_v42 = vsel %vm1008_vm2, %v1015_v32, 0.0  ;;  %6561 = vmatpush1.msk.msra.mxu0 %vm545_vm0, %v408_v23  ;;  %v483_v31 = vld [vmem:[%s7706_s7 + $0x58] sm:$0xff]  ;;  %v7934_v35 = vld [vmem:[%s11024_s3 + $0x70] sm:$0xff]  ;;  %v485_v36 = vld [vmem:[%s7706_s7 + $0x68] sm:$0xff] }
  0x30   : > { %11123 = vst [vmem:[#allocation12_spill] sm:$0xff] %v7780_v38  ;;  %7455 = vmatpush1.msk.msra.mxu1 %vm545_vm0, %v408_v23  ;;  %v1043_v43 = vrot.slane %v7745_v22, %v7675_v10  ;;  %vm1011_vm5 = vcmp.eq.s32.totalorder %v1005_v16, %v7653_v6  ;;  %vm1039_vm6 = vcmp.eq.s32.totalorder %v1033_v26, %v7653_v6  ;;  %v7856_v16 = vld [vmem:[%s11024_s3 + $0x38] sm:$0xff]  ;;  %v7879_v23 = vld [vmem:[%s11024_s3 + $0x48] sm:$0xff] }
  0x31   : > { %6566 = vmatmul.mubr.msk.f32.vlgmr.msra.gmra.mrb[0].mxu1 %vm490_vm9, %v7777_v34  ;;  %v7068_v44 = vpack.c.bf16 %v1057_v41, %v1055_v40  ;;  %v1025_v45 = vsel %vm1011_vm5, %v1019_v24, 0.0  ;;  %v1053_v46 = vsel %vm1039_vm6, %v1047_v27, 0.0  ;;  %vm1010_vm7 = vcmp.eq.s32.totalorder %v1001_v28, %v7653_v6  ;;  %v480_v24 = vld [vmem:[%s7706_s7 + $0x40] sm:$0xff]  ;;  %v481_v26 = vld [vmem:[%s7706_s7 + $0x48] sm:$0xff]  ;;  %v7901_v27 = vld [vmem:[%s11024_s3 + $0x58] sm:$0xff] }
  0x32   : > { %6545 = vmatmul.mubr.msk.f32.gmra.mrb[6].mxu0 %vm490_vm9, %v475_v39  ;;  %879 = vmatprep.mubr.f32.mxu1 %v11027_v1  ;;  %v1048_v48 = vsel %vm1034_vm3, %v1043_v43, 0.0  ;;  %v1050_v49 = vsel %vm1036_vm4, %v1043_v43, 0.0  ;;  %v1059_v50 = vadd.f32 %v1053_v46, %v1025_v45  ;;  %v1024_v51 = vsel %vm1010_vm7, %v1015_v32, 0.0  ;;  %v482_v28 = vld [vmem:[%s7706_s7 + $0x50] sm:$0xff]  ;;  %v7923_v32 = vld [vmem:[%s11024_s3 + $0x68] sm:$0xff] }
  0x33   : > { %640 = vmatprep.mubr.f32.mxu0 %v11027_v1  ;;  %7069 = vmatprep.subr.bf16.mxu1 %v7068_v44  ;;  %v1054_v53 = vadd.f32 %v1048_v48, %v1020_v37  ;;  %v1056_v54 = vadd.f32 %v1050_v49, %v1022_v42  ;;  %vm1038_vm8 = vcmp.eq.s32.totalorder %v1029_v33, %v7653_v6  ;;  %v484_v33 = vld [vmem:[%s7706_s7 + $0x60] sm:$0xff]  ;;  %v7945_v37 = vld [vmem:[%s11024_s3 + $0x78] sm:$0xff]  ;;  %v486_v39 = vld [vmem:[%s7706_s7 + $0x70] sm:$0xff] }
  0x34   : > { %v1052_v55 = vsel %vm1038_vm8, %v1043_v43, 0.0  ;;  %v7811_v56 = vrot.slane %v7727_v60, %v7761_v29  ;;  %v7815_v57 = vrot.slane %v7735_v14, %v7761_v29  ;;  %v7819_v58 = vrot.slane %v7727_v60, %v7780_v38  ;;  %v477_v60 = vld [vmem:[%s7706_s7 + $0x28] sm:$0xff]  ;;  %v7960_v42 = vld [vmem:[%s11024_s3 + $0x80] sm:$0xff]  ;;  %v487_v43 = vld [vmem:[%s7706_s7 + $0x78] sm:$0xff] }
  0x35   : > { %6567 = vmatmul.mubr.msk.f32.gmra.mrb[2].mxu1 %vm490_vm9, %v7800_v47  ;;  %v7070_v59 = vpack.c.bf16 %v1056_v54, %v1054_v53  ;;  %v1058_v61 = vadd.f32 %v1052_v55, %v1024_v51  ;;  %v7825_v62 = vrot.slane %v7735_v14, %v7780_v38  ;;  %v1063_v40 = vrot.slane %v7742_v17, %v7761_v29  ;;  %v489_v51 = vld [vmem:[%s7706_s7 + $0x88] sm:$0xff]  ;;  %v324_v54 = vld [vmem:[%s11024_s3] sm:$0xff] }
  0x36   : > { %6546 = vmatmul.mubr.msk.f32.gmra.mrb[8].mxu0 %vm490_vm9, %v476_v52  ;;  %885 = vmatprep.mubr.f32.mxu1 %v11027_v1  ;;  %vm1069_vm10 = vcmp.eq.s32.totalorder %v7811_v56, %v7640_v2  ;;  %vm1071_vm11 = vcmp.eq.s32.totalorder %v7811_v56, %v7650_v5  ;;  %vm1097_vm12 = vcmp.eq.s32.totalorder %v7819_v58, %v7640_v2 }
  0x37   : > { %646 = vmatprep.mubr.f32.mxu0 %v11027_v1  ;;  %7071 = vmatpush1.bf16.msra.mxu1 %v7070_v59  ;;  %v1083_v0 = vsel %vm1069_vm10, %v7815_v57, 0.0  ;;  %v1085_v11 = vsel %vm1071_vm11, %v7815_v57, 0.0  ;;  %vm1099_vm13 = vcmp.eq.s32.totalorder %v7819_v58, %v7650_v5  ;;  %v1111_v12 = vsel %vm1097_vm12, %v7825_v62, 0.0 }
  0x38   : > { %6618 = vmatprep.subr.msk.mxu1 %vm545_vm0, %v1059_v50  ;;  %v1113_v13 = vsel %vm1099_vm13, %v7825_v62, 0.0  ;;  %v1117_v14 = vadd.f32 %v1111_v12, %v1083_v0  ;;  %v1091_v41 = vrot.slane %v7742_v17, %v7780_v38  ;;  %v1077_v44 = vrot.slane %v7745_v22, %v7761_v29  ;;  %v7979_v17 = vld [vmem:[%s11024_s3 + $0x88] sm:$0xff]  ;;  %v326_v0 = vld [vmem:[%s11024_s3 + $0x10] sm:$0xff] }
  0x39   : > { %6568 = vmatmul.mubr.msk.f32.gmra.mrb[4].mxu1 %vm490_vm9, %v7832_v63  ;;  %v1119_v15 = vadd.f32 %v1113_v13, %v1085_v11  ;;  %v1105_v45 = vrot.slane %v7745_v22, %v7780_v38  ;;  %vm1068_vm14 = vcmp.eq.s32.totalorder %v1063_v40, %v7640_v2  ;;  %vm1070_vm15 = vcmp.eq.s32.totalorder %v1063_v40, %v7650_v5  ;;  %v488_v22 = vld [vmem:[%s7706_s7 + $0x80] sm:$0xff]  ;;  %v327_v11 = vld [vmem:[%s11024_s3 + $0x18] sm:$0xff]  ;;  %v6580_v12 = vld [vmem:[%s7706_s7 + $0x90] sm:$0xff] }
  0x3a   : > { %6547 = vmatmul.mubr.msk.f32.gmra.mrb[10].mxu0 %vm490_vm9, %v477_v60  ;;  %891 = vmatprep.mubr.f32.mxu1 %v11027_v1  ;;  %vm1096_vm1 = vcmp.eq.s32.totalorder %v1091_v41, %v7640_v2  ;;  %vm1098_vm2 = vcmp.eq.s32.totalorder %v1091_v41, %v7650_v5  ;;  %v1082_v46 = vsel %vm1068_vm14, %v1077_v44, 0.0  ;;  %v1084_v48 = vsel %vm1070_vm15, %v1077_v44, 0.0  ;;  %v6581_v13 = vld [vmem:[%s7706_s7 + $0x98] sm:$0xff] }
  0x3b   : > { %652 = vmatprep.mubr.f32.mxu0 %v11027_v1  ;;  %6619 = vmatpush1.msk.msra.mxu1 %vm545_vm0, %v1058_v61  ;;  %v7064_v19 = vpack.c.bf16 %v1119_v15, %v1117_v14  ;;  %v1110_v49 = vsel %vm1096_vm1, %v1105_v45, 0.0  ;;  %v1112_v50 = vsel %vm1098_vm2, %v1105_v45, 0.0  ;;  %vm1073_vm3 = vcmp.eq.s32.totalorder %v7811_v56, %v7653_v6  ;;  %v6585_v14 = vld [vmem:[%s7706_s7 + $0xb8] sm:$0xff]  ;;  %v6586_v15 = vld [vmem:[%s7706_s7 + $0xc0] sm:$0xff] }
  0x3c   : > { %vm1101_vm4 = vcmp.eq.s32.totalorder %v7819_v58, %v7653_v6  ;;  %v1116_v52 = vadd.f32 %v1110_v49, %v1082_v46  ;;  %v1118_v53 = vadd.f32 %v1112_v50, %v1084_v48  ;;  %v1087_v55 = vsel %vm1073_vm3, %v7815_v57, 0.0  ;;  %v325_v58 = vld [vmem:[%s11024_s3 + $0x8] sm:$0xff] }
  0x3d   : > { %6569 = vmatmul.mubr.msk.f32.gmra.mrb[6].mxu1 %vm490_vm9, %v7856_v16  ;;  %7065 = vmatprep.subr.bf16.mxu0 %v7064_v19  ;;  %v1115_v59 = vsel %vm1101_vm4, %v7825_v62, 0.0  ;;  %vm1072_vm5 = vcmp.eq.s32.totalorder %v1063_v40, %v7653_v6  ;;  %vm1100_vm6 = vcmp.eq.s32.totalorder %v1091_v41, %v7653_v6  ;;  %v6589_v19 = vld [vmem:[%s7706_s7 + $0xd8] sm:$0xff]  ;;  %vm1589_vm1 = vcmask 130048  }
  0x3e   : > { %6548 = vmatmul.mubr.msk.f32.gmra.mrb[12].mxu0 %vm490_vm9, %v478_v18  ;;  %897 = vmatprep.mubr.f32.mxu1 %v11027_v1  ;;  %v7066_v56 = vpack.c.bf16 %v1118_v53, %v1116_v52  ;;  %v1121_v57 = vadd.f32 %v1115_v59, %v1087_v55  ;;  %v1086_v61 = vsel %vm1072_vm5, %v1077_v44, 0.0  ;;  %v1114_v62 = vsel %vm1100_vm6, %v1105_v45, 0.0  ;;  %v6588_v18 = vld [vmem:[%s7706_s7 + $0xd0] sm:$0xff]  ;;  %v8140_v40 = vld [vmem:[%s7663_s28 + $0x18] sm:$0xf] }
  0x3f   : > { %658 = vmatprep.mubr.f32.mxu0 %v11027_v1  ;;  %v1120_v60 = vadd.f32 %v1114_v62, %v1086_v61  ;;  %v8150_v44 = vrot.slane %v8140_v40, %v7644_v3  ;;  %v8175_v59 = vld [vmem:[%s7658_s25 + $0x10] sm:$0xf] }
  0x40   : > { %v8184_v61 = vrot.slane %v8175_v59, %v7644_v3 }
  0x41   : > { %6570 = vmatmul.mubr.msk.f32.gmra.mrb[8].mxu1 %vm490_vm9, %v7868_v20 }
  0x42   : > { %6549 = vmatmul.mubr.msk.f32.gmra.mrb[14].mxu0 %vm490_vm9, %v479_v21  ;;  %903 = vmatprep.mubr.f32.mxu1 %v11027_v1  ;;  %v6591_v21 = vld [vmem:[%s7706_s7 + $0xe8] sm:$0xff]  ;;  %vm1809_vm12 = vcmp.eq.s32.totalorder %v8184_v61, %v7640_v2  ;;  %vm1811_vm13 = vcmp.eq.s32.totalorder %v8184_v61, %v7650_v5  ;;  %vm1813_vm4 = vcmp.eq.s32.totalorder %v8184_v61, %v7653_v6 }
  0x43   : > { %664 = vmatprep.mubr.f32.mxu0 %v11027_v1 }
  0x45   : > { %6571 = vmatmul.mubr.msk.f32.gmra.mrb[10].mxu1 %vm490_vm9, %v7879_v23 }
  0x46   : > { %6550 = vmatmul.mubr.msk.f32.gmra.mrb[16].mxu0 %vm490_vm9, %v480_v24  ;;  %909 = vmatprep.mubr.f32.mxu1 %v11027_v1  ;;  %v6593_v24 = vld [vmem:[%s7706_s7 + $0xf8] sm:$0xff] }
  0x47   : > { %670 = vmatprep.mubr.f32.mxu0 %v11027_v1 }
  0x49   : > { %6572 = vmatmul.mubr.msk.f32.gmra.mrb[12].mxu1 %vm490_vm9, %v7890_v25 }
  0x4a   : > { %6551 = vmatmul.mubr.msk.f32.gmra.mrb[18].mxu0 %vm490_vm9, %v481_v26  ;;  %915 = vmatprep.mubr.f32.mxu1 %v11027_v1  ;;  %v6595_v26 = vld [vmem:[%s7706_s7 + $0x108] sm:$0xff] }
  0x4b   : > { %676 = vmatprep.mubr.f32.mxu0 %v11027_v1 }
  0x4d   : > { %6573 = vmatmul.mubr.msk.f32.gmra.mrb[14].mxu1 %vm490_vm9, %v7901_v27 }
  0x4e   : > { %6552 = vmatmul.mubr.msk.f32.gmra.mrb[20].mxu0 %vm490_vm9, %v482_v28  ;;  %921 = vmatprep.mubr.f32.mxu1 %v11027_v1  ;;  %v6597_v28 = vld [vmem:[%s7706_s7 + $0x118] sm:$0xff] }
  0x4f   : > { %682 = vmatprep.mubr.f32.mxu0 %v11027_v1 }
  0x51   : > { %6574 = vmatmul.mubr.msk.f32.gmra.mrb[16].mxu1 %vm490_vm9, %v7912_v30 }
  0x52   : > { %6553 = vmatmul.mubr.msk.f32.gmra.mrb[22].mxu0 %vm490_vm9, %v483_v31  ;;  %927 = vmatprep.mubr.f32.mxu1 %v11027_v1 }
  0x53   : > { %688 = vmatprep.mubr.f32.mxu0 %v11027_v1 }
  0x55   : > { %6575 = vmatmul.mubr.msk.f32.gmra.mrb[18].mxu1 %vm490_vm9, %v7923_v32 }
  0x56   : > { %6554 = vmatmul.mubr.msk.f32.gmra.mrb[24].mxu0 %vm490_vm9, %v484_v33  ;;  %933 = vmatprep.mubr.f32.mxu1 %v11027_v1 }
  0x57   : > { %694 = vmatprep.mubr.f32.mxu0 %v11027_v1 }
  0x59   : > { %6576 = vmatmul.mubr.msk.f32.gmra.mrb[20].mxu1 %vm490_vm9, %v7934_v35 }
  0x5a   : > { %6555 = vmatmul.mubr.msk.f32.gmra.mrb[26].mxu0 %vm490_vm9, %v485_v36  ;;  %939 = vmatprep.mubr.f32.mxu1 %v11027_v1 }
  0x5b   : > { %700 = vmatprep.mubr.f32.mxu0 %v11027_v1 }
  0x5d   : > { %6577 = vmatmul.mubr.msk.f32.gmra.mrb[22].mxu1 %vm490_vm9, %v7945_v37 }
  0x5e   : > { %6556 = vmatmul.mubr.msk.f32.gmra.mrb[28].mxu0 %vm490_vm9, %v486_v39  ;;  %945 = vmatprep.mubr.f32.mxu1 %v11027_v1  ;;  %v8137_v39 = vld [vmem:[%s7658_s25 + $0x18] sm:$0xf] }
  0x5f   : > { %706 = vmatprep.mubr.f32.mxu0 %v11027_v1  ;;  %v8154_v45 = vrot.slane %v8137_v39, %v7647_v4 }
  0x61   : > { %6578 = vmatmul.mubr.msk.f32.gmra.mrb[24].mxu1 %vm490_vm9, %v7960_v42  ;;  %vm1838_vm10 = vcmp.eq.s32.totalorder %v8154_v45, %v7640_v2  ;;  %vm1840_vm11 = vcmp.eq.s32.totalorder %v8154_v45, %v7650_v5  ;;  %vm1842_vm3 = vcmp.eq.s32.totalorder %v8154_v45, %v7653_v6 }
  0x62   : > { %6557 = vmatmul.mubr.msk.f32.gmra.mrb[30].mxu0 %vm490_vm9, %v487_v43  ;;  %951 = vmatprep.mubr.f32.mxu1 %v11027_v1  ;;  %v8146_v43 = vrot.slane %v8137_v39, %v7644_v3 }
  0x63   : > { %712 = vmatprep.mubr.f32.mxu0 %v11027_v1 }
  0x64   : > { %vm1810_vm7 = vcmp.eq.s32.totalorder %v8146_v43, %v7640_v2  ;;  %vm1812_vm8 = vcmp.eq.s32.totalorder %v8146_v43, %v7650_v5  ;;  %vm1814_vm2 = vcmp.eq.s32.totalorder %v8146_v43, %v7653_v6 }
  0x65   : > { %6579 = vmatmul.mubr.msk.f32.gmra.mrb[26].mxu1 %vm490_vm9, %v7979_v17  ;;  %v1824_v48 = vsel %vm1810_vm7, %v8150_v44, 0.0  ;;  %v1826_v49 = vsel %vm1812_vm8, %v8150_v44, 0.0 }
  0x66   : > { %6558 = vmatmul.mubr.msk.f32.gmra.mrb[32].mxu0 %vm490_vm9, %v488_v22  ;;  %1444 = vmatprep.mubr.f32.mxu1 %v11027_v1 }
  0x67   : > { %718 = vmatprep.mubr.f32.mxu0 %v11027_v1 }
  0x69   : > { %6620 = vmatmul.mubr.msk.f32.vlgmr.msra.gmra.mrb[28].mxu1 %vm490_vm9, %v324_v54 }
  0x6a   : > { %6559 = vmatmul.mubr.msk.f32.gmra.mrb[34].mxu0 %vm490_vm9, %v489_v51  ;;  %1450 = vmatprep.mubr.f32.mxu1 %v11027_v1 }
  0x6b   : > { %849 = vmatprep.mubr.f32.mxu0 %v11027_v1 }
  0x6d   : > { %6621 = vmatmul.mubr.msk.f32.gmra.mrb[30].mxu1 %vm490_vm9, %v325_v58 }
  0x6e   : > { %6562 = vmatmul.mubr.msk.f32.vlgmr.msra.gmra.mrb[36].mxu0 %vm490_vm9, %v324_v54  ;;  %1456 = vmatprep.mubr.f32.mxu1 %v11027_v1 }
  0x6f   : > { %855 = vmatprep.mubr.f32.mxu0 %v11027_v1  ;;  %7067 = vmatpush1.bf16.msra.mxu0 %v7066_v56  ;;  %v8178_v56 = vld [vmem:[%s7663_s28 + $0x10] sm:$0xf] }
  0x70   : > { %6598 = vmatprep.subr.msk.mxu0 %vm545_vm0, %v1121_v57  ;;  %v8188_v62 = vrot.slane %v8178_v56, %v7644_v3 }
  0x71   : > { %6622 = vmatmul.mubr.msk.f32.gmra.mrb[32].mxu1 %vm490_vm9, %v326_v0 }
  0x72   : > { %6563 = vmatmul.mubr.msk.f32.gmra.mrb[38].mxu0 %vm490_vm9, %v325_v58  ;;  %1462 = vmatprep.mubr.f32.mxu1 %v11027_v1  ;;  %v1827_v43 = vsel %vm1813_vm4, %v8188_v62, 0.0 }
  0x73   : > { %861 = vmatprep.mubr.f32.mxu0 %v11027_v1  ;;  %6599 = vmatpush1.msk.msra.mxu0 %vm545_vm0, %v1120_v60  ;;  %v8192_v60 = vrot.slane %v8175_v59, %v7647_v4 }
  0x75   : > { %6623 = vmatmul.mubr.msk.f32.gmra.mrb[34].mxu1 %vm490_vm9, %v327_v11  ;;  %vm1837_vm14 = vcmp.eq.s32.totalorder %v8192_v60, %v7640_v2  ;;  %vm1839_vm15 = vcmp.eq.s32.totalorder %v8192_v60, %v7650_v5  ;;  %vm1841_vm5 = vcmp.eq.s32.totalorder %v8192_v60, %v7653_v6 }
  0x76   : > { %6564 = vmatmul.mubr.msk.f32.gmra.mrb[40].mxu0 %vm490_vm9, %v326_v0  ;;  %1468 = vmatprep.mubr.f32.mxu1 %v11027_v1 }
  0x77   : > { %867 = vmatprep.mubr.f32.mxu0 %v11027_v1 }
  0x79   : > { %6624 = vmatmul.mubr.msk.f32.gmra.mrb[36].mxu1 %vm490_vm9, %v7777_v34  ;;  %v6582_v34 = vld [vmem:[%s7706_s7 + $0xa0] sm:$0xff] }
  0x7a   : > { %6565 = vmatmul.mubr.msk.f32.gmra.mrb[42].mxu0 %vm490_vm9, %v327_v11  ;;  %1474 = vmatprep.mubr.f32.mxu1 %v11027_v1 }
  0x7b   : > { %1265 = vmatprep.mubr.f32.mxu0 %v11027_v1 }
  0x7d   : > { %6625 = vmatmul.mubr.msk.f32.gmra.mrb[38].mxu1 %vm490_vm9, %v7800_v47  ;;  %v6583_v47 = vld [vmem:[%s7706_s7 + $0xa8] sm:$0xff] }
  0x7e   : > { %6600 = vmatmul.mubr.msk.f32.vlgmr.msra.gmra.mrb[44].mxu0 %vm490_vm9, %v6580_v12  ;;  %1480 = vmatprep.mubr.f32.mxu1 %v11027_v1  ;;  %v8198_v12 = vrot.slane %v8178_v56, %v7647_v4 }
  0x7f   : > { %1271 = vmatprep.mubr.f32.mxu0 %v11027_v1 }
  0x80   : > { %v1855_v45 = vsel %vm1841_vm5, %v8198_v12, 0.0 }
  0x81   : > { %6626 = vmatmul.mubr.msk.f32.gmra.mrb[40].mxu1 %vm490_vm9, %v7832_v63  ;;  %v6584_v63 = vld [vmem:[%s7706_s7 + $0xb0] sm:$0xff] }
  0x82   : > { %6601 = vmatmul.mubr.msk.f32.gmra.mrb[46].mxu0 %vm490_vm9, %v6581_v13  ;;  %1486 = vmatprep.mubr.f32.mxu1 %v11027_v1 }
  0x83   : > { %1277 = vmatprep.mubr.f32.mxu0 %v11027_v1 }
  0x85   : > { %6627 = vmatmul.mubr.msk.f32.gmra.mrb[42].mxu1 %vm490_vm9, %v7856_v16  ;;  %v6587_v16 = vld [vmem:[%s7706_s7 + $0xc8] sm:$0xff] }
  0x86   : > { %6602 = vmatmul.mubr.msk.f32.gmra.mrb[48].mxu0 %vm490_vm9, %v6582_v34  ;;  %1492 = vmatprep.mubr.f32.mxu1 %v11027_v1 }
  0x87   : > { %1283 = vmatprep.mubr.f32.mxu0 %v11027_v1 }
  0x89   : > { %6628 = vmatmul.mubr.msk.f32.gmra.mrb[44].mxu1 %vm490_vm9, %v7868_v20  ;;  %v6590_v20 = vld [vmem:[%s7706_s7 + $0xe0] sm:$0xff] }
  0x8a   : > { %6603 = vmatmul.mubr.msk.f32.gmra.mrb[50].mxu0 %vm490_vm9, %v6583_v47  ;;  %1498 = vmatprep.mubr.f32.mxu1 %v11027_v1 }
  0x8b   : > { %1289 = vmatprep.mubr.f32.mxu0 %v11027_v1 }
  0x8d   : > { %6629 = vmatmul.mubr.msk.f32.gmra.mrb[46].mxu1 %vm490_vm9, %v7879_v23  ;;  %v6592_v23 = vld [vmem:[%s7706_s7 + $0xf0] sm:$0xff] }
  0x8e   : > { %6604 = vmatmul.mubr.msk.f32.gmra.mrb[52].mxu0 %vm490_vm9, %v6584_v63  ;;  %1504 = vmatprep.mubr.f32.mxu1 %v11027_v1  ;;  %v1823_v63 = vsel %vm1809_vm12, %v8188_v62, 0.0 }
  0x8f   : > { %1295 = vmatprep.mubr.f32.mxu0 %v11027_v1 }
  0x91   : > { %6630 = vmatmul.mubr.msk.f32.gmra.mrb[48].mxu1 %vm490_vm9, %v7890_v25  ;;  %v6594_v25 = vld [vmem:[%s7706_s7 + $0x100] sm:$0xff] }
  0x92   : > { %6605 = vmatmul.mubr.msk.f32.gmra.mrb[54].mxu0 %vm490_vm9, %v6585_v14  ;;  %1510 = vmatprep.mubr.f32.mxu1 %v11027_v1  ;;  %v1825_v14 = vsel %vm1811_vm13, %v8188_v62, 0.0 }
  0x93   : > { %1301 = vmatprep.mubr.f32.mxu0 %v11027_v1 }
  0x95   : > { %6631 = vmatmul.mubr.msk.f32.gmra.mrb[50].mxu1 %vm490_vm9, %v7901_v27  ;;  %v6596_v27 = vld [vmem:[%s7706_s7 + $0x110] sm:$0xff] }
  0x96   : > { %6606 = vmatmul.mubr.msk.f32.gmra.mrb[56].mxu0 %vm490_vm9, %v6586_v15  ;;  %1516 = vmatprep.mubr.f32.mxu1 %v11027_v1  ;;  %v1851_v15 = vsel %vm1837_vm14, %v8198_v12, 0.0 }
  0x97   : > { %1307 = vmatprep.mubr.f32.mxu0 %v11027_v1 }
  0x99   : > { %6632 = vmatmul.mubr.msk.f32.gmra.mrb[52].mxu1 %vm490_vm9, %v7912_v30 }
  0x9a   : > { %6607 = vmatmul.mubr.msk.f32.gmra.mrb[58].mxu0 %vm490_vm9, %v6587_v16  ;;  %1522 = vmatprep.mubr.f32.mxu1 %v11027_v1  ;;  %v1853_v16 = vsel %vm1839_vm15, %v8198_v12, 0.0 }
  0x9b   : > { %1313 = vmatprep.mubr.f32.mxu0 %v11027_v1 }
  0x9d   : > { %6633 = vmatmul.mubr.msk.f32.gmra.mrb[54].mxu1 %vm490_vm9, %v7923_v32 }
  0x9e   : > { %6608 = vmatmul.mubr.msk.f32.gmra.mrb[60].mxu0 %vm490_vm9, %v6588_v18  ;;  %1528 = vmatprep.mubr.f32.mxu1 %v11027_v1 }
  0x9f   : > { %1319 = vmatprep.mubr.f32.mxu0 %v11027_v1 }
  0xa1   : > { %6634 = vmatmul.mubr.msk.f32.gmra.mrb[56].mxu1 %vm490_vm9, %v7934_v35 }
  0xa2   : > { %6609 = vmatmul.mubr.msk.f32.gmra.mrb[62].mxu0 %vm490_vm9, %v6589_v19  ;;  %1534 = vmatprep.mubr.f32.mxu1 %v11027_v1 }
  0xa3   : > { %1325 = vmatprep.mubr.f32.mxu0 %v11027_v1 }
  0xa5   : > { %6635 = vmatmul.mubr.msk.f32.gmra.mrb[58].mxu1 %vm490_vm9, %v7945_v37 }
  0xa6   : > { %6610 = vmatmul.mubr.msk.f32.gmra.mrb[64].mxu0 %vm490_vm9, %v6590_v20  ;;  %1540 = vmatprep.mubr.f32.mxu1 %v11027_v1  ;;  %v1857_v20 = vadd.f32 %v1851_v15, %v1823_v63 }
  0xa7   : > { %1331 = vmatprep.mubr.f32.mxu0 %v11027_v1 }
  0xa9   : > { %6636 = vmatmul.mubr.msk.f32.gmra.mrb[60].mxu1 %vm490_vm9, %v7960_v42 }
  0xaa   : > { %6611 = vmatmul.mubr.msk.f32.gmra.mrb[66].mxu0 %vm490_vm9, %v6591_v21  ;;  %1546 = vmatprep.mubr.f32.mxu1 %v11027_v1  ;;  %v1859_v21 = vadd.f32 %v1853_v16, %v1825_v14 }
  0xab   : > { %1337 = vmatprep.mubr.f32.mxu0 %v11027_v1 }
  0xad   : > { %6637 = vmatmul.mubr.msk.f32.gmra.mrb[62].mxu1 %vm490_vm9, %v7979_v17  ;;  %v8158_v17 = vrot.slane %v8140_v40, %v7647_v4 }
  0xae   : > { %6612 = vmatmul.mubr.msk.f32.gmra.mrb[68].mxu0 %vm490_vm9, %v6592_v23  ;;  %2006 = vmatprep.mubr.f32.mxu1 %v11027_v1 }
  0xaf   : > { %1343 = vmatprep.mubr.f32.mxu0 %v11027_v1  ;;  %v1852_v50 = vsel %vm1838_vm10, %v8158_v17, 0.0  ;;  %v1854_v51 = vsel %vm1840_vm11, %v8158_v17, 0.0 }
  0xb0   : > { %v1858_v54 = vadd.f32 %v1852_v50, %v1824_v48  ;;  %v1860_v55 = vadd.f32 %v1854_v51, %v1826_v49 }
  0xb2   : > { %6613 = vmatmul.mubr.msk.f32.gmra.mrb[70].mxu0 %vm490_vm9, %v6593_v24  ;;  %v7144_v11 = vpack.c.bf16 %v1860_v55, %v1858_v54 }
  0xb3   : > { %1349 = vmatprep.mubr.f32.mxu0 %v11027_v1 }
  0xb4   : > { %7145 = vmatprep.subr.bf16.mxu1 %v7144_v11 }
  0xb6   : > { %6614 = vmatmul.mubr.msk.f32.gmra.mrb[72].mxu0 %vm490_vm9, %v6594_v25 }
  0xb7   : > { %1355 = vmatprep.mubr.f32.mxu0 %v11027_v1 }
  0xba   : > { %6615 = vmatmul.mubr.msk.f32.gmra.mrb[74].mxu0 %vm490_vm9, %v6595_v26  ;;  %v7146_v26 = vpack.c.bf16 %v1859_v21, %v1857_v20  ;;  %v8239_v20 = vld [vmem:[%s11025_s4 + $0x8] sm:$0xff] }
  0xbb   : > { %1361 = vmatprep.mubr.f32.mxu0 %v11027_v1 }
  0xbc   : > { %7147 = vmatpush1.bf16.msra.mxu1 %v7146_v26 }
  0xbe   : > { %6616 = vmatmul.mubr.msk.f32.gmra.mrb[76].mxu0 %vm490_vm9, %v6596_v27 }
  0xbf   : > { %1367 = vmatprep.mubr.f32.mxu0 %v11027_v1 }
  0xc2   : > { %6617 = vmatmul.mubr.msk.f32.gmra.mrb[78].mxu0 %vm490_vm9, %v6597_v28 }
  0xc3   : > { %6638 = vmatprep.mubr.msk.f32.mxu0 %vm1589_vm1, %v8239_v20 }
  0xf9   : > { %v8124_v30 = vpop.f32.mrb[0].mxu0 }
  0xfa   : > { %v8126_v31 = vpop.f32.mrb[1].mxu0 }
  0xfd   : > { %v8128_v32 = vpop.f32.mrb[2].mxu0 }
  0xfe   : > { %v8130_v33 = vpop.f32.mrb[3].mxu0 }
 0x101   : > { %v8132_v35 = vpop.f32.mrb[4].mxu0 }
 0x102   : > { %v8134_v36 = vpop.f32.mrb[5].mxu0 }
 0x104   : > { %v875_v37 = vpop.f32.mrb[0].mxu1 }
 0x105   : > { %v8142_v41 = vpop.f32.mrb[6].mxu0  ;;  %v877_v42 = vpop.f32.mrb[1].mxu1 }
 0x106   : > { %v8160_v22 = vpop.f32.mrb[7].mxu0 }
 0x108   : > { %v881_v46 = vpop.f32.mrb[2].mxu1 }
 0x109   : > { %v642_v52 = vpop.f32.mrb[8].mxu0  ;;  %v883_v53 = vpop.f32.mrb[3].mxu1 }
 0x10a   : > { %v8180_v58 = vmul.f32 %v875_v37, %v642_v52  ;;  %v644_v57 = vpop.f32.mrb[9].mxu0 }
 0x10b   : > { %v8194_v0 = vmul.f32 %v877_v42, %v644_v57 }
 0x10c   : > { %v887_v13 = vpop.f32.mrb[4].mxu1 }
 0x10d   : > { %v648_v34 = vpop.f32.mrb[10].mxu0  ;;  %v889_v47 = vpop.f32.mrb[5].mxu1 }
 0x10e   : > { %v8212_v18 = vmul.f32 %v881_v46, %v648_v34  ;;  %v650_v19 = vpop.f32.mrb[11].mxu0 }
 0x10f   : > { %v8214_v23 = vmul.f32 %v883_v53, %v650_v19 }
 0x110   : > { %v893_v25 = vpop.f32.mrb[6].mxu1 }
 0x111   : > { %v654_v27 = vpop.f32.mrb[12].mxu0  ;;  %v895_v28 = vpop.f32.mrb[7].mxu1 }
 0x112   : > { %v8220_v42 = vmul.f32 %v887_v13, %v654_v27  ;;  %v656_v48 = vpop.f32.mrb[13].mxu0  ;;  %v1861_v27 = vadd.f32 %v1855_v45, %v1827_v43 }
 0x113   : > { %v8222_v46 = vmul.f32 %v889_v47, %v656_v48 }
 0x114   : > { %v899_v49 = vpop.f32.mrb[8].mxu1 }
 0x115   : > { %v660_v50 = vpop.f32.mrb[14].mxu0  ;;  %v901_v51 = vpop.f32.mrb[9].mxu1 }
 0x116   : > { %v8224_v52 = vmul.f32 %v893_v25, %v660_v50  ;;  %v662_v53 = vpop.f32.mrb[15].mxu0 }
 0x117   : > { %v8226_v54 = vmul.f32 %v895_v28, %v662_v53 }
 0x118   : > { %v905_v57 = vpop.f32.mrb[10].mxu1 }
 0x119   : > { %v666_v11 = vpop.f32.mrb[16].mxu0  ;;  %v907_v34 = vpop.f32.mrb[11].mxu1 }
 0x11a   : > { %v8232_v63 = vmul.f32 %v899_v49, %v666_v11  ;;  %v668_v47 = vpop.f32.mrb[17].mxu0 }
 0x11b   : > { %v8234_v14 = vmul.f32 %v901_v51, %v668_v47 }
 0x11c   : > { %v911_v15 = vpop.f32.mrb[12].mxu1 }
 0x11d   : > { %v672_v16 = vpop.f32.mrb[18].mxu0  ;;  %v913_v19 = vpop.f32.mrb[13].mxu1 }
 0x11e   : > { %v8241_v21 = vmul.f32 %v905_v57, %v672_v16  ;;  %v674_v25 = vpop.f32.mrb[19].mxu0 }
 0x11f   : > { %v8245_v26 = vmul.f32 %v907_v34, %v674_v25 }
 0x120   : > { %v917_v28 = vpop.f32.mrb[14].mxu1 }
 0x121   : > { %v678_v48 = vpop.f32.mrb[20].mxu0  ;;  %v919_v49 = vpop.f32.mrb[15].mxu1 }
 0x122   : > { %v8251_v51 = vmul.f32 %v911_v15, %v678_v48  ;;  %v680_v53 = vpop.f32.mrb[21].mxu0  ;;  %v1828_v48 = vsel %vm1814_vm2, %v8150_v44, 0.0 }
 0x123   : > { %v8253_v57 = vmul.f32 %v913_v19, %v680_v53 }
 0x124   : > { %v923_v11 = vpop.f32.mrb[16].mxu1 }
 0x125   : > { %v684_v47 = vpop.f32.mrb[22].mxu0  ;;  %v925_v16 = vpop.f32.mrb[17].mxu1 }
 0x126   : > { %v8255_v55 = vmul.f32 %v917_v28, %v684_v47  ;;  %v686_v34 = vpop.f32.mrb[23].mxu0  ;;  %v1856_v28 = vsel %vm1842_vm3, %v8158_v17, 0.0 }
 0x127   : > { %v8257_v25 = vmul.f32 %v919_v49, %v686_v34  ;;  %v1862_v47 = vadd.f32 %v1856_v28, %v1828_v48 }
 0x128   : > { %v929_v13 = vpop.f32.mrb[18].mxu1 }
 0x129   : > { %v690_v15 = vpop.f32.mrb[24].mxu0  ;;  %v931_v19 = vpop.f32.mrb[19].mxu1  ;;  %6658 = vmatprep.subr.msk.mxu1 %vm545_vm0, %v1862_v47 }
 0x12a   : > { %v8271_v49 = vmul.f32 %v923_v11, %v690_v15  ;;  %v692_v53 = vpop.f32.mrb[25].mxu0  ;;  %6659 = vmatpush1.msk.msra.mxu1 %vm545_vm0, %v1861_v27 }
 0x12b   : > { %v8275_v34 = vmul.f32 %v925_v16, %v692_v53 }
 0x12c   : > { %v935_v17 = vpop.f32.mrb[20].mxu1 }
 0x12d   : > { %v696_v61 = vpop.f32.mrb[26].mxu0  ;;  %v937_v50 = vpop.f32.mrb[21].mxu1 }
 0x12e   : > { %v8281_v60 = vmul.f32 %v929_v13, %v696_v61  ;;  %v698_v11 = vpop.f32.mrb[27].mxu0 }
 0x12f   : > { %v8283_v15 = vmul.f32 %v931_v19, %v698_v11 }
 0x130   : > { %v941_v12 = vpop.f32.mrb[22].mxu1 }
 0x131   : > { %v702_v16 = vpop.f32.mrb[28].mxu0  ;;  %v943_v48 = vpop.f32.mrb[23].mxu1 }
 0x132   : > { %v8289_v53 = vmul.f32 %v935_v17, %v702_v16  ;;  %v704_v47 = vpop.f32.mrb[29].mxu0 }
 0x133   : > { %v8291_v43 = vmul.f32 %v937_v50, %v704_v47 }
 0x134   : > { %v947_v27 = vpop.f32.mrb[24].mxu1 }
 0x135   : > { %v708_v13 = vpop.f32.mrb[30].mxu0  ;;  %v949_v45 = vpop.f32.mrb[25].mxu1 }
 0x136   : > { %v8293_v61 = vmul.f32 %v941_v12, %v708_v13  ;;  %v710_v19 = vpop.f32.mrb[31].mxu0 }
 0x137   : > { %v8295_v11 = vmul.f32 %v943_v48, %v710_v19  ;;  %v1746_v48 = vrot.slane %v8137_v39, %v7666_v7  ;;  %v1774_v19 = vrot.slane %v8137_v39, %v7669_v8 }
 0x138   : > { %v953_v44 = vpop.f32.mrb[26].mxu1 }
 0x139   : > { %v714_v24 = vpop.f32.mrb[32].mxu0  ;;  %v955_v37 = vpop.f32.mrb[27].mxu1  ;;  %vm1748_vm6 = vcmp.eq.s32.totalorder %v1746_v48, %v7640_v2  ;;  %vm1750_vm7 = vcmp.eq.s32.totalorder %v1746_v48, %v7650_v5  ;;  %vm1776_vm8 = vcmp.eq.s32.totalorder %v1774_v19, %v7640_v2  ;;  %vm1778_vm10 = vcmp.eq.s32.totalorder %v1774_v19, %v7650_v5 }
 0x13a   : > { %v8301_v16 = vmul.f32 %v947_v27, %v714_v24  ;;  %v716_v50 = vpop.f32.mrb[33].mxu0  ;;  %v1760_v24 = vrot.slane %v8140_v40, %v7666_v7  ;;  %v1788_v27 = vrot.slane %v8140_v40, %v7669_v8  ;;  %vm1752_vm13 = vcmp.eq.s32.totalorder %v1746_v48, %v7653_v6 }
 0x13b   : > { %v8303_v47 = vmul.f32 %v949_v45, %v716_v50  ;;  %v1742_v45 = vrot.slane %v8175_v59, %v7666_v7  ;;  %vm1780_vm14 = vcmp.eq.s32.totalorder %v1774_v19, %v7653_v6  ;;  %v6644_v19 = vld [vmem:[%s7706_s7 + $0x140] sm:$0xff] }
 0x13c   : > { %11124 = vst [vmem:[#allocation13_spill] sm:$0xff] %v8301_v16  ;;  %v8305_v28 = vpop.f32.mrb[28].mxu1  ;;  %v1764_v17 = vsel %vm1750_vm7, %v1760_v24, 0.0  ;;  %v1792_v3 = vsel %vm1778_vm10, %v1788_v27, 0.0  ;;  %v1770_v16 = vrot.slane %v8175_v59, %v7669_v8  ;;  %v6640_v59 = vld [vmem:[%s7706_s7 + $0x120] sm:$0xff] }
 0x13d   : > { %v720_v12 = vpop.f32.mrb[34].mxu0  ;;  %v8307_v13 = vpop.f32.mrb[29].mxu1  ;;  %vm1747_vm11 = vcmp.eq.s32.totalorder %v1742_v45, %v7640_v2  ;;  %v8341_v38 = vadd.f32 %v1792_v3, %v1764_v17  ;;  %vm1749_vm12 = vcmp.eq.s32.totalorder %v1742_v45, %v7650_v5  ;;  %6660 = vmatmul.mubr.msk.f32.vlgmr.msra.gmra.mrb[64].mxu1 %vm490_vm9, %v6640_v59  ;;  %vm1751_vm3 = vcmp.eq.s32.totalorder %v1742_v45, %v7653_v6  ;;  %v6641_v59 = vld [vmem:[%s7706_s7 + $0x128] sm:$0xff] }
 0x13e   : > { %v8313_v62 = vmul.f32 %v953_v44, %v720_v12  ;;  %v722_v1 = vpop.f32.mrb[35].mxu0  ;;  %v1762_v12 = vsel %vm1748_vm6, %v1760_v24, 0.0  ;;  %vm1775_vm15 = vcmp.eq.s32.totalorder %v1770_v16, %v7640_v2  ;;  %vm1777_vm2 = vcmp.eq.s32.totalorder %v1770_v16, %v7650_v5 }
 0x13f   : > { %v8321_v50 = vmul.f32 %v955_v37, %v722_v1  ;;  %v1790_v37 = vsel %vm1776_vm8, %v1788_v27, 0.0  ;;  %11127 = vst [vmem:[#allocation16_spill] sm:$0xff] %v8341_v38  ;;  %v1756_v1 = vrot.slane %v8178_v56, %v7666_v7  ;;  %v1794_v5 = vsel %vm1780_vm14, %v1788_v27, 0.0 }
 0x140   : > { %11125 = vst [vmem:[#allocation14_spill] sm:$0xff] %v8313_v62  ;;  %v8328_v44 = vpop.f32.mrb[30].mxu1  ;;  %v8339_v9 = vadd.f32 %v1790_v37, %v1762_v12  ;;  %v11130_v2 = vmov 0.0   ;;  %vm1779_vm4 = vcmp.eq.s32.totalorder %v1770_v16, %v7653_v6 }
 0x141   : > { %v851_v40 = vpop.f32.mrb[36].mxu0  ;;  %v8331_v4 = vpop.f32.mrb[31].mxu1  ;;  %v1763_v12 = vsel %vm1749_vm12, %v1756_v1, 0.0  ;;  %2012 = vmatprep.mubr.f32.mxu1 %v11130_v2 }
 0x142   : > { %v8337_v10 = vmul.f32 %v851_v40, %v8124_v30  ;;  %v853_v39 = vpop.f32.mrb[37].mxu0  ;;  %11126 = vst [vmem:[#allocation15_spill] sm:$0xff] %v8339_v9  ;;  %v1784_v30 = vrot.slane %v8178_v56, %v7669_v8  ;;  %v1766_v8 = vsel %vm1752_vm13, %v1760_v24, 0.0  ;;  %6661 = vmatmul.mubr.msk.f32.gmra.mrb[66].mxu1 %vm490_vm9, %v6641_v59 }
 0x143   : > { %v8345_v29 = vmul.f32 %v853_v39, %v8126_v31  ;;  %v1761_v39 = vsel %vm1747_vm11, %v1756_v1, 0.0  ;;  %v8384_v24 = vadd.f32 %v1794_v5, %v1766_v8  ;;  %2018 = vmatprep.mubr.f32.mxu1 %v11130_v2 }
 0x144   : > { %v8353_v40 = vpop.f32.mrb[32].mxu1  ;;  %v1789_v3 = vsel %vm1775_vm15, %v1784_v30, 0.0  ;;  %v1791_v48 = vsel %vm1777_vm2, %v1784_v30, 0.0 }
 0x145   : > { %v857_v31 = vpop.f32.mrb[38].mxu0  ;;  %v8359_v17 = vpop.f32.mrb[33].mxu1  ;;  %v8373_v9 = vadd.f32 %v1789_v3, %v1761_v39  ;;  %v8375_v38 = vadd.f32 %v1791_v48, %v1763_v12  ;;  %11131 = vst [vmem:[#allocation19_spill] sm:$0xff] %v8384_v24  ;;  %v1765_v39 = vsel %vm1751_vm3, %v1756_v1, 0.0  ;;  %v1793_v12 = vsel %vm1779_vm4, %v1784_v30, 0.0  ;;  %v6642_v1 = vld [vmem:[%s7706_s7 + $0x130] sm:$0xff] }
 0x146   : > { %v8367_v56 = vmul.f32 %v857_v31, %v8128_v32  ;;  %v859_v37 = vpop.f32.mrb[39].mxu0  ;;  %v8396_v8 = vadd.f32 %v1793_v12, %v1765_v39  ;;  %6662 = vmatmul.mubr.msk.f32.gmra.mrb[68].mxu1 %vm490_vm9, %v6642_v1  ;;  %v6645_v24 = vld [vmem:[%s7706_s7 + $0x148] sm:$0xff] }
 0x147   : > { %v8371_v7 = vmul.f32 %v859_v37, %v8130_v33  ;;  %11128 = vst [vmem:[#allocation17_spill] sm:$0xff] %v8373_v9  ;;  %11129 = vst [vmem:[#allocation18_spill] sm:$0xff] %v8375_v38  ;;  %2024 = vmatprep.mubr.f32.mxu1 %v11130_v2 }
 0x148   : > { %v8382_v31 = vpop.f32.mrb[34].mxu1  ;;  %11132 = vst [vmem:[#allocation20_spill] sm:$0xff] %v8396_v8 }
 0x149   : > { %v863_v33 = vpop.f32.mrb[40].mxu0  ;;  %v1466_v3 = vpop.f32.mrb[35].mxu1 }
 0x14a   : > { %v8394_v37 = vmul.f32 %v863_v33, %v8132_v35  ;;  %v865_v5 = vpop.f32.mrb[41].mxu0 }
 0x14b   : > { %v8400_v16 = vmul.f32 %v865_v5, %v8134_v36 }
 0x14c   : > { %v1470_v45 = vpop.f32.mrb[36].mxu1 }
 0x14d   : > { %v869_v48 = vpop.f32.mrb[42].mxu0  ;;  %v1472_v27 = vpop.f32.mrb[37].mxu1 }
 0x14e   : > { %v8405_v30 = vmul.f32 %v869_v48, %v8142_v41  ;;  %v871_v35 = vpop.f32.mrb[43].mxu0  ;;  %v6643_v41 = vld [vmem:[%s7706_s7 + $0x138] sm:$0xff] }
 0x14f   : > { %v8409_v33 = vmul.f32 %v871_v35, %v8160_v22  ;;  %6663 = vmatmul.mubr.msk.f32.gmra.mrb[70].mxu1 %vm490_vm9, %v6643_v41 }
 0x150   : > { %v1476_v39 = vpop.f32.mrb[38].mxu1  ;;  %2030 = vmatprep.mubr.f32.mxu1 %v11130_v2 }
 0x151   : > { %v1267_v59 = vpop.f32.mrb[44].mxu0  ;;  %v1478_v5 = vpop.f32.mrb[39].mxu1 }
 0x152   : > { %v1553_v48 = vmul.f32 %v8305_v28, %v1267_v59  ;;  %v1269_v32 = vpop.f32.mrb[45].mxu0 }
 0x153   : > { %v1554_v22 = vmul.f32 %v8307_v13, %v1269_v32  ;;  %6664 = vmatmul.mubr.msk.f32.gmra.mrb[72].mxu1 %vm490_vm9, %v6644_v19 }
 0x154   : > { %v1482_v1 = vpop.f32.mrb[40].mxu1  ;;  %2036 = vmatprep.mubr.f32.mxu1 %v11130_v2 }
 0x155   : > { %v1273_v35 = vpop.f32.mrb[46].mxu0  ;;  %v1484_v36 = vpop.f32.mrb[41].mxu1 }
 0x156   : > { %v1555_v6 = vmul.f32 %v8328_v44, %v1273_v35  ;;  %v1275_v12 = vpop.f32.mrb[47].mxu0 }
 0x157   : > { %v1556_v8 = vmul.f32 %v8331_v4, %v1275_v12  ;;  %6665 = vmatmul.mubr.msk.f32.gmra.mrb[74].mxu1 %vm490_vm9, %v6645_v24  ;;  %v6646_v12 = vld [vmem:[%s7706_s7 + $0x150] sm:$0xff] }
 0x158   : > { %v7074_v28 = vpack.c.bf16 %v1555_v6, %v1553_v48  ;;  %v1488_v59 = vpop.f32.mrb[42].mxu1  ;;  %2042 = vmatprep.mubr.f32.mxu1 %v11130_v2 }
 0x159   : > { %v7072_v13 = vpack.c.bf16 %v1556_v8, %v1554_v22  ;;  %v1279_v32 = vpop.f32.mrb[48].mxu0  ;;  %v1490_v41 = vpop.f32.mrb[43].mxu1 }
 0x15a   : > { %v1557_v9 = vmul.f32 %v8353_v40, %v1279_v32  ;;  %v1281_v38 = vpop.f32.mrb[49].mxu0 }
 0x15b   : > { %v1558_v44 = vmul.f32 %v8359_v17, %v1281_v38  ;;  %7073 = vmatprep.subr.bf16.mxu0 %v7072_v13  ;;  %6666 = vmatmul.mubr.msk.f32.gmra.mrb[76].mxu1 %vm490_vm9, %v6646_v12  ;;  %v6647_v13 = vld [vmem:[%s7706_s7 + $0x158] sm:$0xff] }
 0x15c   : > { %7075 = vmatpush1.bf16.msra.mxu0 %v7074_v28  ;;  %v1494_v4 = vpop.f32.mrb[44].mxu1  ;;  %2048 = vmatprep.mubr.f32.mxu1 %v11130_v2 }
 0x15d   : > { %v1285_v6 = vpop.f32.mrb[50].mxu0  ;;  %v1496_v19 = vpop.f32.mrb[45].mxu1 }
 0x15e   : > { %v1559_v8 = vmul.f32 %v8382_v31, %v1285_v6  ;;  %v1287_v48 = vpop.f32.mrb[51].mxu0 }
 0x15f   : > { %v1560_v40 = vmul.f32 %v1466_v3, %v1287_v48  ;;  %6667 = vmatmul.mubr.msk.f32.gmra.mrb[78].mxu1 %vm490_vm9, %v6647_v13 }
 0x160   : > { %v7078_v24 = vpack.c.bf16 %v1559_v8, %v1557_v9  ;;  %v1500_v38 = vpop.f32.mrb[46].mxu1  ;;  %2054 = vmatprep.mubr.f32.mxu1 %v11130_v2  ;;  %v6648_v9 = vld [vmem:[%s7706_s7 + $0x160] sm:$0xff] }
 0x161   : > { %v7076_v17 = vpack.c.bf16 %v1560_v40, %v1558_v44  ;;  %v1291_v22 = vpop.f32.mrb[52].mxu0  ;;  %v1502_v35 = vpop.f32.mrb[47].mxu1 }
 0x162   : > { %v1561_v28 = vmul.f32 %v1470_v45, %v1291_v22  ;;  %v1293_v32 = vpop.f32.mrb[53].mxu0  ;;  %v6649_v22 = vld [vmem:[%s7706_s7 + $0x168] sm:$0xff] }
 0x163   : > { %v1562_v62 = vmul.f32 %v1472_v27, %v1293_v32  ;;  %7077 = vmatprep.subr.bf16.mxu0 %v7076_v17  ;;  %6668 = vmatmul.mubr.msk.f32.gmra.mrb[80].mxu1 %vm490_vm9, %v6648_v9 }
 0x164   : > { %7079 = vmatpush1.bf16.msra.mxu0 %v7078_v24  ;;  %v1506_v31 = vpop.f32.mrb[48].mxu1  ;;  %2060 = vmatprep.mubr.f32.mxu1 %v11130_v2 }
 0x165   : > { %v1297_v3 = vpop.f32.mrb[54].mxu0  ;;  %v1508_v6 = vpop.f32.mrb[49].mxu1 }
 0x166   : > { %v1563_v12 = vmul.f32 %v1476_v39, %v1297_v3  ;;  %v1299_v8 = vpop.f32.mrb[55].mxu0 }
 0x167   : > { %v1564_v44 = vmul.f32 %v1478_v5, %v1299_v8  ;;  %6669 = vmatmul.mubr.msk.f32.gmra.mrb[82].mxu1 %vm490_vm9, %v6649_v22 }
 0x168   : > { %v7082_v45 = vpack.c.bf16 %v1563_v12, %v1561_v28  ;;  %v1512_v48 = vpop.f32.mrb[50].mxu1  ;;  %2066 = vmatprep.mubr.f32.mxu1 %v11130_v2  ;;  %v6650_v28 = vld [vmem:[%s7706_s7 + $0x170] sm:$0xff] }
 0x169   : > { %v7080_v27 = vpack.c.bf16 %v1564_v44, %v1562_v62  ;;  %v1303_v40 = vpop.f32.mrb[56].mxu0  ;;  %v1514_v17 = vpop.f32.mrb[51].mxu1 }
 0x16a   : > { %v1565_v13 = vmul.f32 %v1482_v1, %v1303_v40  ;;  %v1305_v24 = vpop.f32.mrb[57].mxu0  ;;  %v6651_v40 = vld [vmem:[%s7706_s7 + $0x178] sm:$0xff] }
 0x16b   : > { %v1566_v32 = vmul.f32 %v1484_v36, %v1305_v24  ;;  %7081 = vmatprep.subr.bf16.mxu0 %v7080_v27  ;;  %6670 = vmatmul.mubr.msk.f32.gmra.mrb[84].mxu1 %vm490_vm9, %v6650_v28 }
 0x16c   : > { %7083 = vmatpush1.bf16.msra.mxu0 %v7082_v45  ;;  %v1518_v39 = vpop.f32.mrb[52].mxu1  ;;  %2072 = vmatprep.mubr.f32.mxu1 %v11130_v2 }
 0x16d   : > { %v1309_v5 = vpop.f32.mrb[58].mxu0  ;;  %v1520_v3 = vpop.f32.mrb[53].mxu1 }
 0x16e   : > { %v1567_v9 = vmul.f32 %v1488_v59, %v1309_v5  ;;  %v1311_v12 = vpop.f32.mrb[59].mxu0 }
 0x16f   : > { %v1568_v62 = vmul.f32 %v1490_v41, %v1311_v12  ;;  %6671 = vmatmul.mubr.msk.f32.gmra.mrb[86].mxu1 %vm490_vm9, %v6651_v40 }
 0x170   : > { %v7086_v1 = vpack.c.bf16 %v1567_v9, %v1565_v13  ;;  %v1524_v8 = vpop.f32.mrb[54].mxu1  ;;  %2078 = vmatprep.mubr.f32.mxu1 %v11130_v2  ;;  %v6652_v13 = vld [vmem:[%s7706_s7 + $0x180] sm:$0xff] }
 0x171   : > { %v7084_v36 = vpack.c.bf16 %v1568_v62, %v1566_v32  ;;  %v1315_v44 = vpop.f32.mrb[60].mxu0  ;;  %v1526_v27 = vpop.f32.mrb[55].mxu1 }
 0x172   : > { %v1569_v22 = vmul.f32 %v1494_v4, %v1315_v44  ;;  %v1317_v45 = vpop.f32.mrb[61].mxu0  ;;  %v6653_v44 = vld [vmem:[%s7706_s7 + $0x188] sm:$0xff] }
 0x173   : > { %v1570_v24 = vmul.f32 %v1496_v19, %v1317_v45  ;;  %7085 = vmatprep.subr.bf16.mxu0 %v7084_v36  ;;  %6672 = vmatmul.mubr.msk.f32.gmra.mrb[88].mxu1 %vm490_vm9, %v6652_v13 }
 0x174   : > { %7087 = vmatpush1.bf16.msra.mxu0 %v7086_v1  ;;  %v1530_v59 = vpop.f32.mrb[56].mxu1  ;;  %2084 = vmatprep.mubr.f32.mxu1 %v11130_v2 }
 0x175   : > { %v1321_v41 = vpop.f32.mrb[62].mxu0  ;;  %v1532_v5 = vpop.f32.mrb[57].mxu1 }
 0x176   : > { %v1571_v28 = vmul.f32 %v1500_v38, %v1321_v41  ;;  %v1323_v9 = vpop.f32.mrb[63].mxu0 }
 0x177   : > { %v1572_v32 = vmul.f32 %v1502_v35, %v1323_v9  ;;  %6673 = vmatmul.mubr.msk.f32.gmra.mrb[90].mxu1 %vm490_vm9, %v6653_v44 }
 0x178   : > { %v7090_v4 = vpack.c.bf16 %v1571_v28, %v1569_v22  ;;  %v1536_v12 = vpop.f32.mrb[58].mxu1  ;;  %2090 = vmatprep.mubr.f32.mxu1 %v11130_v2  ;;  %v6654_v22 = vld [vmem:[%s7706_s7 + $0x190] sm:$0xff] }
 0x179   : > { %v7088_v19 = vpack.c.bf16 %v1572_v32, %v1570_v24  ;;  %v1327_v62 = vpop.f32.mrb[64].mxu0  ;;  %v1538_v36 = vpop.f32.mrb[59].mxu1 }
 0x17a   : > { %v1573_v40 = vmul.f32 %v1506_v31, %v1327_v62  ;;  %v1329_v1 = vpop.f32.mrb[65].mxu0  ;;  %v6655_v62 = vld [vmem:[%s7706_s7 + $0x198] sm:$0xff] }
 0x17b   : > { %v1574_v45 = vmul.f32 %v1508_v6, %v1329_v1  ;;  %7089 = vmatprep.subr.bf16.mxu0 %v7088_v19  ;;  %6674 = vmatmul.mubr.msk.f32.gmra.mrb[92].mxu1 %vm490_vm9, %v6654_v22 }
 0x17c   : > { %7091 = vmatpush1.bf16.msra.mxu0 %v7090_v4  ;;  %v1542_v38 = vpop.f32.mrb[60].mxu1  ;;  %2096 = vmatprep.mubr.f32.mxu1 %v11130_v2 }
 0x17d   : > { %v1333_v35 = vpop.f32.mrb[66].mxu0  ;;  %v1544_v41 = vpop.f32.mrb[61].mxu1 }
 0x17e   : > { %v1575_v13 = vmul.f32 %v1512_v48, %v1333_v35  ;;  %v1335_v28 = vpop.f32.mrb[67].mxu0 }
 0x17f   : > { %v1576_v24 = vmul.f32 %v1514_v17, %v1335_v28  ;;  %6675 = vmatmul.mubr.msk.f32.gmra.mrb[94].mxu1 %vm490_vm9, %v6655_v62  ;;  %v6656_v17 = vld [vmem:[%s7706_s7 + $0x1a0] sm:$0xff]  ;;  %v6657_v28 = vld [vmem:[%s7706_s7 + $0x1a8] sm:$0xff] }
 0x180   : > { %v7094_v31 = vpack.c.bf16 %v1575_v13, %v1573_v40  ;;  %v1548_v9 = vpop.f32.mrb[62].mxu1  ;;  %2102 = vmatprep.mubr.f32.mxu1 %v11130_v2 }
 0x181   : > { %v7092_v6 = vpack.c.bf16 %v1576_v24, %v1574_v45  ;;  %v1339_v32 = vpop.f32.mrb[68].mxu0  ;;  %v1550_v19 = vpop.f32.mrb[63].mxu1 }
 0x182   : > { %v1577_v44 = vmul.f32 %v1518_v39, %v1339_v32  ;;  %v1341_v4 = vpop.f32.mrb[69].mxu0 }
 0x183   : > { %v1578_v1 = vmul.f32 %v1520_v3, %v1341_v4  ;;  %7093 = vmatprep.subr.bf16.mxu0 %v7092_v6  ;;  %6676 = vmatmul.mubr.msk.f32.gmra.mrb[96].mxu1 %vm490_vm9, %v6656_v17 }
 0x184   : > { %7095 = vmatpush1.bf16.msra.mxu0 %v7094_v31  ;;  %2108 = vmatprep.mubr.f32.mxu1 %v11130_v2 }
 0x185   : > { %v1345_v48 = vpop.f32.mrb[70].mxu0 }
 0x186   : > { %v1579_v35 = vmul.f32 %v1524_v8, %v1345_v48  ;;  %v1347_v22 = vpop.f32.mrb[71].mxu0 }
 0x187   : > { %v1580_v40 = vmul.f32 %v1526_v27, %v1347_v22  ;;  %6677 = vmatmul.mubr.msk.f32.gmra.mrb[98].mxu1 %vm490_vm9, %v6657_v28  ;;  %v8649_v28 = vld [vmem:[%s11024_s3 + $0x68] sm:$0xff] }
 0x188   : > { %v7098_v45 = vpack.c.bf16 %v1579_v35, %v1577_v44  ;;  %2674 = vmatprep.mubr.f32.mxu1 %v11130_v2  ;;  %11171 = vst [vmem:[#allocation23_spill] sm:$0xff] %v8649_v28 }
 0x189   : > { %v7096_v39 = vpack.c.bf16 %v1580_v40, %v1578_v1  ;;  %v1351_v13 = vpop.f32.mrb[72].mxu0 }
 0x18a   : > { %v1581_v24 = vmul.f32 %v1530_v59, %v1351_v13  ;;  %v1353_v32 = vpop.f32.mrb[73].mxu0  ;;  %v8641_v13 = vld [vmem:[%s11024_s3 + $0x60] sm:$0xff] }
 0x18b   : > { %v1582_v3 = vmul.f32 %v1532_v5, %v1353_v32  ;;  %7097 = vmatprep.subr.bf16.mxu0 %v7096_v39  ;;  %11170 = vst [vmem:[#allocation22_spill] sm:$0xff] %v8641_v13  ;;  %v8665_v32 = vld [vmem:[%s11024_s3 + $0x78] sm:$0xff] }
 0x18c   : > { %7099 = vmatpush1.bf16.msra.mxu0 %v7098_v45  ;;  %v8633_v45 = vld [vmem:[%s11024_s3 + $0x58] sm:$0xff]  ;;  %11173 = vst [vmem:[#allocation25_spill] sm:$0xff] %v8665_v32 }
 0x18d   : > { %v1357_v8 = vpop.f32.mrb[74].mxu0  ;;  %11169 = vst [vmem:[#allocation21_spill] sm:$0xff] %v8633_v45 }
 0x18e   : > { %v1583_v31 = vmul.f32 %v1536_v12, %v1357_v8  ;;  %v1359_v6 = vpop.f32.mrb[75].mxu0  ;;  %v8471_v12 = vld [vmem:[%s11025_s4] sm:$0xff]  ;;  %v8681_v8 = vld [vmem:[%s11024_s3 + $0x88] sm:$0xff] }
 0x18f   : > { %v1584_v62 = vmul.f32 %v1538_v36, %v1359_v6  ;;  %v11133_v36 = vpack.c.bf16 %v8371_v7, %v8345_v29  ;;  %v11137_v7 = vpack.c.bf16 %v8214_v23, %v8194_v0  ;;  %v11138_v29 = vpack.c.bf16 %v8212_v18, %v8180_v58  ;;  %11175 = vst [vmem:[#allocation27_spill] sm:$0xff] %v8681_v8 }
 0x190   : > { %v7102_v27 = vpack.c.bf16 %v1583_v31, %v1581_v24  ;;  %v11142_v0 = vpack.c.bf16 %v8241_v21, %v8232_v63  ;;  %v11143_v58 = vpack.c.bf16 %v8257_v25, %v8253_v57  ;;  %v11144_v18 = vpack.c.bf16 %v8255_v55, %v8251_v51  ;;  %v11150_v55 = vld [vmem:[#allocation14_spill] sm:$0xff]  ;;  %v11151_v63 = vld [vmem:[#allocation13_spill] sm:$0xff]  ;;  %v11153_v21 = vld [vmem:[#allocation16_spill] sm:$0xff] }
 0x191   : > { %v7100_v4 = vpack.c.bf16 %v1584_v62, %v1582_v3  ;;  %v1363_v48 = vpop.f32.mrb[76].mxu0  ;;  %v11145_v23 = vpack.c.bf16 %v8283_v15, %v8275_v34  ;;  %v11156_v57 = vld [vmem:[#allocation18_spill] sm:$0xff]  ;;  %v11157_v25 = vld [vmem:[#allocation17_spill] sm:$0xff]  ;;  %v11159_v34 = vld [vmem:[#allocation19_spill] sm:$0xff] }
 0x192   : > { %v1585_v44 = vmul.f32 %v1542_v38, %v1363_v48  ;;  %v1365_v1 = vpop.f32.mrb[77].mxu0  ;;  %v11134_v38 = vpack.c.bf16 %v8367_v56, %v8337_v10  ;;  %v11139_v10 = vpack.c.bf16 %v8226_v54, %v8222_v46  ;;  %v11140_v56 = vpack.c.bf16 %v8224_v52, %v8220_v42  ;;  %v8545_v15 = vld [vmem:[%s11024_s3] sm:$0xff]  ;;  %v8657_v24 = vld [vmem:[%s11024_s3 + $0x70] sm:$0xff] }
 0x193   : > { %v1586_v17 = vmul.f32 %v1544_v41, %v1365_v1  ;;  %7101 = vmatprep.subr.bf16.mxu0 %v7100_v4  ;;  %v11135_v41 = vpack.c.bf16 %v8409_v33, %v8400_v16  ;;  %v11146_v42 = vpack.c.bf16 %v8281_v60, %v8271_v49  ;;  %v11147_v46 = vpack.c.bf16 %v8295_v11, %v8291_v43  ;;  %v11160_v60 = vld [vmem:[#allocation20_spill] sm:$0xff]  ;;  %v8577_v11 = vld [vmem:[%s11024_s3 + $0x20] sm:$0xff]  ;;  %v8601_v16 = vld [vmem:[%s11024_s3 + $0x38] sm:$0xff] }
 0x194   : > { %7103 = vmatpush1.bf16.msra.mxu0 %v7102_v27  ;;  %v11148_v52 = vpack.c.bf16 %v8293_v61, %v8289_v53  ;;  %v11149_v54 = vpack.c.bf16 %v8321_v50, %v8303_v47  ;;  %v11158_v49 = vpack.c.bf16 %v11156_v57, %v11157_v25  ;;  %v8553_v53 = vld [vmem:[%s11024_s3 + $0x8] sm:$0xff]  ;;  %v8561_v43 = vld [vmem:[%s11024_s3 + $0x10] sm:$0xff]  ;;  %v8569_v61 = vld [vmem:[%s11024_s3 + $0x18] sm:$0xff]  ;;  %11162 = vst [vmem:[#allocation13_spill] sm:$0xff] %v8577_v11 }
 0x195   : > { %v1369_v59 = vpop.f32.mrb[78].mxu0  ;;  %11161 = vst [vmem:[#allocation14_spill] sm:$0xff] %v8569_v61  ;;  %v8585_v47 = vld [vmem:[%s11024_s3 + $0x28] sm:$0xff]  ;;  %v8593_v50 = vld [vmem:[%s11024_s3 + $0x30] sm:$0xff]  ;;  %11165 = vst [vmem:[#allocation18_spill] sm:$0xff] %v8601_v16 }
 0x196   : > { %v1587_v35 = vmul.f32 %v1548_v9, %v1369_v59  ;;  %v1371_v22 = vpop.f32.mrb[79].mxu0  ;;  %v11136_v9 = vpack.c.bf16 %v8405_v30, %v8394_v37  ;;  %v11141_v37 = vpack.c.bf16 %v8245_v26, %v8234_v14  ;;  %v11152_v14 = vpack.c.bf16 %v11150_v55, %v11151_v63  ;;  %v11154_v26 = vld [vmem:[#allocation15_spill] sm:$0xff]  ;;  %11163 = vst [vmem:[#allocation16_spill] sm:$0xff] %v8585_v47  ;;  %v8609_v30 = vld [vmem:[%s11024_s3 + $0x40] sm:$0xff]  ;;  %v8709_v59 = vld [vmem:[%s7663_s28 + $0x18] sm:$0xf0] }
 0x197   : > { %v1588_v5 = vmul.f32 %v1550_v19, %v1371_v22  ;;  %v11155_v51 = vpack.c.bf16 %v11153_v21, %v11154_v26  ;;  %11164 = vst [vmem:[#allocation15_spill] sm:$0xff] %v8593_v50  ;;  %11166 = vst [vmem:[#allocation17_spill] sm:$0xff] %v8609_v30  ;;  %v8617_v33 = vld [vmem:[%s11024_s3 + $0x48] sm:$0xff]  ;;  %v8625_v19 = vld [vmem:[%s11024_s3 + $0x50] sm:$0xff] }
 0x198   : > { %v7106_v40 = vpack.c.bf16 %v1587_v35, %v1585_v44  ;;  %11167 = vst [vmem:[#allocation19_spill] sm:$0xff] %v8617_v33  ;;  %11168 = vst [vmem:[#allocation20_spill] sm:$0xff] %v8625_v19  ;;  %v8673_v3 = vld [vmem:[%s11024_s3 + $0x80] sm:$0xff]  ;;  %v11176_v35 = vld [vmem:[#allocation11_spill] sm:$0xff] }
 0x199   : > { %v7104_v39 = vpack.c.bf16 %v1588_v5, %v1586_v17  ;;  %11172 = vst [vmem:[#allocation24_spill] sm:$0xff] %v8657_v24  ;;  %11174 = vst [vmem:[#allocation26_spill] sm:$0xff] %v8673_v3  ;;  %v2490_v5 = vrot.slane %v8709_v59, %v11176_v35 }
 0x19b   : > { %7105 = vmatprep.subr.bf16.mxu0 %v7104_v39 }
 0x19c   : > { %7107 = vmatpush1.bf16.msra.mxu0 %v7106_v40  ;;  %v11177_v40 = vld [vmem:[#allocation12_spill] sm:$0xff] }
 0x19d   : > { %7109 = vmatprep.subr.bf16.mxu0 %v11133_v36  ;;  %v2518_v36 = vrot.slane %v8709_v59, %v11177_v40 }
 0x19f   : > { %1658 = vmatmul.mubr.f32.vlgmr.msra.gmra.mrb[80].mxu0 %v8471_v12 }
 0x1a0   : > { %7111 = vmatpush1.bf16.msra.mxu0 %v11134_v38  ;;  %6639 = vmatprep.mubr.msk.f32.mxu0 %vm1589_vm1, %v8239_v20 }
 0x1a1   : > { %7113 = vmatprep.subr.bf16.mxu0 %v11135_v41  ;;  %v8722_v41 = vld [vmem:[%s7658_s25 + $0x10] sm:$0xf0] }
 0x1a4   : > { %7115 = vmatpush1.bf16.msra.mxu0 %v11136_v9  ;;  %v8725_v9 = vld [vmem:[%s7663_s28 + $0x10] sm:$0xf0] }
 0x1a5   : > { %7117 = vmatprep.subr.bf16.mxu0 %v11137_v7  ;;  %v2472_v7 = vrot.slane %v8722_v41, %v11176_v35 }
 0x1a8   : > { %7119 = vmatpush1.bf16.msra.mxu0 %v11138_v29  ;;  %v2486_v29 = vrot.slane %v8725_v9, %v11176_v35 }
 0x1a9   : > { %7121 = vmatprep.subr.bf16.mxu0 %v11139_v10  ;;  %v2500_v10 = vrot.slane %v8722_v41, %v11177_v40 }
 0x1ac   : > { %7123 = vmatpush1.bf16.msra.mxu0 %v11140_v56  ;;  %v2514_v56 = vrot.slane %v8725_v9, %v11177_v40 }
 0x1ad   : > { %7125 = vmatprep.subr.bf16.mxu0 %v11141_v37 }
 0x1b0   : > { %7127 = vmatpush1.bf16.msra.mxu0 %v11142_v0  ;;  %v11178_v0 = vld [vmem:[#allocation2_spill] sm:$0xff] }
 0x1b1   : > { %7129 = vmatprep.subr.bf16.mxu0 %v11143_v58  ;;  %v11179_v58 = vld [vmem:[#allocation5_spill] sm:$0xff]  ;;  %vm2477_vm10 = vcmp.eq.s32.totalorder %v2472_v7, %v11178_v0  ;;  %vm2505_vm12 = vcmp.eq.s32.totalorder %v2500_v10, %v11178_v0 }
 0x1b2   : > { %vm2479_vm11 = vcmp.eq.s32.totalorder %v2472_v7, %v11179_v58  ;;  %v2491_v63 = vsel %vm2477_vm10, %v2486_v29, 0.0  ;;  %vm2507_vm13 = vcmp.eq.s32.totalorder %v2500_v10, %v11179_v58  ;;  %v2519_v26 = vsel %vm2505_vm12, %v2514_v56, 0.0 }
 0x1b3   : > { %v2525_v57 = vadd.f32 %v2519_v26, %v2491_v63 }
 0x1b4   : > { %7131 = vmatpush1.bf16.msra.mxu0 %v11144_v18 }
 0x1b5   : > { %7133 = vmatprep.subr.bf16.mxu0 %v11145_v23 }
 0x1b8   : > { %7135 = vmatpush1.bf16.msra.mxu0 %v11146_v42 }
 0x1b9   : > { %7137 = vmatprep.subr.bf16.mxu0 %v11147_v46 }
 0x1bc   : > { %7139 = vmatpush1.bf16.msra.mxu0 %v11148_v52 }
 0x1bd   : > { %7141 = vmatprep.subr.bf16.mxu0 %v11149_v54 }
 0x1c0   : > { %7143 = vmatpush1.bf16.msra.mxu0 %v11152_v14  ;;  %v2493_v14 = vsel %vm2479_vm11, %v2486_v29, 0.0 }
 0x1c1   : > { %7149 = vmatprep.subr.bf16.mxu0 %v11155_v51  ;;  %v2521_v51 = vsel %vm2507_vm13, %v2514_v56, 0.0 }
 0x1c2   : > { %v2527_v25 = vadd.f32 %v2521_v51, %v2493_v14 }
 0x1c3   : > { %1729 = vmatmul.mubr.f32.vlgmr.msra.gmra.mrb[80].mxu0 %v8471_v12 }
 0x1c4   : > { %7151 = vmatpush1.bf16.msra.mxu0 %v11158_v49  ;;  %2185 = vmatprep.mubr.f32.mxu0 %v11130_v2 }
 0x1c5   : > { %6678 = vmatprep.subr.msk.mxu0 %vm545_vm0, %v11159_v34 }
 0x1c8   : > { %6679 = vmatpush1.msk.msra.mxu0 %vm545_vm0, %v11160_v60  ;;  %v7190_v60 = vpack.c.bf16 %v2527_v25, %v2525_v57 }
 0x1c9   : > { %6680 = vmatmul.mubr.msk.f32.vlgmr.msra.gmra.mrb[82].mxu0 %vm490_vm9, %v8545_v15 }
 0x1ca   : > { %2191 = vmatprep.mubr.f32.mxu0 %v11130_v2 }
 0x1cd   : > { %6681 = vmatmul.mubr.msk.f32.gmra.mrb[84].mxu0 %vm490_vm9, %v8553_v53 }
 0x1ce   : > { %2197 = vmatprep.mubr.f32.mxu0 %v11130_v2 }
 0x1d1   : > { %6682 = vmatmul.mubr.msk.f32.gmra.mrb[86].mxu0 %vm490_vm9, %v8561_v43 }
 0x1d2   : > { %2203 = vmatprep.mubr.f32.mxu0 %v11130_v2 }
 0x1d5   : > { %6683 = vmatmul.mubr.msk.f32.gmra.mrb[88].mxu0 %vm490_vm9, %v8569_v61 }
 0x1d6   : > { %2209 = vmatprep.mubr.f32.mxu0 %v11130_v2 }
 0x1d9   : > { %6684 = vmatmul.mubr.msk.f32.gmra.mrb[90].mxu0 %vm490_vm9, %v8577_v11 }
 0x1da   : > { %2215 = vmatprep.mubr.f32.mxu0 %v11130_v2 }
 0x1dd   : > { %6685 = vmatmul.mubr.msk.f32.gmra.mrb[92].mxu0 %vm490_vm9, %v8585_v47 }
 0x1de   : > { %2221 = vmatprep.mubr.f32.mxu0 %v11130_v2 }
 0x1e1   : > { %6686 = vmatmul.mubr.msk.f32.gmra.mrb[94].mxu0 %vm490_vm9, %v8593_v50 }
 0x1e2   : > { %2227 = vmatprep.mubr.f32.mxu0 %v11130_v2 }
 0x1e5   : > { %6687 = vmatmul.mubr.msk.f32.gmra.mrb[96].mxu0 %vm490_vm9, %v8601_v16 }
 0x1e6   : > { %2233 = vmatprep.mubr.f32.mxu0 %v11130_v2 }
 0x1e9   : > { %6688 = vmatmul.mubr.msk.f32.gmra.mrb[98].mxu0 %vm490_vm9, %v8609_v30 }
 0x1ea   : > { %2239 = vmatprep.mubr.f32.mxu0 %v11130_v2 }
 0x1ed   : > { %6689 = vmatmul.mubr.msk.f32.gmra.mrb[100].mxu0 %vm490_vm9, %v8617_v33 }
 0x1ee   : > { %2245 = vmatprep.mubr.f32.mxu0 %v11130_v2 }
 0x1f1   : > { %6690 = vmatmul.mubr.msk.f32.gmra.mrb[102].mxu0 %vm490_vm9, %v8625_v19 }
 0x1f2   : > { %2251 = vmatprep.mubr.f32.mxu0 %v11130_v2 }
 0x1f5   : > { %6691 = vmatmul.mubr.msk.f32.gmra.mrb[104].mxu0 %vm490_vm9, %v8633_v45 }
 0x1f6   : > { %2257 = vmatprep.mubr.f32.mxu0 %v11130_v2 }
 0x1f9   : > { %6692 = vmatmul.mubr.msk.f32.gmra.mrb[106].mxu0 %vm490_vm9, %v8641_v13 }
 0x1fa   : > { %2263 = vmatprep.mubr.f32.mxu0 %v11130_v2 }
 0x1fd   : > { %6693 = vmatmul.mubr.msk.f32.gmra.mrb[108].mxu0 %vm490_vm9, %v8649_v28 }
 0x1fe   : > { %2269 = vmatprep.mubr.f32.mxu0 %v11130_v2 }
 0x201   : > { %6694 = vmatmul.mubr.msk.f32.gmra.mrb[110].mxu0 %vm490_vm9, %v8657_v24 }
 0x202   : > { %2275 = vmatprep.mubr.f32.mxu0 %v11130_v2 }
 0x205   : > { %6695 = vmatmul.mubr.msk.f32.gmra.mrb[112].mxu0 %vm490_vm9, %v8665_v32 }
 0x206   : > { %2281 = vmatprep.mubr.f32.mxu0 %v11130_v2 }
 0x209   : > { %6696 = vmatmul.mubr.msk.f32.gmra.mrb[114].mxu0 %vm490_vm9, %v8673_v3 }
 0x20a   : > { %2287 = vmatprep.mubr.f32.mxu0 %v11130_v2 }
 0x20d   : > { %6697 = vmatmul.mubr.msk.f32.gmra.mrb[116].mxu0 %vm490_vm9, %v8681_v8 }
 0x20e   : > { %6698 = vmatprep.mubr.msk.f32.mxu0 %vm1589_vm1, %v8239_v20  ;;  %v8706_v20 = vld [vmem:[%s7658_s25 + $0x18] sm:$0xf0] }
 0x20f   : > { %v2476_v22 = vrot.slane %v8706_v20, %v11176_v35  ;;  %v2504_v39 = vrot.slane %v8706_v20, %v11177_v40 }
 0x210   : > { %v8687_v31 = vpop.f32.mrb[64].mxu1 }
 0x211   : > { %v8689_v6 = vpop.f32.mrb[65].mxu1  ;;  %vm2478_vm5 = vcmp.eq.s32.totalorder %v2476_v22, %v11178_v0  ;;  %vm2480_vm6 = vcmp.eq.s32.totalorder %v2476_v22, %v11179_v58  ;;  %vm2506_vm7 = vcmp.eq.s32.totalorder %v2504_v39, %v11178_v0  ;;  %vm2508_vm8 = vcmp.eq.s32.totalorder %v2504_v39, %v11179_v58 }
 0x212   : > { %v2492_v23 = vsel %vm2478_vm5, %v2490_v5, 0.0  ;;  %v2494_v42 = vsel %vm2480_vm6, %v2490_v5, 0.0  ;;  %v2520_v46 = vsel %vm2506_vm7, %v2518_v36, 0.0  ;;  %v2522_v52 = vsel %vm2508_vm8, %v2518_v36, 0.0 }
 0x213   : > { %v2526_v54 = vadd.f32 %v2520_v46, %v2492_v23  ;;  %v2528_v55 = vadd.f32 %v2522_v52, %v2494_v42 }
 0x215   : > { %v8691_v62 = vpop.f32.mrb[66].mxu1  ;;  %v7188_v21 = vpack.c.bf16 %v2528_v55, %v2526_v54 }
 0x216   : > { %v8693_v27 = vpop.f32.mrb[67].mxu1 }
 0x217   : > { %7189 = vmatprep.subr.bf16.mxu1 %v7188_v21 }
 0x218   : > { %7191 = vmatpush1.bf16.msra.mxu1 %v7190_v60  ;;  %v11180_v60 = vld [vmem:[#allocation6_spill] sm:$0xff] }
 0x219   : > { %v8695_v4 = vpop.f32.mrb[68].mxu1  ;;  %vm2482_vm14 = vcmp.eq.s32.totalorder %v2476_v22, %v11180_v60  ;;  %vm2510_vm15 = vcmp.eq.s32.totalorder %v2504_v39, %v11180_v60  ;;  %vm2481_vm2 = vcmp.eq.s32.totalorder %v2472_v7, %v11180_v60  ;;  %vm2509_vm3 = vcmp.eq.s32.totalorder %v2500_v10, %v11180_v60 }
 0x21a   : > { %v8697_v48 = vpop.f32.mrb[69].mxu1  ;;  %v2496_v35 = vsel %vm2482_vm14, %v2490_v5, 0.0  ;;  %v2524_v8 = vsel %vm2510_vm15, %v2518_v36, 0.0  ;;  %v2495_v32 = vsel %vm2481_vm2, %v2486_v29, 0.0  ;;  %v2523_v24 = vsel %vm2509_vm3, %v2514_v56, 0.0  ;;  %v11181_v36 = vld [vmem:[#allocation9_spill] sm:$0xff] }
 0x21b   : > { %v2530_v3 = vadd.f32 %v2524_v8, %v2496_v35  ;;  %v2529_v13 = vadd.f32 %v2523_v24, %v2495_v32  ;;  %v2414_v7 = vrot.slane %v8706_v20, %v11181_v36  ;;  %v11182_v24 = vld [vmem:[#allocation10_spill] sm:$0xff]  ;;  %v2428_v29 = vrot.slane %v8709_v59, %v11181_v36 }
 0x21c   : > { %v2442_v32 = vrot.slane %v8706_v20, %v11182_v24  ;;  %v2410_v10 = vrot.slane %v8722_v41, %v11181_v36  ;;  %v2438_v56 = vrot.slane %v8722_v41, %v11182_v24  ;;  %v2424_v41 = vrot.slane %v8725_v9, %v11181_v36  ;;  %v6699_v36 = vld [vmem:[%s7706_s7 + $0x1b0] sm:$0xff] }
 0x21d   : > { %6717 = vmatprep.subr.msk.mxu1 %vm545_vm0, %v2530_v3  ;;  %vm2416_vm4 = vcmp.eq.s32.totalorder %v2414_v7, %v11178_v0  ;;  %vm2418_vm5 = vcmp.eq.s32.totalorder %v2414_v7, %v11179_v58  ;;  %v2452_v50 = vrot.slane %v8725_v9, %v11182_v24  ;;  %vm2420_vm13 = vcmp.eq.s32.totalorder %v2414_v7, %v11180_v60 }
 0x21e   : > { %6718 = vmatpush1.msk.msra.mxu1 %vm545_vm0, %v2529_v13  ;;  %v2456_v13 = vrot.slane %v8709_v59, %v11182_v24  ;;  %vm2444_vm6 = vcmp.eq.s32.totalorder %v2442_v32, %v11178_v0  ;;  %vm2446_vm7 = vcmp.eq.s32.totalorder %v2442_v32, %v11179_v58  ;;  %v2430_v20 = vsel %vm2416_vm4, %v2428_v29, 0.0 }
 0x21f   : > { %v2432_v19 = vsel %vm2418_vm5, %v2428_v29, 0.0  ;;  %vm2415_vm8 = vcmp.eq.s32.totalorder %v2410_v10, %v11178_v0  ;;  %vm2417_vm10 = vcmp.eq.s32.totalorder %v2410_v10, %v11179_v58  ;;  %vm2443_vm11 = vcmp.eq.s32.totalorder %v2438_v56, %v11178_v0  ;;  %6719 = vmatmul.mubr.msk.f32.vlgmr.msra.gmra.mrb[100].mxu1 %vm490_vm9, %v6699_v36  ;;  %v6701_v36 = vld [vmem:[%s7706_s7 + $0x1c0] sm:$0xff] }
 0x220   : > { %v2458_v33 = vsel %vm2444_vm6, %v2456_v13, 0.0  ;;  %v2460_v30 = vsel %vm2446_vm7, %v2456_v13, 0.0  ;;  %vm2445_vm12 = vcmp.eq.s32.totalorder %v2438_v56, %v11179_v58  ;;  %vm2448_vm14 = vcmp.eq.s32.totalorder %v2442_v32, %v11180_v60  ;;  %2680 = vmatprep.mubr.f32.mxu1 %v11130_v2 }
 0x221   : > { %v8817_v16 = vadd.f32 %v2458_v33, %v2430_v20  ;;  %v8819_v59 = vadd.f32 %v2460_v30, %v2432_v19  ;;  %v2429_v30 = vsel %vm2415_vm8, %v2424_v41, 0.0  ;;  %v2431_v19 = vsel %vm2417_vm10, %v2424_v41, 0.0 }
 0x222   : > { %v8699_v44 = vpop.f32.mrb[70].mxu1  ;;  %v2457_v20 = vsel %vm2443_vm11, %v2452_v50, 0.0  ;;  %v2459_v47 = vsel %vm2445_vm12, %v2452_v50, 0.0  ;;  %v2434_v58 = vsel %vm2420_vm13, %v2428_v29, 0.0  ;;  %v2462_v9 = vsel %vm2448_vm14, %v2456_v13, 0.0  ;;  %v6700_v13 = vld [vmem:[%s7706_s7 + $0x1b8] sm:$0xff] }
 0x223   : > { %v8701_v1 = vpop.f32.mrb[71].mxu1  ;;  %v7192_v33 = vpack.c.bf16 %v8819_v59, %v8817_v16  ;;  %v8831_v11 = vadd.f32 %v2457_v20, %v2429_v30  ;;  %v8833_v61 = vadd.f32 %v2459_v47, %v2431_v19  ;;  %vm2419_vm15 = vcmp.eq.s32.totalorder %v2410_v10, %v11180_v60  ;;  %6720 = vmatmul.mubr.msk.f32.gmra.mrb[102].mxu1 %vm490_vm9, %v6700_v13  ;;  %v6704_v10 = vld [vmem:[%s7706_s7 + $0x1d8] sm:$0xff]  ;;  %v6707_v19 = vld [vmem:[%s7706_s7 + $0x1f0] sm:$0xff]  ;;  %v11189_v16 = vld [vmem:[#allocation19_spill] sm:$0xff] }
 0x224   : > { %vm2447_vm2 = vcmp.eq.s32.totalorder %v2438_v56, %v11180_v60  ;;  %v8843_v30 = vadd.f32 %v2462_v9, %v2434_v58  ;;  %v2433_v7 = vsel %vm2419_vm15, %v2424_v41, 0.0  ;;  %2686 = vmatprep.mubr.f32.mxu1 %v11130_v2  ;;  %v6702_v58 = vld [vmem:[%s7706_s7 + $0x1c8] sm:$0xff]  ;;  %v6705_v56 = vld [vmem:[%s7706_s7 + $0x1e0] sm:$0xff]  ;;  %v6708_v20 = vld [vmem:[%s7706_s7 + $0x1f8] sm:$0xff] }
 0x225   : > { %v7194_v47 = vpack.c.bf16 %v8833_v61, %v8831_v11  ;;  %v2461_v32 = vsel %vm2447_vm2, %v2452_v50, 0.0  ;;  %v6703_v50 = vld [vmem:[%s7706_s7 + $0x1d0] sm:$0xff]  ;;  %v6706_v41 = vld [vmem:[%s7706_s7 + $0x1e8] sm:$0xff]  ;;  %v6709_v9 = vld [vmem:[%s7706_s7 + $0x200] sm:$0xff] }
 0x226   : > { %v8703_v17 = vpop.f32.mrb[72].mxu1  ;;  %v8846_v29 = vadd.f32 %v2461_v32, %v2433_v7  ;;  %v6710_v7 = vld [vmem:[%s7706_s7 + $0x208] sm:$0xff]  ;;  %v6711_v13 = vld [vmem:[%s7706_s7 + $0x210] sm:$0xff]  ;;  %v11184_v61 = vld [vmem:[#allocation13_spill] sm:$0xff] }
 0x227   : > { %v8719_v38 = vpop.f32.mrb[73].mxu1  ;;  %6721 = vmatmul.mubr.msk.f32.gmra.mrb[104].mxu1 %vm490_vm9, %v6701_v36  ;;  %v11188_v11 = vld [vmem:[#allocation17_spill] sm:$0xff] }
 0x228   : > { %2692 = vmatprep.mubr.f32.mxu1 %v11130_v2  ;;  %v11195_v59 = vld [vmem:[#allocation25_spill] sm:$0xff] }
 0x22a   : > { %v8735_v37 = vpop.f32.mrb[74].mxu1 }
 0x22b   : > { %v8741_v18 = vpop.f32.mrb[75].mxu1  ;;  %6722 = vmatmul.mubr.msk.f32.gmra.mrb[106].mxu1 %vm490_vm9, %v6702_v58 }
 0x22c   : > { %2698 = vmatprep.mubr.f32.mxu1 %v11130_v2 }
 0x22e   : > { %v8747_v49 = vpop.f32.mrb[76].mxu1 }
 0x22f   : > { %v8749_v34 = vpop.f32.mrb[77].mxu1  ;;  %6723 = vmatmul.mubr.msk.f32.gmra.mrb[108].mxu1 %vm490_vm9, %v6703_v50 }
 0x230   : > { %2704 = vmatprep.mubr.f32.mxu1 %v11130_v2 }
 0x232   : > { %v8751_v23 = vpop.f32.mrb[78].mxu1 }
 0x233   : > { %v8753_v42 = vpop.f32.mrb[79].mxu1  ;;  %6724 = vmatmul.mubr.msk.f32.gmra.mrb[110].mxu1 %vm490_vm9, %v6704_v10 }
 0x234   : > { %2710 = vmatprep.mubr.f32.mxu1 %v11130_v2 }
 0x236   : > { %v8755_v46 = vpop.f32.mrb[80].mxu1 }
 0x237   : > { %v8757_v52 = vpop.f32.mrb[81].mxu1  ;;  %6725 = vmatmul.mubr.msk.f32.gmra.mrb[112].mxu1 %vm490_vm9, %v6705_v56  ;;  %v6712_v56 = vld [vmem:[%s7706_s7 + $0x218] sm:$0xff] }
 0x238   : > { %2716 = vmatprep.mubr.f32.mxu1 %v11130_v2 }
 0x23a   : > { %v8759_v54 = vpop.f32.mrb[82].mxu1 }
 0x23b   : > { %v8761_v55 = vpop.f32.mrb[83].mxu1  ;;  %6726 = vmatmul.mubr.msk.f32.gmra.mrb[114].mxu1 %vm490_vm9, %v6706_v41 }
 0x23c   : > { %2722 = vmatprep.mubr.f32.mxu1 %v11130_v2 }
 0x23e   : > { %v8763_v63 = vpop.f32.mrb[84].mxu1 }
 0x23f   : > { %v8765_v14 = vpop.f32.mrb[85].mxu1  ;;  %6727 = vmatmul.mubr.msk.f32.gmra.mrb[116].mxu1 %vm490_vm9, %v6707_v19 }
 0x240   : > { %2728 = vmatprep.mubr.f32.mxu1 %v11130_v2 }
 0x242   : > { %v8767_v21 = vpop.f32.mrb[86].mxu1 }
 0x243   : > { %v8769_v26 = vpop.f32.mrb[87].mxu1  ;;  %6728 = vmatmul.mubr.msk.f32.gmra.mrb[118].mxu1 %vm490_vm9, %v6708_v20 }
 0x244   : > { %2734 = vmatprep.mubr.f32.mxu1 %v11130_v2 }
 0x246   : > { %v8771_v51 = vpop.f32.mrb[88].mxu1 }
 0x247   : > { %v8773_v57 = vpop.f32.mrb[89].mxu1  ;;  %6729 = vmatmul.mubr.msk.f32.gmra.mrb[120].mxu1 %vm490_vm9, %v6709_v9 }
 0x248   : > { %2740 = vmatprep.mubr.f32.mxu1 %v11130_v2 }
 0x24a   : > { %v8775_v25 = vpop.f32.mrb[90].mxu1 }
 0x24b   : > { %v8779_v40 = vpop.f32.mrb[91].mxu1  ;;  %6730 = vmatmul.mubr.msk.f32.gmra.mrb[122].mxu1 %vm490_vm9, %v6710_v7 }
 0x24c   : > { %2746 = vmatprep.mubr.f32.mxu1 %v11130_v2 }
 0x24e   : > { %v8784_v28 = vpop.f32.mrb[92].mxu1 }
 0x24f   : > { %v8786_v45 = vpop.f32.mrb[93].mxu1  ;;  %6731 = vmatmul.mubr.msk.f32.gmra.mrb[124].mxu1 %vm490_vm9, %v6711_v13 }
 0x250   : > { %2752 = vmatprep.mubr.f32.mxu1 %v11130_v2 }
 0x252   : > { %v8788_v22 = vpop.f32.mrb[94].mxu1 }
 0x253   : > { %v8791_v5 = vpop.f32.mrb[95].mxu1  ;;  %6732 = vmatmul.mubr.msk.f32.gmra.mrb[126].mxu1 %vm490_vm9, %v6712_v56 }
 0x254   : > { %2758 = vmatprep.mubr.f32.mxu1 %v11130_v2 }
 0x256   : > { %v8793_v8 = vpop.f32.mrb[96].mxu1 }
 0x257   : > { %v8795_v3 = vpop.f32.mrb[97].mxu1 }
 0x25a   : > { %v8797_v35 = vpop.f32.mrb[98].mxu1 }
 0x25b   : > { %v8799_v39 = vpop.f32.mrb[99].mxu1 }
 0x29c   : > { %v2187_v32 = vpop.f32.mrb[82].mxu0 }
 0x29d   : > { %v2294_v36 = vmul.f32 %v2187_v32, %v8687_v31  ;;  %v2189_v58 = vpop.f32.mrb[83].mxu0  ;;  %v6713_v32 = vld [vmem:[%s7706_s7 + $0x220] sm:$0xff] }
 0x29e   : > { %v2295_v50 = vmul.f32 %v2189_v58, %v8689_v6  ;;  %6733 = vmatmul.mubr.msk.f32.gmra.mrb[128].mxu1 %vm490_vm9, %v6713_v32 }
 0x29f   : > { %2764 = vmatprep.mubr.f32.mxu1 %v11130_v2 }
 0x2a0   : > { %v2193_v10 = vpop.f32.mrb[84].mxu0 }
 0x2a1   : > { %v2296_v41 = vmul.f32 %v2193_v10, %v8691_v62  ;;  %v2195_v19 = vpop.f32.mrb[85].mxu0 }
 0x2a2   : > { %v2297_v20 = vmul.f32 %v2195_v19, %v8693_v27  ;;  %v6714_v27 = vld [vmem:[%s7706_s7 + $0x228] sm:$0xff] }
 0x2a3   : > { %v7154_v31 = vpack.c.bf16 %v2296_v41, %v2294_v36  ;;  %6734 = vmatmul.mubr.msk.f32.gmra.mrb[130].mxu1 %vm490_vm9, %v6714_v27 }
 0x2a4   : > { %v7152_v9 = vpack.c.bf16 %v2297_v20, %v2295_v50  ;;  %v2199_v7 = vpop.f32.mrb[86].mxu0  ;;  %2770 = vmatprep.mubr.f32.mxu1 %v11130_v2 }
 0x2a5   : > { %v2298_v6 = vmul.f32 %v2199_v7, %v8695_v4  ;;  %v2201_v13 = vpop.f32.mrb[87].mxu0 }
 0x2a6   : > { %v2299_v62 = vmul.f32 %v2201_v13, %v8697_v48  ;;  %7153 = vmatprep.subr.bf16.mxu0 %v7152_v9  ;;  %v6715_v48 = vld [vmem:[%s7706_s7 + $0x230] sm:$0xff]  ;;  %v6716_v9 = vld [vmem:[%s7706_s7 + $0x238] sm:$0xff] }
 0x2a7   : > { %7155 = vmatpush1.bf16.msra.mxu0 %v7154_v31  ;;  %6735 = vmatmul.mubr.msk.f32.gmra.mrb[132].mxu1 %vm490_vm9, %v6715_v48 }
 0x2a8   : > { %v2205_v58 = vpop.f32.mrb[88].mxu0  ;;  %2776 = vmatprep.mubr.f32.mxu1 %v11130_v2 }
 0x2a9   : > { %v2300_v10 = vmul.f32 %v2205_v58, %v8699_v44  ;;  %v2207_v36 = vpop.f32.mrb[89].mxu0 }
 0x2aa   : > { %v2301_v4 = vmul.f32 %v2207_v36, %v8701_v1 }
 0x2ab   : > { %v7158_v50 = vpack.c.bf16 %v2300_v10, %v2298_v6  ;;  %6736 = vmatmul.mubr.msk.f32.gmra.mrb[134].mxu1 %vm490_vm9, %v6716_v9 }
 0x2ac   : > { %v7156_v56 = vpack.c.bf16 %v2301_v4, %v2299_v62  ;;  %v2211_v41 = vpop.f32.mrb[90].mxu0  ;;  %3342 = vmatprep.mubr.f32.mxu1 %v11130_v2 }
 0x2ad   : > { %v2302_v19 = vmul.f32 %v2211_v41, %v8703_v17  ;;  %v2213_v20 = vpop.f32.mrb[91].mxu0 }
 0x2ae   : > { %v2303_v31 = vmul.f32 %v2213_v20, %v8719_v38  ;;  %7157 = vmatprep.subr.bf16.mxu0 %v7156_v56 }
 0x2af   : > { %7159 = vmatpush1.bf16.msra.mxu0 %v7158_v50 }
 0x2b0   : > { %v2217_v44 = vpop.f32.mrb[92].mxu0 }
 0x2b1   : > { %v2304_v1 = vmul.f32 %v2217_v44, %v8735_v37  ;;  %v2219_v7 = vpop.f32.mrb[93].mxu0 }
 0x2b2   : > { %v2305_v32 = vmul.f32 %v2219_v7, %v8741_v18 }
 0x2b3   : > { %v7162_v17 = vpack.c.bf16 %v2304_v1, %v2302_v19 }
 0x2b4   : > { %v7160_v6 = vpack.c.bf16 %v2305_v32, %v2303_v31  ;;  %v2223_v13 = vpop.f32.mrb[94].mxu0 }
 0x2b5   : > { %v2306_v38 = vmul.f32 %v2223_v13, %v8747_v49  ;;  %v2225_v62 = vpop.f32.mrb[95].mxu0 }
 0x2b6   : > { %v2307_v58 = vmul.f32 %v2225_v62, %v8749_v34  ;;  %7161 = vmatprep.subr.bf16.mxu0 %v7160_v6 }
 0x2b7   : > { %7163 = vmatpush1.bf16.msra.mxu0 %v7162_v17 }
 0x2b8   : > { %v2229_v27 = vpop.f32.mrb[96].mxu0 }
 0x2b9   : > { %v2308_v37 = vmul.f32 %v2229_v27, %v8751_v23  ;;  %v2231_v10 = vpop.f32.mrb[97].mxu0 }
 0x2ba   : > { %v2309_v36 = vmul.f32 %v2231_v10, %v8753_v42 }
 0x2bb   : > { %v7166_v4 = vpack.c.bf16 %v2308_v37, %v2306_v38 }
 0x2bc   : > { %v7164_v18 = vpack.c.bf16 %v2309_v36, %v2307_v58  ;;  %v2235_v50 = vpop.f32.mrb[98].mxu0 }
 0x2bd   : > { %v2310_v56 = vmul.f32 %v2235_v50, %v8755_v46  ;;  %v2237_v41 = vpop.f32.mrb[99].mxu0 }
 0x2be   : > { %v2311_v48 = vmul.f32 %v2237_v41, %v8757_v52  ;;  %7165 = vmatprep.subr.bf16.mxu0 %v7164_v18 }
 0x2bf   : > { %7167 = vmatpush1.bf16.msra.mxu0 %v7166_v4 }
 0x2c0   : > { %v2241_v49 = vpop.f32.mrb[100].mxu0 }
 0x2c1   : > { %v2312_v34 = vmul.f32 %v2241_v49, %v8759_v54  ;;  %v2243_v19 = vpop.f32.mrb[101].mxu0 }
 0x2c2   : > { %v2313_v20 = vmul.f32 %v2243_v19, %v8761_v55 }
 0x2c3   : > { %v7170_v23 = vpack.c.bf16 %v2312_v34, %v2310_v56 }
 0x2c4   : > { %v7168_v31 = vpack.c.bf16 %v2313_v20, %v2311_v48  ;;  %v2247_v44 = vpop.f32.mrb[102].mxu0 }
 0x2c5   : > { %v2314_v42 = vmul.f32 %v2247_v44, %v8763_v63  ;;  %v2249_v9 = vpop.f32.mrb[103].mxu0 }
 0x2c6   : > { %v2315_v1 = vmul.f32 %v2249_v9, %v8765_v14  ;;  %7169 = vmatprep.subr.bf16.mxu0 %v7168_v31 }
 0x2c7   : > { %7171 = vmatpush1.bf16.msra.mxu0 %v7170_v23 }
 0x2c8   : > { %v2253_v46 = vpop.f32.mrb[104].mxu0 }
 0x2c9   : > { %v2316_v52 = vmul.f32 %v2253_v46, %v8767_v21  ;;  %v2255_v7 = vpop.f32.mrb[105].mxu0 }
 0x2ca   : > { %v2317_v32 = vmul.f32 %v2255_v7, %v8769_v26  ;;  %v9029_v7 = vld [vmem:[%s7663_s28 + $0x28] sm:$0xf] }
 0x2cb   : > { %v7174_v54 = vpack.c.bf16 %v2316_v52, %v2314_v42  ;;  %v9026_v52 = vld [vmem:[%s7658_s25 + $0x28] sm:$0xf] }
 0x2cc   : > { %v7172_v17 = vpack.c.bf16 %v2317_v32, %v2315_v1  ;;  %v2259_v6 = vpop.f32.mrb[106].mxu0  ;;  %v11198_v32 = vld [vmem:[#allocation3_spill] sm:$0xff] }
 0x2cd   : > { %v2318_v55 = vmul.f32 %v2259_v6, %v8771_v51  ;;  %v2261_v13 = vpop.f32.mrb[107].mxu0  ;;  %v11199_v6 = vld [vmem:[#allocation4_spill] sm:$0xff] }
 0x2ce   : > { %v2319_v38 = vmul.f32 %v2261_v13, %v8773_v57  ;;  %7173 = vmatprep.subr.bf16.mxu0 %v7172_v17  ;;  %v3158_v17 = vrot.slane %v9029_v7, %v11198_v32  ;;  %v3186_v13 = vrot.slane %v9029_v7, %v11199_v6 }
 0x2cf   : > { %7175 = vmatpush1.bf16.msra.mxu0 %v7174_v54  ;;  %v3144_v54 = vrot.slane %v9026_v52, %v11198_v32 }
 0x2d0   : > { %v2265_v63 = vpop.f32.mrb[108].mxu0 }
 0x2d1   : > { %v2320_v14 = vmul.f32 %v2265_v63, %v8775_v25  ;;  %v2267_v62 = vpop.f32.mrb[109].mxu0  ;;  %v9042_v63 = vld [vmem:[%s7658_s25 + $0x20] sm:$0xf]  ;;  %vm3146_vm3 = vcmp.eq.s32.totalorder %v3144_v54, %v11178_v0  ;;  %vm3150_vm12 = vcmp.eq.s32.totalorder %v3144_v54, %v11180_v60 }
 0x2d2   : > { %v2321_v58 = vmul.f32 %v2267_v62, %v8779_v40  ;;  %v3140_v62 = vrot.slane %v9042_v63, %v11198_v32 }
 0x2d3   : > { %v7178_v21 = vpack.c.bf16 %v2320_v14, %v2318_v55  ;;  %v3172_v55 = vrot.slane %v9026_v52, %v11199_v6  ;;  %v9045_v14 = vld [vmem:[%s7663_s28 + $0x20] sm:$0xf] }
 0x2d4   : > { %v7176_v27 = vpack.c.bf16 %v2321_v58, %v2319_v38  ;;  %v2271_v37 = vpop.f32.mrb[110].mxu0  ;;  %v3154_v58 = vrot.slane %v9045_v14, %v11198_v32  ;;  %vm3145_vm7 = vcmp.eq.s32.totalorder %v3140_v62, %v11178_v0  ;;  %vm3149_vm14 = vcmp.eq.s32.totalorder %v3140_v62, %v11180_v60 }
 0x2d5   : > { %v2322_v26 = vmul.f32 %v2271_v37, %v8784_v28  ;;  %v2273_v10 = vpop.f32.mrb[111].mxu0  ;;  %vm3174_vm5 = vcmp.eq.s32.totalorder %v3172_v55, %v11178_v0  ;;  %vm3178_vm13 = vcmp.eq.s32.totalorder %v3172_v55, %v11180_v60 }
 0x2d6   : > { %v2323_v36 = vmul.f32 %v2273_v10, %v8786_v45  ;;  %7177 = vmatprep.subr.bf16.mxu0 %v7176_v27  ;;  %v3182_v27 = vrot.slane %v9045_v14, %v11199_v6 }
 0x2d7   : > { %7179 = vmatpush1.bf16.msra.mxu0 %v7178_v21  ;;  %v3168_v21 = vrot.slane %v9042_v63, %v11199_v6 }
 0x2d8   : > { %v2277_v51 = vpop.f32.mrb[112].mxu0 }
 0x2d9   : > { %v2324_v57 = vmul.f32 %v2277_v51, %v8788_v22  ;;  %v2279_v4 = vpop.f32.mrb[113].mxu0  ;;  %vm3173_vm10 = vcmp.eq.s32.totalorder %v3168_v21, %v11178_v0  ;;  %vm3177_vm15 = vcmp.eq.s32.totalorder %v3168_v21, %v11180_v60 }
 0x2da   : > { %v2325_v18 = vmul.f32 %v2279_v4, %v8791_v5  ;;  %v11190_v5 = vld [vmem:[#allocation20_spill] sm:$0xff] }
 0x2db   : > { %v7182_v25 = vpack.c.bf16 %v2324_v57, %v2322_v26  ;;  %v11200_v26 = vld [vmem:[#allocation5_spill] sm:$0xff]  ;;  %v3188_v57 = vsel %vm3174_vm5, %v3186_v13, 0.0 }
 0x2dc   : > { %v7180_v50 = vpack.c.bf16 %v2325_v18, %v2323_v36  ;;  %v2283_v56 = vpop.f32.mrb[114].mxu0  ;;  %vm3148_vm4 = vcmp.eq.s32.totalorder %v3144_v54, %v11200_v26  ;;  %vm3176_vm6 = vcmp.eq.s32.totalorder %v3172_v55, %v11200_v26  ;;  %v3160_v36 = vsel %vm3146_vm3, %v3158_v17, 0.0 }
 0x2dd   : > { %v2326_v40 = vmul.f32 %v2283_v56, %v8793_v8  ;;  %v2285_v41 = vpop.f32.mrb[115].mxu0  ;;  %v11191_v8 = vld [vmem:[#allocation21_spill] sm:$0xff]  ;;  %v3162_v51 = vsel %vm3148_vm4, %v3158_v17, 0.0  ;;  %v3190_v4 = vsel %vm3176_vm6, %v3186_v13, 0.0  ;;  %v3194_v18 = vadd.f32 %v3188_v57, %v3160_v36 }
 0x2de   : > { %v2327_v48 = vmul.f32 %v2285_v41, %v8795_v3  ;;  %7181 = vmatprep.subr.bf16.mxu0 %v7180_v50  ;;  %v11192_v3 = vld [vmem:[#allocation22_spill] sm:$0xff]  ;;  %vm3147_vm8 = vcmp.eq.s32.totalorder %v3140_v62, %v11200_v26  ;;  %v3159_v50 = vsel %vm3145_vm7, %v3154_v58, 0.0  ;;  %vm3175_vm11 = vcmp.eq.s32.totalorder %v3168_v21, %v11200_v26 }
 0x2df   : > { %7183 = vmatpush1.bf16.msra.mxu0 %v7182_v25  ;;  %v3196_v25 = vadd.f32 %v3190_v4, %v3162_v51  ;;  %v3161_v56 = vsel %vm3147_vm8, %v3154_v58, 0.0  ;;  %v3187_v41 = vsel %vm3173_vm10, %v3182_v27, 0.0  ;;  %v3163_v51 = vsel %vm3149_vm14, %v3154_v58, 0.0  ;;  %v11201_v58 = vld [vmem:[#allocation7_spill] sm:$0xff] }
 0x2e0   : > { %v2289_v28 = vpop.f32.mrb[116].mxu0  ;;  %v3191_v57 = vsel %vm3177_vm15, %v3182_v27, 0.0 }
 0x2e1   : > { %v2328_v45 = vmul.f32 %v2289_v28, %v8797_v35  ;;  %v2291_v49 = vpop.f32.mrb[117].mxu0  ;;  %v11193_v35 = vld [vmem:[#allocation23_spill] sm:$0xff]  ;;  %v3193_v28 = vadd.f32 %v3187_v41, %v3159_v50  ;;  %v11202_v50 = vld [vmem:[#allocation8_spill] sm:$0xff] }
 0x2e2   : > { %v2329_v34 = vmul.f32 %v2291_v49, %v8799_v39  ;;  %v11194_v39 = vld [vmem:[#allocation24_spill] sm:$0xff]  ;;  %v3124_v41 = vrot.slane %v9029_v7, %v11202_v50 }
 0x2e3   : > { %v7186_v22 = vpack.c.bf16 %v2328_v45, %v2326_v40  ;;  %v7232_v40 = vpack.c.bf16 %v3196_v25, %v3194_v18  ;;  %v3197_v18 = vadd.f32 %v3191_v57, %v3163_v51 }
 0x2e4   : > { %v7184_v19 = vpack.c.bf16 %v2329_v34, %v2327_v48  ;;  %v3189_v48 = vsel %vm3175_vm11, %v3182_v27, 0.0  ;;  %v3082_v27 = vrot.slane %v9026_v52, %v11201_v58 }
 0x2e5   : > { %v3195_v45 = vadd.f32 %v3189_v48, %v3161_v56  ;;  %7233 = vmatprep.subr.bf16.mxu1 %v7232_v40  ;;  %v3110_v56 = vrot.slane %v9026_v52, %v11202_v50  ;;  %v3096_v40 = vrot.slane %v9029_v7, %v11201_v58  ;;  %v3078_v48 = vrot.slane %v9042_v63, %v11201_v58 }
 0x2e6   : > { %7185 = vmatprep.subr.bf16.mxu0 %v7184_v19  ;;  %vm3084_vm2 = vcmp.eq.s32.totalorder %v3082_v27, %v11178_v0  ;;  %vm3086_vm3 = vcmp.eq.s32.totalorder %v3082_v27, %v11200_v26  ;;  %vm3088_vm11 = vcmp.eq.s32.totalorder %v3082_v27, %v11180_v60 }
 0x2e7   : > { %7187 = vmatpush1.bf16.msra.mxu0 %v7186_v22  ;;  %v7234_v22 = vpack.c.bf16 %v3195_v45, %v3193_v28  ;;  %v3106_v28 = vrot.slane %v9042_v63, %v11202_v50  ;;  %vm3112_vm4 = vcmp.eq.s32.totalorder %v3110_v56, %v11178_v0  ;;  %vm3114_vm5 = vcmp.eq.s32.totalorder %v3110_v56, %v11200_v26 }
 0x2e8   : > { %7193 = vmatprep.subr.bf16.mxu0 %v7192_v33  ;;  %v11196_v33 = vld [vmem:[#allocation26_spill] sm:$0xff]  ;;  %v3098_v52 = vsel %vm3084_vm2, %v3096_v40, 0.0  ;;  %v3100_v45 = vsel %vm3086_vm3, %v3096_v40, 0.0  ;;  %vm3083_vm6 = vcmp.eq.s32.totalorder %v3078_v48, %v11178_v0  ;;  %vm3085_vm7 = vcmp.eq.s32.totalorder %v3078_v48, %v11200_v26 }
 0x2e9   : > { %7235 = vmatpush1.bf16.msra.mxu1 %v7234_v22  ;;  %v3126_v22 = vsel %vm3112_vm4, %v3124_v41, 0.0  ;;  %v3092_v63 = vrot.slane %v9045_v14, %v11201_v58  ;;  %vm3111_vm8 = vcmp.eq.s32.totalorder %v3106_v28, %v11178_v0  ;;  %vm3113_vm10 = vcmp.eq.s32.totalorder %v3106_v28, %v11200_v26  ;;  %v6758_v58 = vld [vmem:[%s7706_s7 + $0x240] sm:$0xff] }
 0x2ea   : > { %2395 = vmatmul.mubr.f32.vlgmr.msra.gmra.mrb[80].mxu0 %v8471_v12  ;;  %v11183_v12 = vld [vmem:[#allocation14_spill] sm:$0xff]  ;;  %v3102_v6 = vsel %vm3088_vm11, %v3096_v40, 0.0  ;;  %vm3115_vm14 = vcmp.eq.s32.totalorder %v3106_v28, %v11180_v60  ;;  %v6763_v28 = vld [vmem:[%s7706_s7 + $0x268] sm:$0xff] }
 0x2eb   : > { %7195 = vmatpush1.bf16.msra.mxu0 %v7194_v47  ;;  %2853 = vmatprep.mubr.f32.mxu0 %v11130_v2  ;;  %v11197_v47 = vld [vmem:[#allocation27_spill] sm:$0xff]  ;;  %v3097_v57 = vsel %vm3083_vm6, %v3092_v63, 0.0 }
 0x2ec   : > { %6737 = vmatprep.subr.msk.mxu0 %vm545_vm0, %v8843_v30  ;;  %v9003_v30 = vld [vmem:[%s11025_s4 + $0x8] sm:$0xff] }
 0x2ef   : > { %6738 = vmatpush1.msk.msra.mxu0 %vm545_vm0, %v8846_v29 }
 0x2f0   : > { %6739 = vmatmul.mubr.msk.f32.vlgmr.msra.gmra.mrb[118].mxu0 %vm490_vm9, %v8545_v15  ;;  %v11185_v15 = vld [vmem:[#allocation16_spill] sm:$0xff] }
 0x2f1   : > { %2859 = vmatprep.mubr.f32.mxu0 %v11130_v2 }
 0x2f2   : > { %v9007_v29 = vpop.f32.mrb[100].mxu1 }
 0x2f3   : > { %v9009_v20 = vpop.f32.mrb[101].mxu1 }
 0x2f4   : > { %6740 = vmatmul.mubr.msk.f32.gmra.mrb[120].mxu0 %vm490_vm9, %v8553_v53  ;;  %v11186_v53 = vld [vmem:[#allocation15_spill] sm:$0xff] }
 0x2f5   : > { %2865 = vmatprep.mubr.f32.mxu0 %v11130_v2 }
 0x2f6   : > { %v9011_v23 = vpop.f32.mrb[102].mxu1 }
 0x2f7   : > { %v9013_v31 = vpop.f32.mrb[103].mxu1 }
 0x2f8   : > { %6741 = vmatmul.mubr.msk.f32.gmra.mrb[122].mxu0 %vm490_vm9, %v8561_v43  ;;  %v11187_v43 = vld [vmem:[#allocation18_spill] sm:$0xff] }
 0x2f9   : > { %2871 = vmatprep.mubr.f32.mxu0 %v11130_v2 }
 0x2fa   : > { %v9015_v44 = vpop.f32.mrb[104].mxu1 }
 0x2fb   : > { %v9017_v42 = vpop.f32.mrb[105].mxu1 }
 0x2fc   : > { %6742 = vmatmul.mubr.msk.f32.gmra.mrb[124].mxu0 %vm490_vm9, %v11183_v12 }
 0x2fd   : > { %2877 = vmatprep.mubr.f32.mxu0 %v11130_v2 }
 0x2fe   : > { %v9019_v9 = vpop.f32.mrb[106].mxu1 }
 0x2ff   : > { %v9021_v1 = vpop.f32.mrb[107].mxu1 }
 0x300   : > { %6743 = vmatmul.mubr.msk.f32.gmra.mrb[126].mxu0 %vm490_vm9, %v11184_v61 }
 0x301   : > { %2883 = vmatprep.mubr.f32.mxu0 %v11130_v2 }
 0x302   : > { %v9023_v46 = vpop.f32.mrb[108].mxu1 }
 0x303   : > { %v9039_v38 = vpop.f32.mrb[109].mxu1 }
 0x304   : > { %6744 = vmatmul.mubr.msk.f32.gmra.mrb[128].mxu0 %vm490_vm9, %v11185_v15 }
 0x305   : > { %2889 = vmatprep.mubr.f32.mxu0 %v11130_v2 }
 0x306   : > { %v9055_v37 = vpop.f32.mrb[110].mxu1 }
 0x307   : > { %v9061_v10 = vpop.f32.mrb[111].mxu1 }
 0x308   : > { %6745 = vmatmul.mubr.msk.f32.gmra.mrb[130].mxu0 %vm490_vm9, %v11186_v53 }
 0x309   : > { %2895 = vmatprep.mubr.f32.mxu0 %v11130_v2 }
 0x30a   : > { %v9067_v49 = vpop.f32.mrb[112].mxu1 }
 0x30b   : > { %v9069_v34 = vpop.f32.mrb[113].mxu1 }
 0x30c   : > { %6746 = vmatmul.mubr.msk.f32.gmra.mrb[132].mxu0 %vm490_vm9, %v11187_v43 }
 0x30d   : > { %2901 = vmatprep.mubr.f32.mxu0 %v11130_v2 }
 0x30e   : > { %v9071_v19 = vpop.f32.mrb[114].mxu1 }
 0x30f   : > { %v9073_v12 = vpop.f32.mrb[115].mxu1 }
 0x310   : > { %6747 = vmatmul.mubr.msk.f32.gmra.mrb[134].mxu0 %vm490_vm9, %v11188_v11 }
 0x311   : > { %2907 = vmatprep.mubr.f32.mxu0 %v11130_v2 }
 0x312   : > { %v9075_v61 = vpop.f32.mrb[116].mxu1 }
 0x313   : > { %v9077_v15 = vpop.f32.mrb[117].mxu1 }
 0x314   : > { %6748 = vmatmul.mubr.msk.f32.gmra.mrb[136].mxu0 %vm490_vm9, %v11189_v16 }
 0x315   : > { %2913 = vmatprep.mubr.f32.mxu0 %v11130_v2 }
 0x316   : > { %v9079_v53 = vpop.f32.mrb[118].mxu1 }
 0x317   : > { %v9081_v43 = vpop.f32.mrb[119].mxu1 }
 0x318   : > { %6749 = vmatmul.mubr.msk.f32.gmra.mrb[138].mxu0 %vm490_vm9, %v11190_v5 }
 0x319   : > { %2919 = vmatprep.mubr.f32.mxu0 %v11130_v2 }
 0x31a   : > { %v9083_v11 = vpop.f32.mrb[120].mxu1 }
 0x31b   : > { %v9085_v16 = vpop.f32.mrb[121].mxu1 }
 0x31c   : > { %6750 = vmatmul.mubr.msk.f32.gmra.mrb[140].mxu0 %vm490_vm9, %v11191_v8 }
 0x31d   : > { %2925 = vmatprep.mubr.f32.mxu0 %v11130_v2 }
 0x31e   : > { %v9087_v5 = vpop.f32.mrb[122].mxu1 }
 0x31f   : > { %v9089_v8 = vpop.f32.mrb[123].mxu1 }
 0x320   : > { %6751 = vmatmul.mubr.msk.f32.gmra.mrb[142].mxu0 %vm490_vm9, %v11192_v3 }
 0x321   : > { %2931 = vmatprep.mubr.f32.mxu0 %v11130_v2 }
 0x322   : > { %v9091_v3 = vpop.f32.mrb[124].mxu1 }
 0x324   : > { %6752 = vmatmul.mubr.msk.f32.gmra.mrb[144].mxu0 %vm490_vm9, %v11193_v35  ;;  %v9093_v35 = vpop.f32.mrb[125].mxu1 }
 0x325   : > { %2937 = vmatprep.mubr.f32.mxu0 %v11130_v2 }
 0x328   : > { %6753 = vmatmul.mubr.msk.f32.gmra.mrb[146].mxu0 %vm490_vm9, %v11194_v39  ;;  %v9095_v39 = vpop.f32.mrb[126].mxu1 }
 0x329   : > { %2943 = vmatprep.mubr.f32.mxu0 %v11130_v2 }
 0x32c   : > { %6754 = vmatmul.mubr.msk.f32.gmra.mrb[148].mxu0 %vm490_vm9, %v11195_v59  ;;  %v9099_v59 = vpop.f32.mrb[127].mxu1 }
 0x32d   : > { %2949 = vmatprep.mubr.f32.mxu0 %v11130_v2 }
 0x330   : > { %6755 = vmatmul.mubr.msk.f32.gmra.mrb[150].mxu0 %vm490_vm9, %v11196_v33  ;;  %v3164_v33 = vsel %vm3150_vm12, %v3158_v17, 0.0  ;;  %vm3116_vm12 = vcmp.eq.s32.totalorder %v3110_v56, %v11180_v60 }
 0x331   : > { %2955 = vmatprep.mubr.f32.mxu0 %v11130_v2 }
 0x334   : > { %6756 = vmatmul.mubr.msk.f32.gmra.mrb[152].mxu0 %vm490_vm9, %v11197_v47  ;;  %v3192_v47 = vsel %vm3178_vm13, %v3186_v13, 0.0  ;;  %vm3087_vm13 = vcmp.eq.s32.totalorder %v3078_v48, %v11180_v60  ;;  %v6762_v48 = vld [vmem:[%s7706_s7 + $0x260] sm:$0xff] }
 0x335   : > { %6757 = vmatprep.mubr.msk.f32.mxu0 %vm1589_vm1, %v9003_v30  ;;  %v3198_v36 = vadd.f32 %v3192_v47, %v3164_v33  ;;  %v3128_v33 = vsel %vm3114_vm5, %v3124_v41, 0.0  ;;  %v9137_v47 = vadd.f32 %v3126_v22, %v3098_v52  ;;  %v3101_v27 = vsel %vm3087_vm13, %v3092_v63, 0.0 }
 0x336   : > { %v9139_v7 = vadd.f32 %v3128_v33, %v3100_v45 }
 0x337   : > { %6776 = vmatprep.subr.msk.mxu1 %vm545_vm0, %v3198_v36  ;;  %v3120_v36 = vrot.slane %v9045_v14, %v11202_v50  ;;  %v3130_v14 = vsel %vm3116_vm12, %v3124_v41, 0.0  ;;  %v6759_v41 = vld [vmem:[%s7706_s7 + $0x248] sm:$0xff] }
 0x338   : > { %6777 = vmatpush1.msk.msra.mxu1 %vm545_vm0, %v3197_v18  ;;  %v7236_v51 = vpack.c.bf16 %v9139_v7, %v9137_v47  ;;  %v3099_v18 = vsel %vm3085_vm7, %v3092_v63, 0.0  ;;  %v6764_v63 = vld [vmem:[%s7706_s7 + $0x270] sm:$0xff]  ;;  %v9307_v47 = vld [vmem:[%s11024_s3 + $0x20] sm:$0xff]  ;;  %v9315_v7 = vld [vmem:[%s11024_s3 + $0x28] sm:$0xff] }
 0x339   : > { %v3125_v52 = vsel %vm3111_vm8, %v3120_v36, 0.0  ;;  %v3127_v45 = vsel %vm3113_vm10, %v3120_v36, 0.0  ;;  %6778 = vmatmul.mubr.msk.f32.vlgmr.msra.gmra.mrb[136].mxu1 %vm490_vm9, %v6758_v58  ;;  %v3129_v56 = vsel %vm3115_vm14, %v3120_v36, 0.0  ;;  %v6760_v58 = vld [vmem:[%s7706_s7 + $0x250] sm:$0xff]  ;;  %v6765_v36 = vld [vmem:[%s7706_s7 + $0x278] sm:$0xff]  ;;  %11204 = vst [vmem:[#allocation6_spill] sm:$0xff] %v9307_v47 }
 0x33a   : > { %v9151_v22 = vadd.f32 %v3125_v52, %v3097_v57  ;;  %v9153_v33 = vadd.f32 %v3127_v45, %v3099_v18  ;;  %v9163_v18 = vadd.f32 %v3130_v14, %v3102_v6  ;;  %3348 = vmatprep.mubr.f32.mxu1 %v11130_v2  ;;  %v9166_v40 = vadd.f32 %v3129_v56, %v3101_v27  ;;  %v6761_v6 = vld [vmem:[%s7706_s7 + $0x258] sm:$0xff]  ;;  %v6766_v52 = vld [vmem:[%s7706_s7 + $0x280] sm:$0xff]  ;;  %v6767_v45 = vld [vmem:[%s7706_s7 + $0x288] sm:$0xff] }
 0x33b   : > { %v6768_v14 = vld [vmem:[%s7706_s7 + $0x290] sm:$0xff]  ;;  %v6769_v27 = vld [vmem:[%s7706_s7 + $0x298] sm:$0xff]  ;;  %11205 = vst [vmem:[#allocation14_spill] sm:$0xff] %v9315_v7 }
 0x33c   : > { %v7238_v57 = vpack.c.bf16 %v9153_v33, %v9151_v22  ;;  %v9331_v22 = vld [vmem:[%s11024_s3 + $0x38] sm:$0xff]  ;;  %v9339_v33 = vld [vmem:[%s11024_s3 + $0x40] sm:$0xff] }
 0x33d   : > { %6779 = vmatmul.mubr.msk.f32.gmra.mrb[138].mxu1 %vm490_vm9, %v6759_v41  ;;  %v6770_v41 = vld [vmem:[%s7706_s7 + $0x2a0] sm:$0xff]  ;;  %11207 = vst [vmem:[#allocation16_spill] sm:$0xff] %v9331_v22  ;;  %11208 = vst [vmem:[#allocation15_spill] sm:$0xff] %v9339_v33 }
 0x33e   : > { %3354 = vmatprep.mubr.f32.mxu1 %v11130_v2 }
 0x341   : > { %6780 = vmatmul.mubr.msk.f32.gmra.mrb[140].mxu1 %vm490_vm9, %v6760_v58 }
 0x342   : > { %3360 = vmatprep.mubr.f32.mxu1 %v11130_v2 }
 0x345   : > { %6781 = vmatmul.mubr.msk.f32.gmra.mrb[142].mxu1 %vm490_vm9, %v6761_v6 }
 0x346   : > { %3366 = vmatprep.mubr.f32.mxu1 %v11130_v2 }
 0x349   : > { %6782 = vmatmul.mubr.msk.f32.gmra.mrb[144].mxu1 %vm490_vm9, %v6762_v48 }
 0x34a   : > { %3372 = vmatprep.mubr.f32.mxu1 %v11130_v2 }
 0x34d   : > { %6783 = vmatmul.mubr.msk.f32.gmra.mrb[146].mxu1 %vm490_vm9, %v6763_v28 }
 0x34e   : > { %3378 = vmatprep.mubr.f32.mxu1 %v11130_v2 }
 0x351   : > { %6784 = vmatmul.mubr.msk.f32.gmra.mrb[148].mxu1 %vm490_vm9, %v6764_v63  ;;  %v6771_v63 = vld [vmem:[%s7706_s7 + $0x2a8] sm:$0xff] }
 0x352   : > { %3384 = vmatprep.mubr.f32.mxu1 %v11130_v2 }
 0x355   : > { %6785 = vmatmul.mubr.msk.f32.gmra.mrb[150].mxu1 %vm490_vm9, %v6765_v36 }
 0x356   : > { %3390 = vmatprep.mubr.f32.mxu1 %v11130_v2 }
 0x359   : > { %6786 = vmatmul.mubr.msk.f32.gmra.mrb[152].mxu1 %vm490_vm9, %v6766_v52 }
 0x35a   : > { %3396 = vmatprep.mubr.f32.mxu1 %v11130_v2 }
 0x35d   : > { %6787 = vmatmul.mubr.msk.f32.gmra.mrb[154].mxu1 %vm490_vm9, %v6767_v45 }
 0x35e   : > { %3402 = vmatprep.mubr.f32.mxu1 %v11130_v2 }
 0x361   : > { %6788 = vmatmul.mubr.msk.f32.gmra.mrb[156].mxu1 %vm490_vm9, %v6768_v14 }
 0x362   : > { %3408 = vmatprep.mubr.f32.mxu1 %v11130_v2 }
 0x365   : > { %6789 = vmatmul.mubr.msk.f32.gmra.mrb[158].mxu1 %vm490_vm9, %v6769_v27 }
 0x366   : > { %3414 = vmatprep.mubr.f32.mxu1 %v11130_v2 }
 0x369   : > { %6790 = vmatmul.mubr.msk.f32.gmra.mrb[160].mxu1 %vm490_vm9, %v6770_v41 }
 0x36a   : > { %3420 = vmatprep.mubr.f32.mxu1 %v11130_v2 }
 0x36d   : > { %6791 = vmatmul.mubr.msk.f32.gmra.mrb[162].mxu1 %vm490_vm9, %v6771_v63 }
 0x36e   : > { %3426 = vmatprep.mubr.f32.mxu1 %v11130_v2 }
 0x371   : > { %v9104_v4 = vpop.f32.mrb[128].mxu1 }
 0x372   : > { %v9106_v25 = vpop.f32.mrb[129].mxu1 }
 0x376   : > { %v9108_v54 = vpop.f32.mrb[130].mxu1 }
 0x377   : > { %v9111_v17 = vpop.f32.mrb[131].mxu1 }
 0x37a   : > { %v9113_v55 = vpop.f32.mrb[132].mxu1 }
 0x37b   : > { %v9115_v13 = vpop.f32.mrb[133].mxu1 }
 0x37e   : > { %v9117_v62 = vpop.f32.mrb[134].mxu1 }
 0x37f   : > { %v9119_v21 = vpop.f32.mrb[135].mxu1 }
 0x3c3   : > { %v2855_v56 = vpop.f32.mrb[118].mxu0 }
 0x3c4   : > { %v2962_v58 = vmul.f32 %v2855_v56, %v9007_v29  ;;  %v2857_v6 = vpop.f32.mrb[119].mxu0  ;;  %v6772_v56 = vld [vmem:[%s7706_s7 + $0x2b0] sm:$0xff] }
 0x3c5   : > { %v2963_v48 = vmul.f32 %v2857_v6, %v9009_v20  ;;  %6792 = vmatmul.mubr.msk.f32.gmra.mrb[164].mxu1 %vm490_vm9, %v6772_v56 }
 0x3c6   : > { %3432 = vmatprep.mubr.f32.mxu1 %v11130_v2 }
 0x3c7   : > { %v2861_v28 = vpop.f32.mrb[120].mxu0 }
 0x3c8   : > { %v2964_v36 = vmul.f32 %v2861_v28, %v9011_v23  ;;  %v2863_v52 = vpop.f32.mrb[121].mxu0 }
 0x3c9   : > { %v2965_v45 = vmul.f32 %v2863_v52, %v9013_v31  ;;  %v6773_v31 = vld [vmem:[%s7706_s7 + $0x2b8] sm:$0xff] }
 0x3ca   : > { %v7198_v29 = vpack.c.bf16 %v2964_v36, %v2962_v58  ;;  %6793 = vmatmul.mubr.msk.f32.gmra.mrb[166].mxu1 %vm490_vm9, %v6773_v31 }
 0x3cb   : > { %v7196_v14 = vpack.c.bf16 %v2965_v45, %v2963_v48  ;;  %v2867_v27 = vpop.f32.mrb[122].mxu0  ;;  %3438 = vmatprep.mubr.f32.mxu1 %v11130_v2 }
 0x3cc   : > { %v2966_v20 = vmul.f32 %v2867_v27, %v9015_v44  ;;  %v2869_v41 = vpop.f32.mrb[123].mxu0 }
 0x3cd   : > { %v2967_v23 = vmul.f32 %v2869_v41, %v9017_v42  ;;  %7197 = vmatprep.subr.bf16.mxu0 %v7196_v14  ;;  %v6774_v42 = vld [vmem:[%s7706_s7 + $0x2c0] sm:$0xff]  ;;  %v6775_v14 = vld [vmem:[%s7706_s7 + $0x2c8] sm:$0xff] }
 0x3ce   : > { %7199 = vmatpush1.bf16.msra.mxu0 %v7198_v29  ;;  %6794 = vmatmul.mubr.msk.f32.gmra.mrb[168].mxu1 %vm490_vm9, %v6774_v42 }
 0x3cf   : > { %v2873_v6 = vpop.f32.mrb[124].mxu0  ;;  %3444 = vmatprep.mubr.f32.mxu1 %v11130_v2 }
 0x3d0   : > { %v2968_v28 = vmul.f32 %v2873_v6, %v9019_v9  ;;  %v2875_v58 = vpop.f32.mrb[125].mxu0 }
 0x3d1   : > { %v2969_v44 = vmul.f32 %v2875_v58, %v9021_v1 }
 0x3d2   : > { %v7202_v48 = vpack.c.bf16 %v2968_v28, %v2966_v20  ;;  %6795 = vmatmul.mubr.msk.f32.gmra.mrb[170].mxu1 %vm490_vm9, %v6775_v14 }
 0x3d3   : > { %v7200_v63 = vpack.c.bf16 %v2969_v44, %v2967_v23  ;;  %v2879_v36 = vpop.f32.mrb[126].mxu0  ;;  %4010 = vmatprep.mubr.f32.mxu1 %v11130_v2 }
 0x3d4   : > { %v2970_v52 = vmul.f32 %v2879_v36, %v9023_v46  ;;  %v2881_v45 = vpop.f32.mrb[127].mxu0 }
 0x3d5   : > { %v2971_v29 = vmul.f32 %v2881_v45, %v9039_v38  ;;  %7201 = vmatprep.subr.bf16.mxu0 %v7200_v63 }
 0x3d6   : > { %7203 = vmatpush1.bf16.msra.mxu0 %v7202_v48 }
 0x3d7   : > { %v2885_v9 = vpop.f32.mrb[128].mxu0 }
 0x3d8   : > { %v2972_v1 = vmul.f32 %v2885_v9, %v9055_v37  ;;  %v2887_v27 = vpop.f32.mrb[129].mxu0 }
 0x3d9   : > { %v2973_v56 = vmul.f32 %v2887_v27, %v9061_v10 }
 0x3da   : > { %v7206_v46 = vpack.c.bf16 %v2972_v1, %v2970_v52 }
 0x3db   : > { %v7204_v20 = vpack.c.bf16 %v2973_v56, %v2971_v29  ;;  %v2891_v41 = vpop.f32.mrb[130].mxu0 }
 0x3dc   : > { %v2974_v38 = vmul.f32 %v2891_v41, %v9067_v49  ;;  %v2893_v23 = vpop.f32.mrb[131].mxu0 }
 0x3dd   : > { %v2975_v6 = vmul.f32 %v2893_v23, %v9069_v34  ;;  %7205 = vmatprep.subr.bf16.mxu0 %v7204_v20 }
 0x3de   : > { %7207 = vmatpush1.bf16.msra.mxu0 %v7206_v46 }
 0x3df   : > { %v2897_v31 = vpop.f32.mrb[132].mxu0 }
 0x3e0   : > { %v2976_v37 = vmul.f32 %v2897_v31, %v9071_v19  ;;  %v2899_v28 = vpop.f32.mrb[133].mxu0 }
 0x3e1   : > { %v2977_v58 = vmul.f32 %v2899_v28, %v9073_v12 }
 0x3e2   : > { %v7210_v44 = vpack.c.bf16 %v2976_v37, %v2974_v38 }
 0x3e3   : > { %v7208_v10 = vpack.c.bf16 %v2977_v58, %v2975_v6  ;;  %v2903_v48 = vpop.f32.mrb[134].mxu0 }
 0x3e4   : > { %v2978_v63 = vmul.f32 %v2903_v48, %v9075_v61  ;;  %v2905_v36 = vpop.f32.mrb[135].mxu0 }
 0x3e5   : > { %v2979_v42 = vmul.f32 %v2905_v36, %v9077_v15  ;;  %7209 = vmatprep.subr.bf16.mxu0 %v7208_v10 }
 0x3e6   : > { %7211 = vmatpush1.bf16.msra.mxu0 %v7210_v44 }
 0x3e7   : > { %v2909_v49 = vpop.f32.mrb[136].mxu0 }
 0x3e8   : > { %v2980_v34 = vmul.f32 %v2909_v49, %v9079_v53  ;;  %v2911_v52 = vpop.f32.mrb[137].mxu0 }
 0x3e9   : > { %v2981_v45 = vmul.f32 %v2911_v52, %v9081_v43 }
 0x3ea   : > { %v7214_v19 = vpack.c.bf16 %v2980_v34, %v2978_v63 }
 0x3eb   : > { %v7212_v29 = vpack.c.bf16 %v2981_v45, %v2979_v42  ;;  %v2915_v9 = vpop.f32.mrb[138].mxu0  ;;  %v9371_v45 = vld [vmem:[%s11024_s3 + $0x60] sm:$0xff] }
 0x3ec   : > { %v2982_v12 = vmul.f32 %v2915_v9, %v9083_v11  ;;  %v2917_v14 = vpop.f32.mrb[139].mxu0  ;;  %11212 = vst [vmem:[#allocation20_spill] sm:$0xff] %v9371_v45  ;;  %v9395_v9 = vld [vmem:[%s11024_s3 + $0x78] sm:$0xff] }
 0x3ed   : > { %v2983_v1 = vmul.f32 %v2917_v14, %v9085_v16  ;;  %7213 = vmatprep.subr.bf16.mxu0 %v7212_v29  ;;  %v9387_v29 = vld [vmem:[%s11024_s3 + $0x70] sm:$0xff]  ;;  %11215 = vst [vmem:[#allocation23_spill] sm:$0xff] %v9395_v9  ;;  %v9411_v14 = vld [vmem:[%s11024_s3 + $0x88] sm:$0xff] }
 0x3ee   : > { %7215 = vmatpush1.bf16.msra.mxu0 %v7214_v19  ;;  %v9379_v19 = vld [vmem:[%s11024_s3 + $0x68] sm:$0xff]  ;;  %11214 = vst [vmem:[#allocation22_spill] sm:$0xff] %v9387_v29  ;;  %11217 = vst [vmem:[#allocation25_spill] sm:$0xff] %v9411_v14 }
 0x3ef   : > { %v2921_v61 = vpop.f32.mrb[140].mxu0  ;;  %11213 = vst [vmem:[#allocation21_spill] sm:$0xff] %v9379_v19 }
 0x3f0   : > { %v2984_v15 = vmul.f32 %v2921_v61, %v9087_v5  ;;  %v2923_v27 = vpop.f32.mrb[141].mxu0 }
 0x3f1   : > { %v2985_v56 = vmul.f32 %v2923_v27, %v9089_v8 }
 0x3f2   : > { %v7218_v53 = vpack.c.bf16 %v2984_v15, %v2982_v12  ;;  %v9403_v12 = vld [vmem:[%s11024_s3 + $0x80] sm:$0xff] }
 0x3f3   : > { %v7216_v46 = vpack.c.bf16 %v2985_v56, %v2983_v1  ;;  %v2927_v20 = vpop.f32.mrb[142].mxu0  ;;  %11216 = vst [vmem:[#allocation24_spill] sm:$0xff] %v9403_v12 }
 0x3f4   : > { %v2986_v43 = vmul.f32 %v2927_v20, %v9091_v3  ;;  %v2929_v41 = vpop.f32.mrb[143].mxu0 }
 0x3f5   : > { %v2987_v38 = vmul.f32 %v2929_v41, %v9093_v35  ;;  %7217 = vmatprep.subr.bf16.mxu0 %v7216_v46  ;;  %v9439_v41 = vld [vmem:[%s7663_s28 + $0x28] sm:$0xf0] }
 0x3f6   : > { %7219 = vmatpush1.bf16.msra.mxu0 %v7218_v53 }
 0x3f7   : > { %v2933_v11 = vpop.f32.mrb[144].mxu0 }
 0x3f8   : > { %v2988_v16 = vmul.f32 %v2933_v11, %v9095_v39  ;;  %v2935_v23 = vpop.f32.mrb[145].mxu0 }
 0x3f9   : > { %v2989_v6 = vmul.f32 %v2935_v23, %v9099_v59  ;;  %v11219_v23 = vld [vmem:[#allocation12_spill] sm:$0xff] }
 0x3fa   : > { %v7222_v5 = vpack.c.bf16 %v2988_v16, %v2986_v43 }
 0x3fb   : > { %v7220_v31 = vpack.c.bf16 %v2989_v6, %v2987_v38  ;;  %v2939_v37 = vpop.f32.mrb[146].mxu0  ;;  %v11218_v38 = vld [vmem:[#allocation11_spill] sm:$0xff] }
 0x3fc   : > { %v2990_v8 = vmul.f32 %v2939_v37, %v9104_v4  ;;  %v2941_v28 = vpop.f32.mrb[147].mxu0  ;;  %v3826_v16 = vrot.slane %v9439_v41, %v11218_v38  ;;  %v9452_v37 = vld [vmem:[%s7658_s25 + $0x20] sm:$0xf0] }
 0x3fd   : > { %v2991_v58 = vmul.f32 %v2941_v28, %v9106_v25  ;;  %7221 = vmatprep.subr.bf16.mxu0 %v7220_v31  ;;  %v3808_v28 = vrot.slane %v9452_v37, %v11218_v38 }
 0x3fe   : > { %7223 = vmatpush1.bf16.msra.mxu0 %v7222_v5  ;;  %v3854_v5 = vrot.slane %v9439_v41, %v11219_v23 }
 0x3ff   : > { %v2945_v3 = vpop.f32.mrb[148].mxu0  ;;  %vm3813_vm5 = vcmp.eq.s32.totalorder %v3808_v28, %v11178_v0  ;;  %vm3815_vm6 = vcmp.eq.s32.totalorder %v3808_v28, %v11200_v26  ;;  %vm3817_vm12 = vcmp.eq.s32.totalorder %v3808_v28, %v11180_v60 }
 0x400   : > { %v2992_v35 = vmul.f32 %v2945_v3, %v9108_v54  ;;  %v2947_v44 = vpop.f32.mrb[149].mxu0  ;;  %v3836_v3 = vrot.slane %v9452_v37, %v11219_v23 }
 0x401   : > { %v2993_v10 = vmul.f32 %v2947_v44, %v9111_v17  ;;  %v9261_v17 = vld [vmem:[%s11025_s4] sm:$0xff] }
 0x402   : > { %v7226_v39 = vpack.c.bf16 %v2992_v35, %v2990_v8  ;;  %v9455_v8 = vld [vmem:[%s7663_s28 + $0x20] sm:$0xf0]  ;;  %vm3841_vm7 = vcmp.eq.s32.totalorder %v3836_v3, %v11178_v0  ;;  %vm3843_vm8 = vcmp.eq.s32.totalorder %v3836_v3, %v11200_v26  ;;  %vm3845_vm13 = vcmp.eq.s32.totalorder %v3836_v3, %v11180_v60 }
 0x403   : > { %v7224_v48 = vpack.c.bf16 %v2993_v10, %v2991_v58  ;;  %v2951_v63 = vpop.f32.mrb[150].mxu0  ;;  %v3822_v58 = vrot.slane %v9455_v8, %v11218_v38  ;;  %v3850_v35 = vrot.slane %v9455_v8, %v11219_v23  ;;  %v3774_v3 = vrot.slane %v9452_v37, %v11182_v24 }
 0x404   : > { %v2994_v59 = vmul.f32 %v2951_v63, %v9113_v55  ;;  %v2953_v36 = vpop.f32.mrb[151].mxu0  ;;  %v9275_v55 = vld [vmem:[%s11024_s3] sm:$0xff] }
 0x405   : > { %v2995_v42 = vmul.f32 %v2953_v36, %v9115_v13  ;;  %7225 = vmatprep.subr.bf16.mxu0 %v7224_v48  ;;  %v9283_v13 = vld [vmem:[%s11024_s3 + $0x8] sm:$0xff] }
 0x406   : > { %7227 = vmatpush1.bf16.msra.mxu0 %v7226_v39 }
 0x407   : > { %v2957_v4 = vpop.f32.mrb[152].mxu0 }
 0x408   : > { %v2996_v25 = vmul.f32 %v2957_v4, %v9117_v62  ;;  %v2959_v49 = vpop.f32.mrb[153].mxu0  ;;  %v9291_v62 = vld [vmem:[%s11024_s3 + $0x10] sm:$0xff]  ;;  %v3827_v4 = vsel %vm3813_vm5, %v3822_v58, 0.0 }
 0x409   : > { %v2997_v34 = vmul.f32 %v2959_v49, %v9119_v21  ;;  %v9299_v21 = vld [vmem:[%s11024_s3 + $0x18] sm:$0xff] }
 0x40a   : > { %v7230_v54 = vpack.c.bf16 %v2996_v25, %v2994_v59  ;;  %11203 = vst [vmem:[#allocation2_spill] sm:$0xff] %v9299_v21  ;;  %v3829_v25 = vsel %vm3815_vm6, %v3822_v58, 0.0  ;;  %vm3779_vm6 = vcmp.eq.s32.totalorder %v3774_v3, %v11178_v0 }
 0x40b   : > { %v7228_v52 = vpack.c.bf16 %v2997_v34, %v2995_v42  ;;  %v3855_v34 = vsel %vm3841_vm7, %v3850_v35, 0.0  ;;  %vm3781_vm7 = vcmp.eq.s32.totalorder %v3774_v3, %v11200_v26 }
 0x40c   : > { %v9417_v1 = vpop.f32.mrb[136].mxu1 }
 0x40d   : > { %7229 = vmatprep.subr.bf16.mxu0 %v7228_v52  ;;  %v9419_v61 = vpop.f32.mrb[137].mxu1  ;;  %v3861_v52 = vadd.f32 %v3855_v34, %v3827_v4 }
 0x40e   : > { %7231 = vmatpush1.bf16.msra.mxu0 %v7230_v54  ;;  %v3857_v54 = vsel %vm3843_vm8, %v3850_v35, 0.0 }
 0x40f   : > { %7237 = vmatprep.subr.bf16.mxu0 %v7236_v51  ;;  %v9323_v51 = vld [vmem:[%s11024_s3 + $0x30] sm:$0xff] }
 0x410   : > { %11206 = vst [vmem:[#allocation13_spill] sm:$0xff] %v9323_v51  ;;  %v9421_v15 = vpop.f32.mrb[138].mxu1 }
 0x411   : > { %3063 = vmatmul.mubr.f32.vlgmr.msra.gmra.mrb[80].mxu0 %v9261_v17  ;;  %v9423_v27 = vpop.f32.mrb[139].mxu1 }
 0x412   : > { %7239 = vmatpush1.bf16.msra.mxu0 %v7238_v57  ;;  %3521 = vmatprep.mubr.f32.mxu0 %v11130_v2  ;;  %v9347_v57 = vld [vmem:[%s11024_s3 + $0x48] sm:$0xff] }
 0x413   : > { %6796 = vmatprep.subr.msk.mxu0 %vm545_vm0, %v9163_v18  ;;  %11209 = vst [vmem:[#allocation18_spill] sm:$0xff] %v9347_v57  ;;  %v9355_v18 = vld [vmem:[%s11024_s3 + $0x50] sm:$0xff] }
 0x414   : > { %11210 = vst [vmem:[#allocation17_spill] sm:$0xff] %v9355_v18  ;;  %v9425_v56 = vpop.f32.mrb[140].mxu1 }
 0x415   : > { %v9427_v53 = vpop.f32.mrb[141].mxu1 }
 0x416   : > { %6797 = vmatpush1.msk.msra.mxu0 %vm545_vm0, %v9166_v40  ;;  %v9363_v40 = vld [vmem:[%s11024_s3 + $0x58] sm:$0xff] }
 0x417   : > { %6798 = vmatmul.mubr.msk.f32.vlgmr.msra.gmra.mrb[154].mxu0 %vm490_vm9, %v9275_v55  ;;  %11211 = vst [vmem:[#allocation19_spill] sm:$0xff] %v9363_v40 }
 0x418   : > { %3527 = vmatprep.mubr.f32.mxu0 %v11130_v2  ;;  %v9429_v46 = vpop.f32.mrb[142].mxu1 }
 0x419   : > { %v9431_v20 = vpop.f32.mrb[143].mxu1 }
 0x41b   : > { %6799 = vmatmul.mubr.msk.f32.gmra.mrb[156].mxu0 %vm490_vm9, %v9283_v13 }
 0x41c   : > { %3533 = vmatprep.mubr.f32.mxu0 %v11130_v2  ;;  %v9433_v43 = vpop.f32.mrb[144].mxu1 }
 0x41d   : > { %v9449_v31 = vpop.f32.mrb[145].mxu1 }
 0x41f   : > { %6800 = vmatmul.mubr.msk.f32.gmra.mrb[158].mxu0 %vm490_vm9, %v9291_v62 }
 0x420   : > { %3539 = vmatprep.mubr.f32.mxu0 %v11130_v2  ;;  %v9465_v44 = vpop.f32.mrb[146].mxu1 }
 0x421   : > { %v9471_v10 = vpop.f32.mrb[147].mxu1 }
 0x423   : > { %6801 = vmatmul.mubr.msk.f32.gmra.mrb[160].mxu0 %vm490_vm9, %v9299_v21 }
 0x424   : > { %3545 = vmatprep.mubr.f32.mxu0 %v11130_v2 }
 0x427   : > { %6802 = vmatmul.mubr.msk.f32.gmra.mrb[162].mxu0 %vm490_vm9, %v9307_v47 }
 0x428   : > { %3551 = vmatprep.mubr.f32.mxu0 %v11130_v2 }
 0x42b   : > { %6803 = vmatmul.mubr.msk.f32.gmra.mrb[164].mxu0 %vm490_vm9, %v9315_v7 }
 0x42c   : > { %3557 = vmatprep.mubr.f32.mxu0 %v11130_v2 }
 0x42f   : > { %6804 = vmatmul.mubr.msk.f32.gmra.mrb[166].mxu0 %vm490_vm9, %v9323_v51  ;;  %v3788_v51 = vrot.slane %v9455_v8, %v11182_v24 }
 0x430   : > { %3563 = vmatprep.mubr.f32.mxu0 %v11130_v2 }
 0x431   : > { %v3795_v7 = vsel %vm3781_vm7, %v3788_v51, 0.0 }
 0x433   : > { %6805 = vmatmul.mubr.msk.f32.gmra.mrb[168].mxu0 %vm490_vm9, %v9331_v22 }
 0x434   : > { %3569 = vmatprep.mubr.f32.mxu0 %v11130_v2 }
 0x437   : > { %6806 = vmatmul.mubr.msk.f32.gmra.mrb[170].mxu0 %vm490_vm9, %v9339_v33 }
 0x438   : > { %3575 = vmatprep.mubr.f32.mxu0 %v11130_v2 }
 0x43b   : > { %6807 = vmatmul.mubr.msk.f32.gmra.mrb[172].mxu0 %vm490_vm9, %v9347_v57 }
 0x43c   : > { %3581 = vmatprep.mubr.f32.mxu0 %v11130_v2 }
 0x43f   : > { %6808 = vmatmul.mubr.msk.f32.gmra.mrb[174].mxu0 %vm490_vm9, %v9355_v18 }
 0x440   : > { %3587 = vmatprep.mubr.f32.mxu0 %v11130_v2 }
 0x443   : > { %6809 = vmatmul.mubr.msk.f32.gmra.mrb[176].mxu0 %vm490_vm9, %v9363_v40 }
 0x444   : > { %3593 = vmatprep.mubr.f32.mxu0 %v11130_v2 }
 0x447   : > { %6810 = vmatmul.mubr.msk.f32.gmra.mrb[178].mxu0 %vm490_vm9, %v9371_v45 }
 0x448   : > { %3599 = vmatprep.mubr.f32.mxu0 %v11130_v2 }
 0x44b   : > { %6811 = vmatmul.mubr.msk.f32.gmra.mrb[180].mxu0 %vm490_vm9, %v9379_v19  ;;  %v3859_v19 = vsel %vm3845_vm13, %v3850_v35, 0.0 }
 0x44c   : > { %3605 = vmatprep.mubr.f32.mxu0 %v11130_v2 }
 0x44f   : > { %6812 = vmatmul.mubr.msk.f32.gmra.mrb[182].mxu0 %vm490_vm9, %v9387_v29  ;;  %v3831_v29 = vsel %vm3817_vm12, %v3822_v58, 0.0  ;;  %vm3783_vm12 = vcmp.eq.s32.totalorder %v3774_v3, %v11180_v60  ;;  %v6823_v3 = vld [vmem:[%s7706_s7 + $0x300] sm:$0xff] }
 0x450   : > { %3611 = vmatprep.mubr.f32.mxu0 %v11130_v2  ;;  %v3865_v40 = vadd.f32 %v3859_v19, %v3831_v29 }
 0x453   : > { %6813 = vmatmul.mubr.msk.f32.gmra.mrb[184].mxu0 %vm490_vm9, %v9395_v9 }
 0x454   : > { %3617 = vmatprep.mubr.f32.mxu0 %v11130_v2 }
 0x457   : > { %6814 = vmatmul.mubr.msk.f32.gmra.mrb[186].mxu0 %vm490_vm9, %v9403_v12 }
 0x458   : > { %3623 = vmatprep.mubr.f32.mxu0 %v11130_v2 }
 0x45b   : > { %6815 = vmatmul.mubr.msk.f32.gmra.mrb[188].mxu0 %vm490_vm9, %v9411_v14 }
 0x45c   : > { %6816 = vmatprep.mubr.msk.f32.mxu0 %vm1589_vm1, %v9003_v30  ;;  %v9436_v30 = vld [vmem:[%s7658_s25 + $0x28] sm:$0xf0] }
 0x45d   : > { %v3812_v11 = vrot.slane %v9436_v30, %v11218_v38  ;;  %v3840_v6 = vrot.slane %v9436_v30, %v11219_v23  ;;  %v3863_v23 = vadd.f32 %v3857_v54, %v3829_v25  ;;  %v9477_v38 = vpop.f32.mrb[148].mxu1  ;;  %v3778_v19 = vrot.slane %v9436_v30, %v11182_v24 }
 0x45f   : > { %vm3814_vm15 = vcmp.eq.s32.totalorder %v3812_v11, %v11178_v0  ;;  %vm3816_vm2 = vcmp.eq.s32.totalorder %v3812_v11, %v11200_v26  ;;  %vm3842_vm3 = vcmp.eq.s32.totalorder %v3840_v6, %v11178_v0  ;;  %vm3844_vm4 = vcmp.eq.s32.totalorder %v3840_v6, %v11200_v26 }
 0x460   : > { %v3828_v39 = vsel %vm3814_vm15, %v3826_v16, 0.0  ;;  %v3830_v48 = vsel %vm3816_vm2, %v3826_v16, 0.0  ;;  %v3856_v63 = vsel %vm3842_vm3, %v3854_v5, 0.0  ;;  %v3858_v59 = vsel %vm3844_vm4, %v3854_v5, 0.0 }
 0x461   : > { %v3862_v36 = vadd.f32 %v3856_v63, %v3828_v39  ;;  %v3864_v42 = vadd.f32 %v3858_v59, %v3830_v48  ;;  %v9479_v39 = vpop.f32.mrb[149].mxu1  ;;  %v7278_v48 = vpack.c.bf16 %v3863_v23, %v3861_v52  ;;  %vm3818_vm10 = vcmp.eq.s32.totalorder %v3812_v11, %v11180_v60 }
 0x462   : > { %v9481_v63 = vpop.f32.mrb[150].mxu1  ;;  %vm3846_vm11 = vcmp.eq.s32.totalorder %v3840_v6, %v11180_v60  ;;  %v3832_v14 = vsel %vm3818_vm10, %v3826_v16, 0.0  ;;  %vm3780_vm2 = vcmp.eq.s32.totalorder %v3778_v19, %v11178_v0  ;;  %vm3782_vm3 = vcmp.eq.s32.totalorder %v3778_v19, %v11200_v26 }
 0x463   : > { %v7276_v49 = vpack.c.bf16 %v3864_v42, %v3862_v36  ;;  %v9483_v59 = vpop.f32.mrb[151].mxu1  ;;  %v3860_v12 = vsel %vm3846_vm11, %v3854_v5, 0.0  ;;  %v11220_v5 = vld [vmem:[#allocation9_spill] sm:$0xff]  ;;  %vm3784_vm10 = vcmp.eq.s32.totalorder %v3778_v19, %v11180_v60  ;;  %v3797_v19 = vsel %vm3783_vm12, %v3788_v51, 0.0 }
 0x464   : > { %v9485_v50 = vpop.f32.mrb[152].mxu1  ;;  %v3866_v9 = vadd.f32 %v3860_v12, %v3832_v14  ;;  %v3750_v28 = vrot.slane %v9436_v30, %v11220_v5  ;;  %v3764_v29 = vrot.slane %v9439_v41, %v11220_v5  ;;  %v3746_v58 = vrot.slane %v9452_v37, %v11220_v5 }
 0x465   : > { %7277 = vmatprep.subr.bf16.mxu1 %v7276_v49  ;;  %v9487_v32 = vpop.f32.mrb[153].mxu1  ;;  %v3760_v37 = vrot.slane %v9455_v8, %v11220_v5  ;;  %v6817_v5 = vld [vmem:[%s7706_s7 + $0x2d0] sm:$0xff] }
 0x466   : > { %7279 = vmatpush1.bf16.msra.mxu1 %v7278_v48  ;;  %v9489_v36 = vpop.f32.mrb[154].mxu1  ;;  %vm3752_vm14 = vcmp.eq.s32.totalorder %v3750_v28, %v11178_v0  ;;  %vm3754_vm15 = vcmp.eq.s32.totalorder %v3750_v28, %v11200_v26  ;;  %vm3751_vm4 = vcmp.eq.s32.totalorder %v3746_v58, %v11178_v0  ;;  %vm3753_vm5 = vcmp.eq.s32.totalorder %v3746_v58, %v11200_v26 }
 0x467   : > { %v9491_v42 = vpop.f32.mrb[155].mxu1  ;;  %6835 = vmatprep.subr.msk.mxu1 %vm545_vm0, %v3866_v9  ;;  %v3766_v30 = vsel %vm3752_vm14, %v3764_v29, 0.0  ;;  %v3768_v35 = vsel %vm3754_vm15, %v3764_v29, 0.0  ;;  %vm3756_vm8 = vcmp.eq.s32.totalorder %v3750_v28, %v11180_v60  ;;  %vm3755_vm11 = vcmp.eq.s32.totalorder %v3746_v58, %v11180_v60  ;;  %v6822_v58 = vld [vmem:[%s7706_s7 + $0x2f8] sm:$0xff] }
 0x468   : > { %v9493_v4 = vpop.f32.mrb[156].mxu1  ;;  %v3770_v26 = vsel %vm3756_vm8, %v3764_v29, 0.0  ;;  %v3769_v28 = vsel %vm3755_vm11, %v3760_v37, 0.0 }
 0x469   : > { %v9495_v25 = vpop.f32.mrb[157].mxu1  ;;  %v9576_v29 = vadd.f32 %v3797_v19, %v3769_v28  ;;  %v6828_v28 = vld [vmem:[%s7706_s7 + $0x328] sm:$0xff] }
 0x46a   : > { %v9497_v49 = vpop.f32.mrb[158].mxu1  ;;  %6836 = vmatpush1.msk.msra.mxu1 %vm545_vm0, %v3865_v40  ;;  %v3792_v40 = vrot.slane %v9439_v41, %v11182_v24  ;;  %v6876_v24 = vld [vmem:[%s7706_s7 + $0x360] sm:$0xff] }
 0x46b   : > { %v9499_v23 = vpop.f32.mrb[159].mxu1  ;;  %6837 = vmatmul.mubr.msk.f32.vlgmr.msra.gmra.mrb[172].mxu1 %vm490_vm9, %v6817_v5  ;;  %v6819_v5 = vld [vmem:[%s7706_s7 + $0x2e0] sm:$0xff] }
 0x46c   : > { %v9501_v34 = vpop.f32.mrb[160].mxu1  ;;  %v3794_v57 = vsel %vm3780_vm2, %v3792_v40, 0.0  ;;  %v3796_v33 = vsel %vm3782_vm3, %v3792_v40, 0.0  ;;  %v3798_v8 = vsel %vm3784_vm10, %v3792_v40, 0.0  ;;  %4016 = vmatprep.mubr.f32.mxu1 %v11130_v2  ;;  %v6818_v40 = vld [vmem:[%s7706_s7 + $0x2d8] sm:$0xff] }
 0x46d   : > { %v9503_v54 = vpop.f32.mrb[161].mxu1  ;;  %v9547_v22 = vadd.f32 %v3794_v57, %v3766_v30  ;;  %v9549_v41 = vadd.f32 %v3796_v33, %v3768_v35  ;;  %v3765_v33 = vsel %vm3751_vm4, %v3760_v37, 0.0  ;;  %v3767_v30 = vsel %vm3753_vm5, %v3760_v37, 0.0  ;;  %v6824_v37 = vld [vmem:[%s7706_s7 + $0x308] sm:$0xff] }
 0x46e   : > { %v9505_v52 = vpop.f32.mrb[162].mxu1  ;;  %v3793_v35 = vsel %vm3779_vm6, %v3788_v51, 0.0  ;;  %v9563_v21 = vadd.f32 %v3795_v7, %v3767_v30  ;;  %v6821_v51 = vld [vmem:[%s7706_s7 + $0x2f0] sm:$0xff] }
 0x46f   : > { %v9509_v48 = vpop.f32.mrb[163].mxu1  ;;  %v7280_v57 = vpack.c.bf16 %v9549_v41, %v9547_v22  ;;  %v9561_v47 = vadd.f32 %v3793_v35, %v3765_v33  ;;  %v9573_v33 = vadd.f32 %v3798_v8, %v3770_v26  ;;  %6838 = vmatmul.mubr.msk.f32.gmra.mrb[174].mxu1 %vm490_vm9, %v6818_v40  ;;  %v6820_v26 = vld [vmem:[%s7706_s7 + $0x2e8] sm:$0xff]  ;;  %v6825_v30 = vld [vmem:[%s7706_s7 + $0x310] sm:$0xff]  ;;  %v6826_v35 = vld [vmem:[%s7706_s7 + $0x318] sm:$0xff] }
 0x470   : > { %4022 = vmatprep.mubr.f32.mxu1 %v11130_v2  ;;  %v6827_v8 = vld [vmem:[%s7706_s7 + $0x320] sm:$0xff]  ;;  %v6829_v40 = vld [vmem:[%s7706_s7 + $0x330] sm:$0xff]  ;;  %v11233_v41 = vld [vmem:[#allocation23_spill] sm:$0xff] }
 0x471   : > { %v7282_v7 = vpack.c.bf16 %v9563_v21, %v9561_v47  ;;  %v11222_v21 = vld [vmem:[#allocation6_spill] sm:$0xff]  ;;  %v11226_v47 = vld [vmem:[#allocation15_spill] sm:$0xff] }
 0x472   : > { %v11227_v22 = vld [vmem:[#allocation18_spill] sm:$0xff] }
 0x473   : > { %6839 = vmatmul.mubr.msk.f32.gmra.mrb[176].mxu1 %vm490_vm9, %v6819_v5 }
 0x474   : > { %4028 = vmatprep.mubr.f32.mxu1 %v11130_v2 }
 0x477   : > { %6840 = vmatmul.mubr.msk.f32.gmra.mrb[178].mxu1 %vm490_vm9, %v6820_v26 }
 0x478   : > { %4034 = vmatprep.mubr.f32.mxu1 %v11130_v2 }
 0x47b   : > { %6841 = vmatmul.mubr.msk.f32.gmra.mrb[180].mxu1 %vm490_vm9, %v6821_v51 }
 0x47c   : > { %4040 = vmatprep.mubr.f32.mxu1 %v11130_v2 }
 0x47f   : > { %6842 = vmatmul.mubr.msk.f32.gmra.mrb[182].mxu1 %vm490_vm9, %v6822_v58 }
 0x480   : > { %4046 = vmatprep.mubr.f32.mxu1 %v11130_v2 }
 0x483   : > { %6843 = vmatmul.mubr.msk.f32.gmra.mrb[184].mxu1 %vm490_vm9, %v6823_v3  ;;  %v6830_v3 = vld [vmem:[%s7706_s7 + $0x338] sm:$0xff] }
 0x484   : > { %4052 = vmatprep.mubr.f32.mxu1 %v11130_v2 }
 0x487   : > { %6844 = vmatmul.mubr.msk.f32.gmra.mrb[186].mxu1 %vm490_vm9, %v6824_v37 }
 0x488   : > { %4058 = vmatprep.mubr.f32.mxu1 %v11130_v2 }
 0x48b   : > { %6845 = vmatmul.mubr.msk.f32.gmra.mrb[188].mxu1 %vm490_vm9, %v6825_v30 }
 0x48c   : > { %4064 = vmatprep.mubr.f32.mxu1 %v11130_v2 }
 0x48f   : > { %6846 = vmatmul.mubr.msk.f32.gmra.mrb[190].mxu1 %vm490_vm9, %v6826_v35 }
 0x490   : > { %4070 = vmatprep.mubr.f32.mxu1 %v11130_v2 }
 0x493   : > { %6847 = vmatmul.mubr.msk.f32.gmra.mrb[192].mxu1 %vm490_vm9, %v6827_v8 }
 0x494   : > { %4076 = vmatprep.mubr.f32.mxu1 %v11130_v2 }
 0x497   : > { %6848 = vmatmul.mubr.msk.f32.gmra.mrb[194].mxu1 %vm490_vm9, %v6828_v28 }
 0x498   : > { %v9514_v45 = vpop.f32.mrb[164].mxu1  ;;  %4082 = vmatprep.mubr.f32.mxu1 %v11130_v2 }
 0x499   : > { %v9516_v18 = vpop.f32.mrb[165].mxu1 }
 0x49b   : > { %6849 = vmatmul.mubr.msk.f32.gmra.mrb[196].mxu1 %vm490_vm9, %v6829_v40 }
 0x49c   : > { %4088 = vmatprep.mubr.f32.mxu1 %v11130_v2 }
 0x49d   : > { %v9518_v11 = vpop.f32.mrb[166].mxu1 }
 0x49e   : > { %v9521_v16 = vpop.f32.mrb[167].mxu1 }
 0x49f   : > { %6850 = vmatmul.mubr.msk.f32.gmra.mrb[198].mxu1 %vm490_vm9, %v6830_v3 }
 0x4a0   : > { %4094 = vmatprep.mubr.f32.mxu1 %v11130_v2 }
 0x4a1   : > { %v9523_v12 = vpop.f32.mrb[168].mxu1 }
 0x4a2   : > { %v9525_v9 = vpop.f32.mrb[169].mxu1 }
 0x4a5   : > { %v9527_v14 = vpop.f32.mrb[170].mxu1 }
 0x4a6   : > { %v9529_v6 = vpop.f32.mrb[171].mxu1 }
 0x4ea   : > { %v3523_v19 = vpop.f32.mrb[154].mxu0 }
 0x4eb   : > { %v3630_v5 = vmul.f32 %v3523_v19, %v9417_v1  ;;  %v3525_v26 = vpop.f32.mrb[155].mxu0  ;;  %v6831_v19 = vld [vmem:[%s7706_s7 + $0x340] sm:$0xff] }
 0x4ec   : > { %v3631_v51 = vmul.f32 %v3525_v26, %v9419_v61  ;;  %6851 = vmatmul.mubr.msk.f32.gmra.mrb[200].mxu1 %vm490_vm9, %v6831_v19 }
 0x4ed   : > { %4100 = vmatprep.mubr.f32.mxu1 %v11130_v2 }
 0x4ee   : > { %v3529_v58 = vpop.f32.mrb[156].mxu0 }
 0x4ef   : > { %v3632_v37 = vmul.f32 %v3529_v58, %v9421_v15  ;;  %v3531_v30 = vpop.f32.mrb[157].mxu0 }
 0x4f0   : > { %v3633_v35 = vmul.f32 %v3531_v30, %v9423_v27  ;;  %v6832_v27 = vld [vmem:[%s7706_s7 + $0x348] sm:$0xff] }
 0x4f1   : > { %v7242_v1 = vpack.c.bf16 %v3632_v37, %v3630_v5  ;;  %6852 = vmatmul.mubr.msk.f32.gmra.mrb[202].mxu1 %vm490_vm9, %v6832_v27 }
 0x4f2   : > { %v7240_v8 = vpack.c.bf16 %v3633_v35, %v3631_v51  ;;  %v3535_v28 = vpop.f32.mrb[158].mxu0  ;;  %4106 = vmatprep.mubr.f32.mxu1 %v11130_v2 }
 0x4f3   : > { %v3634_v61 = vmul.f32 %v3535_v28, %v9425_v56  ;;  %v3537_v40 = vpop.f32.mrb[159].mxu0 }
 0x4f4   : > { %v3635_v15 = vmul.f32 %v3537_v40, %v9427_v53  ;;  %7241 = vmatprep.subr.bf16.mxu0 %v7240_v8  ;;  %v6833_v53 = vld [vmem:[%s7706_s7 + $0x350] sm:$0xff]  ;;  %v6834_v8 = vld [vmem:[%s7706_s7 + $0x358] sm:$0xff] }
 0x4f5   : > { %7243 = vmatpush1.bf16.msra.mxu0 %v7242_v1  ;;  %6853 = vmatmul.mubr.msk.f32.gmra.mrb[204].mxu1 %vm490_vm9, %v6833_v53 }
 0x4f6   : > { %v3541_v26 = vpop.f32.mrb[160].mxu0  ;;  %4112 = vmatprep.mubr.f32.mxu1 %v11130_v2 }
 0x4f7   : > { %v3636_v58 = vmul.f32 %v3541_v26, %v9429_v46  ;;  %v3543_v5 = vpop.f32.mrb[161].mxu0 }
 0x4f8   : > { %v3637_v56 = vmul.f32 %v3543_v5, %v9431_v20 }
 0x4f9   : > { %v7246_v51 = vpack.c.bf16 %v3636_v58, %v3634_v61  ;;  %6854 = vmatmul.mubr.msk.f32.gmra.mrb[206].mxu1 %vm490_vm9, %v6834_v8 }
 0x4fa   : > { %v7244_v3 = vpack.c.bf16 %v3637_v56, %v3635_v15  ;;  %v3547_v37 = vpop.f32.mrb[162].mxu0  ;;  %4678 = vmatprep.mubr.f32.mxu1 %v11130_v2 }
 0x4fb   : > { %v3638_v30 = vmul.f32 %v3547_v37, %v9433_v43  ;;  %v3549_v35 = vpop.f32.mrb[163].mxu0 }
 0x4fc   : > { %v3639_v1 = vmul.f32 %v3549_v35, %v9449_v31  ;;  %7245 = vmatprep.subr.bf16.mxu0 %v7244_v3 }
 0x4fd   : > { %7247 = vmatpush1.bf16.msra.mxu0 %v7246_v51 }
 0x4fe   : > { %v3553_v46 = vpop.f32.mrb[164].mxu0 }
 0x4ff   : > { %v3640_v20 = vmul.f32 %v3553_v46, %v9465_v44  ;;  %v3555_v28 = vpop.f32.mrb[165].mxu0 }
 0x500   : > { %v3641_v19 = vmul.f32 %v3555_v28, %v9471_v10 }
 0x501   : > { %v7250_v43 = vpack.c.bf16 %v3640_v20, %v3638_v30 }
 0x502   : > { %v7248_v61 = vpack.c.bf16 %v3641_v19, %v3639_v1  ;;  %v3559_v40 = vpop.f32.mrb[166].mxu0 }
 0x503   : > { %v3642_v31 = vmul.f32 %v3559_v40, %v9477_v38  ;;  %v3561_v15 = vpop.f32.mrb[167].mxu0 }
 0x504   : > { %v3643_v26 = vmul.f32 %v3561_v15, %v9479_v39  ;;  %7249 = vmatprep.subr.bf16.mxu0 %v7248_v61 }
 0x505   : > { %7251 = vmatpush1.bf16.msra.mxu0 %v7250_v43 }
 0x506   : > { %v3565_v27 = vpop.f32.mrb[168].mxu0 }
 0x507   : > { %v3644_v44 = vmul.f32 %v3565_v27, %v9481_v63  ;;  %v3567_v58 = vpop.f32.mrb[169].mxu0 }
 0x508   : > { %v3645_v5 = vmul.f32 %v3567_v58, %v9483_v59 }
 0x509   : > { %v7254_v56 = vpack.c.bf16 %v3644_v44, %v3642_v31 }
 0x50a   : > { %v7252_v10 = vpack.c.bf16 %v3645_v5, %v3643_v26  ;;  %v3571_v51 = vpop.f32.mrb[170].mxu0 }
 0x50b   : > { %v3646_v3 = vmul.f32 %v3571_v51, %v9485_v50  ;;  %v3573_v37 = vpop.f32.mrb[171].mxu0 }
 0x50c   : > { %v3647_v53 = vmul.f32 %v3573_v37, %v9487_v32  ;;  %7253 = vmatprep.subr.bf16.mxu0 %v7252_v10 }
 0x50d   : > { %7255 = vmatpush1.bf16.msra.mxu0 %v7254_v56 }
 0x50e   : > { %v3577_v38 = vpop.f32.mrb[172].mxu0 }
 0x50f   : > { %v3648_v39 = vmul.f32 %v3577_v38, %v9489_v36  ;;  %v3579_v30 = vpop.f32.mrb[173].mxu0 }
 0x510   : > { %v3649_v35 = vmul.f32 %v3579_v30, %v9491_v42 }
 0x511   : > { %v7258_v63 = vpack.c.bf16 %v3648_v39, %v3646_v3 }
 0x512   : > { %v7256_v1 = vpack.c.bf16 %v3649_v35, %v3647_v53  ;;  %v3583_v46 = vpop.f32.mrb[174].mxu0 }
 0x513   : > { %v3650_v59 = vmul.f32 %v3583_v46, %v9493_v4  ;;  %v3585_v8 = vpop.f32.mrb[175].mxu0 }
 0x514   : > { %v3651_v20 = vmul.f32 %v3585_v8, %v9495_v25  ;;  %7257 = vmatprep.subr.bf16.mxu0 %v7256_v1 }
 0x515   : > { %7259 = vmatpush1.bf16.msra.mxu0 %v7258_v63 }
 0x516   : > { %v3589_v50 = vpop.f32.mrb[176].mxu0 }
 0x517   : > { %v3652_v32 = vmul.f32 %v3589_v50, %v9497_v49  ;;  %v3591_v28 = vpop.f32.mrb[177].mxu0 }
 0x518   : > { %v3653_v19 = vmul.f32 %v3591_v28, %v9499_v23  ;;  %v9759_v28 = vld [vmem:[%s7663_s28 + $0x38] sm:$0xf] }
 0x519   : > { %v7262_v36 = vpack.c.bf16 %v3652_v32, %v3650_v59  ;;  %v9756_v32 = vld [vmem:[%s7658_s25 + $0x38] sm:$0xf] }
 0x51a   : > { %v7260_v43 = vpack.c.bf16 %v3653_v19, %v3651_v20  ;;  %v3595_v61 = vpop.f32.mrb[178].mxu0  ;;  %v11236_v19 = vld [vmem:[#allocation3_spill] sm:$0xff] }
 0x51b   : > { %v3654_v42 = vmul.f32 %v3595_v61, %v9501_v34  ;;  %v3597_v40 = vpop.f32.mrb[179].mxu0  ;;  %v11237_v61 = vld [vmem:[#allocation4_spill] sm:$0xff] }
 0x51c   : > { %v3655_v31 = vmul.f32 %v3597_v40, %v9503_v54  ;;  %7261 = vmatprep.subr.bf16.mxu0 %v7260_v43  ;;  %v4494_v43 = vrot.slane %v9759_v28, %v11236_v19  ;;  %v4522_v40 = vrot.slane %v9759_v28, %v11237_v61 }
 0x51d   : > { %7263 = vmatpush1.bf16.msra.mxu0 %v7262_v36  ;;  %v4480_v36 = vrot.slane %v9756_v32, %v11236_v19 }
 0x51e   : > { %v3601_v4 = vpop.f32.mrb[180].mxu0 }
 0x51f   : > { %v3656_v25 = vmul.f32 %v3601_v4, %v9505_v52  ;;  %v3603_v15 = vpop.f32.mrb[181].mxu0  ;;  %v9772_v4 = vld [vmem:[%s7658_s25 + $0x30] sm:$0xf]  ;;  %vm4482_vm13 = vcmp.eq.s32.totalorder %v4480_v36, %v11178_v0  ;;  %vm4486_vm7 = vcmp.eq.s32.totalorder %v4480_v36, %v11180_v60 }
 0x520   : > { %v3657_v26 = vmul.f32 %v3603_v15, %v9509_v48  ;;  %v4476_v15 = vrot.slane %v9772_v4, %v11236_v19 }
 0x521   : > { %v7266_v49 = vpack.c.bf16 %v3656_v25, %v3654_v42  ;;  %v4508_v42 = vrot.slane %v9756_v32, %v11237_v61  ;;  %v9775_v25 = vld [vmem:[%s7663_s28 + $0x30] sm:$0xf] }
 0x522   : > { %v7264_v27 = vpack.c.bf16 %v3657_v26, %v3655_v31  ;;  %v3607_v44 = vpop.f32.mrb[182].mxu0  ;;  %v4490_v26 = vrot.slane %v9775_v25, %v11236_v19  ;;  %vm4481_vm3 = vcmp.eq.s32.totalorder %v4476_v15, %v11178_v0  ;;  %vm4485_vm10 = vcmp.eq.s32.totalorder %v4476_v15, %v11180_v60 }
 0x523   : > { %v3658_v23 = vmul.f32 %v3607_v44, %v9514_v45  ;;  %v3609_v58 = vpop.f32.mrb[183].mxu0  ;;  %vm4510_vm15 = vcmp.eq.s32.totalorder %v4508_v42, %v11178_v0  ;;  %vm4514_vm8 = vcmp.eq.s32.totalorder %v4508_v42, %v11180_v60 }
 0x524   : > { %v3659_v5 = vmul.f32 %v3609_v58, %v9516_v18  ;;  %7265 = vmatprep.subr.bf16.mxu0 %v7264_v27  ;;  %v4518_v27 = vrot.slane %v9775_v25, %v11237_v61 }
 0x525   : > { %7267 = vmatpush1.bf16.msra.mxu0 %v7266_v49  ;;  %v4504_v49 = vrot.slane %v9772_v4, %v11237_v61 }
 0x526   : > { %v3613_v34 = vpop.f32.mrb[184].mxu0 }
 0x527   : > { %v3660_v54 = vmul.f32 %v3613_v34, %v9518_v11  ;;  %v3615_v56 = vpop.f32.mrb[185].mxu0  ;;  %vm4509_vm5 = vcmp.eq.s32.totalorder %v4504_v49, %v11178_v0  ;;  %vm4513_vm11 = vcmp.eq.s32.totalorder %v4504_v49, %v11180_v60 }
 0x528   : > { %v3661_v10 = vmul.f32 %v3615_v56, %v9521_v16  ;;  %v11228_v16 = vld [vmem:[#allocation17_spill] sm:$0xff] }
 0x529   : > { %v7270_v52 = vpack.c.bf16 %v3660_v54, %v3658_v23  ;;  %v11238_v23 = vld [vmem:[#allocation5_spill] sm:$0xff]  ;;  %v4524_v54 = vsel %vm4510_vm15, %v4522_v40, 0.0 }
 0x52a   : > { %v7268_v51 = vpack.c.bf16 %v3661_v10, %v3659_v5  ;;  %v3619_v3 = vpop.f32.mrb[186].mxu0  ;;  %vm4484_vm14 = vcmp.eq.s32.totalorder %v4480_v36, %v11238_v23  ;;  %vm4512_vm2 = vcmp.eq.s32.totalorder %v4508_v42, %v11238_v23  ;;  %v4496_v5 = vsel %vm4482_vm13, %v4494_v43, 0.0 }
 0x52b   : > { %v3662_v48 = vmul.f32 %v3619_v3, %v9523_v12  ;;  %v3621_v37 = vpop.f32.mrb[187].mxu0  ;;  %v11229_v12 = vld [vmem:[#allocation19_spill] sm:$0xff]  ;;  %v4498_v34 = vsel %vm4484_vm14, %v4494_v43, 0.0  ;;  %v4526_v56 = vsel %vm4512_vm2, %v4522_v40, 0.0  ;;  %v4530_v10 = vadd.f32 %v4524_v54, %v4496_v5 }
 0x52c   : > { %v3663_v53 = vmul.f32 %v3621_v37, %v9525_v9  ;;  %7269 = vmatprep.subr.bf16.mxu0 %v7268_v51  ;;  %v11230_v9 = vld [vmem:[#allocation20_spill] sm:$0xff]  ;;  %vm4483_vm4 = vcmp.eq.s32.totalorder %v4476_v15, %v11238_v23  ;;  %v4495_v51 = vsel %vm4481_vm3, %v4490_v26, 0.0  ;;  %vm4511_vm6 = vcmp.eq.s32.totalorder %v4504_v49, %v11238_v23 }
 0x52d   : > { %7271 = vmatpush1.bf16.msra.mxu0 %v7270_v52  ;;  %v4532_v52 = vadd.f32 %v4526_v56, %v4498_v34  ;;  %v4497_v3 = vsel %vm4483_vm4, %v4490_v26, 0.0  ;;  %v4523_v37 = vsel %vm4509_vm5, %v4518_v27, 0.0  ;;  %v4499_v34 = vsel %vm4485_vm10, %v4490_v26, 0.0  ;;  %v11239_v26 = vld [vmem:[#allocation7_spill] sm:$0xff] }
 0x52e   : > { %v3625_v45 = vpop.f32.mrb[188].mxu0  ;;  %v4527_v54 = vsel %vm4513_vm11, %v4518_v27, 0.0 }
 0x52f   : > { %v3664_v18 = vmul.f32 %v3625_v45, %v9527_v14  ;;  %v3627_v38 = vpop.f32.mrb[189].mxu0  ;;  %v11231_v14 = vld [vmem:[#allocation21_spill] sm:$0xff]  ;;  %v4529_v45 = vadd.f32 %v4523_v37, %v4495_v51  ;;  %v11240_v51 = vld [vmem:[#allocation8_spill] sm:$0xff] }
 0x530   : > { %v3665_v39 = vmul.f32 %v3627_v38, %v9529_v6  ;;  %v11232_v6 = vld [vmem:[#allocation22_spill] sm:$0xff]  ;;  %v4460_v37 = vrot.slane %v9759_v28, %v11240_v51 }
 0x531   : > { %v7274_v11 = vpack.c.bf16 %v3664_v18, %v3662_v48  ;;  %v7320_v48 = vpack.c.bf16 %v4532_v52, %v4530_v10  ;;  %v4533_v10 = vadd.f32 %v4527_v54, %v4499_v34 }
 0x532   : > { %v7272_v30 = vpack.c.bf16 %v3665_v39, %v3663_v53  ;;  %v4525_v53 = vsel %vm4511_vm6, %v4518_v27, 0.0  ;;  %v4418_v27 = vrot.slane %v9756_v32, %v11239_v26 }
 0x533   : > { %v4531_v18 = vadd.f32 %v4525_v53, %v4497_v3  ;;  %7321 = vmatprep.subr.bf16.mxu1 %v7320_v48  ;;  %v4446_v3 = vrot.slane %v9756_v32, %v11240_v51  ;;  %v4432_v48 = vrot.slane %v9759_v28, %v11239_v26  ;;  %v4414_v53 = vrot.slane %v9772_v4, %v11239_v26 }
 0x534   : > { %7273 = vmatprep.subr.bf16.mxu0 %v7272_v30  ;;  %vm4420_vm12 = vcmp.eq.s32.totalorder %v4418_v27, %v11178_v0  ;;  %vm4422_vm13 = vcmp.eq.s32.totalorder %v4418_v27, %v11238_v23  ;;  %vm4424_vm6 = vcmp.eq.s32.totalorder %v4418_v27, %v11180_v60 }
 0x535   : > { %7275 = vmatpush1.bf16.msra.mxu0 %v7274_v11  ;;  %v7322_v11 = vpack.c.bf16 %v4531_v18, %v4529_v45  ;;  %v4442_v45 = vrot.slane %v9772_v4, %v11240_v51  ;;  %vm4448_vm14 = vcmp.eq.s32.totalorder %v4446_v3, %v11178_v0  ;;  %vm4450_vm15 = vcmp.eq.s32.totalorder %v4446_v3, %v11238_v23 }
 0x536   : > { %7281 = vmatprep.subr.bf16.mxu0 %v7280_v57  ;;  %v11234_v57 = vld [vmem:[#allocation24_spill] sm:$0xff]  ;;  %v4434_v32 = vsel %vm4420_vm12, %v4432_v48, 0.0  ;;  %v4436_v18 = vsel %vm4422_vm13, %v4432_v48, 0.0  ;;  %vm4419_vm2 = vcmp.eq.s32.totalorder %v4414_v53, %v11178_v0  ;;  %vm4421_vm3 = vcmp.eq.s32.totalorder %v4414_v53, %v11238_v23 }
 0x537   : > { %7323 = vmatpush1.bf16.msra.mxu1 %v7322_v11  ;;  %v4462_v11 = vsel %vm4448_vm14, %v4460_v37, 0.0  ;;  %v4428_v4 = vrot.slane %v9775_v25, %v11239_v26  ;;  %vm4447_vm4 = vcmp.eq.s32.totalorder %v4442_v45, %v11178_v0  ;;  %vm4449_vm5 = vcmp.eq.s32.totalorder %v4442_v45, %v11238_v23 }
 0x538   : > { %3731 = vmatmul.mubr.f32.vlgmr.msra.gmra.mrb[80].mxu0 %v9261_v17  ;;  %v11221_v17 = vld [vmem:[#allocation2_spill] sm:$0xff]  ;;  %v4438_v26 = vsel %vm4424_vm6, %v4432_v48, 0.0  ;;  %vm4451_vm10 = vcmp.eq.s32.totalorder %v4442_v45, %v11180_v60  ;;  %v6881_v45 = vld [vmem:[%s7706_s7 + $0x388] sm:$0xff] }
 0x539   : > { %7283 = vmatpush1.bf16.msra.mxu0 %v7282_v7  ;;  %4189 = vmatprep.mubr.f32.mxu0 %v11130_v2  ;;  %v11235_v7 = vld [vmem:[#allocation25_spill] sm:$0xff]  ;;  %v4433_v54 = vsel %vm4419_vm2, %v4428_v4, 0.0 }
 0x53a   : > { %6855 = vmatprep.subr.msk.mxu0 %vm545_vm0, %v9573_v33  ;;  %v9733_v33 = vld [vmem:[%s11025_s4 + $0x8] sm:$0xff] }
 0x53d   : > { %6856 = vmatpush1.msk.msra.mxu0 %vm545_vm0, %v9576_v29 }
 0x53e   : > { %6857 = vmatmul.mubr.msk.f32.vlgmr.msra.gmra.mrb[190].mxu0 %vm490_vm9, %v9275_v55  ;;  %v11223_v55 = vld [vmem:[#allocation14_spill] sm:$0xff]  ;;  %v9737_v29 = vpop.f32.mrb[172].mxu1 }
 0x53f   : > { %4195 = vmatprep.mubr.f32.mxu0 %v11130_v2  ;;  %v9739_v35 = vpop.f32.mrb[173].mxu1 }
 0x542   : > { %6858 = vmatmul.mubr.msk.f32.gmra.mrb[192].mxu0 %vm490_vm9, %v9283_v13  ;;  %v11224_v13 = vld [vmem:[#allocation13_spill] sm:$0xff]  ;;  %v9741_v63 = vpop.f32.mrb[174].mxu1 }
 0x543   : > { %4201 = vmatprep.mubr.f32.mxu0 %v11130_v2  ;;  %v9743_v1 = vpop.f32.mrb[175].mxu1 }
 0x546   : > { %6859 = vmatmul.mubr.msk.f32.gmra.mrb[194].mxu0 %vm490_vm9, %v9291_v62  ;;  %v11225_v62 = vld [vmem:[#allocation16_spill] sm:$0xff]  ;;  %v9745_v46 = vpop.f32.mrb[176].mxu1 }
 0x547   : > { %4207 = vmatprep.mubr.f32.mxu0 %v11130_v2  ;;  %v9747_v59 = vpop.f32.mrb[177].mxu1 }
 0x54a   : > { %6860 = vmatmul.mubr.msk.f32.gmra.mrb[196].mxu0 %vm490_vm9, %v11221_v17  ;;  %v9749_v8 = vpop.f32.mrb[178].mxu1 }
 0x54b   : > { %4213 = vmatprep.mubr.f32.mxu0 %v11130_v2  ;;  %v9751_v20 = vpop.f32.mrb[179].mxu1 }
 0x54e   : > { %6861 = vmatmul.mubr.msk.f32.gmra.mrb[198].mxu0 %vm490_vm9, %v11222_v21  ;;  %v9753_v50 = vpop.f32.mrb[180].mxu1 }
 0x54f   : > { %4219 = vmatprep.mubr.f32.mxu0 %v11130_v2  ;;  %v9769_v31 = vpop.f32.mrb[181].mxu1 }
 0x552   : > { %6862 = vmatmul.mubr.msk.f32.gmra.mrb[200].mxu0 %vm490_vm9, %v11223_v55  ;;  %v9785_v44 = vpop.f32.mrb[182].mxu1 }
 0x553   : > { %4225 = vmatprep.mubr.f32.mxu0 %v11130_v2  ;;  %v9791_v58 = vpop.f32.mrb[183].mxu1 }
 0x556   : > { %6863 = vmatmul.mubr.msk.f32.gmra.mrb[202].mxu0 %vm490_vm9, %v11224_v13  ;;  %v9797_v38 = vpop.f32.mrb[184].mxu1 }
 0x557   : > { %4231 = vmatprep.mubr.f32.mxu0 %v11130_v2  ;;  %v9799_v39 = vpop.f32.mrb[185].mxu1 }
 0x55a   : > { %6864 = vmatmul.mubr.msk.f32.gmra.mrb[204].mxu0 %vm490_vm9, %v11225_v62  ;;  %v9801_v30 = vpop.f32.mrb[186].mxu1 }
 0x55b   : > { %4237 = vmatprep.mubr.f32.mxu0 %v11130_v2  ;;  %v9803_v17 = vpop.f32.mrb[187].mxu1 }
 0x55e   : > { %6865 = vmatmul.mubr.msk.f32.gmra.mrb[206].mxu0 %vm490_vm9, %v11226_v47  ;;  %v9805_v21 = vpop.f32.mrb[188].mxu1 }
 0x55f   : > { %4243 = vmatprep.mubr.f32.mxu0 %v11130_v2  ;;  %v9807_v55 = vpop.f32.mrb[189].mxu1 }
 0x562   : > { %6866 = vmatmul.mubr.msk.f32.gmra.mrb[208].mxu0 %vm490_vm9, %v11227_v22  ;;  %v9809_v13 = vpop.f32.mrb[190].mxu1 }
 0x563   : > { %4249 = vmatprep.mubr.f32.mxu0 %v11130_v2  ;;  %v9811_v62 = vpop.f32.mrb[191].mxu1 }
 0x566   : > { %6867 = vmatmul.mubr.msk.f32.gmra.mrb[210].mxu0 %vm490_vm9, %v11228_v16  ;;  %v9813_v47 = vpop.f32.mrb[192].mxu1 }
 0x567   : > { %4255 = vmatprep.mubr.f32.mxu0 %v11130_v2  ;;  %v9815_v22 = vpop.f32.mrb[193].mxu1 }
 0x56a   : > { %6868 = vmatmul.mubr.msk.f32.gmra.mrb[212].mxu0 %vm490_vm9, %v11229_v12  ;;  %v9817_v16 = vpop.f32.mrb[194].mxu1 }
 0x56b   : > { %4261 = vmatprep.mubr.f32.mxu0 %v11130_v2  ;;  %v9819_v12 = vpop.f32.mrb[195].mxu1 }
 0x56e   : > { %6869 = vmatmul.mubr.msk.f32.gmra.mrb[214].mxu0 %vm490_vm9, %v11230_v9  ;;  %v9821_v9 = vpop.f32.mrb[196].mxu1 }
 0x56f   : > { %4267 = vmatprep.mubr.f32.mxu0 %v11130_v2 }
 0x572   : > { %6870 = vmatmul.mubr.msk.f32.gmra.mrb[216].mxu0 %vm490_vm9, %v11231_v14  ;;  %v9823_v14 = vpop.f32.mrb[197].mxu1 }
 0x573   : > { %4273 = vmatprep.mubr.f32.mxu0 %v11130_v2 }
 0x576   : > { %6871 = vmatmul.mubr.msk.f32.gmra.mrb[218].mxu0 %vm490_vm9, %v11232_v6  ;;  %v9825_v6 = vpop.f32.mrb[198].mxu1 }
 0x577   : > { %4279 = vmatprep.mubr.f32.mxu0 %v11130_v2 }
 0x57a   : > { %6872 = vmatmul.mubr.msk.f32.gmra.mrb[220].mxu0 %vm490_vm9, %v11233_v41  ;;  %v9829_v41 = vpop.f32.mrb[199].mxu1 }
 0x57b   : > { %4285 = vmatprep.mubr.f32.mxu0 %v11130_v2 }
 0x57e   : > { %6873 = vmatmul.mubr.msk.f32.gmra.mrb[222].mxu0 %vm490_vm9, %v11234_v57  ;;  %v4500_v57 = vsel %vm4486_vm7, %v4494_v43, 0.0  ;;  %vm4452_vm7 = vcmp.eq.s32.totalorder %v4446_v3, %v11180_v60 }
 0x57f   : > { %4291 = vmatprep.mubr.f32.mxu0 %v11130_v2 }
 0x582   : > { %6874 = vmatmul.mubr.msk.f32.gmra.mrb[224].mxu0 %vm490_vm9, %v11235_v7  ;;  %v4528_v7 = vsel %vm4514_vm8, %v4522_v40, 0.0  ;;  %vm4423_vm8 = vcmp.eq.s32.totalorder %v4414_v53, %v11180_v60  ;;  %v6880_v53 = vld [vmem:[%s7706_s7 + $0x380] sm:$0xff] }
 0x583   : > { %6875 = vmatprep.mubr.msk.f32.mxu0 %vm1589_vm1, %v9733_v33  ;;  %v4534_v5 = vadd.f32 %v4528_v7, %v4500_v57  ;;  %v4464_v57 = vsel %vm4450_vm15, %v4460_v37, 0.0  ;;  %v9867_v7 = vadd.f32 %v4462_v11, %v4434_v32  ;;  %v4437_v27 = vsel %vm4423_vm8, %v4428_v4, 0.0 }
 0x584   : > { %v9869_v28 = vadd.f32 %v4464_v57, %v4436_v18 }
 0x585   : > { %6894 = vmatprep.subr.msk.mxu1 %vm545_vm0, %v4534_v5  ;;  %v4456_v5 = vrot.slane %v9775_v25, %v11240_v51  ;;  %v4466_v25 = vsel %vm4452_vm7, %v4460_v37, 0.0  ;;  %v6877_v37 = vld [vmem:[%s7706_s7 + $0x368] sm:$0xff] }
 0x586   : > { %6895 = vmatpush1.msk.msra.mxu1 %vm545_vm0, %v4533_v10  ;;  %v4435_v10 = vsel %vm4421_vm3, %v4428_v4, 0.0  ;;  %v6882_v4 = vld [vmem:[%s7706_s7 + $0x390] sm:$0xff] }
 0x587   : > { %v4461_v32 = vsel %vm4447_vm4, %v4456_v5, 0.0  ;;  %v4463_v18 = vsel %vm4449_vm5, %v4456_v5, 0.0  ;;  %6896 = vmatmul.mubr.msk.f32.vlgmr.msra.gmra.mrb[208].mxu1 %vm490_vm9, %v6876_v24  ;;  %v4465_v3 = vsel %vm4451_vm10, %v4456_v5, 0.0  ;;  %v6878_v24 = vld [vmem:[%s7706_s7 + $0x370] sm:$0xff]  ;;  %v6883_v5 = vld [vmem:[%s7706_s7 + $0x398] sm:$0xff] }
 0x588   : > { %v9881_v11 = vadd.f32 %v4461_v32, %v4433_v54  ;;  %v9883_v57 = vadd.f32 %v4463_v18, %v4435_v10  ;;  %v9893_v10 = vadd.f32 %v4466_v25, %v4438_v26  ;;  %4684 = vmatprep.mubr.f32.mxu1 %v11130_v2  ;;  %v9896_v48 = vadd.f32 %v4465_v3, %v4437_v27  ;;  %v6879_v26 = vld [vmem:[%s7706_s7 + $0x378] sm:$0xff]  ;;  %v6884_v32 = vld [vmem:[%s7706_s7 + $0x3a0] sm:$0xff]  ;;  %v6885_v18 = vld [vmem:[%s7706_s7 + $0x3a8] sm:$0xff] }
 0x589   : > { %v6886_v25 = vld [vmem:[%s7706_s7 + $0x3b0] sm:$0xff]  ;;  %v6887_v27 = vld [vmem:[%s7706_s7 + $0x3b8] sm:$0xff] }
 0x58b   : > { %6897 = vmatmul.mubr.msk.f32.gmra.mrb[210].mxu1 %vm490_vm9, %v6877_v37  ;;  %v6888_v37 = vld [vmem:[%s7706_s7 + $0x3c0] sm:$0xff] }
 0x58c   : > { %4690 = vmatprep.mubr.f32.mxu1 %v11130_v2 }
 0x58f   : > { %6898 = vmatmul.mubr.msk.f32.gmra.mrb[212].mxu1 %vm490_vm9, %v6878_v24 }
 0x590   : > { %4696 = vmatprep.mubr.f32.mxu1 %v11130_v2 }
 0x593   : > { %6899 = vmatmul.mubr.msk.f32.gmra.mrb[214].mxu1 %vm490_vm9, %v6879_v26 }
 0x594   : > { %4702 = vmatprep.mubr.f32.mxu1 %v11130_v2 }
 0x597   : > { %6900 = vmatmul.mubr.msk.f32.gmra.mrb[216].mxu1 %vm490_vm9, %v6880_v53 }
 0x598   : > { %4708 = vmatprep.mubr.f32.mxu1 %v11130_v2 }
 0x59b   : > { %6901 = vmatmul.mubr.msk.f32.gmra.mrb[218].mxu1 %vm490_vm9, %v6881_v45 }
 0x59c   : > { %4714 = vmatprep.mubr.f32.mxu1 %v11130_v2 }
 0x59f   : > { %6902 = vmatmul.mubr.msk.f32.gmra.mrb[220].mxu1 %vm490_vm9, %v6882_v4  ;;  %v6889_v4 = vld [vmem:[%s7706_s7 + $0x3c8] sm:$0xff] }
 0x5a0   : > { %4720 = vmatprep.mubr.f32.mxu1 %v11130_v2 }
 0x5a3   : > { %6903 = vmatmul.mubr.msk.f32.gmra.mrb[222].mxu1 %vm490_vm9, %v6883_v5 }
 0x5a4   : > { %4726 = vmatprep.mubr.f32.mxu1 %v11130_v2 }
 0x5a7   : > { %6904 = vmatmul.mubr.msk.f32.gmra.mrb[224].mxu1 %vm490_vm9, %v6884_v32 }
 0x5a8   : > { %4732 = vmatprep.mubr.f32.mxu1 %v11130_v2 }
 0x5ab   : > { %6905 = vmatmul.mubr.msk.f32.gmra.mrb[226].mxu1 %vm490_vm9, %v6885_v18 }
 0x5ac   : > { %4738 = vmatprep.mubr.f32.mxu1 %v11130_v2 }
 0x5af   : > { %6906 = vmatmul.mubr.msk.f32.gmra.mrb[228].mxu1 %vm490_vm9, %v6886_v25 }
 0x5b0   : > { %4744 = vmatprep.mubr.f32.mxu1 %v11130_v2 }
 0x5b3   : > { %6907 = vmatmul.mubr.msk.f32.gmra.mrb[230].mxu1 %vm490_vm9, %v6887_v27 }
 0x5b4   : > { %4750 = vmatprep.mubr.f32.mxu1 %v11130_v2 }
 0x5b7   : > { %6908 = vmatmul.mubr.msk.f32.gmra.mrb[232].mxu1 %vm490_vm9, %v6888_v37 }
 0x5b8   : > { %4756 = vmatprep.mubr.f32.mxu1 %v11130_v2 }
 0x5bb   : > { %6909 = vmatmul.mubr.msk.f32.gmra.mrb[234].mxu1 %vm490_vm9, %v6889_v4 }
 0x5bc   : > { %4762 = vmatprep.mubr.f32.mxu1 %v11130_v2 }
 0x5bf   : > { %v9834_v56 = vpop.f32.mrb[200].mxu1 }
 0x5c0   : > { %v9836_v52 = vpop.f32.mrb[201].mxu1 }
 0x5c4   : > { %v9838_v36 = vpop.f32.mrb[202].mxu1 }
 0x5c5   : > { %v9841_v43 = vpop.f32.mrb[203].mxu1 }
 0x5c8   : > { %v9843_v42 = vpop.f32.mrb[204].mxu1 }
 0x5c9   : > { %v9845_v40 = vpop.f32.mrb[205].mxu1 }
 0x5cc   : > { %v9847_v15 = vpop.f32.mrb[206].mxu1 }
 0x5cd   : > { %v9849_v49 = vpop.f32.mrb[207].mxu1 }
 0x611   : > { %v4191_v3 = vpop.f32.mrb[190].mxu0 }
 0x612   : > { %v4298_v24 = vmul.f32 %v4191_v3, %v9737_v29  ;;  %v4193_v26 = vpop.f32.mrb[191].mxu0  ;;  %v6890_v3 = vld [vmem:[%s7706_s7 + $0x3d0] sm:$0xff] }
 0x613   : > { %v4299_v53 = vmul.f32 %v4193_v26, %v9739_v35  ;;  %6910 = vmatmul.mubr.msk.f32.gmra.mrb[236].mxu1 %vm490_vm9, %v6890_v3 }
 0x614   : > { %4768 = vmatprep.mubr.f32.mxu1 %v11130_v2 }
 0x615   : > { %v4197_v45 = vpop.f32.mrb[192].mxu0 }
 0x616   : > { %v4300_v5 = vmul.f32 %v4197_v45, %v9741_v63  ;;  %v4199_v32 = vpop.f32.mrb[193].mxu0 }
 0x617   : > { %v4301_v18 = vmul.f32 %v4199_v32, %v9743_v1  ;;  %v6891_v1 = vld [vmem:[%s7706_s7 + $0x3d8] sm:$0xff] }
 0x618   : > { %v7286_v29 = vpack.c.bf16 %v4300_v5, %v4298_v24  ;;  %6911 = vmatmul.mubr.msk.f32.gmra.mrb[238].mxu1 %vm490_vm9, %v6891_v1 }
 0x619   : > { %v7284_v25 = vpack.c.bf16 %v4301_v18, %v4299_v53  ;;  %v4203_v27 = vpop.f32.mrb[194].mxu0  ;;  %4774 = vmatprep.mubr.f32.mxu1 %v11130_v2 }
 0x61a   : > { %v4302_v35 = vmul.f32 %v4203_v27, %v9745_v46  ;;  %v4205_v37 = vpop.f32.mrb[195].mxu0 }
 0x61b   : > { %v4303_v63 = vmul.f32 %v4205_v37, %v9747_v59  ;;  %7285 = vmatprep.subr.bf16.mxu0 %v7284_v25  ;;  %v6892_v59 = vld [vmem:[%s7706_s7 + $0x3e0] sm:$0xff]  ;;  %v5076_v37 = vld [vmem:[%s7658_s25 + $0x38] sm:$0xf0] }
 0x61c   : > { %7287 = vmatpush1.bf16.msra.mxu0 %v7286_v29  ;;  %6912 = vmatmul.mubr.msk.f32.gmra.mrb[240].mxu1 %vm490_vm9, %v6892_v59  ;;  %v6893_v29 = vld [vmem:[%s7706_s7 + $0x3e8] sm:$0xff] }
 0x61d   : > { %v4209_v26 = vpop.f32.mrb[196].mxu0  ;;  %4780 = vmatprep.mubr.f32.mxu1 %v11130_v2 }
 0x61e   : > { %v4304_v45 = vmul.f32 %v4209_v26, %v9749_v8  ;;  %v4211_v24 = vpop.f32.mrb[197].mxu0 }
 0x61f   : > { %v4305_v46 = vmul.f32 %v4211_v24, %v9751_v20 }
 0x620   : > { %v7290_v53 = vpack.c.bf16 %v4304_v45, %v4302_v35  ;;  %6913 = vmatmul.mubr.msk.f32.gmra.mrb[242].mxu1 %vm490_vm9, %v6893_v29  ;;  %v11241_v45 = vld [vmem:[#allocation11_spill] sm:$0xff] }
 0x621   : > { %v7288_v4 = vpack.c.bf16 %v4305_v46, %v4303_v63  ;;  %v4215_v5 = vpop.f32.mrb[198].mxu0  ;;  %5346 = vmatprep.mubr.f32.mxu1 %v11130_v2  ;;  %v5078_v63 = vld [vmem:[%s7663_s28 + $0x38] sm:$0xf0]  ;;  %v5148_v24 = vrot.slane %v5076_v37, %v11241_v45  ;;  %v11242_v46 = vld [vmem:[#allocation12_spill] sm:$0xff] }
 0x622   : > { %v4306_v32 = vmul.f32 %v4215_v5, %v9753_v50  ;;  %v4217_v18 = vpop.f32.mrb[199].mxu0  ;;  %v5077_v5 = vld [vmem:[%s7663_s28 + $0x30] sm:$0xf0]  ;;  %v5190_v59 = vrot.slane %v5078_v63, %v11242_v46 }
 0x623   : > { %v4307_v8 = vmul.f32 %v4217_v18, %v9769_v31  ;;  %7289 = vmatprep.subr.bf16.mxu0 %v7288_v4  ;;  %v5075_v4 = vld [vmem:[%s7658_s25 + $0x30] sm:$0xf0]  ;;  %v5158_v18 = vrot.slane %v5077_v5, %v11241_v45  ;;  %vm5150_vm11 = vcmp.eq.s32.totalorder %v5148_v24, %v11178_v0  ;;  %vm5152_vm12 = vcmp.eq.s32.totalorder %v5148_v24, %v11238_v23 }
 0x624   : > { %7291 = vmatpush1.bf16.msra.mxu0 %v7290_v53  ;;  %v5176_v53 = vrot.slane %v5076_v37, %v11242_v46  ;;  %v5172_v37 = vrot.slane %v5075_v4, %v11242_v46  ;;  %v5186_v54 = vrot.slane %v5077_v5, %v11242_v46  ;;  %vm5154_vm5 = vcmp.eq.s32.totalorder %v5148_v24, %v11180_v60 }
 0x625   : > { %v4221_v20 = vpop.f32.mrb[200].mxu0 }
 0x626   : > { %v4308_v25 = vmul.f32 %v4221_v20, %v9785_v44  ;;  %v4223_v27 = vpop.f32.mrb[201].mxu0  ;;  %v5162_v44 = vrot.slane %v5078_v63, %v11241_v45  ;;  %vm5178_vm13 = vcmp.eq.s32.totalorder %v5176_v53, %v11178_v0  ;;  %vm5180_vm14 = vcmp.eq.s32.totalorder %v5176_v53, %v11238_v23 }
 0x627   : > { %v4309_v50 = vmul.f32 %v4223_v27, %v9791_v58  ;;  %v5194_v29 = vsel %vm5180_vm14, %v5190_v59, 0.0  ;;  %vm5177_vm3 = vcmp.eq.s32.totalorder %v5172_v37, %v11178_v0  ;;  %vm5179_vm4 = vcmp.eq.s32.totalorder %v5172_v37, %v11238_v23 }
 0x628   : > { %v7294_v3 = vpack.c.bf16 %v4308_v25, %v4306_v32  ;;  %v5144_v32 = vrot.slane %v5075_v4, %v11241_v45  ;;  %v5166_v20 = vsel %vm5152_vm12, %v5162_v44, 0.0  ;;  %v5193_v4 = vsel %vm5179_vm4, %v5186_v54, 0.0 }
 0x629   : > { %v7292_v35 = vpack.c.bf16 %v4309_v50, %v4307_v8  ;;  %v4227_v31 = vpop.f32.mrb[202].mxu0  ;;  %v5164_v8 = vsel %vm5150_vm11, %v5162_v44, 0.0  ;;  %vm5182_vm6 = vcmp.eq.s32.totalorder %v5176_v53, %v11180_v60  ;;  %vm5181_vm8 = vcmp.eq.s32.totalorder %v5172_v37, %v11180_v60 }
 0x62a   : > { %v4310_v26 = vmul.f32 %v4227_v31, %v9797_v38  ;;  %v4229_v1 = vpop.f32.mrb[203].mxu0  ;;  %vm5149_vm15 = vcmp.eq.s32.totalorder %v5144_v32, %v11178_v0  ;;  %vm5151_vm2 = vcmp.eq.s32.totalorder %v5144_v32, %v11238_v23  ;;  %v5196_v24 = vsel %vm5182_vm6, %v5190_v59, 0.0 }
 0x62b   : > { %v4311_v58 = vmul.f32 %v4229_v1, %v9799_v39  ;;  %7293 = vmatprep.subr.bf16.mxu0 %v7292_v35  ;;  %v5192_v39 = vsel %vm5178_vm13, %v5190_v59, 0.0  ;;  %v5200_v35 = vadd.f32 %v5194_v29, %v5166_v20  ;;  %v5163_v31 = vsel %vm5149_vm15, %v5158_v18, 0.0 }
 0x62c   : > { %7295 = vmatpush1.bf16.msra.mxu0 %v7294_v3  ;;  %v5198_v50 = vadd.f32 %v5192_v39, %v5164_v8  ;;  %v5165_v45 = vsel %vm5151_vm2, %v5158_v18, 0.0  ;;  %v5168_v20 = vsel %vm5154_vm5, %v5162_v44, 0.0  ;;  %vm5153_vm7 = vcmp.eq.s32.totalorder %v5144_v32, %v11180_v60  ;;  %v10000_v44 = vld [vmem:[%s7658_s25 + $0x40] sm:$0xf] }
 0x62d   : > { %v4233_v38 = vpop.f32.mrb[204].mxu0  ;;  %v5202_v29 = vadd.f32 %v5196_v24, %v5168_v20 }
 0x62e   : > { %v4312_v25 = vmul.f32 %v4233_v38, %v9801_v30  ;;  %v4235_v27 = vpop.f32.mrb[205].mxu0  ;;  %v7364_v1 = vpack.c.bf16 %v5200_v35, %v5198_v50  ;;  %v9987_v38 = vld [vmem:[%s7658_s25 + $0x48] sm:$0xf]  ;;  %v10003_v50 = vld [vmem:[%s7663_s28 + $0x40] sm:$0xf] }
 0x62f   : > { %v4313_v3 = vmul.f32 %v4235_v27, %v9803_v17  ;;  %v5816_v39 = vrot.slane %v9987_v38, %v11236_v19  ;;  %v5195_v27 = vsel %vm5181_vm8, %v5186_v54, 0.0  ;;  %v5826_v37 = vrot.slane %v10003_v50, %v11236_v19 }
 0x630   : > { %v7298_v63 = vpack.c.bf16 %v4312_v25, %v4310_v26  ;;  %7365 = vmatprep.subr.bf16.mxu1 %v7364_v1  ;;  %v5191_v26 = vsel %vm5177_vm3, %v5186_v54, 0.0  ;;  %v5167_v25 = vsel %vm5153_vm7, %v5158_v18, 0.0  ;;  %v5844_v54 = vrot.slane %v9987_v38, %v11237_v61 }
 0x631   : > { %v7296_v34 = vpack.c.bf16 %v4313_v3, %v4311_v58  ;;  %v4239_v30 = vpop.f32.mrb[206].mxu0  ;;  %v5197_v5 = vadd.f32 %v5191_v26, %v5163_v31  ;;  %v5199_v58 = vadd.f32 %v5193_v4, %v5165_v45  ;;  %v5201_v32 = vadd.f32 %v5195_v27, %v5167_v25  ;;  %v6935_v45 = vld [vmem:[%s7706_s7 + $0x3f0] sm:$0xff] }
 0x632   : > { %v4314_v17 = vmul.f32 %v4239_v30, %v9805_v21  ;;  %v4241_v8 = vpop.f32.mrb[207].mxu0  ;;  %v9995_v21 = vld [vmem:[%s7663_s28 + $0x48] sm:$0xf]  ;;  %vm5818_vm10 = vcmp.eq.s32.totalorder %v5816_v39, %v11178_v0  ;;  %vm5820_vm11 = vcmp.eq.s32.totalorder %v5816_v39, %v11238_v23  ;;  %v5812_v31 = vrot.slane %v10000_v44, %v11236_v19 }
 0x633   : > { %v4315_v46 = vmul.f32 %v4241_v8, %v9807_v55  ;;  %7297 = vmatprep.subr.bf16.mxu0 %v7296_v34  ;;  %v7366_v34 = vpack.c.bf16 %v5199_v58, %v5197_v5  ;;  %v5830_v3 = vrot.slane %v9995_v21, %v11236_v19  ;;  %v5858_v18 = vrot.slane %v9995_v21, %v11237_v61 }
 0x634   : > { %7299 = vmatpush1.bf16.msra.mxu0 %v7298_v63  ;;  %vm5846_vm12 = vcmp.eq.s32.totalorder %v5844_v54, %v11178_v0  ;;  %vm5848_vm13 = vcmp.eq.s32.totalorder %v5844_v54, %v11238_v23  ;;  %vm5817_vm14 = vcmp.eq.s32.totalorder %v5812_v31, %v11178_v0  ;;  %vm5819_vm15 = vcmp.eq.s32.totalorder %v5812_v31, %v11238_v23 }
 0x635   : > { %v4245_v55 = vpop.f32.mrb[208].mxu0  ;;  %7367 = vmatpush1.bf16.msra.mxu1 %v7366_v34  ;;  %v5832_v30 = vsel %vm5818_vm10, %v5830_v3, 0.0  ;;  %v5834_v8 = vsel %vm5820_vm11, %v5830_v3, 0.0  ;;  %v5860_v4 = vsel %vm5846_vm12, %v5858_v18, 0.0  ;;  %v5862_v20 = vsel %vm5848_vm13, %v5858_v18, 0.0 }
 0x636   : > { %v4316_v53 = vmul.f32 %v4245_v55, %v9809_v13  ;;  %v4247_v59 = vpop.f32.mrb[209].mxu0  ;;  %6953 = vmatprep.subr.msk.mxu1 %vm545_vm0, %v5202_v29  ;;  %v5831_v5 = vsel %vm5817_vm14, %v5826_v37, 0.0  ;;  %v5833_v58 = vsel %vm5819_vm15, %v5826_v37, 0.0  ;;  %v6936_v55 = vld [vmem:[%s7706_s7 + $0x3f8] sm:$0xff]  ;;  %vm5822_vm4 = vcmp.eq.s32.totalorder %v5816_v39, %v11180_v60 }
 0x637   : > { %v4317_v35 = vmul.f32 %v4247_v59, %v9811_v62  ;;  %v5840_v62 = vrot.slane %v10000_v44, %v11237_v61  ;;  %vm5850_vm5 = vcmp.eq.s32.totalorder %v5844_v54, %v11180_v60  ;;  %v5836_v27 = vsel %vm5822_vm4, %v5830_v3, 0.0 }
 0x638   : > { %v7302_v13 = vpack.c.bf16 %v4316_v53, %v4314_v17  ;;  %v5864_v53 = vsel %vm5850_vm5, %v5858_v18, 0.0  ;;  %vm5821_vm6 = vcmp.eq.s32.totalorder %v5812_v31, %v11180_v60 }
 0x639   : > { %v7300_v63 = vpack.c.bf16 %v4317_v35, %v4315_v46  ;;  %v4251_v1 = vpop.f32.mrb[210].mxu0  ;;  %6954 = vmatpush1.msk.msra.mxu1 %vm545_vm0, %v5201_v32  ;;  %v5866_v46 = vadd.f32 %v5860_v4, %v5832_v30  ;;  %vm5845_vm2 = vcmp.eq.s32.totalorder %v5840_v62, %v11178_v0  ;;  %vm5847_vm3 = vcmp.eq.s32.totalorder %v5840_v62, %v11238_v23 }
 0x63a   : > { %v4318_v17 = vmul.f32 %v4251_v1, %v9813_v47  ;;  %v4253_v26 = vpop.f32.mrb[211].mxu0  ;;  %6955 = vmatmul.mubr.msk.f32.vlgmr.msra.gmra.mrb[244].mxu1 %vm490_vm9, %v6935_v45  ;;  %v5868_v47 = vadd.f32 %v5862_v20, %v5834_v8  ;;  %v5870_v54 = vadd.f32 %v5864_v53, %v5836_v27  ;;  %vm5849_vm7 = vcmp.eq.s32.totalorder %v5840_v62, %v11180_v60  ;;  %v6939_v20 = vld [vmem:[%s7706_s7 + $0x410] sm:$0xff] }
 0x63b   : > { %v4319_v19 = vmul.f32 %v4253_v26, %v9815_v22  ;;  %7301 = vmatprep.subr.bf16.mxu0 %v7300_v63  ;;  %5352 = vmatprep.mubr.f32.mxu1 %v11130_v2  ;;  %v5854_v22 = vrot.slane %v10003_v50, %v11237_v61  ;;  %v5835_v45 = vsel %vm5821_vm6, %v5826_v37, 0.0  ;;  %v6938_v26 = vld [vmem:[%s7706_s7 + $0x408] sm:$0xff] }
 0x63c   : > { %7303 = vmatpush1.bf16.msra.mxu0 %v7302_v13  ;;  %v7408_v25 = vpack.c.bf16 %v5868_v47, %v5866_v46 }
 0x63d   : > { %v4257_v24 = vpop.f32.mrb[212].mxu0  ;;  %v5859_v32 = vsel %vm5845_vm2, %v5854_v22, 0.0  ;;  %v5861_v35 = vsel %vm5847_vm3, %v5854_v22, 0.0  ;;  %v5863_v30 = vsel %vm5849_vm7, %v5854_v22, 0.0 }
 0x63e   : > { %v4320_v34 = vmul.f32 %v4257_v24, %v9817_v16  ;;  %v4259_v29 = vpop.f32.mrb[213].mxu0  ;;  %6956 = vmatmul.mubr.msk.f32.gmra.mrb[246].mxu1 %vm490_vm9, %v6936_v55  ;;  %7409 = vmatprep.subr.bf16.mxu1 %v7408_v25  ;;  %v5865_v61 = vadd.f32 %v5859_v32, %v5831_v5  ;;  %v5867_v63 = vadd.f32 %v5861_v35, %v5833_v58  ;;  %v6937_v16 = vld [vmem:[%s7706_s7 + $0x400] sm:$0xff]  ;;  %v6940_v5 = vld [vmem:[%s7706_s7 + $0x418] sm:$0xff] }
 0x63f   : > { %v4321_v59 = vmul.f32 %v4259_v29, %v9819_v12  ;;  %5358 = vmatprep.mubr.f32.mxu1 %v11130_v2  ;;  %v5869_v31 = vadd.f32 %v5863_v30, %v5835_v45  ;;  %v6952_v45 = vld [vmem:[%s7706_s7 + $0x478] sm:$0xff] }
 0x640   : > { %v7306_v13 = vpack.c.bf16 %v4320_v34, %v4318_v17  ;;  %v7410_v18 = vpack.c.bf16 %v5867_v63, %v5865_v61  ;;  %v11245_v61 = vpack.c.bf16 %v9883_v57, %v9881_v11  ;;  %v6946_v11 = vld [vmem:[%s7706_s7 + $0x448] sm:$0xff]  ;;  %v6948_v63 = vld [vmem:[%s7706_s7 + $0x458] sm:$0xff] }
 0x641   : > { %v7304_v39 = vpack.c.bf16 %v4321_v59, %v4319_v19  ;;  %v4263_v1 = vpop.f32.mrb[214].mxu0  ;;  %v10115_v57 = vld [vmem:[%s11024_s3 + $0x8] sm:$0xff]  ;;  %v10181_v30 = vld [vmem:[%s11024_s3 + $0x38] sm:$0xff] }
 0x642   : > { %v4322_v12 = vmul.f32 %v4263_v1, %v9821_v9  ;;  %v4265_v3 = vpop.f32.mrb[215].mxu0  ;;  %6957 = vmatmul.mubr.msk.f32.gmra.mrb[248].mxu1 %vm490_vm9, %v6937_v16  ;;  %v6949_v1 = vld [vmem:[%s7706_s7 + $0x460] sm:$0xff] }
 0x643   : > { %v4323_v8 = vmul.f32 %v4265_v3, %v9823_v14  ;;  %7305 = vmatprep.subr.bf16.mxu0 %v7304_v39  ;;  %5364 = vmatprep.mubr.f32.mxu1 %v11130_v2  ;;  %v10137_v39 = vld [vmem:[%s11024_s3 + $0x18] sm:$0xff]  ;;  %v10148_v16 = vld [vmem:[%s11024_s3 + $0x20] sm:$0xff]  ;;  %v6951_v3 = vld [vmem:[%s7706_s7 + $0x470] sm:$0xff] }
 0x644   : > { %7307 = vmatpush1.bf16.msra.mxu0 %v7306_v13  ;;  %7411 = vmatpush1.bf16.msra.mxu1 %v7410_v18  ;;  %v11243_v13 = vpack.c.bf16 %v9869_v28, %v9867_v7  ;;  %v6945_v7 = vld [vmem:[%s7706_s7 + $0x440] sm:$0xff]  ;;  %v10170_v18 = vld [vmem:[%s11024_s3 + $0x30] sm:$0xff] }
 0x645   : > { %v4269_v17 = vpop.f32.mrb[216].mxu0  ;;  %7012 = vmatprep.subr.msk.mxu1 %vm545_vm0, %v5870_v54  ;;  %v10104_v28 = vld [vmem:[%s11024_s3] sm:$0xff]  ;;  %v6950_v54 = vld [vmem:[%s7706_s7 + $0x468] sm:$0xff] }
 0x646   : > { %v4324_v62 = vmul.f32 %v4269_v17, %v9825_v6  ;;  %v4271_v9 = vpop.f32.mrb[217].mxu0  ;;  %6958 = vmatmul.mubr.msk.f32.gmra.mrb[250].mxu1 %vm490_vm9, %v6938_v26  ;;  %v10192_v17 = vld [vmem:[%s11024_s3 + $0x40] sm:$0xff]  ;;  %v6995_v26 = vld [vmem:[%s7706_s7 + $0x488] sm:$0xff] }
 0x647   : > { %v4325_v37 = vmul.f32 %v4271_v9, %v9829_v41  ;;  %5370 = vmatprep.mubr.f32.mxu1 %v11130_v2  ;;  %v10214_v9 = vld [vmem:[%s11024_s3 + $0x50] sm:$0xff] }
 0x648   : > { %v7310_v14 = vpack.c.bf16 %v4324_v62, %v4322_v12  ;;  %7013 = vmatpush1.msk.msra.mxu1 %vm545_vm0, %v5869_v31  ;;  %v10159_v12 = vld [vmem:[%s11024_s3 + $0x28] sm:$0xff]  ;;  %v6996_v62 = vld [vmem:[%s7706_s7 + $0x490] sm:$0xff]  ;;  %11247 = vst [vmem:[#allocation2_spill] sm:$0xff] %v10214_v9 }
 0x649   : > { %v7308_v4 = vpack.c.bf16 %v4325_v37, %v4323_v8  ;;  %v4275_v19 = vpop.f32.mrb[218].mxu0  ;;  %v6994_v8 = vld [vmem:[%s7706_s7 + $0x480] sm:$0xff]  ;;  %v10203_v31 = vld [vmem:[%s11024_s3 + $0x48] sm:$0xff]  ;;  %v6997_v37 = vld [vmem:[%s7706_s7 + $0x498] sm:$0xff] }
 0x64a   : > { %v4326_v46 = vmul.f32 %v4275_v19, %v9834_v56  ;;  %v4277_v47 = vpop.f32.mrb[219].mxu0  ;;  %6959 = vmatmul.mubr.msk.f32.gmra.mrb[252].mxu1 %vm490_vm9, %v6939_v20  ;;  %11246 = vst [vmem:[#allocation27_spill] sm:$0xff] %v10203_v31  ;;  %v10236_v19 = vld [vmem:[%s11024_s3 + $0x60] sm:$0xff]  ;;  %v6999_v20 = vld [vmem:[%s7706_s7 + $0x4a8] sm:$0xff] }
 0x64b   : > { %v4327_v6 = vmul.f32 %v4277_v47, %v9836_v52  ;;  %7309 = vmatprep.subr.bf16.mxu0 %v7308_v4  ;;  %5376 = vmatprep.mubr.f32.mxu1 %v11130_v2  ;;  %v6941_v52 = vld [vmem:[%s7706_s7 + $0x420] sm:$0xff]  ;;  %11249 = vst [vmem:[#allocation14_spill] sm:$0xff] %v10236_v19  ;;  %v7000_v47 = vld [vmem:[%s7706_s7 + $0x4b0] sm:$0xff] }
 0x64c   : > { %7311 = vmatpush1.bf16.msra.mxu0 %v7310_v14  ;;  %v10225_v14 = vld [vmem:[%s11024_s3 + $0x58] sm:$0xff]  ;;  %v6998_v4 = vld [vmem:[%s7706_s7 + $0x4a0] sm:$0xff] }
 0x64d   : > { %v4281_v41 = vpop.f32.mrb[220].mxu0  ;;  %11248 = vst [vmem:[#allocation6_spill] sm:$0xff] %v10225_v14 }
 0x64e   : > { %v4328_v58 = vmul.f32 %v4281_v41, %v9838_v36  ;;  %v4283_v24 = vpop.f32.mrb[221].mxu0  ;;  %6960 = vmatmul.mubr.msk.f32.gmra.mrb[254].mxu1 %vm490_vm9, %v6940_v5  ;;  %v10268_v41 = vld [vmem:[%s11024_s3 + $0x78] sm:$0xff]  ;;  %v10276_v5 = vld [vmem:[%s11024_s3 + $0x80] sm:$0xff] }
 0x64f   : > { %v4329_v55 = vmul.f32 %v4283_v24, %v9841_v43  ;;  %5382 = vmatprep.mubr.f32.mxu1 %v11130_v2  ;;  %v6942_v43 = vld [vmem:[%s7706_s7 + $0x428] sm:$0xff]  ;;  %11252 = vst [vmem:[#allocation15_spill] sm:$0xff] %v10268_v41  ;;  %11253 = vst [vmem:[#allocation18_spill] sm:$0xff] %v10276_v5 }
 0x650   : > { %v7314_v22 = vpack.c.bf16 %v4328_v58, %v4326_v46  ;;  %v10247_v46 = vld [vmem:[%s11024_s3 + $0x68] sm:$0xff] }
 0x651   : > { %v7312_v56 = vpack.c.bf16 %v4329_v55, %v4327_v6  ;;  %v4287_v34 = vpop.f32.mrb[222].mxu0  ;;  %11250 = vst [vmem:[#allocation13_spill] sm:$0xff] %v10247_v46  ;;  %v10258_v6 = vld [vmem:[%s11024_s3 + $0x70] sm:$0xff]  ;;  %v10284_v58 = vld [vmem:[%s11024_s3 + $0x88] sm:$0xff] }
 0x652   : > { %v4330_v29 = vmul.f32 %v4287_v34, %v9843_v42  ;;  %v4289_v25 = vpop.f32.mrb[223].mxu0  ;;  %6961 = vmatmul.mubr.msk.f32.gmra.mrb[0].mxu1 %vm490_vm9, %v6941_v52  ;;  %11251 = vst [vmem:[#allocation16_spill] sm:$0xff] %v10258_v6  ;;  %11254 = vst [vmem:[#allocation17_spill] sm:$0xff] %v10284_v58  ;;  %v7002_v52 = vld [vmem:[%s7706_s7 + $0x4c0] sm:$0xff] }
 0x653   : > { %v4331_v27 = vmul.f32 %v4289_v25, %v9845_v40  ;;  %7313 = vmatprep.subr.bf16.mxu0 %v7312_v56  ;;  %5388 = vmatprep.mubr.f32.mxu1 %v11130_v2  ;;  %v6943_v40 = vld [vmem:[%s7706_s7 + $0x430] sm:$0xff] }
 0x654   : > { %7315 = vmatpush1.bf16.msra.mxu0 %v7314_v22  ;;  %v7001_v22 = vld [vmem:[%s7706_s7 + $0x4b8] sm:$0xff] }
 0x655   : > { %v4293_v36 = vpop.f32.mrb[224].mxu0 }
 0x656   : > { %v4332_v53 = vmul.f32 %v4293_v36, %v9847_v15  ;;  %v4295_v59 = vpop.f32.mrb[225].mxu0  ;;  %6962 = vmatmul.mubr.msk.f32.gmra.mrb[2].mxu1 %vm490_vm9, %v6942_v43  ;;  %v6944_v15 = vld [vmem:[%s7706_s7 + $0x438] sm:$0xff]  ;;  %v7004_v43 = vld [vmem:[%s7706_s7 + $0x4d0] sm:$0xff] }
 0x657   : > { %v4333_v32 = vmul.f32 %v4295_v59, %v9849_v49  ;;  %5394 = vmatprep.mubr.f32.mxu1 %v11130_v2  ;;  %v10087_v49 = vld [vmem:[%s11025_s4] sm:$0xff]  ;;  %v7005_v59 = vld [vmem:[%s7706_s7 + $0x4d8] sm:$0xff] }
 0x658   : > { %v7318_v35 = vpack.c.bf16 %v4332_v53, %v4330_v29  ;;  %11244 = vst [vmem:[#allocation26_spill] sm:$0xff] %v10087_v49  ;;  %v7003_v29 = vld [vmem:[%s7706_s7 + $0x4c8] sm:$0xff] }
 0x659   : > { %v7316_v42 = vpack.c.bf16 %v4333_v32, %v4331_v27 }
 0x65a   : > { %6963 = vmatmul.mubr.msk.f32.gmra.mrb[4].mxu1 %vm490_vm9, %v6943_v40  ;;  %v10290_v24 = vpop.f32.mrb[208].mxu1  ;;  %v7006_v40 = vld [vmem:[%s7706_s7 + $0x4e0] sm:$0xff] }
 0x65b   : > { %7317 = vmatprep.subr.bf16.mxu0 %v7316_v42  ;;  %5400 = vmatprep.mubr.f32.mxu1 %v11130_v2  ;;  %v10292_v55 = vpop.f32.mrb[209].mxu1 }
 0x65c   : > { %7319 = vmatpush1.bf16.msra.mxu0 %v7318_v35 }
 0x65d   : > { %7325 = vmatprep.subr.bf16.mxu0 %v11243_v13 }
 0x65e   : > { %6964 = vmatmul.mubr.msk.f32.gmra.mrb[6].mxu1 %vm490_vm9, %v6944_v15  ;;  %v10296_v56 = vpop.f32.mrb[210].mxu1  ;;  %v7007_v15 = vld [vmem:[%s7706_s7 + $0x4e8] sm:$0xff] }
 0x65f   : > { %4399 = vmatmul.mubr.f32.vlgmr.msra.gmra.mrb[80].mxu0 %v10087_v49  ;;  %5406 = vmatprep.mubr.f32.mxu1 %v11130_v2  ;;  %v10299_v34 = vpop.f32.mrb[211].mxu1  ;;  %v7011_v49 = vld [vmem:[%s7706_s7 + $0x508] sm:$0xff] }
 0x660   : > { %7327 = vmatpush1.bf16.msra.mxu0 %v11245_v61  ;;  %4857 = vmatprep.mubr.f32.mxu0 %v11130_v2 }
 0x661   : > { %6914 = vmatprep.subr.msk.mxu0 %vm545_vm0, %v9893_v10  ;;  %v6947_v10 = vld [vmem:[%s7706_s7 + $0x450] sm:$0xff] }
 0x662   : > { %6965 = vmatmul.mubr.msk.f32.gmra.mrb[8].mxu1 %vm490_vm9, %v6945_v7 }
 0x663   : > { %5412 = vmatprep.mubr.f32.mxu1 %v11130_v2 }
 0x664   : > { %6915 = vmatpush1.msk.msra.mxu0 %vm545_vm0, %v9896_v48  ;;  %v10126_v48 = vld [vmem:[%s11024_s3 + $0x10] sm:$0xff] }
 0x665   : > { %6916 = vmatmul.mubr.msk.f32.vlgmr.msra.gmra.mrb[226].mxu0 %vm490_vm9, %v10104_v28 }
 0x666   : > { %4863 = vmatprep.mubr.f32.mxu0 %v11130_v2  ;;  %6966 = vmatmul.mubr.msk.f32.gmra.mrb[10].mxu1 %vm490_vm9, %v6946_v11 }
 0x667   : > { %5418 = vmatprep.mubr.f32.mxu1 %v11130_v2 }
 0x669   : > { %6917 = vmatmul.mubr.msk.f32.gmra.mrb[228].mxu0 %vm490_vm9, %v10115_v57 }
 0x66a   : > { %4869 = vmatprep.mubr.f32.mxu0 %v11130_v2  ;;  %6967 = vmatmul.mubr.msk.f32.gmra.mrb[12].mxu1 %vm490_vm9, %v6947_v10  ;;  %v7008_v10 = vld [vmem:[%s7706_s7 + $0x4f0] sm:$0xff] }
 0x66b   : > { %5424 = vmatprep.mubr.f32.mxu1 %v11130_v2 }
 0x66d   : > { %6918 = vmatmul.mubr.msk.f32.gmra.mrb[230].mxu0 %vm490_vm9, %v10126_v48 }
 0x66e   : > { %4875 = vmatprep.mubr.f32.mxu0 %v11130_v2  ;;  %6968 = vmatmul.mubr.msk.f32.gmra.mrb[14].mxu1 %vm490_vm9, %v6948_v63  ;;  %v11255_v63 = vld [vmem:[#allocation7_spill] sm:$0xff] }
 0x66f   : > { %5430 = vmatprep.mubr.f32.mxu1 %v11130_v2 }
 0x671   : > { %6919 = vmatmul.mubr.msk.f32.gmra.mrb[232].mxu0 %vm490_vm9, %v10137_v39 }
 0x672   : > { %4881 = vmatprep.mubr.f32.mxu0 %v11130_v2  ;;  %6969 = vmatmul.mubr.msk.f32.gmra.mrb[16].mxu1 %vm490_vm9, %v6949_v1  ;;  %v5754_v1 = vrot.slane %v9987_v38, %v11255_v63 }
 0x673   : > { %5436 = vmatprep.mubr.f32.mxu1 %v11130_v2 }
 0x674   : > { %vm5756_vm8 = vcmp.eq.s32.totalorder %v5754_v1, %v11178_v0  ;;  %vm5758_vm10 = vcmp.eq.s32.totalorder %v5754_v1, %v11238_v23  ;;  %vm5760_vm3 = vcmp.eq.s32.totalorder %v5754_v1, %v11180_v60 }
 0x675   : > { %6920 = vmatmul.mubr.msk.f32.gmra.mrb[234].mxu0 %vm490_vm9, %v10148_v16 }
 0x676   : > { %4887 = vmatprep.mubr.f32.mxu0 %v11130_v2  ;;  %6970 = vmatmul.mubr.msk.f32.gmra.mrb[18].mxu1 %vm490_vm9, %v6950_v54  ;;  %v5782_v54 = vrot.slane %v9987_v38, %v11240_v51 }
 0x677   : > { %5442 = vmatprep.mubr.f32.mxu1 %v11130_v2 }
 0x678   : > { %vm5784_vm11 = vcmp.eq.s32.totalorder %v5782_v54, %v11178_v0  ;;  %vm5786_vm12 = vcmp.eq.s32.totalorder %v5782_v54, %v11238_v23  ;;  %vm5788_vm4 = vcmp.eq.s32.totalorder %v5782_v54, %v11180_v60 }
 0x679   : > { %6921 = vmatmul.mubr.msk.f32.gmra.mrb[236].mxu0 %vm490_vm9, %v10159_v12 }
 0x67a   : > { %4893 = vmatprep.mubr.f32.mxu0 %v11130_v2  ;;  %6971 = vmatmul.mubr.msk.f32.gmra.mrb[20].mxu1 %vm490_vm9, %v6951_v3 }
 0x67b   : > { %5448 = vmatprep.mubr.f32.mxu1 %v11130_v2 }
 0x67d   : > { %6922 = vmatmul.mubr.msk.f32.gmra.mrb[238].mxu0 %vm490_vm9, %v10170_v18 }
 0x67e   : > { %4899 = vmatprep.mubr.f32.mxu0 %v11130_v2  ;;  %6972 = vmatmul.mubr.msk.f32.gmra.mrb[22].mxu1 %vm490_vm9, %v6952_v45  ;;  %v7009_v45 = vld [vmem:[%s7706_s7 + $0x4f8] sm:$0xff] }
 0x67f   : > { %6014 = vmatprep.mubr.f32.mxu1 %v11130_v2 }
 0x681   : > { %6923 = vmatmul.mubr.msk.f32.gmra.mrb[240].mxu0 %vm490_vm9, %v10181_v30 }
 0x682   : > { %4905 = vmatprep.mubr.f32.mxu0 %v11130_v2  ;;  %7014 = vmatmul.mubr.msk.f32.vlgmr.msra.gmra.mrb[24].mxu1 %vm490_vm9, %v6994_v8  ;;  %v5768_v8 = vrot.slane %v9995_v21, %v11255_v63 }
 0x683   : > { %6020 = vmatprep.mubr.f32.mxu1 %v11130_v2 }
 0x685   : > { %6924 = vmatmul.mubr.msk.f32.gmra.mrb[242].mxu0 %vm490_vm9, %v10192_v17 }
 0x686   : > { %4911 = vmatprep.mubr.f32.mxu0 %v11130_v2  ;;  %7015 = vmatmul.mubr.msk.f32.gmra.mrb[26].mxu1 %vm490_vm9, %v6995_v26  ;;  %v5796_v26 = vrot.slane %v9995_v21, %v11240_v51  ;;  %v5770_v21 = vsel %vm5756_vm8, %v5768_v8, 0.0 }
 0x687   : > { %6026 = vmatprep.mubr.f32.mxu1 %v11130_v2 }
 0x689   : > { %6925 = vmatmul.mubr.msk.f32.gmra.mrb[244].mxu0 %vm490_vm9, %v10203_v31 }
 0x68a   : > { %4917 = vmatprep.mubr.f32.mxu0 %v11130_v2  ;;  %7016 = vmatmul.mubr.msk.f32.gmra.mrb[28].mxu1 %vm490_vm9, %v6996_v62  ;;  %v5750_v62 = vrot.slane %v10000_v44, %v11255_v63 }
 0x68b   : > { %6032 = vmatprep.mubr.f32.mxu1 %v11130_v2 }
 0x68c   : > { %vm5755_vm13 = vcmp.eq.s32.totalorder %v5750_v62, %v11178_v0  ;;  %vm5757_vm14 = vcmp.eq.s32.totalorder %v5750_v62, %v11238_v23  ;;  %vm5759_vm5 = vcmp.eq.s32.totalorder %v5750_v62, %v11180_v60 }
 0x68d   : > { %6926 = vmatmul.mubr.msk.f32.gmra.mrb[246].mxu0 %vm490_vm9, %v10214_v9 }
 0x68e   : > { %4923 = vmatprep.mubr.f32.mxu0 %v11130_v2  ;;  %7017 = vmatmul.mubr.msk.f32.gmra.mrb[30].mxu1 %vm490_vm9, %v6997_v37  ;;  %v5778_v37 = vrot.slane %v10000_v44, %v11240_v51  ;;  %v5798_v44 = vsel %vm5784_vm11, %v5796_v26, 0.0 }
 0x68f   : > { %6038 = vmatprep.mubr.f32.mxu1 %v11130_v2 }
 0x690   : > { %vm5783_vm15 = vcmp.eq.s32.totalorder %v5778_v37, %v11178_v0  ;;  %vm5785_vm2 = vcmp.eq.s32.totalorder %v5778_v37, %v11238_v23  ;;  %vm5787_vm6 = vcmp.eq.s32.totalorder %v5778_v37, %v11180_v60 }
 0x691   : > { %6927 = vmatmul.mubr.msk.f32.gmra.mrb[248].mxu0 %vm490_vm9, %v10225_v14 }
 0x692   : > { %4929 = vmatprep.mubr.f32.mxu0 %v11130_v2  ;;  %7018 = vmatmul.mubr.msk.f32.gmra.mrb[32].mxu1 %vm490_vm9, %v6998_v4 }
 0x693   : > { %6044 = vmatprep.mubr.f32.mxu1 %v11130_v2 }
 0x695   : > { %6928 = vmatmul.mubr.msk.f32.gmra.mrb[250].mxu0 %vm490_vm9, %v10236_v19 }
 0x696   : > { %4935 = vmatprep.mubr.f32.mxu0 %v11130_v2  ;;  %7019 = vmatmul.mubr.msk.f32.gmra.mrb[34].mxu1 %vm490_vm9, %v6999_v20  ;;  %v5772_v20 = vsel %vm5758_vm10, %v5768_v8, 0.0 }
 0x697   : > { %6050 = vmatprep.mubr.f32.mxu1 %v11130_v2 }
 0x699   : > { %6929 = vmatmul.mubr.msk.f32.gmra.mrb[252].mxu0 %vm490_vm9, %v10247_v46 }
 0x69a   : > { %4941 = vmatprep.mubr.f32.mxu0 %v11130_v2  ;;  %7020 = vmatmul.mubr.msk.f32.gmra.mrb[36].mxu1 %vm490_vm9, %v7000_v47  ;;  %v5800_v47 = vsel %vm5786_vm12, %v5796_v26, 0.0 }
 0x69b   : > { %6056 = vmatprep.mubr.f32.mxu1 %v11130_v2 }
 0x69d   : > { %6930 = vmatmul.mubr.msk.f32.gmra.mrb[254].mxu0 %vm490_vm9, %v10258_v6 }
 0x69e   : > { %4947 = vmatprep.mubr.f32.mxu0 %v11130_v2  ;;  %7021 = vmatmul.mubr.msk.f32.gmra.mrb[38].mxu1 %vm490_vm9, %v7001_v22 }
 0x69f   : > { %6062 = vmatprep.mubr.f32.mxu1 %v11130_v2 }
 0x6a1   : > { %6931 = vmatmul.mubr.msk.f32.gmra.mrb[0].mxu0 %vm490_vm9, %v10268_v41 }
 0x6a2   : > { %4953 = vmatprep.mubr.f32.mxu0 %v11130_v2  ;;  %7022 = vmatmul.mubr.msk.f32.gmra.mrb[40].mxu1 %vm490_vm9, %v7002_v52  ;;  %v5804_v52 = vadd.f32 %v5798_v44, %v5770_v21 }
 0x6a3   : > { %6068 = vmatprep.mubr.f32.mxu1 %v11130_v2 }
 0x6a5   : > { %6932 = vmatmul.mubr.msk.f32.gmra.mrb[2].mxu0 %vm490_vm9, %v10276_v5 }
 0x6a6   : > { %4959 = vmatprep.mubr.f32.mxu0 %v11130_v2  ;;  %7023 = vmatmul.mubr.msk.f32.gmra.mrb[42].mxu1 %vm490_vm9, %v7003_v29  ;;  %v5806_v29 = vadd.f32 %v5800_v47, %v5772_v20 }
 0x6a7   : > { %6074 = vmatprep.mubr.f32.mxu1 %v11130_v2 }
 0x6a9   : > { %6933 = vmatmul.mubr.msk.f32.gmra.mrb[4].mxu0 %vm490_vm9, %v10284_v58 }
 0x6aa   : > { %6934 = vmatprep.mubr.msk.f32.mxu0 %vm1589_vm1, %v9733_v33  ;;  %v10304_v33 = vpop.f32.mrb[212].mxu1  ;;  %7024 = vmatmul.mubr.msk.f32.gmra.mrb[44].mxu1 %vm490_vm9, %v7004_v43  ;;  %v7010_v43 = vld [vmem:[%s7706_s7 + $0x500] sm:$0xff] }
 0x6ab   : > { %v10307_v25 = vpop.f32.mrb[213].mxu1  ;;  %6080 = vmatprep.mubr.f32.mxu1 %v11130_v2 }
 0x6ac   : > { %v10310_v27 = vpop.f32.mrb[214].mxu1 }
 0x6ad   : > { %v10313_v36 = vpop.f32.mrb[215].mxu1 }
 0x6ae   : > { %v10318_v53 = vpop.f32.mrb[216].mxu1  ;;  %7025 = vmatmul.mubr.msk.f32.gmra.mrb[46].mxu1 %vm490_vm9, %v7005_v59  ;;  %v5764_v59 = vrot.slane %v10003_v50, %v11255_v63 }
 0x6af   : > { %v10321_v32 = vpop.f32.mrb[217].mxu1  ;;  %6086 = vmatprep.mubr.f32.mxu1 %v11130_v2 }
 0x6b0   : > { %v10324_v35 = vpop.f32.mrb[218].mxu1 }
 0x6b1   : > { %v10327_v42 = vpop.f32.mrb[219].mxu1 }
 0x6b2   : > { %7026 = vmatmul.mubr.msk.f32.gmra.mrb[48].mxu1 %vm490_vm9, %v7006_v40  ;;  %v10332_v13 = vpop.f32.mrb[220].mxu1  ;;  %v5792_v40 = vrot.slane %v10003_v50, %v11240_v51  ;;  %v5774_v51 = vsel %vm5760_vm3, %v5768_v8, 0.0  ;;  %v5802_v50 = vsel %vm5788_vm4, %v5796_v26, 0.0 }
 0x6b3   : > { %6092 = vmatprep.mubr.f32.mxu1 %v11130_v2  ;;  %v10335_v61 = vpop.f32.mrb[221].mxu1 }
 0x6b4   : > { %v10338_v7 = vpop.f32.mrb[222].mxu1  ;;  %v5797_v21 = vsel %vm5783_vm15, %v5792_v40, 0.0  ;;  %v5799_v20 = vsel %vm5785_vm2, %v5792_v40, 0.0 }
 0x6b5   : > { %v10341_v11 = vpop.f32.mrb[223].mxu1 }
 0x6b6   : > { %7027 = vmatmul.mubr.msk.f32.gmra.mrb[50].mxu1 %vm490_vm9, %v7007_v15  ;;  %v10350_v3 = vpop.f32.mrb[224].mxu1  ;;  %v7412_v15 = vpack.c.bf16 %v5806_v29, %v5804_v52 }
 0x6b7   : > { %6098 = vmatprep.mubr.f32.mxu1 %v11130_v2  ;;  %v10361_v4 = vpop.f32.mrb[225].mxu1 }
 0x6b8   : > { %v10368_v38 = vpop.f32.mrb[226].mxu1  ;;  %7413 = vmatprep.subr.bf16.mxu1 %v7412_v15  ;;  %v5773_v15 = vsel %vm5759_vm5, %v5764_v59, 0.0 }
 0x6b9   : > { %v10371_v22 = vpop.f32.mrb[227].mxu1 }
 0x6ba   : > { %7028 = vmatmul.mubr.msk.f32.gmra.mrb[52].mxu1 %vm490_vm9, %v7008_v10  ;;  %v5769_v10 = vsel %vm5755_vm13, %v5764_v59, 0.0  ;;  %v10386_v47 = vpop.f32.mrb[228].mxu1 }
 0x6bb   : > { %6104 = vmatprep.mubr.f32.mxu1 %v11130_v2  ;;  %v5803_v44 = vadd.f32 %v5797_v21, %v5769_v10  ;;  %v10391_v52 = vpop.f32.mrb[229].mxu1  ;;  %v5801_v10 = vsel %vm5787_vm6, %v5792_v40, 0.0 }
 0x6bc   : > { %v10394_v1 = vpop.f32.mrb[230].mxu1  ;;  %v5807_v8 = vadd.f32 %v5801_v10, %v5773_v15 }
 0x6bd   : > { %v10397_v54 = vpop.f32.mrb[231].mxu1 }
 0x6be   : > { %7029 = vmatmul.mubr.msk.f32.gmra.mrb[54].mxu1 %vm490_vm9, %v7009_v45  ;;  %v5771_v45 = vsel %vm5757_vm14, %v5764_v59, 0.0  ;;  %v10401_v26 = vpop.f32.mrb[232].mxu1 }
 0x6bf   : > { %6110 = vmatprep.mubr.f32.mxu1 %v11130_v2  ;;  %v5805_v63 = vadd.f32 %v5799_v20, %v5771_v45 }
 0x6c1   : > { %v7414_v29 = vpack.c.bf16 %v5805_v63, %v5803_v44 }
 0x6c2   : > { %7030 = vmatmul.mubr.msk.f32.gmra.mrb[56].mxu1 %vm490_vm9, %v7010_v43  ;;  %v5808_v43 = vadd.f32 %v5802_v50, %v5774_v51 }
 0x6c3   : > { %6116 = vmatprep.mubr.f32.mxu1 %v11130_v2  ;;  %7415 = vmatpush1.bf16.msra.mxu1 %v7414_v29 }
 0x6c4   : > { %7032 = vmatprep.subr.msk.mxu1 %vm545_vm0, %v5808_v43 }
 0x6c6   : > { %7031 = vmatmul.mubr.msk.f32.gmra.mrb[58].mxu1 %vm490_vm9, %v7011_v49  ;;  %v10405_v49 = vpop.f32.mrb[233].mxu1 }
 0x6c7   : > { %6193 = vmatprep.mubr.f32.mxu1 %v11130_v2  ;;  %7033 = vmatpush1.msk.msra.mxu1 %vm545_vm0, %v5807_v8  ;;  %v10408_v62 = vpop.f32.mrb[234].mxu1 }
 0x6c8   : > { %v10410_v37 = vpop.f32.mrb[235].mxu1 }
 0x6ca   : > { %7034 = vmatmul.mubr.msk.f32.vlgmr.msra.gmra.mrb[60].mxu1 %vm490_vm9, %v10104_v28 }
 0x6cb   : > { %6199 = vmatprep.mubr.f32.mxu1 %v11130_v2 }
 0x6ce   : > { %7035 = vmatmul.mubr.msk.f32.gmra.mrb[62].mxu1 %vm490_vm9, %v10115_v57 }
 0x6cf   : > { %6205 = vmatprep.mubr.f32.mxu1 %v11130_v2 }
 0x6d2   : > { %7036 = vmatmul.mubr.msk.f32.gmra.mrb[64].mxu1 %vm490_vm9, %v10126_v48 }
 0x6d3   : > { %6211 = vmatprep.mubr.f32.mxu1 %v11130_v2 }
 0x6d6   : > { %7037 = vmatmul.mubr.msk.f32.gmra.mrb[66].mxu1 %vm490_vm9, %v10137_v39 }
 0x6d7   : > { %6217 = vmatprep.mubr.f32.mxu1 %v11130_v2 }
 0x6da   : > { %7038 = vmatmul.mubr.msk.f32.gmra.mrb[68].mxu1 %vm490_vm9, %v10148_v16 }
 0x6db   : > { %6223 = vmatprep.mubr.f32.mxu1 %v11130_v2 }
 0x6de   : > { %7039 = vmatmul.mubr.msk.f32.gmra.mrb[70].mxu1 %vm490_vm9, %v10159_v12 }
 0x6df   : > { %6229 = vmatprep.mubr.f32.mxu1 %v11130_v2 }
 0x6e2   : > { %7040 = vmatmul.mubr.msk.f32.gmra.mrb[72].mxu1 %vm490_vm9, %v10170_v18 }
 0x6e3   : > { %6235 = vmatprep.mubr.f32.mxu1 %v11130_v2 }
 0x6e6   : > { %v10415_v59 = vpop.f32.mrb[236].mxu1  ;;  %7041 = vmatmul.mubr.msk.f32.gmra.mrb[74].mxu1 %vm490_vm9, %v10181_v30 }
 0x6e7   : > { %v10419_v40 = vpop.f32.mrb[237].mxu1  ;;  %6241 = vmatprep.mubr.f32.mxu1 %v11130_v2 }
 0x6ea   : > { %7042 = vmatmul.mubr.msk.f32.gmra.mrb[76].mxu1 %vm490_vm9, %v10192_v17 }
 0x6eb   : > { %v10422_v45 = vpop.f32.mrb[238].mxu1  ;;  %6247 = vmatprep.mubr.f32.mxu1 %v11130_v2 }
 0x6ec   : > { %v10424_v21 = vpop.f32.mrb[239].mxu1 }
 0x6ee   : > { %7043 = vmatmul.mubr.msk.f32.gmra.mrb[78].mxu1 %vm490_vm9, %v10203_v31 }
 0x6ef   : > { %v10429_v20 = vpop.f32.mrb[240].mxu1  ;;  %6253 = vmatprep.mubr.f32.mxu1 %v11130_v2 }
 0x6f0   : > { %v10433_v44 = vpop.f32.mrb[241].mxu1 }
 0x6f2   : > { %7044 = vmatmul.mubr.msk.f32.gmra.mrb[80].mxu1 %vm490_vm9, %v10214_v9 }
 0x6f3   : > { %v10436_v63 = vpop.f32.mrb[242].mxu1  ;;  %6259 = vmatprep.mubr.f32.mxu1 %v11130_v2 }
 0x6f4   : > { %v10438_v51 = vpop.f32.mrb[243].mxu1 }
 0x6f6   : > { %7045 = vmatmul.mubr.msk.f32.gmra.mrb[82].mxu1 %vm490_vm9, %v10225_v14 }
 0x6f7   : > { %6265 = vmatprep.mubr.f32.mxu1 %v11130_v2 }
 0x6fa   : > { %7046 = vmatmul.mubr.msk.f32.gmra.mrb[84].mxu1 %vm490_vm9, %v10236_v19 }
 0x6fb   : > { %6271 = vmatprep.mubr.f32.mxu1 %v11130_v2 }
 0x6fe   : > { %7047 = vmatmul.mubr.msk.f32.gmra.mrb[86].mxu1 %vm490_vm9, %v10247_v46 }
 0x6ff   : > { %6277 = vmatprep.mubr.f32.mxu1 %v11130_v2 }
 0x702   : > { %7048 = vmatmul.mubr.msk.f32.gmra.mrb[88].mxu1 %vm490_vm9, %v10258_v6 }
 0x703   : > { %6283 = vmatprep.mubr.f32.mxu1 %v11130_v2 }
 0x706   : > { %7049 = vmatmul.mubr.msk.f32.gmra.mrb[90].mxu1 %vm490_vm9, %v10268_v41 }
 0x707   : > { %6289 = vmatprep.mubr.f32.mxu1 %v11130_v2 }
 0x70a   : > { %7050 = vmatmul.mubr.msk.f32.gmra.mrb[92].mxu1 %vm490_vm9, %v10276_v5 }
 0x70b   : > { %6295 = vmatprep.mubr.f32.mxu1 %v11130_v2 }
 0x70e   : > { %7051 = vmatmul.mubr.msk.f32.gmra.mrb[94].mxu1 %vm490_vm9, %v10284_v58 }
 0x738   : > { %v4859_v50 = vpop.f32.mrb[226].mxu0 }
 0x739   : > { %v4966_v29 = vmul.f32 %v4859_v50, %v10290_v24  ;;  %v4861_v43 = vpop.f32.mrb[227].mxu0 }
 0x73a   : > { %v4967_v15 = vmul.f32 %v4861_v43, %v10292_v55 }
 0x73c   : > { %v4865_v10 = vpop.f32.mrb[228].mxu0 }
 0x73d   : > { %v4968_v8 = vmul.f32 %v4865_v10, %v10296_v56  ;;  %v4867_v41 = vpop.f32.mrb[229].mxu0 }
 0x73e   : > { %v4969_v6 = vmul.f32 %v4867_v41, %v10299_v34 }
 0x73f   : > { %v7330_v46 = vpack.c.bf16 %v4968_v8, %v4966_v29 }
 0x740   : > { %v7328_v19 = vpack.c.bf16 %v4969_v6, %v4967_v15  ;;  %v4871_v5 = vpop.f32.mrb[230].mxu0 }
 0x741   : > { %v4970_v14 = vmul.f32 %v4871_v5, %v10304_v33  ;;  %v4873_v9 = vpop.f32.mrb[231].mxu0 }
 0x742   : > { %v4971_v58 = vmul.f32 %v4873_v9, %v10307_v25  ;;  %7329 = vmatprep.subr.bf16.mxu0 %v7328_v19 }
 0x743   : > { %7331 = vmatpush1.bf16.msra.mxu0 %v7330_v46 }
 0x744   : > { %v4877_v24 = vpop.f32.mrb[232].mxu0 }
 0x745   : > { %v4972_v50 = vmul.f32 %v4877_v24, %v10310_v27  ;;  %v4879_v55 = vpop.f32.mrb[233].mxu0 }
 0x746   : > { %v4973_v43 = vmul.f32 %v4879_v55, %v10313_v36  ;;  %v10490_v36 = vpop.f32.mrb[244].mxu1 }
 0x747   : > { %v7334_v56 = vpack.c.bf16 %v4972_v50, %v4970_v14 }
 0x748   : > { %v7332_v10 = vpack.c.bf16 %v4973_v43, %v4971_v58  ;;  %v4883_v31 = vpop.f32.mrb[234].mxu0 }
 0x749   : > { %v4974_v41 = vmul.f32 %v4883_v31, %v10318_v53  ;;  %v4885_v6 = vpop.f32.mrb[235].mxu0  ;;  %v10493_v31 = vpop.f32.mrb[245].mxu1 }
 0x74a   : > { %v4975_v34 = vmul.f32 %v4885_v6, %v10321_v32  ;;  %7333 = vmatprep.subr.bf16.mxu0 %v7332_v10  ;;  %v10496_v32 = vpop.f32.mrb[246].mxu1 }
 0x74b   : > { %7335 = vmatpush1.bf16.msra.mxu0 %v7334_v56 }
 0x74c   : > { %v4889_v5 = vpop.f32.mrb[236].mxu0 }
 0x74d   : > { %v4976_v9 = vmul.f32 %v4889_v5, %v10324_v35  ;;  %v4891_v19 = vpop.f32.mrb[237].mxu0  ;;  %v10498_v35 = vpop.f32.mrb[247].mxu1 }
 0x74e   : > { %v4977_v46 = vmul.f32 %v4891_v19, %v10327_v42  ;;  %v10500_v42 = vpop.f32.mrb[248].mxu1 }
 0x74f   : > { %v7338_v33 = vpack.c.bf16 %v4976_v9, %v4974_v41  ;;  %v10503_v24 = vpop.f32.mrb[249].mxu1 }
 0x750   : > { %v7336_v25 = vpack.c.bf16 %v4977_v46, %v4975_v34  ;;  %v4895_v27 = vpop.f32.mrb[238].mxu0  ;;  %v10506_v50 = vpop.f32.mrb[250].mxu1 }
 0x751   : > { %v4978_v14 = vmul.f32 %v4895_v27, %v10332_v13  ;;  %v4897_v58 = vpop.f32.mrb[239].mxu0 }
 0x752   : > { %v4979_v53 = vmul.f32 %v4897_v58, %v10335_v61  ;;  %7337 = vmatprep.subr.bf16.mxu0 %v7336_v25  ;;  %v10508_v61 = vpop.f32.mrb[251].mxu1 }
 0x753   : > { %7339 = vmatpush1.bf16.msra.mxu0 %v7338_v33  ;;  %v10510_v10 = vpop.f32.mrb[252].mxu1 }
 0x754   : > { %v4901_v29 = vpop.f32.mrb[240].mxu0  ;;  %v10513_v34 = vpop.f32.mrb[253].mxu1 }
 0x755   : > { %v4980_v15 = vmul.f32 %v4901_v29, %v10338_v7  ;;  %v4903_v8 = vpop.f32.mrb[241].mxu0  ;;  %v10516_v5 = vpop.f32.mrb[254].mxu1 }
 0x756   : > { %v4981_v13 = vmul.f32 %v4903_v8, %v10341_v11  ;;  %v10518_v11 = vpop.f32.mrb[255].mxu1 }
 0x757   : > { %v7342_v55 = vpack.c.bf16 %v4980_v15, %v4978_v14  ;;  %v10520_v19 = vpop.f32.mrb[0].mxu1 }
 0x758   : > { %v7340_v43 = vpack.c.bf16 %v4981_v13, %v4979_v53  ;;  %v4907_v56 = vpop.f32.mrb[242].mxu0  ;;  %v10523_v25 = vpop.f32.mrb[1].mxu1 }
 0x759   : > { %v4982_v41 = vmul.f32 %v4907_v56, %v10350_v3  ;;  %v4909_v6 = vpop.f32.mrb[243].mxu0  ;;  %v10526_v27 = vpop.f32.mrb[2].mxu1 }
 0x75a   : > { %v4983_v7 = vmul.f32 %v4909_v6, %v10361_v4  ;;  %7341 = vmatprep.subr.bf16.mxu0 %v7340_v43  ;;  %11256 = vst [vmem:[#allocation19_spill] sm:$0xff] %v10526_v27  ;;  %v10528_v4 = vpop.f32.mrb[3].mxu1 }
 0x75b   : > { %7343 = vmatpush1.bf16.msra.mxu0 %v7342_v55  ;;  %11257 = vst [vmem:[#allocation20_spill] sm:$0xff] %v10528_v4  ;;  %v10530_v29 = vpop.f32.mrb[4].mxu1 }
 0x75c   : > { %v4913_v9 = vpop.f32.mrb[244].mxu0  ;;  %11258 = vst [vmem:[#allocation21_spill] sm:$0xff] %v10530_v29  ;;  %v10533_v13 = vpop.f32.mrb[5].mxu1 }
 0x75d   : > { %v4984_v46 = vmul.f32 %v4913_v9, %v10368_v38  ;;  %v4915_v33 = vpop.f32.mrb[245].mxu0  ;;  %11259 = vst [vmem:[#allocation22_spill] sm:$0xff] %v10533_v13  ;;  %v10536_v55 = vpop.f32.mrb[6].mxu1 }
 0x75e   : > { %v4985_v3 = vmul.f32 %v4915_v33, %v10371_v22  ;;  %11260 = vst [vmem:[#allocation23_spill] sm:$0xff] %v10536_v55  ;;  %v10538_v22 = vpop.f32.mrb[7].mxu1 }
 0x75f   : > { %v7346_v14 = vpack.c.bf16 %v4984_v46, %v4982_v41  ;;  %11261 = vst [vmem:[#allocation24_spill] sm:$0xff] %v10538_v22  ;;  %v10540_v56 = vpop.f32.mrb[8].mxu1 }
 0x760   : > { %v7344_v58 = vpack.c.bf16 %v4985_v3, %v4983_v7  ;;  %v4919_v53 = vpop.f32.mrb[246].mxu0  ;;  %11262 = vst [vmem:[#allocation25_spill] sm:$0xff] %v10540_v56  ;;  %v10543_v7 = vpop.f32.mrb[9].mxu1 }
 0x761   : > { %v4986_v15 = vmul.f32 %v4919_v53, %v10386_v47  ;;  %v4921_v8 = vpop.f32.mrb[247].mxu0  ;;  %11263 = vst [vmem:[#allocation3_spill] sm:$0xff] %v10543_v7  ;;  %v10546_v9 = vpop.f32.mrb[10].mxu1 }
 0x762   : > { %v4987_v38 = vmul.f32 %v4921_v8, %v10391_v52  ;;  %7345 = vmatprep.subr.bf16.mxu0 %v7344_v58  ;;  %11264 = vst [vmem:[#allocation4_spill] sm:$0xff] %v10546_v9  ;;  %v10548_v52 = vpop.f32.mrb[11].mxu1 }
 0x763   : > { %7347 = vmatpush1.bf16.msra.mxu0 %v7346_v14  ;;  %11265 = vst [vmem:[#allocation5_spill] sm:$0xff] %v10548_v52  ;;  %v10550_v14 = vpop.f32.mrb[12].mxu1 }
 0x764   : > { %v4925_v43 = vpop.f32.mrb[248].mxu0  ;;  %11266 = vst [vmem:[#allocation8_spill] sm:$0xff] %v10550_v14  ;;  %v10553_v8 = vpop.f32.mrb[13].mxu1 }
 0x765   : > { %v4988_v41 = vmul.f32 %v4925_v43, %v10394_v1  ;;  %v4927_v6 = vpop.f32.mrb[249].mxu0  ;;  %11267 = vst [vmem:[#allocation11_spill] sm:$0xff] %v10553_v8  ;;  %v10556_v43 = vpop.f32.mrb[14].mxu1 }
 0x766   : > { %v4989_v47 = vmul.f32 %v4927_v6, %v10397_v54  ;;  %11268 = vst [vmem:[#allocation12_spill] sm:$0xff] %v10556_v43  ;;  %v10558_v54 = vpop.f32.mrb[15].mxu1 }
 0x767   : > { %v7350_v46 = vpack.c.bf16 %v4988_v41, %v4986_v15  ;;  %11269 = vst [vmem:[#allocation7_spill] sm:$0xff] %v10558_v54  ;;  %v10560_v41 = vpop.f32.mrb[16].mxu1 }
 0x768   : > { %v7348_v33 = vpack.c.bf16 %v4989_v47, %v4987_v38  ;;  %v4931_v3 = vpop.f32.mrb[250].mxu0  ;;  %11270 = vst [vmem:[#allocation28_spill] sm:$0xff] %v10560_v41  ;;  %v10563_v47 = vpop.f32.mrb[17].mxu1  ;;  %v11275_v41 = vld [vmem:[#allocation10_spill] sm:$0xff] }
 0x769   : > { %v4990_v58 = vmul.f32 %v4931_v3, %v10401_v26  ;;  %v4933_v53 = vpop.f32.mrb[251].mxu0  ;;  %11271 = vst [vmem:[#allocation29_spill] sm:$0xff] %v10563_v47  ;;  %v10566_v3 = vpop.f32.mrb[18].mxu1 }
 0x76a   : > { %v4991_v1 = vmul.f32 %v4933_v53, %v10405_v49  ;;  %7349 = vmatprep.subr.bf16.mxu0 %v7348_v33  ;;  %11272 = vst [vmem:[#allocation30_spill] sm:$0xff] %v10566_v3  ;;  %v7557_v33 = vld [vmem:[%s7658_s25 + $0x38] sm:$0xf0] }
 0x76b   : > { %7351 = vmatpush1.bf16.msra.mxu0 %v7350_v46  ;;  %v11273_v53 = vld [vmem:[#allocation9_spill] sm:$0xff]  ;;  %v10572_v46 = vpop.f32.mrb[19].mxu1  ;;  %v10575_v14 = vrot.slane %v7557_v33, %v11275_v41 }
 0x76c   : > { %v4937_v15 = vpop.f32.mrb[252].mxu0  ;;  %v10570_v43 = vrot.slane %v7557_v33, %v11273_v53  ;;  %11274 = vst [vmem:[#allocation9_spill] sm:$0xff] %v10572_v46 }
 0x76d   : > { %v4992_v38 = vmul.f32 %v4937_v15, %v10408_v62  ;;  %v4939_v6 = vpop.f32.mrb[253].mxu0  ;;  %v10577_v62 = vpop.f32.mrb[20].mxu1  ;;  %vm5116_vm10 = vcmp.eq.s32.totalorder %v10575_v14, %v11178_v0  ;;  %vm5118_vm11 = vcmp.eq.s32.totalorder %v10575_v14, %v11238_v23  ;;  %vm5120_vm3 = vcmp.eq.s32.totalorder %v10575_v14, %v11180_v60 }
 0x76e   : > { %v4993_v26 = vmul.f32 %v4939_v6, %v10410_v37  ;;  %11276 = vst [vmem:[#allocation10_spill] sm:$0xff] %v10577_v62  ;;  %v10580_v6 = vpop.f32.mrb[21].mxu1  ;;  %vm5088_vm7 = vcmp.eq.s32.totalorder %v10570_v43, %v11178_v0  ;;  %vm5090_vm8 = vcmp.eq.s32.totalorder %v10570_v43, %v11238_v23  ;;  %vm5092_vm2 = vcmp.eq.s32.totalorder %v10570_v43, %v11180_v60 }
 0x76f   : > { %v7354_v49 = vpack.c.bf16 %v4992_v38, %v4990_v58  ;;  %11277 = vst [vmem:[#allocation31_spill] sm:$0xff] %v10580_v6  ;;  %v7558_v38 = vld [vmem:[%s7663_s28 + $0x38] sm:$0xf0] }
 0x770   : > { %v7352_v54 = vpack.c.bf16 %v4993_v26, %v4991_v1  ;;  %v4943_v8 = vpop.f32.mrb[254].mxu0  ;;  %v10585_v3 = vrot.slane %v7558_v38, %v11273_v53  ;;  %v10587_v1 = vpop.f32.mrb[22].mxu1  ;;  %v5128_v26 = vrot.slane %v7558_v38, %v11275_v41 }
 0x771   : > { %v4994_v15 = vmul.f32 %v4943_v8, %v10415_v59  ;;  %v4945_v37 = vpop.f32.mrb[255].mxu0  ;;  %11278 = vst [vmem:[#allocation32_spill] sm:$0xff] %v10587_v1  ;;  %v10592_v59 = vpop.f32.mrb[23].mxu1 }
 0x772   : > { %v4995_v58 = vmul.f32 %v4945_v37, %v10419_v40  ;;  %7353 = vmatprep.subr.bf16.mxu0 %v7352_v54  ;;  %11279 = vst [vmem:[#allocation33_spill] sm:$0xff] %v10592_v59  ;;  %v7559_v40 = vld [vmem:[%s7658_s25 + $0x30] sm:$0xf0]  ;;  %v5102_v6 = vsel %vm5088_vm7, %v10585_v3, 0.0  ;;  %v5104_v47 = vsel %vm5090_vm8, %v10585_v3, 0.0  ;;  %v5130_v52 = vsel %vm5116_vm10, %v5128_v26, 0.0 }
 0x773   : > { %7355 = vmatpush1.bf16.msra.mxu0 %v7354_v49  ;;  %v10602_v54 = vrot.slane %v7559_v40, %v11273_v53  ;;  %v10604_v49 = vpop.f32.mrb[24].mxu1  ;;  %v5110_v38 = vrot.slane %v7559_v40, %v11275_v41  ;;  %v5132_v9 = vsel %vm5118_vm11, %v5128_v26, 0.0  ;;  %v5106_v27 = vsel %vm5092_vm2, %v10585_v3, 0.0 }
 0x774   : > { %v4949_v8 = vpop.f32.mrb[0].mxu0  ;;  %v10608_v59 = vpop.f32.mrb[25].mxu1 }
 0x775   : > { %v4996_v33 = vmul.f32 %v4949_v8, %v10422_v45  ;;  %v4951_v37 = vpop.f32.mrb[1].mxu0  ;;  %v10612_v62 = vpop.f32.mrb[26].mxu1  ;;  %vm5087_vm12 = vcmp.eq.s32.totalorder %v10602_v54, %v11178_v0  ;;  %v7560_v8 = vld [vmem:[%s7663_s28 + $0x30] sm:$0xf0]  ;;  %vm5089_vm13 = vcmp.eq.s32.totalorder %v10602_v54, %v11238_v23  ;;  %vm5115_vm14 = vcmp.eq.s32.totalorder %v5110_v38, %v11178_v0 }
 0x776   : > { %v4997_v1 = vmul.f32 %v4951_v37, %v10424_v21  ;;  %v10615_v7 = vpop.f32.mrb[27].mxu1  ;;  %v5096_v40 = vrot.slane %v7560_v8, %v11273_v53  ;;  %v5124_v21 = vrot.slane %v7560_v8, %v11275_v41  ;;  %vm5117_vm15 = vcmp.eq.s32.totalorder %v5110_v38, %v11238_v23 }
 0x777   : > { %v7358_v46 = vpack.c.bf16 %v4996_v33, %v4994_v15  ;;  %v10622_v37 = vpop.f32.mrb[28].mxu1  ;;  %v5136_v41 = vadd.f32 %v5130_v52, %v5102_v6  ;;  %v5138_v8 = vadd.f32 %v5132_v9, %v5104_v47  ;;  %vm5091_vm4 = vcmp.eq.s32.totalorder %v10602_v54, %v11180_v60 }
 0x778   : > { %v7356_v56 = vpack.c.bf16 %v4997_v1, %v4995_v58  ;;  %v4955_v45 = vpop.f32.mrb[2].mxu0  ;;  %v10629_v58 = vpop.f32.mrb[29].mxu1  ;;  %v5103_v55 = vsel %vm5089_vm13, %v5096_v40, 0.0  ;;  %v5129_v13 = vsel %vm5115_vm14, %v5124_v21, 0.0  ;;  %v5131_v23 = vsel %vm5117_vm15, %v5124_v21, 0.0 }
 0x779   : > { %v4998_v15 = vmul.f32 %v4955_v45, %v10429_v20  ;;  %v4957_v33 = vpop.f32.mrb[3].mxu0  ;;  %v10632_v53 = vpop.f32.mrb[30].mxu1  ;;  %v5101_v45 = vsel %vm5087_vm12, %v5096_v40, 0.0  ;;  %vm5119_vm5 = vcmp.eq.s32.totalorder %v5110_v38, %v11180_v60  ;;  %v5105_v43 = vsel %vm5091_vm4, %v5096_v40, 0.0 }
 0x77a   : > { %v4999_v1 = vmul.f32 %v4957_v33, %v10433_v44  ;;  %7357 = vmatprep.subr.bf16.mxu0 %v7356_v56  ;;  %v10634_v22 = vpop.f32.mrb[31].mxu1  ;;  %v5135_v47 = vadd.f32 %v5129_v13, %v5101_v45 }
 0x77b   : > { %7359 = vmatpush1.bf16.msra.mxu0 %v7358_v46  ;;  %v10639_v29 = vpop.f32.mrb[32].mxu1  ;;  %v5137_v46 = vadd.f32 %v5131_v23, %v5103_v55  ;;  %v11281_v23 = vld [vmem:[#allocation27_spill] sm:$0xff] }
 0x77c   : > { %v4961_v20 = vpop.f32.mrb[4].mxu0  ;;  %v10642_v33 = vpop.f32.mrb[33].mxu1 }
 0x77d   : > { %v5000_v44 = vmul.f32 %v4961_v20, %v10436_v63  ;;  %v4963_v56 = vpop.f32.mrb[5].mxu0  ;;  %v10649_v0 = vpop.f32.mrb[34].mxu1  ;;  %v7368_v63 = vpack.c.bf16 %v5138_v8, %v5136_v41  ;;  %v7370_v13 = vpack.c.bf16 %v5137_v46, %v5135_v47  ;;  %v11284_v46 = vld [vmem:[#allocation14_spill] sm:$0xff] }
 0x77e   : > { %v5001_v52 = vmul.f32 %v4963_v56, %v10438_v51  ;;  %v10651_v6 = vpop.f32.mrb[35].mxu1  ;;  %v5134_v51 = vsel %vm5120_vm3, %v5128_v26, 0.0  ;;  %v11282_v56 = vld [vmem:[#allocation2_spill] sm:$0xff] }
 0x77f   : > { %v7362_v9 = vpack.c.bf16 %v5000_v44, %v4998_v15  ;;  %v10653_v20 = vpop.f32.mrb[36].mxu1  ;;  %v5140_v55 = vadd.f32 %v5134_v51, %v5106_v27  ;;  %v5133_v15 = vsel %vm5119_vm5, %v5124_v21, 0.0 }
 0x780   : > { %v7360_v4 = vpack.c.bf16 %v5001_v52, %v4999_v1  ;;  %v10659_v14 = vpop.f32.mrb[37].mxu1  ;;  %v11280_v1 = vld [vmem:[#allocation26_spill] sm:$0xff]  ;;  %v5139_v41 = vadd.f32 %v5133_v15, %v5105_v43  ;;  %v11285_v43 = vld [vmem:[#allocation13_spill] sm:$0xff] }
 0x781   : > { %v10667_v60 = vpop.f32.mrb[38].mxu1 }
 0x782   : > { %7361 = vmatprep.subr.bf16.mxu0 %v7360_v4  ;;  %v10670_v27 = vpop.f32.mrb[39].mxu1 }
 0x783   : > { %7363 = vmatpush1.bf16.msra.mxu0 %v7362_v9  ;;  %v10674_v4 = vpop.f32.mrb[40].mxu1  ;;  %v11283_v9 = vld [vmem:[#allocation6_spill] sm:$0xff] }
 0x784   : > { %7369 = vmatprep.subr.bf16.mxu0 %v7368_v63  ;;  %v10677_v3 = vpop.f32.mrb[41].mxu1 }
 0x785   : > { %v10681_v26 = vpop.f32.mrb[42].mxu1 }
 0x786   : > { %5067 = vmatmul.mubr.f32.vlgmr.msra.gmra.mrb[80].mxu0 %v11280_v1 }
 0x787   : > { %7371 = vmatpush1.bf16.msra.mxu0 %v7370_v13  ;;  %5525 = vmatprep.mubr.f32.mxu0 %v11130_v2 }
 0x788   : > { %6973 = vmatprep.subr.msk.mxu0 %vm545_vm0, %v5140_v55 }
 0x78b   : > { %6974 = vmatpush1.msk.msra.mxu0 %vm545_vm0, %v5139_v41 }
 0x78c   : > { %6975 = vmatmul.mubr.msk.f32.vlgmr.msra.gmra.mrb[6].mxu0 %vm490_vm9, %v10104_v28  ;;  %v10684_v28 = vpop.f32.mrb[43].mxu1 }
 0x78d   : > { %5531 = vmatprep.mubr.f32.mxu0 %v11130_v2  ;;  %v10688_v54 = vpop.f32.mrb[44].mxu1 }
 0x790   : > { %6976 = vmatmul.mubr.msk.f32.gmra.mrb[8].mxu0 %vm490_vm9, %v10115_v57  ;;  %v10691_v57 = vpop.f32.mrb[45].mxu1 }
 0x791   : > { %5537 = vmatprep.mubr.f32.mxu0 %v11130_v2  ;;  %v10695_v38 = vpop.f32.mrb[46].mxu1 }
 0x794   : > { %6977 = vmatmul.mubr.msk.f32.gmra.mrb[10].mxu0 %vm490_vm9, %v10126_v48  ;;  %v10698_v48 = vpop.f32.mrb[47].mxu1 }
 0x795   : > { %5543 = vmatprep.mubr.f32.mxu0 %v11130_v2  ;;  %v10702_v40 = vpop.f32.mrb[48].mxu1 }
 0x798   : > { %6978 = vmatmul.mubr.msk.f32.gmra.mrb[12].mxu0 %vm490_vm9, %v10137_v39  ;;  %v10705_v39 = vpop.f32.mrb[49].mxu1 }
 0x799   : > { %5549 = vmatprep.mubr.f32.mxu0 %v11130_v2  ;;  %v10709_v21 = vpop.f32.mrb[50].mxu1 }
 0x79c   : > { %6979 = vmatmul.mubr.msk.f32.gmra.mrb[14].mxu0 %vm490_vm9, %v10148_v16  ;;  %v10712_v16 = vpop.f32.mrb[51].mxu1 }
 0x79d   : > { %5555 = vmatprep.mubr.f32.mxu0 %v11130_v2  ;;  %v10716_v8 = vpop.f32.mrb[52].mxu1 }
 0x7a0   : > { %6980 = vmatmul.mubr.msk.f32.gmra.mrb[16].mxu0 %vm490_vm9, %v10159_v12  ;;  %v10719_v12 = vpop.f32.mrb[53].mxu1 }
 0x7a1   : > { %5561 = vmatprep.mubr.f32.mxu0 %v11130_v2  ;;  %v10723_v45 = vpop.f32.mrb[54].mxu1 }
 0x7a4   : > { %6981 = vmatmul.mubr.msk.f32.gmra.mrb[18].mxu0 %vm490_vm9, %v10170_v18  ;;  %v10726_v18 = vpop.f32.mrb[55].mxu1 }
 0x7a5   : > { %5567 = vmatprep.mubr.f32.mxu0 %v11130_v2  ;;  %v10730_v44 = vpop.f32.mrb[56].mxu1 }
 0x7a8   : > { %6982 = vmatmul.mubr.msk.f32.gmra.mrb[20].mxu0 %vm490_vm9, %v10181_v30  ;;  %v10733_v30 = vpop.f32.mrb[57].mxu1 }
 0x7a9   : > { %5573 = vmatprep.mubr.f32.mxu0 %v11130_v2  ;;  %v10737_v52 = vpop.f32.mrb[58].mxu1 }
 0x7ac   : > { %6983 = vmatmul.mubr.msk.f32.gmra.mrb[22].mxu0 %vm490_vm9, %v10192_v17  ;;  %v10740_v17 = vpop.f32.mrb[59].mxu1 }
 0x7ad   : > { %5579 = vmatprep.mubr.f32.mxu0 %v11130_v2  ;;  %v6195_v47 = vpop.f32.mrb[60].mxu1 }
 0x7ae   : > { %v10748_v63 = vmul.f32 %v6195_v47, %v10604_v49  ;;  %v6197_v51 = vpop.f32.mrb[61].mxu1 }
 0x7af   : > { %v10752_v13 = vmul.f32 %v6197_v51, %v10608_v59  ;;  %v6201_v55 = vpop.f32.mrb[62].mxu1 }
 0x7b0   : > { %6984 = vmatmul.mubr.msk.f32.gmra.mrb[24].mxu0 %vm490_vm9, %v11281_v23  ;;  %v10757_v15 = vmul.f32 %v6201_v55, %v10612_v62  ;;  %v6203_v1 = vpop.f32.mrb[63].mxu1 }
 0x7b1   : > { %5585 = vmatprep.mubr.f32.mxu0 %v11130_v2  ;;  %v10761_v41 = vmul.f32 %v6203_v1, %v10615_v7  ;;  %v6207_v23 = vpop.f32.mrb[64].mxu1 }
 0x7b2   : > { %v6209_v62 = vpop.f32.mrb[65].mxu1 }
 0x7b3   : > { %v10774_v47 = vmul.f32 %v6209_v62, %v10629_v58  ;;  %v6213_v7 = vpop.f32.mrb[66].mxu1 }
 0x7b4   : > { %6985 = vmatmul.mubr.msk.f32.gmra.mrb[26].mxu0 %vm490_vm9, %v11282_v56  ;;  %v11286_v56 = vld [vmem:[#allocation16_spill] sm:$0xff]  ;;  %v10779_v51 = vmul.f32 %v6213_v7, %v10632_v53  ;;  %v6215_v55 = vpop.f32.mrb[67].mxu1  ;;  %v11289_v7 = vld [vmem:[#allocation17_spill] sm:$0xff] }
 0x7b5   : > { %5591 = vmatprep.mubr.f32.mxu0 %v11130_v2  ;;  %v6219_v1 = vpop.f32.mrb[68].mxu1 }
 0x7b6   : > { %v6221_v53 = vpop.f32.mrb[69].mxu1 }
 0x7b7   : > { %v10796_v62 = vmul.f32 %v6221_v53, %v10642_v33 }
 0x7b8   : > { %6986 = vmatmul.mubr.msk.f32.gmra.mrb[28].mxu0 %vm490_vm9, %v11283_v9  ;;  %v10770_v9 = vmul.f32 %v6207_v23, %v10622_v37  ;;  %v11288_v23 = vld [vmem:[#allocation18_spill] sm:$0xff] }
 0x7b9   : > { %5597 = vmatprep.mubr.f32.mxu0 %v11130_v2 }
 0x7bc   : > { %6987 = vmatmul.mubr.msk.f32.gmra.mrb[30].mxu0 %vm490_vm9, %v11284_v46  ;;  %v11287_v46 = vld [vmem:[#allocation15_spill] sm:$0xff] }
 0x7bd   : > { %5603 = vmatprep.mubr.f32.mxu0 %v11130_v2 }
 0x7c0   : > { %6988 = vmatmul.mubr.msk.f32.gmra.mrb[32].mxu0 %vm490_vm9, %v11285_v43  ;;  %v10783_v43 = vmul.f32 %v6215_v55, %v10634_v22  ;;  %v6225_v22 = vpop.f32.mrb[70].mxu1 }
 0x7c1   : > { %5609 = vmatprep.mubr.f32.mxu0 %v11130_v2  ;;  %v6227_v55 = vpop.f32.mrb[71].mxu1 }
 0x7c2   : > { %v10804_v37 = vmul.f32 %v6227_v55, %v10651_v6 }
 0x7c4   : > { %6989 = vmatmul.mubr.msk.f32.gmra.mrb[34].mxu0 %vm490_vm9, %v11286_v56  ;;  %v10792_v56 = vmul.f32 %v6219_v1, %v10639_v29  ;;  %v10809_v29 = vld [vmem:[%s11025_s4 + $0x8] sm:$0xff] }
 0x7c5   : > { %5615 = vmatprep.mubr.f32.mxu0 %v11130_v2 }
 0x7c8   : > { %6990 = vmatmul.mubr.msk.f32.gmra.mrb[36].mxu0 %vm490_vm9, %v11287_v46  ;;  %v10801_v46 = vmul.f32 %v6225_v22, %v10649_v0  ;;  %v6231_v0 = vpop.f32.mrb[72].mxu1 }
 0x7c9   : > { %5621 = vmatprep.mubr.f32.mxu0 %v11130_v2  ;;  %v10818_v1 = vmul.f32 %v6231_v0, %v10653_v20  ;;  %v6233_v6 = vpop.f32.mrb[73].mxu1 }
 0x7ca   : > { %v6237_v53 = vpop.f32.mrb[74].mxu1 }
 0x7cb   : > { %v10824_v22 = vmul.f32 %v6237_v53, %v10667_v60 }
 0x7cc   : > { %6991 = vmatmul.mubr.msk.f32.gmra.mrb[38].mxu0 %vm490_vm9, %v11288_v23  ;;  %v10821_v23 = vmul.f32 %v6233_v6, %v10659_v14 }
 0x7cd   : > { %5627 = vmatprep.mubr.f32.mxu0 %v11130_v2 }
 0x7d0   : > { %6992 = vmatmul.mubr.msk.f32.gmra.mrb[40].mxu0 %vm490_vm9, %v11289_v7  ;;  %v6239_v7 = vpop.f32.mrb[75].mxu1 }
 0x7d1   : > { %6993 = vmatprep.mubr.msk.f32.mxu0 %vm1589_vm1, %v10809_v29  ;;  %v10827_v55 = vmul.f32 %v6239_v7, %v10670_v27  ;;  %v6243_v20 = vpop.f32.mrb[76].mxu1 }
 0x7d2   : > { %v10834_v0 = vmul.f32 %v6243_v20, %v10674_v4  ;;  %v6245_v14 = vpop.f32.mrb[77].mxu1 }
 0x7d3   : > { %v10837_v6 = vmul.f32 %v6245_v14, %v10677_v3  ;;  %v6249_v60 = vpop.f32.mrb[78].mxu1 }
 0x7d4   : > { %v10840_v53 = vmul.f32 %v6249_v60, %v10681_v26  ;;  %v6251_v27 = vpop.f32.mrb[79].mxu1 }
 0x7d5   : > { %v10843_v7 = vmul.f32 %v6251_v27, %v10684_v28  ;;  %v6255_v4 = vpop.f32.mrb[80].mxu1 }
 0x7d6   : > { %v6257_v20 = vpop.f32.mrb[81].mxu1  ;;  %v10850_v58 = vmul.f32 %v6255_v4, %v10688_v54 }
 0x7d7   : > { %v10853_v3 = vmul.f32 %v6257_v20, %v10691_v57  ;;  %v6261_v26 = vpop.f32.mrb[82].mxu1 }
 0x7d8   : > { %v10856_v14 = vmul.f32 %v6261_v26, %v10695_v38  ;;  %v6263_v28 = vpop.f32.mrb[83].mxu1 }
 0x7d9   : > { %v10859_v60 = vmul.f32 %v6263_v28, %v10698_v48  ;;  %v6267_v33 = vpop.f32.mrb[84].mxu1 }
 0x7da   : > { %v6269_v54 = vpop.f32.mrb[85].mxu1  ;;  %v10866_v4 = vmul.f32 %v6267_v33, %v10702_v40 }
 0x7db   : > { %v10869_v57 = vmul.f32 %v6269_v54, %v10705_v39  ;;  %v6273_v38 = vpop.f32.mrb[86].mxu1 }
 0x7dc   : > { %v10872_v20 = vmul.f32 %v6273_v38, %v10709_v21  ;;  %v6275_v48 = vpop.f32.mrb[87].mxu1 }
 0x7dd   : > { %v10875_v26 = vmul.f32 %v6275_v48, %v10712_v16  ;;  %v6279_v2 = vpop.f32.mrb[88].mxu1 }
 0x7de   : > { %v6281_v40 = vpop.f32.mrb[89].mxu1  ;;  %v10882_v33 = vmul.f32 %v6279_v2, %v10716_v8 }
 0x7df   : > { %v10885_v39 = vmul.f32 %v6281_v40, %v10719_v12  ;;  %v6285_v21 = vpop.f32.mrb[90].mxu1 }
 0x7e0   : > { %v10888_v54 = vmul.f32 %v6285_v21, %v10723_v45  ;;  %v6287_v16 = vpop.f32.mrb[91].mxu1 }
 0x7e1   : > { %v10891_v38 = vmul.f32 %v6287_v16, %v10726_v18  ;;  %v6291_v27 = vpop.f32.mrb[92].mxu1 }
 0x7e2   : > { %v6293_v8 = vpop.f32.mrb[93].mxu1  ;;  %v10898_v2 = vmul.f32 %v6291_v27, %v10730_v44 }
 0x7e3   : > { %v10901_v12 = vmul.f32 %v6293_v8, %v10733_v30  ;;  %v6297_v45 = vpop.f32.mrb[94].mxu1 }
 0x7e4   : > { %11290 = vst [vmem:[#allocation26_spill] sm:$0xff] %v10898_v2  ;;  %v10904_v40 = vmul.f32 %v6297_v45, %v10737_v52  ;;  %v6299_v18 = vpop.f32.mrb[95].mxu1 }
 0x7e5   : > { %v10907_v21 = vmul.f32 %v6299_v18, %v10740_v17 }
 0x7e6   : > { %11291 = vst [vmem:[#allocation27_spill] sm:$0xff] %v10904_v40 }
 0x85f   : > { %v5527_v28 = vpop.f32.mrb[6].mxu0 }
 0x860   : > { %v5634_v44 = vmul.f32 %v5527_v28, %v10490_v36  ;;  %v5529_v27 = vpop.f32.mrb[7].mxu0 }
 0x861   : > { %v5635_v30 = vmul.f32 %v5529_v27, %v10493_v31 }
 0x863   : > { %v5533_v8 = vpop.f32.mrb[8].mxu0 }
 0x864   : > { %v5636_v52 = vmul.f32 %v5533_v8, %v10496_v32  ;;  %v5535_v45 = vpop.f32.mrb[9].mxu0 }
 0x865   : > { %v5637_v49 = vmul.f32 %v5535_v45, %v10498_v35 }
 0x866   : > { %v7374_v17 = vpack.c.bf16 %v5636_v52, %v5634_v44 }
 0x867   : > { %v7372_v18 = vpack.c.bf16 %v5637_v49, %v5635_v30  ;;  %v5539_v59 = vpop.f32.mrb[10].mxu0 }
 0x868   : > { %v5638_v16 = vmul.f32 %v5539_v59, %v10500_v42  ;;  %v5541_v2 = vpop.f32.mrb[11].mxu0 }
 0x869   : > { %v5639_v48 = vmul.f32 %v5541_v2, %v10503_v24  ;;  %7373 = vmatprep.subr.bf16.mxu0 %v7372_v18 }
 0x86a   : > { %7375 = vmatpush1.bf16.msra.mxu0 %v7374_v17  ;;  %v11293_v17 = vld [vmem:[#allocation20_spill] sm:$0xff] }
 0x86b   : > { %v5545_v36 = vpop.f32.mrb[12].mxu0 }
 0x86c   : > { %v5640_v28 = vmul.f32 %v5545_v36, %v10506_v50  ;;  %v5547_v31 = vpop.f32.mrb[13].mxu0 }
 0x86d   : > { %v5641_v27 = vmul.f32 %v5547_v31, %v10508_v61 }
 0x86e   : > { %v7378_v32 = vpack.c.bf16 %v5640_v28, %v5638_v16 }
 0x86f   : > { %v7376_v8 = vpack.c.bf16 %v5641_v27, %v5639_v48  ;;  %v5551_v40 = vpop.f32.mrb[14].mxu0 }
 0x870   : > { %v5642_v35 = vmul.f32 %v5551_v40, %v10510_v10  ;;  %v5553_v49 = vpop.f32.mrb[15].mxu0 }
 0x871   : > { %v5643_v44 = vmul.f32 %v5553_v49, %v10513_v34  ;;  %7377 = vmatprep.subr.bf16.mxu0 %v7376_v8  ;;  %v11292_v34 = vld [vmem:[#allocation19_spill] sm:$0xff] }
 0x872   : > { %7379 = vmatpush1.bf16.msra.mxu0 %v7378_v32  ;;  %v11295_v32 = vld [vmem:[#allocation22_spill] sm:$0xff] }
 0x873   : > { %v5557_v42 = vpop.f32.mrb[16].mxu0 }
 0x874   : > { %v5644_v24 = vmul.f32 %v5557_v42, %v10516_v5  ;;  %v5559_v59 = vpop.f32.mrb[17].mxu0 }
 0x875   : > { %v5645_v2 = vmul.f32 %v5559_v59, %v10518_v11  ;;  %v11294_v11 = vld [vmem:[#allocation21_spill] sm:$0xff] }
 0x876   : > { %v7382_v50 = vpack.c.bf16 %v5644_v24, %v5642_v35 }
 0x877   : > { %v7380_v30 = vpack.c.bf16 %v5645_v2, %v5643_v44  ;;  %v5563_v52 = vpop.f32.mrb[18].mxu0  ;;  %v11297_v44 = vld [vmem:[#allocation24_spill] sm:$0xff] }
 0x878   : > { %v5646_v61 = vmul.f32 %v5563_v52, %v10520_v19  ;;  %v5565_v48 = vpop.f32.mrb[19].mxu0 }
 0x879   : > { %v5647_v16 = vmul.f32 %v5565_v48, %v10523_v25  ;;  %7381 = vmatprep.subr.bf16.mxu0 %v7380_v30  ;;  %v11296_v25 = vld [vmem:[#allocation23_spill] sm:$0xff] }
 0x87a   : > { %7383 = vmatpush1.bf16.msra.mxu0 %v7382_v50  ;;  %v11298_v50 = vld [vmem:[#allocation25_spill] sm:$0xff] }
 0x87b   : > { %v5569_v10 = vpop.f32.mrb[20].mxu0 }
 0x87c   : > { %v5648_v40 = vmul.f32 %v5569_v10, %v11292_v34  ;;  %v5571_v45 = vpop.f32.mrb[21].mxu0  ;;  %v11300_v10 = vld [vmem:[#allocation4_spill] sm:$0xff] }
 0x87d   : > { %v5649_v18 = vmul.f32 %v5571_v45, %v11293_v17  ;;  %v11301_v45 = vld [vmem:[#allocation5_spill] sm:$0xff] }
 0x87e   : > { %v7386_v5 = vpack.c.bf16 %v5648_v40, %v5646_v61  ;;  %v11299_v61 = vld [vmem:[#allocation3_spill] sm:$0xff] }
 0x87f   : > { %v7384_v36 = vpack.c.bf16 %v5649_v18, %v5647_v16  ;;  %v5575_v28 = vpop.f32.mrb[22].mxu0 }
 0x880   : > { %v5650_v31 = vmul.f32 %v5575_v28, %v11294_v11  ;;  %v5577_v27 = vpop.f32.mrb[23].mxu0  ;;  %v11302_v28 = vld [vmem:[#allocation8_spill] sm:$0xff] }
 0x881   : > { %v5651_v8 = vmul.f32 %v5577_v27, %v11295_v32  ;;  %7385 = vmatprep.subr.bf16.mxu0 %v7384_v36  ;;  %v11303_v27 = vld [vmem:[#allocation11_spill] sm:$0xff] }
 0x882   : > { %7387 = vmatpush1.bf16.msra.mxu0 %v7386_v5 }
 0x883   : > { %v5581_v19 = vpop.f32.mrb[24].mxu0 }
 0x884   : > { %v5652_v35 = vmul.f32 %v5581_v19, %v11296_v25  ;;  %v5583_v49 = vpop.f32.mrb[25].mxu0  ;;  %v11304_v19 = vld [vmem:[#allocation12_spill] sm:$0xff] }
 0x885   : > { %v5653_v42 = vmul.f32 %v5583_v49, %v11297_v44  ;;  %v11305_v49 = vld [vmem:[#allocation7_spill] sm:$0xff] }
 0x886   : > { %v7390_v24 = vpack.c.bf16 %v5652_v35, %v5650_v31 }
 0x887   : > { %v7388_v59 = vpack.c.bf16 %v5653_v42, %v5651_v8  ;;  %v5587_v2 = vpop.f32.mrb[26].mxu0 }
 0x888   : > { %v5654_v30 = vmul.f32 %v5587_v2, %v11298_v50  ;;  %v5589_v52 = vpop.f32.mrb[27].mxu0  ;;  %v11306_v2 = vld [vmem:[#allocation28_spill] sm:$0xff] }
 0x889   : > { %v5655_v48 = vmul.f32 %v5589_v52, %v11299_v61  ;;  %7389 = vmatprep.subr.bf16.mxu0 %v7388_v59  ;;  %v11307_v52 = vld [vmem:[#allocation29_spill] sm:$0xff] }
 0x88a   : > { %7391 = vmatpush1.bf16.msra.mxu0 %v7390_v24 }
 0x88b   : > { %v5593_v16 = vpop.f32.mrb[28].mxu0 }
 0x88c   : > { %v5656_v34 = vmul.f32 %v5593_v16, %v11300_v10  ;;  %v5595_v40 = vpop.f32.mrb[29].mxu0  ;;  %v11308_v16 = vld [vmem:[#allocation30_spill] sm:$0xff] }
 0x88d   : > { %v5657_v17 = vmul.f32 %v5595_v40, %v11301_v45  ;;  %v11309_v40 = vld [vmem:[#allocation9_spill] sm:$0xff] }
 0x88e   : > { %v7394_v18 = vpack.c.bf16 %v5656_v34, %v5654_v30 }
 0x88f   : > { %v7392_v5 = vpack.c.bf16 %v5657_v17, %v5655_v48  ;;  %v5599_v36 = vpop.f32.mrb[30].mxu0 }
 0x890   : > { %v5658_v11 = vmul.f32 %v5599_v36, %v11302_v28  ;;  %v5601_v31 = vpop.f32.mrb[31].mxu0  ;;  %v11310_v36 = vld [vmem:[#allocation10_spill] sm:$0xff] }
 0x891   : > { %v5659_v32 = vmul.f32 %v5601_v31, %v11303_v27  ;;  %7393 = vmatprep.subr.bf16.mxu0 %v7392_v5  ;;  %v11311_v31 = vld [vmem:[#allocation31_spill] sm:$0xff] }
 0x892   : > { %7395 = vmatpush1.bf16.msra.mxu0 %v7394_v18 }
 0x893   : > { %v5605_v8 = vpop.f32.mrb[32].mxu0 }
 0x894   : > { %v5660_v25 = vmul.f32 %v5605_v8, %v11304_v19  ;;  %v5607_v35 = vpop.f32.mrb[33].mxu0  ;;  %v11312_v8 = vld [vmem:[#allocation32_spill] sm:$0xff] }
 0x895   : > { %v5661_v44 = vmul.f32 %v5607_v35, %v11305_v49  ;;  %v11313_v35 = vld [vmem:[#allocation33_spill] sm:$0xff] }
 0x896   : > { %v7398_v42 = vpack.c.bf16 %v5660_v25, %v5658_v11 }
 0x897   : > { %v7396_v24 = vpack.c.bf16 %v5661_v44, %v5659_v32  ;;  %v5611_v59 = vpop.f32.mrb[34].mxu0 }
 0x898   : > { %v5662_v50 = vmul.f32 %v5611_v59, %v11306_v2  ;;  %v5613_v30 = vpop.f32.mrb[35].mxu0  ;;  %v7562_v59 = vld [vmem:[%s11025_s4] sm:$0xff]  ;;  %v11315_v2 = vpack.c.bf16 %v10757_v15, %v10748_v63  ;;  %v11319_v63 = vpack.c.bf16 %v10801_v46, %v10792_v56  ;;  %v11320_v15 = vpack.c.bf16 %v10827_v55, %v10821_v23 }
 0x899   : > { %v5663_v61 = vmul.f32 %v5613_v30, %v11307_v52  ;;  %7397 = vmatprep.subr.bf16.mxu0 %v7396_v24  ;;  %v11314_v24 = vpack.c.bf16 %v10761_v41, %v10752_v13  ;;  %v11317_v13 = vpack.c.bf16 %v10779_v51, %v10770_v9  ;;  %v11318_v41 = vpack.c.bf16 %v10804_v37, %v10796_v62  ;;  %v11332_v23 = vld [vmem:[#allocation26_spill] sm:$0xff] }
 0x89a   : > { %7399 = vmatpush1.bf16.msra.mxu0 %v7398_v42  ;;  %v11322_v9 = vpack.c.bf16 %v10843_v7, %v10837_v6  ;;  %v11323_v51 = vpack.c.bf16 %v10840_v53, %v10834_v0  ;;  %v11325_v37 = vpack.c.bf16 %v10856_v14, %v10850_v58  ;;  %v11326_v56 = vpack.c.bf16 %v10875_v26, %v10869_v57 }
 0x89b   : > { %v5617_v48 = vpop.f32.mrb[36].mxu0  ;;  %v11327_v62 = vpack.c.bf16 %v10872_v20, %v10866_v4  ;;  %v11328_v46 = vpack.c.bf16 %v10891_v38, %v10885_v39  ;;  %v11330_v58 = vpack.c.bf16 %v10907_v21, %v10901_v12 }
 0x89c   : > { %v5664_v10 = vmul.f32 %v5617_v48, %v11308_v16  ;;  %v5619_v34 = vpop.f32.mrb[37].mxu0 }
 0x89d   : > { %v5665_v45 = vmul.f32 %v5619_v34, %v11309_v40 }
 0x89e   : > { %v7402_v17 = vpack.c.bf16 %v5664_v10, %v5662_v50  ;;  %v11316_v50 = vpack.c.bf16 %v10783_v43, %v10774_v47  ;;  %v11321_v47 = vpack.c.bf16 %v10824_v22, %v10818_v1  ;;  %v11324_v43 = vpack.c.bf16 %v10859_v60, %v10853_v3  ;;  %v11331_v1 = vld [vmem:[#allocation27_spill] sm:$0xff] }
 0x89f   : > { %v7400_v18 = vpack.c.bf16 %v5665_v45, %v5663_v61  ;;  %v5623_v5 = vpop.f32.mrb[38].mxu0  ;;  %v11333_v22 = vpack.c.bf16 %v11331_v1, %v11332_v23 }
 0x8a0   : > { %v5666_v28 = vmul.f32 %v5623_v5, %v11310_v36  ;;  %v5625_v11 = vpop.f32.mrb[39].mxu0 }
 0x8a1   : > { %v5667_v27 = vmul.f32 %v5625_v11, %v11311_v31  ;;  %7401 = vmatprep.subr.bf16.mxu0 %v7400_v18 }
 0x8a2   : > { %7403 = vmatpush1.bf16.msra.mxu0 %v7402_v17 }
 0x8a3   : > { %v5629_v32 = vpop.f32.mrb[40].mxu0 }
 0x8a4   : > { %v5668_v19 = vmul.f32 %v5629_v32, %v11312_v8  ;;  %v5631_v25 = vpop.f32.mrb[41].mxu0 }
 0x8a5   : > { %v5669_v49 = vmul.f32 %v5631_v25, %v11313_v35 }
 0x8a6   : > { %v7406_v44 = vpack.c.bf16 %v5668_v19, %v5666_v28 }
 0x8a7   : > { %v7404_v42 = vpack.c.bf16 %v5669_v49, %v5667_v27 }
 0x8a9   : > { %7405 = vmatprep.subr.bf16.mxu0 %v7404_v42 }
 0x8aa   : > { %7407 = vmatpush1.bf16.msra.mxu0 %v7406_v44 }
 0x8ab   : > { %7417 = vmatprep.subr.bf16.mxu0 %v11314_v24 }
 0x8ad   : > { %5735 = vmatmul.mubr.f32.vlgmr.msra.gmra.mrb[80].mxu0 %v7562_v59 }
 0x8ae   : > { %7419 = vmatpush1.bf16.msra.mxu0 %v11315_v2  ;;  %7052 = vmatprep.mubr.msk.f32.mxu0 %vm1589_vm1, %v10809_v29  ;;  %v11329_v29 = vpack.c.bf16 %v10888_v54, %v10882_v33 }
 0x8af   : > { %7421 = vmatprep.subr.bf16.mxu0 %v11316_v50 }
 0x8b2   : > { %7423 = vmatpush1.bf16.msra.mxu0 %v11317_v13 }
 0x8b3   : > { %7425 = vmatprep.subr.bf16.mxu0 %v11318_v41 }
 0x8b6   : > { %7427 = vmatpush1.bf16.msra.mxu0 %v11319_v63 }
 0x8b7   : > { %7429 = vmatprep.subr.bf16.mxu0 %v11320_v15 }
 0x8ba   : > { %7431 = vmatpush1.bf16.msra.mxu0 %v11321_v47 }
 0x8bb   : > { %7433 = vmatprep.subr.bf16.mxu0 %v11322_v9 }
 0x8be   : > { %7435 = vmatpush1.bf16.msra.mxu0 %v11323_v51 }
 0x8bf   : > { %7437 = vmatprep.subr.bf16.mxu0 %v11324_v43 }
 0x8c2   : > { %7439 = vmatpush1.bf16.msra.mxu0 %v11325_v37 }
 0x8c3   : > { %7441 = vmatprep.subr.bf16.mxu0 %v11326_v56 }
 0x8c6   : > { %7443 = vmatpush1.bf16.msra.mxu0 %v11327_v62 }
 0x8c7   : > { %7445 = vmatprep.subr.bf16.mxu0 %v11328_v46 }
 0x8ca   : > { %7447 = vmatpush1.bf16.msra.mxu0 %v11329_v29 }
 0x8cb   : > { %7449 = vmatprep.subr.bf16.mxu0 %v11330_v58 }
 0x8ce   : > { %7451 = vmatpush1.bf16.msra.mxu0 %v11333_v22 }
 0x8d1   : > { %6403 = vmatmul.mubr.f32.vlgmr.msra.gmra.mrb[80].mxu0 %v7562_v59 }
 0x9a4   : > { %v6404_v55 = vpop.f32.mrb[80].mxu0 }
 0x9a5   : > { %6411 = vst [vmem:[%s318_s30] sm:$0xff] %v6404_v55  ;;  %v6406_v0 = vpop.f32.mrb[81].mxu0 }
 0x9a6   : > { %6412 = vst [vmem:[%s318_s30 + $0x8] sm:$0xff] %v6406_v0 }
 0x9a7 PF: > { %s15_s20 = sadd.s32 1, %s7585_s20   ;;  %s11334_s18 = smov %s7581_s19 }
 0x9a8   : > { %p12_p5 = scmp.ge.s32.totalorder %s15_s20, 4   ;;  %s11335_s19 = smov %s11337_s21 }
 0x9aa   :  { %14 = sbr.rel (!%p12_p5) target bundleno = 2 (0x2), region = 84 }

</bundles_post_ra>
